<compile_context>
chip_gen: v6e
topology: v6e:2x2x1
jax: 0.10.0
libtpu: 0.0.40
codegen_flags: <defaults>
</compile_context>

<pallas_src>
import functools
import math

import jax
import jax.numpy as jnp
from jax.experimental import pallas as pl
from jax.experimental.pallas import tpu as pltpu


_ACT_DTYPE = jnp.bfloat16      # inter-kernel activation dtype


def _detect_budget():
    """v5e/v6e (128 MiB VMEM) -> bigger budget & tile; v7x (64 MiB) -> conservative."""
    try:
        info = pltpu.get_tpu_info()
        vmem = getattr(info, "vmem_capacity_bytes", 0) or 0
        if vmem >= 100 * 1024 * 1024:
            return 64 * 1024 * 1024, 1024
    except Exception:
        pass
    return 32 * 1024 * 1024, 512


_VMEM_LIMIT_BYTES, _ROW_TILE = _detect_budget()


def _row_grid(M, row_tile=None):
    """Row tile: full array if small (always a valid block), else a tile."""
    row_tile = _ROW_TILE if row_tile is None else row_tile
    if M <= row_tile:
        return M, 1
    return row_tile, pl.cdiv(M, row_tile)


def _compiler_params(n_grid_dims=1):
    return pltpu.CompilerParams(
        dimension_semantics=("parallel",) * n_grid_dims,
        vmem_limit_bytes=_VMEM_LIMIT_BYTES,
    )


# ----------------------------------------------------------------------------
# Pallas kernels
# ----------------------------------------------------------------------------
def _apply_activation(y, activation):
    if activation == "relu":
        return jnp.maximum(y, 0.0)
    if activation == "sigmoid":
        return jax.nn.sigmoid(y)
    return y


def _linear_kernel(x_ref, w_ref, b_ref, o_ref, *, activation):
    x = x_ref[...].astype(jnp.bfloat16)                       # bf16 MXU operands
    y = jnp.dot(x, w_ref[...], preferred_element_type=jnp.float32)  # f32 accum
    y = _apply_activation(y + b_ref[...], activation)
    o_ref[...] = y.astype(o_ref.dtype)


def _linear_add_kernel(x_ref, a_ref, w_ref, b_ref, o_ref, *, activation):
    # Fused (x + a) @ w + b  (no separate HBM round-trip for the add).
    x = (x_ref[...] + a_ref[...]).astype(jnp.bfloat16)
    y = jnp.dot(x, w_ref[...], preferred_element_type=jnp.float32)
    y = _apply_activation(y + b_ref[...], activation)
    o_ref[...] = y.astype(o_ref.dtype)


def pallas_linear(x, w, b, activation="none", x_add=None, out_dtype=_ACT_DTYPE):
    """x: (M, K), w: (K, N) bf16, b: (N,) -> (M, N); optional fused (x + x_add)."""
    M, K = x.shape
    N = w.shape[1]
    tm, steps = _row_grid(M)
    b2 = b.reshape(1, N).astype(jnp.float32)

    n_in = 1 if x_add is None else 2
    bytes_accessed = (x.dtype.itemsize * n_in * M * K
                      + w.dtype.itemsize * K * N
                      + jnp.dtype(out_dtype).itemsize * M * N)
    cost = pl.CostEstimate(
        flops=2 * M * K * N,
        transcendentals=M * N if activation == "sigmoid" else 0,
        bytes_accessed=bytes_accessed)

    x_spec = pl.BlockSpec((tm, K), lambda i: (i, 0))
    w_spec = pl.BlockSpec((K, N), lambda i: (0, 0))
    b_spec = pl.BlockSpec((1, N), lambda i: (0, 0))
    o_spec = pl.BlockSpec((tm, N), lambda i: (i, 0))
    out_shape = jax.ShapeDtypeStruct((M, N), out_dtype)

    if x_add is None:
        return pl.pallas_call(
            functools.partial(_linear_kernel, activation=activation),
            grid=(steps,),
            in_specs=[x_spec, w_spec, b_spec],
            out_specs=o_spec,
            out_shape=out_shape,
            compiler_params=_compiler_params(1),
            cost_estimate=cost,
        )(x, w, b2)
    return pl.pallas_call(
        functools.partial(_linear_add_kernel, activation=activation),
        grid=(steps,),
        in_specs=[x_spec, x_spec, w_spec, b_spec],
        out_specs=o_spec,
        out_shape=out_shape,
        compiler_params=_compiler_params(1),
        cost_estimate=cost,
    )(x, x_add, w, b2)


def _mlp_kernel(*refs, activations):
    """Fused MLP: x -> [w_i, b_i, act_i]*; intermediates stay in VMEM/vregs."""
    o_ref = refs[-1]
    h = refs[0][...].astype(jnp.bfloat16)
    n = len(activations)
    for i, act in enumerate(activations):
        w_ref = refs[1 + 2 * i]
        b_ref = refs[2 + 2 * i]
        y = jnp.dot(h, w_ref[...], preferred_element_type=jnp.float32) + b_ref[...]
        y = _apply_activation(y, act)
        if i + 1 < n:
            h = y.astype(jnp.bfloat16)
        else:
            o_ref[...] = y.astype(o_ref.dtype)


def pallas_mlp(x, layers, out_dtype=_ACT_DTYPE):
    """Fused multi-layer perceptron. layers: sequence of (w, b, activation)."""
    M, K = x.shape
    tm, steps = _row_grid(M)
    activations = tuple(act for _, _, act in layers)

    in_specs = [pl.BlockSpec((tm, K), lambda i: (i, 0))]
    operands = [x]
    flops = 0
    bytes_accessed = x.dtype.itemsize * M * K
    for w, b, _ in layers:
        k_i, n_i = w.shape
        in_specs.append(pl.BlockSpec((k_i, n_i), lambda i: (0, 0)))
        in_specs.append(pl.BlockSpec((1, n_i), lambda i: (0, 0)))
        operands.append(w)
        operands.append(b.reshape(1, n_i).astype(jnp.float32))
        flops += 2 * M * k_i * n_i
        bytes_accessed += w.dtype.itemsize * k_i * n_i
    N = layers[-1][0].shape[1]
    bytes_accessed += jnp.dtype(out_dtype).itemsize * M * N
    trans = M * N if activations[-1] == "sigmoid" else 0

    return pl.pallas_call(
        functools.partial(_mlp_kernel, activations=activations),
        grid=(steps,),
        in_specs=in_specs,
        out_specs=pl.BlockSpec((tm, N), lambda i: (i, 0)),
        out_shape=jax.ShapeDtypeStruct((M, N), out_dtype),
        compiler_params=_compiler_params(1),
        cost_estimate=pl.CostEstimate(flops=flops, transcendentals=trans,
                                      bytes_accessed=bytes_accessed),
    )(*operands)


def _qkv_proj_kernel(x_ref, p_ref, wqk_ref, bqk_ref, wv_ref, bv_ref,
                     q_ref, k_ref, v_ref):
    """Self-attention projections: q|k = (x+pos)@Wqk, v = x@Wv — single x read."""
    x = x_ref[...].astype(jnp.bfloat16)
    xp = (x_ref[...] + p_ref[...]).astype(jnp.bfloat16)
    qk = jnp.dot(xp, wqk_ref[...], preferred_element_type=jnp.float32) + bqk_ref[...]
    v = jnp.dot(x, wv_ref[...], preferred_element_type=jnp.float32) + bv_ref[...]
    D = wv_ref.shape[1]
    q_ref[...] = qk[:, :D].astype(q_ref.dtype)
    k_ref[...] = qk[:, D:].astype(k_ref.dtype)
    v_ref[...] = v.astype(v_ref.dtype)


def pallas_qkv_proj(x, pos, wqk, bqk, wv, bv):
    """x, pos: (M, D) -> (q, k, v) each (M, D) bf16."""
    M, D = x.shape
    tm, steps = _row_grid(M)
    row = pl.BlockSpec((tm, D), lambda i: (i, 0))
    out = jax.ShapeDtypeStruct((M, D), _ACT_DTYPE)
    bytes_accessed = (2 * x.dtype.itemsize * M * D
                      + wqk.dtype.itemsize * 3 * D * D
                      + 3 * jnp.dtype(_ACT_DTYPE).itemsize * M * D)
    return pl.pallas_call(
        _qkv_proj_kernel,
        grid=(steps,),
        in_specs=[row, row,
                  pl.BlockSpec((D, 2 * D), lambda i: (0, 0)),
                  pl.BlockSpec((1, 2 * D), lambda i: (0, 0)),
                  pl.BlockSpec((D, D), lambda i: (0, 0)),
                  pl.BlockSpec((1, D), lambda i: (0, 0))],
        out_specs=(row, row, row),
        out_shape=(out, out, out),
        compiler_params=_compiler_params(1),
        cost_estimate=pl.CostEstimate(flops=2 * M * D * 3 * D, transcendentals=0,
                                      bytes_accessed=bytes_accessed),
    )(x, pos, wqk, bqk.reshape(1, 2 * D).astype(jnp.float32),
      wv, bv.reshape(1, D).astype(jnp.float32))


def _kv_proj_kernel(x_ref, p_ref, wk_ref, bk_ref, wv_ref, bv_ref, k_ref, v_ref):
    """Cross-attention memory projections: k = (mem+pos)@Wk, v = mem@Wv."""
    x = x_ref[...].astype(jnp.bfloat16)
    xp = (x_ref[...] + p_ref[...]).astype(jnp.bfloat16)
    k = jnp.dot(xp, wk_ref[...], preferred_element_type=jnp.float32) + bk_ref[...]
    v = jnp.dot(x, wv_ref[...], preferred_element_type=jnp.float32) + bv_ref[...]
    k_ref[...] = k.astype(k_ref.dtype)
    v_ref[...] = v.astype(v_ref.dtype)


def pallas_kv_proj(x, pos, wk, bk, wv, bv):
    M, D = x.shape
    tm, steps = _row_grid(M)
    row = pl.BlockSpec((tm, D), lambda i: (i, 0))
    out = jax.ShapeDtypeStruct((M, D), _ACT_DTYPE)
    bytes_accessed = (2 * x.dtype.itemsize * M * D
                      + wk.dtype.itemsize * 2 * D * D
                      + 2 * jnp.dtype(_ACT_DTYPE).itemsize * M * D)
    return pl.pallas_call(
        _kv_proj_kernel,
        grid=(steps,),
        in_specs=[row, row,
                  pl.BlockSpec((D, D), lambda i: (0, 0)),
                  pl.BlockSpec((1, D), lambda i: (0, 0)),
                  pl.BlockSpec((D, D), lambda i: (0, 0)),
                  pl.BlockSpec((1, D), lambda i: (0, 0))],
        out_specs=(row, row),
        out_shape=(out, out),
        compiler_params=_compiler_params(1),
        cost_estimate=pl.CostEstimate(flops=2 * M * D * 2 * D, transcendentals=0,
                                      bytes_accessed=bytes_accessed),
    )(x, pos, wk, bk.reshape(1, D).astype(jnp.float32),
      wv, bv.reshape(1, D).astype(jnp.float32))


def _layernorm_kernel(x_ref, g_ref, b_ref, o_ref, *, eps):
    x = x_ref[...].astype(jnp.float32)
    mu = jnp.mean(x, axis=-1, keepdims=True)
    xc = x - mu
    var = jnp.mean(xc * xc, axis=-1, keepdims=True)
    y = xc * jax.lax.rsqrt(var + eps)
    o_ref[...] = (y * g_ref[...] + b_ref[...]).astype(o_ref.dtype)


def _add_layernorm_kernel(x_ref, r_ref, g_ref, b_ref, o_ref, *, eps):
    # Fused residual add + LayerNorm (f32 statistics).
    x = x_ref[...].astype(jnp.float32) + r_ref[...].astype(jnp.float32)
    mu = jnp.mean(x, axis=-1, keepdims=True)
    xc = x - mu
    var = jnp.mean(xc * xc, axis=-1, keepdims=True)
    y = xc * jax.lax.rsqrt(var + eps)
    o_ref[...] = (y * g_ref[...] + b_ref[...]).astype(o_ref.dtype)


def pallas_layernorm(x, gamma, beta, eps=1e-5, out_dtype=_ACT_DTYPE):
    M, C = x.shape
    tm, steps = _row_grid(M)
    return pl.pallas_call(
        functools.partial(_layernorm_kernel, eps=eps),
        grid=(steps,),
        in_specs=[pl.BlockSpec((tm, C), lambda i: (i, 0)),
                  pl.BlockSpec((1, C), lambda i: (0, 0)),
                  pl.BlockSpec((1, C), lambda i: (0, 0))],
        out_specs=pl.BlockSpec((tm, C), lambda i: (i, 0)),
        out_shape=jax.ShapeDtypeStruct((M, C), out_dtype),
        compiler_params=_compiler_params(1),
    )(x, gamma.reshape(1, C), beta.reshape(1, C))


def pallas_add_layernorm(x, res, gamma, beta, eps=1e-5, out_dtype=_ACT_DTYPE):
    """LayerNorm(x + res)."""
    M, C = x.shape
    tm, steps = _row_grid(M)
    row_spec = pl.BlockSpec((tm, C), lambda i: (i, 0))
    return pl.pallas_call(
        functools.partial(_add_layernorm_kernel, eps=eps),
        grid=(steps,),
        in_specs=[row_spec, row_spec,
                  pl.BlockSpec((1, C), lambda i: (0, 0)),
                  pl.BlockSpec((1, C), lambda i: (0, 0))],
        out_specs=row_spec,
        out_shape=jax.ShapeDtypeStruct((M, C), out_dtype),
        compiler_params=_compiler_params(1),
    )(x, res, gamma.reshape(1, C), beta.reshape(1, C))


def _mha_kernel(q_ref, k_ref, v_ref, o_ref, *, nheads, scale):
    """One batch element / one q-tile, all heads. q: (tq, D), k/v: (Lk, D)."""
    q = q_ref[0]
    k = k_ref[0]
    v = v_ref[0]
    D = q.shape[-1]
    Dh = D // nheads
    for h in range(nheads):                       # static lane slices per head
        lo = h * Dh
        qh = q[:, lo:lo + Dh].astype(jnp.bfloat16)
        kh = k[:, lo:lo + Dh].astype(jnp.bfloat16)
        vh = v[:, lo:lo + Dh].astype(jnp.bfloat16)
        # scores = qh @ kh^T (contract head dim, no explicit transpose)
        s = jax.lax.dot_general(qh, kh, (((1,), (1,)), ((), ())),
                                preferred_element_type=jnp.float32) * scale
        m = jnp.max(s, axis=-1, keepdims=True)
        p = jnp.exp(s - m)
        denom = jnp.sum(p, axis=-1, keepdims=True)
        p = p * pl.reciprocal(denom, approx=True)          # EUP reciprocal
        oh = jnp.dot(p.astype(jnp.bfloat16), vh,
                     preferred_element_type=jnp.float32)
        # write each head directly into its lane slot (no concatenate relayout)
        o_ref[0, :, lo:lo + Dh] = oh.astype(o_ref.dtype)


def pallas_mha(q, k, v, nheads, scale):
    """q: (B, Lq, D), k/v: (B, Lk, D) -> (B, Lq, D). Softmax fused."""
    B, Lq, D = q.shape
    Lk = k.shape[1]
    tq = Lq if Lq <= 128 else 128
    nq = pl.cdiv(Lq, tq)
    q_spec = pl.BlockSpec((1, tq, D), lambda b, i: (b, i, 0))
    kv_spec = pl.BlockSpec((1, Lk, D), lambda b, i: (b, 0, 0))   # resident over q tiles
    return pl.pallas_call(
        functools.partial(_mha_kernel, nheads=nheads, scale=scale),
        grid=(B, nq),
        in_specs=[q_spec, kv_spec, kv_spec],
        out_specs=q_spec,
        out_shape=jax.ShapeDtypeStruct((B, Lq, D), q.dtype),
        compiler_params=_compiler_params(2),
        cost_estimate=pl.CostEstimate(
            flops=4 * B * Lq * Lk * D,
            transcendentals=B * Lq * Lk,
            bytes_accessed=q.dtype.itemsize * (2 * B * Lq * D + 2 * B * Lk * D)),
    )(q, k, v)


# ----------------------------------------------------------------------------
# Model pieces (glue in plain JAX, compute in the Pallas kernels above)
# ----------------------------------------------------------------------------
def self_attention(x, pos, p, nheads):
    """q = k = x + pos, v = x.  x/pos: (B, L, D)."""
    B, L, D = x.shape
    x2 = x.reshape(B * L, D)
    pos2 = pos.reshape(B * L, D)
    q, k, v = pallas_qkv_proj(x2, pos2, p["wqk"], p["bqk"], p["wv"], p["bv"])
    o = pallas_mha(q.reshape(B, L, D), k.reshape(B, L, D), v.reshape(B, L, D),
                   nheads, 1.0 / math.sqrt(D // nheads))
    o = pallas_linear(o.reshape(B * L, D), p["wo"], p["bo"])
    return o            # (B*L, D)


def cross_attention(x2, x_pos2, mem, mem_pos, p, nheads, B, Lq, D):
    """q = x + x_pos, k = mem + mem_pos, v = mem.  x2/x_pos2: (B*Lq, D)."""
    Lk = mem.shape[1]
    m2 = mem.reshape(B * Lk, D)
    q = pallas_linear(x2, p["wq"], p["bq"], x_add=x_pos2)
    k, v = pallas_kv_proj(m2, mem_pos.reshape(B * Lk, D),
                          p["wk"], p["bk"], p["wv"], p["bv"])
    o = pallas_mha(q.reshape(B, Lq, D), k.reshape(B, Lk, D), v.reshape(B, Lk, D),
                   nheads, 1.0 / math.sqrt(D // nheads))
    o = pallas_linear(o.reshape(B * Lq, D), p["wo"], p["bo"])
    return o            # (B*Lq, D)


def encoder_layer(src, pos, p, nheads):
    B, L, D = src.shape
    src2 = self_attention(src, pos, p["attn"], nheads)
    s2d = pallas_add_layernorm(src2, src.reshape(B * L, D),
                               p["ln1_g"], p["ln1_b"])      # dropout = identity (eval)
    h = pallas_mlp(s2d, [(p["w1"], p["b1"], "relu"), (p["w2"], p["b2"], "none")])
    s2d = pallas_add_layernorm(h, s2d, p["ln2_g"], p["ln2_b"])
    return s2d.reshape(B, L, D)


def decoder_layer(tgt, memory, pos, query_pos, p, nheads):
    B, Q, D = tgt.shape
    qp2 = query_pos.reshape(B * Q, D)
    t2 = self_attention(tgt, query_pos, p["self_attn"], nheads)
    t2d = pallas_add_layernorm(t2, tgt.reshape(B * Q, D), p["ln1_g"], p["ln1_b"])
    c2 = cross_attention(t2d, qp2, memory, pos, p["cross_attn"], nheads, B, Q, D)
    t2d = pallas_add_layernorm(c2, t2d, p["ln2_g"], p["ln2_b"])
    h = pallas_mlp(t2d, [(p["w1"], p["b1"], "relu"), (p["w2"], p["b2"], "none")])
    t2d = pallas_add_layernorm(h, t2d, p["ln3_g"], p["ln3_b"])
    return t2d.reshape(B, Q, D)


def sine_position_embedding(B, Hf, Wf, d_model):
    """DETR PositionEmbeddingSine (normalize=True, full valid mask) -> (B,Hf,Wf,D)."""
    num_pos_feats = d_model // 2
    temperature = 10000.0
    scale = 2 * math.pi
    eps = 1e-6
    y_embed = jnp.broadcast_to(jnp.arange(1, Hf + 1, dtype=jnp.float32)[:, None], (Hf, Wf))
    x_embed = jnp.broadcast_to(jnp.arange(1, Wf + 1, dtype=jnp.float32)[None, :], (Hf, Wf))
    y_embed = y_embed / (Hf + eps) * scale
    x_embed = x_embed / (Wf + eps) * scale
    dim_t = jnp.arange(num_pos_feats, dtype=jnp.float32)
    dim_t = temperature ** (2.0 * jnp.floor(dim_t / 2.0) / num_pos_feats)
    pos_x = x_embed[..., None] / dim_t
    pos_y = y_embed[..., None] / dim_t
    pos_x = jnp.stack([jnp.sin(pos_x[..., 0::2]), jnp.cos(pos_x[..., 1::2])],
                      axis=-1).reshape(Hf, Wf, num_pos_feats)
    pos_y = jnp.stack([jnp.sin(pos_y[..., 0::2]), jnp.cos(pos_y[..., 1::2])],
                      axis=-1).reshape(Hf, Wf, num_pos_feats)
    pos = jnp.concatenate([pos_y, pos_x], axis=-1)           # (Hf, Wf, D)
    return jnp.broadcast_to(pos[None], (B, Hf, Wf, d_model))


def detr_forward(params, samples, cfg):
    """samples: (B, 3, H, W) float32 NCHW (PyTorch convention)."""
    B, Cin, H, W = samples.shape
    P = cfg["patch"]
    D = cfg["d_model"]
    nheads = cfg["nheads"]
    Q = cfg["num_queries"]
    Hf, Wf = H // P, W // P
    HW = Hf * Wf

    # --- backbone: patchify conv (kernel=stride=P) + ReLU, as a Pallas matmul ---
    x = samples.transpose(0, 2, 3, 1)                               # NHWC
    patches = x.reshape(B, Hf, P, Wf, P, Cin).transpose(0, 1, 3, 2, 4, 5)
    patches = patches.reshape(B * HW, P * P * Cin)
    feat = pallas_linear(patches, params["backbone_w"], params["backbone_b"],
                         activation="relu")                          # (B*HW, Cb) bf16

    # --- sine position embedding (batch-first, bf16) ---
    pos = sine_position_embedding(B, Hf, Wf, D).reshape(B, HW, D).astype(_ACT_DTYPE)

    # --- input_proj: 1x1 conv == channel matmul ---
    src = pallas_linear(feat, params["proj_w"], params["proj_b"]).reshape(B, HW, D)

    # --- transformer encoder ---
    memory = src
    for lp in params["encoder"]:
        memory = encoder_layer(memory, pos, lp, nheads)

    # --- transformer decoder ---
    query_pos = jnp.broadcast_to(params["query_embed"].astype(_ACT_DTYPE)[None],
                                 (B, Q, D))
    tgt = jnp.zeros((B, Q, D), _ACT_DTYPE)
    for lp in params["decoder"]:
        tgt = decoder_layer(tgt, memory, pos, query_pos, lp, nheads)

    # aux_loss=False: final LayerNorm + heads only on the LAST decoder output.
    hs_last = pallas_layernorm(tgt.reshape(B * Q, D),
                               params["dec_norm_g"], params["dec_norm_b"])

    logits = pallas_linear(hs_last, params["cls_w"], params["cls_b"],
                           out_dtype=jnp.float32)
    boxes = pallas_mlp(hs_last,
                       [(params["bbox_w1"], params["bbox_b1"], "relu"),
                        (params["bbox_w2"], params["bbox_b2"], "relu"),
                        (params["bbox_w3"], params["bbox_b3"], "sigmoid")],
                       out_dtype=jnp.float32)

    return {"pred_logits": logits.reshape(B, Q, -1),
            "pred_boxes": boxes.reshape(B, Q, 4)}


# ----------------------------------------------------------------------------
# Deterministic parameter initialization (weights bf16, biases / LN params f32)
# ----------------------------------------------------------------------------
class _Keys:
    def __init__(self, seed):
        self._key = jax.random.PRNGKey(seed)

    def __call__(self):
        self._key, sub = jax.random.split(self._key)
        return sub


def _dense(kg, fan_in, fan_out, scale=0.02):
    w = (scale * jax.random.normal(kg(), (fan_in, fan_out), jnp.float32)).astype(jnp.bfloat16)
    b = scale * jax.random.normal(kg(), (fan_out,), jnp.float32)
    return w, b


def _attn_params(kg, D, fuse_qk):
    wq, bq = _dense(kg, D, D)
    wk, bk = _dense(kg, D, D)
    wv, bv = _dense(kg, D, D)
    wo, bo = _dense(kg, D, D)
    p = dict(wv=wv, bv=bv, wo=wo, bo=bo)
    if fuse_qk:
        # Pre-concatenated Q|K projection (q and k share the same (x + pos) input).
        p["wqk"] = jnp.concatenate([wq, wk], axis=1)
        p["bqk"] = jnp.concatenate([bq, bk], axis=0)
    else:
        p.update(wq=wq, bq=bq, wk=wk, bk=bk)
    return p


def init_detr_params(seed, cfg):
    kg = _Keys(seed)
    D, F = cfg["d_model"], cfg["d_ffn"]
    Cb, P, Cin = cfg["backbone_channels"], cfg["patch"], 3
    params = {}

    params["backbone_w"], params["backbone_b"] = _dense(kg, P * P * Cin, Cb, scale=0.05)
    params["proj_w"], params["proj_b"] = _dense(kg, Cb, D)

    enc = []
    for _ in range(cfg["num_encoder_layers"]):
        w1, b1 = _dense(kg, D, F)
        w2, b2 = _dense(kg, F, D)
        enc.append(dict(attn=_attn_params(kg, D, fuse_qk=True),
                        w1=w1, b1=b1, w2=w2, b2=b2,
                        ln1_g=jnp.ones((D,)), ln1_b=jnp.zeros((D,)),
                        ln2_g=jnp.ones((D,)), ln2_b=jnp.zeros((D,))))
    params["encoder"] = enc

    dec = []
    for _ in range(cfg["num_decoder_layers"]):
        w1, b1 = _dense(kg, D, F)
        w2, b2 = _dense(kg, F, D)
        dec.append(dict(self_attn=_attn_params(kg, D, fuse_qk=True),
                        cross_attn=_attn_params(kg, D, fuse_qk=False),
                        w1=w1, b1=b1, w2=w2, b2=b2,
                        ln1_g=jnp.ones((D,)), ln1_b=jnp.zeros((D,)),
                        ln2_g=jnp.ones((D,)), ln2_b=jnp.zeros((D,)),
                        ln3_g=jnp.ones((D,)), ln3_b=jnp.zeros((D,))))
    params["decoder"] = dec
    params["dec_norm_g"] = jnp.ones((D,))
    params["dec_norm_b"] = jnp.zeros((D,))

    params["query_embed"] = 0.02 * jax.random.normal(kg(), (cfg["num_queries"], D),
                                                     jnp.float32)

    params["cls_w"], params["cls_b"] = _dense(kg, D, cfg["num_classes"] + 1)
    params["bbox_w1"], params["bbox_b1"] = _dense(kg, D, D)
    params["bbox_w2"], params["bbox_b2"] = _dense(kg, D, D)
    params["bbox_w3"], params["bbox_b3"] = _dense(kg, D, 4)
    return params


# ----------------------------------------------------------------------------
if __name__ == "__main__":
    cfg = dict(
        patch=4,
        backbone_channels=16,
        d_model=32,
        nheads=4,
        d_ffn=64,
        num_encoder_layers=2,
        num_decoder_layers=2,
        num_classes=5,
        num_queries=8,
    )

    key = jax.random.PRNGKey(0)
    B, H, W = 2, 32, 32
    samples = jax.random.normal(key, (B, 3, H, W), jnp.float32)

    params = init_detr_params(0, cfg)

    fwd = jax.jit(functools.partial(detr_forward, cfg=cfg))
    out = fwd(params, samples)
    jax.block_until_ready(out["pred_logits"])
    jax.block_until_ready(out["pred_boxes"])

    assert out["pred_logits"].shape == (B, cfg["num_queries"], cfg["num_classes"] + 1)
    assert out["pred_boxes"].shape == (B, cfg["num_queries"], 4)
    assert bool(jnp.all(jnp.isfinite(out["pred_logits"])))
    assert bool(jnp.all(jnp.isfinite(out["pred_boxes"])))
    print("KERNEL_OK")
</pallas_src>

<mosaic_0001>
module attributes {stable_mosaic.version = 11 : i64} {
  func.func @_qkv_proj_kernel(%arg0: i32, %arg1: memref<16x32xbf16, #tpu.memory_space<vmem>>, %arg2: memref<16x32xbf16, #tpu.memory_space<vmem>>, %arg3: memref<32x64xbf16, #tpu.memory_space<vmem>>, %arg4: memref<1x64xf32, #tpu.memory_space<vmem>>, %arg5: memref<32x32xbf16, #tpu.memory_space<vmem>>, %arg6: memref<1x32xf32, #tpu.memory_space<vmem>>, %arg7: memref<16x32xbf16, #tpu.memory_space<vmem>>, %arg8: memref<16x32xbf16, #tpu.memory_space<vmem>>, %arg9: memref<16x32xbf16, #tpu.memory_space<vmem>>) attributes {dimension_semantics = [#tpu.dimension_semantics<parallel>], iteration_bounds = array<i64: 1>, scalar_prefetch = 0 : i64, scratch_operands = 0 : i64, tpu.core_type = #tpu.core_type<tc>, window_params = [{transform_indices = @transform_0, window_bounds = array<i64: 16, 32>}, {transform_indices = @transform_1, window_bounds = array<i64: 16, 32>}, {pipeline_mode = #tpu.pipeline_mode<synchronous>, transform_indices = @transform_2, window_bounds = array<i64: 32, 64>}, {pipeline_mode = #tpu.pipeline_mode<synchronous>, transform_indices = @transform_3, window_bounds = array<i64: 1, 64>}, {pipeline_mode = #tpu.pipeline_mode<synchronous>, transform_indices = @transform_4, window_bounds = array<i64: 32, 32>}, {pipeline_mode = #tpu.pipeline_mode<synchronous>, transform_indices = @transform_5, window_bounds = array<i64: 1, 32>}, {transform_indices = @transform_6, window_bounds = array<i64: 16, 32>}, {transform_indices = @transform_7, window_bounds = array<i64: 16, 32>}, {transform_indices = @transform_8, window_bounds = array<i64: 16, 32>}]} {
    %c0 = arith.constant 0 : index
    %c0_0 = arith.constant 0 : index
    %0 = vector.load %arg1[%c0, %c0_0] : memref<16x32xbf16, #tpu.memory_space<vmem>>, vector<16x32xbf16>
    %c0_1 = arith.constant 0 : index
    %c0_2 = arith.constant 0 : index
    %1 = vector.load %arg1[%c0_1, %c0_2] : memref<16x32xbf16, #tpu.memory_space<vmem>>, vector<16x32xbf16>
    %c0_3 = arith.constant 0 : index
    %c0_4 = arith.constant 0 : index
    %2 = vector.load %arg2[%c0_3, %c0_4] : memref<16x32xbf16, #tpu.memory_space<vmem>>, vector<16x32xbf16>
    %3 = arith.addf %1, %2 : vector<16x32xbf16>
    %c0_5 = arith.constant 0 : index
    %c0_6 = arith.constant 0 : index
    %4 = vector.load %arg3[%c0_5, %c0_6] : memref<32x64xbf16, #tpu.memory_space<vmem>>, vector<32x64xbf16>
    %cst = arith.constant dense<0.000000e+00> : vector<16x64xf32>
    %5 = tpu.matmul %3, %4, %cst {dimension_numbers = #tpu.dot_dimension_numbers<[1], [0], [0], [1], [0, 0, 1, 1], [], []>} : vector<16x32xbf16>, vector<32x64xbf16>, vector<16x64xf32> -> vector<16x64xf32>
    %c0_7 = arith.constant 0 : index
    %c0_8 = arith.constant 0 : index
    %6 = vector.load %arg4[%c0_7, %c0_8] : memref<1x64xf32, #tpu.memory_space<vmem>>, vector<1x64xf32>
    %7 = vector.broadcast %6 : vector<1x64xf32> to vector<16x64xf32>
    %8 = arith.addf %5, %7 : vector<16x64xf32>
    %c0_9 = arith.constant 0 : index
    %c0_10 = arith.constant 0 : index
    %9 = vector.load %arg5[%c0_9, %c0_10] : memref<32x32xbf16, #tpu.memory_space<vmem>>, vector<32x32xbf16>
    %cst_11 = arith.constant dense<0.000000e+00> : vector<16x32xf32>
    %10 = tpu.matmul %0, %9, %cst_11 {dimension_numbers = #tpu.dot_dimension_numbers<[1], [0], [0], [1], [0, 0, 1, 1], [], []>} : vector<16x32xbf16>, vector<32x32xbf16>, vector<16x32xf32> -> vector<16x32xf32>
    %c0_12 = arith.constant 0 : index
    %c0_13 = arith.constant 0 : index
    %11 = vector.load %arg6[%c0_12, %c0_13] : memref<1x32xf32, #tpu.memory_space<vmem>>, vector<1x32xf32>
    %12 = vector.broadcast %11 : vector<1x32xf32> to vector<16x32xf32>
    %13 = arith.addf %10, %12 : vector<16x32xf32>
    %14 = vector.extract_strided_slice %8 {offsets = [0, 0], sizes = [16, 32], strides = [1, 1]} : vector<16x64xf32> to vector<16x32xf32>
    %15 = arith.truncf %14 : vector<16x32xf32> to vector<16x32xbf16>
    %c0_14 = arith.constant 0 : index
    %c0_15 = arith.constant 0 : index
    %16 = vector.load %arg7[%c0_14, %c0_15] : memref<16x32xbf16, #tpu.memory_space<vmem>>, vector<16x32xbf16>
    tpu.vector_store %arg7[%c0_14, %c0_15], %15 {strides = array<i32>} : memref<16x32xbf16, #tpu.memory_space<vmem>>, vector<16x32xbf16>,
    %17 = vector.extract_strided_slice %8 {offsets = [0, 32], sizes = [16, 32], strides = [1, 1]} : vector<16x64xf32> to vector<16x32xf32>
    %18 = arith.truncf %17 : vector<16x32xf32> to vector<16x32xbf16>
    %c0_16 = arith.constant 0 : index
    %c0_17 = arith.constant 0 : index
    %19 = vector.load %arg8[%c0_16, %c0_17] : memref<16x32xbf16, #tpu.memory_space<vmem>>, vector<16x32xbf16>
    tpu.vector_store %arg8[%c0_16, %c0_17], %18 {strides = array<i32>} : memref<16x32xbf16, #tpu.memory_space<vmem>>, vector<16x32xbf16>,
    %20 = arith.truncf %13 : vector<16x32xf32> to vector<16x32xbf16>
    %c0_18 = arith.constant 0 : index
    %c0_19 = arith.constant 0 : index
    %21 = vector.load %arg9[%c0_18, %c0_19] : memref<16x32xbf16, #tpu.memory_space<vmem>>, vector<16x32xbf16>
    tpu.vector_store %arg9[%c0_18, %c0_19], %20 {strides = array<i32>} : memref<16x32xbf16, #tpu.memory_space<vmem>>, vector<16x32xbf16>,
    return
  }
  func.func @transform_0(%arg0: i32) -> (i32, i32) {
    %c0_i32 = arith.constant 0 : i32
    %c0_i32_0 = arith.constant 0 : i32
    return %arg0, %c0_i32 : i32, i32
  }
  func.func @transform_1(%arg0: i32) -> (i32, i32) {
    %c0_i32 = arith.constant 0 : i32
    %c0_i32_0 = arith.constant 0 : i32
    return %arg0, %c0_i32 : i32, i32
  }
  func.func @transform_2(%arg0: i32) -> (i32, i32) {
    %c0_i32 = arith.constant 0 : i32
    %c0_i32_0 = arith.constant 0 : i32
    %c0_i32_1 = arith.constant 0 : i32
    return %c0_i32, %c0_i32_0 : i32, i32
  }
  func.func @transform_3(%arg0: i32) -> (i32, i32) {
    %c0_i32 = arith.constant 0 : i32
    %c0_i32_0 = arith.constant 0 : i32
    %c0_i32_1 = arith.constant 0 : i32
    return %c0_i32, %c0_i32_0 : i32, i32
  }
  func.func @transform_4(%arg0: i32) -> (i32, i32) {
    %c0_i32 = arith.constant 0 : i32
    %c0_i32_0 = arith.constant 0 : i32
    %c0_i32_1 = arith.constant 0 : i32
    return %c0_i32, %c0_i32_0 : i32, i32
  }
  func.func @transform_5(%arg0: i32) -> (i32, i32) {
    %c0_i32 = arith.constant 0 : i32
    %c0_i32_0 = arith.constant 0 : i32
    %c0_i32_1 = arith.constant 0 : i32
    return %c0_i32, %c0_i32_0 : i32, i32
  }
  func.func @transform_6(%arg0: i32) -> (i32, i32) {
    %c0_i32 = arith.constant 0 : i32
    %c0_i32_0 = arith.constant 0 : i32
    return %arg0, %c0_i32 : i32, i32
  }
  func.func @transform_7(%arg0: i32) -> (i32, i32) {
    %c0_i32 = arith.constant 0 : i32
    %c0_i32_0 = arith.constant 0 : i32
    return %arg0, %c0_i32 : i32, i32
  }
  func.func @transform_8(%arg0: i32) -> (i32, i32) {
    %c0_i32 = arith.constant 0 : i32
    %c0_i32_0 = arith.constant 0 : i32
    return %arg0, %c0_i32 : i32, i32
  }
}

module attributes {stable_mosaic.version = 11 : i64} {
  func.func @_linear_kernel(%arg0: i32, %arg1: memref<16x32xbf16, #tpu.memory_space<vmem>>, %arg2: memref<32x32xbf16, #tpu.memory_space<vmem>>, %arg3: memref<1x32xf32, #tpu.memory_space<vmem>>, %arg4: memref<16x32xbf16, #tpu.memory_space<vmem>>) attributes {dimension_semantics = [#tpu.dimension_semantics<parallel>], iteration_bounds = array<i64: 1>, scalar_prefetch = 0 : i64, scratch_operands = 0 : i64, tpu.core_type = #tpu.core_type<tc>, window_params = [{transform_indices = @transform_0, window_bounds = array<i64: 16, 32>}, {pipeline_mode = #tpu.pipeline_mode<synchronous>, transform_indices = @transform_1, window_bounds = array<i64: 32, 32>}, {pipeline_mode = #tpu.pipeline_mode<synchronous>, transform_indices = @transform_2, window_bounds = array<i64: 1, 32>}, {transform_indices = @transform_3, window_bounds = array<i64: 16, 32>}]} {
    %c0 = arith.constant 0 : index
    %c0_0 = arith.constant 0 : index
    %0 = vector.load %arg1[%c0, %c0_0] : memref<16x32xbf16, #tpu.memory_space<vmem>>, vector<16x32xbf16>
    %c0_1 = arith.constant 0 : index
    %c0_2 = arith.constant 0 : index
    %1 = vector.load %arg2[%c0_1, %c0_2] : memref<32x32xbf16, #tpu.memory_space<vmem>>, vector<32x32xbf16>
    %cst = arith.constant dense<0.000000e+00> : vector<16x32xf32>
    %2 = tpu.matmul %0, %1, %cst {dimension_numbers = #tpu.dot_dimension_numbers<[1], [0], [0], [1], [0, 0, 1, 1], [], []>} : vector<16x32xbf16>, vector<32x32xbf16>, vector<16x32xf32> -> vector<16x32xf32>
    %c0_3 = arith.constant 0 : index
    %c0_4 = arith.constant 0 : index
    %3 = vector.load %arg3[%c0_3, %c0_4] : memref<1x32xf32, #tpu.memory_space<vmem>>, vector<1x32xf32>
    %4 = vector.broadcast %3 : vector<1x32xf32> to vector<16x32xf32>
    %5 = arith.addf %2, %4 : vector<16x32xf32>
    %6 = arith.truncf %5 : vector<16x32xf32> to vector<16x32xbf16>
    %c0_5 = arith.constant 0 : index
    %c0_6 = arith.constant 0 : index
    %7 = vector.load %arg4[%c0_5, %c0_6] : memref<16x32xbf16, #tpu.memory_space<vmem>>, vector<16x32xbf16>
    tpu.vector_store %arg4[%c0_5, %c0_6], %6 {strides = array<i32>} : memref<16x32xbf16, #tpu.memory_space<vmem>>, vector<16x32xbf16>,
    return
  }
  func.func @transform_0(%arg0: i32) -> (i32, i32) {
    %c0_i32 = arith.constant 0 : i32
    %c0_i32_0 = arith.constant 0 : i32
    return %arg0, %c0_i32 : i32, i32
  }
  func.func @transform_1(%arg0: i32) -> (i32, i32) {
    %c0_i32 = arith.constant 0 : i32
    %c0_i32_0 = arith.constant 0 : i32
    %c0_i32_1 = arith.constant 0 : i32
    return %c0_i32, %c0_i32_0 : i32, i32
  }
  func.func @transform_2(%arg0: i32) -> (i32, i32) {
    %c0_i32 = arith.constant 0 : i32
    %c0_i32_0 = arith.constant 0 : i32
    %c0_i32_1 = arith.constant 0 : i32
    return %c0_i32, %c0_i32_0 : i32, i32
  }
  func.func @transform_3(%arg0: i32) -> (i32, i32) {
    %c0_i32 = arith.constant 0 : i32
    %c0_i32_0 = arith.constant 0 : i32
    return %arg0, %c0_i32 : i32, i32
  }
}

module attributes {stable_mosaic.version = 11 : i64} {
  func.func @_add_layernorm_kernel(%arg0: i32, %arg1: memref<16x32xbf16, #tpu.memory_space<vmem>>, %arg2: memref<16x32xbf16, #tpu.memory_space<vmem>>, %arg3: memref<1x32xf32, #tpu.memory_space<vmem>>, %arg4: memref<1x32xf32, #tpu.memory_space<vmem>>, %arg5: memref<16x32xbf16, #tpu.memory_space<vmem>>) attributes {dimension_semantics = [#tpu.dimension_semantics<parallel>], iteration_bounds = array<i64: 1>, scalar_prefetch = 0 : i64, scratch_operands = 0 : i64, tpu.core_type = #tpu.core_type<tc>, window_params = [{transform_indices = @transform_0, window_bounds = array<i64: 16, 32>}, {transform_indices = @transform_1, window_bounds = array<i64: 16, 32>}, {pipeline_mode = #tpu.pipeline_mode<synchronous>, transform_indices = @transform_2, window_bounds = array<i64: 1, 32>}, {pipeline_mode = #tpu.pipeline_mode<synchronous>, transform_indices = @transform_3, window_bounds = array<i64: 1, 32>}, {transform_indices = @transform_4, window_bounds = array<i64: 16, 32>}]} {
    %c0 = arith.constant 0 : index
    %c0_0 = arith.constant 0 : index
    %0 = vector.load %arg1[%c0, %c0_0] : memref<16x32xbf16, #tpu.memory_space<vmem>>, vector<16x32xbf16>
    %1 = arith.extf %0 : vector<16x32xbf16> to vector<16x32xf32>
    %c0_1 = arith.constant 0 : index
    %c0_2 = arith.constant 0 : index
    %2 = vector.load %arg2[%c0_1, %c0_2] : memref<16x32xbf16, #tpu.memory_space<vmem>>, vector<16x32xbf16>
    %3 = arith.extf %2 : vector<16x32xbf16> to vector<16x32xf32>
    %4 = arith.addf %1, %3 : vector<16x32xf32>
    %cst = arith.constant dense<0.000000e+00> : vector<16xf32>
    %5 = vector.multi_reduction <add>, %4, %cst [1] : vector<16x32xf32> to vector<16xf32>
    %6 = vector.shape_cast %5 : vector<16xf32> to vector<16x1xf32>
    %cst_3 = arith.constant 3.200000e+01 : f32
    %7 = vector.broadcast %cst_3 : f32 to vector<16x1xf32>
    %8 = arith.divf %6, %7 : vector<16x1xf32>
    %9 = vector.broadcast %8 : vector<16x1xf32> to vector<16x32xf32>
    %10 = arith.subf %4, %9 : vector<16x32xf32>
    %11 = arith.mulf %10, %10 : vector<16x32xf32>
    %cst_4 = arith.constant dense<0.000000e+00> : vector<16xf32>
    %12 = vector.multi_reduction <add>, %11, %cst_4 [1] : vector<16x32xf32> to vector<16xf32>
    %13 = vector.shape_cast %12 : vector<16xf32> to vector<16x1xf32>
    %cst_5 = arith.constant 3.200000e+01 : f32
    %14 = vector.broadcast %cst_5 : f32 to vector<16x1xf32>
    %15 = arith.divf %13, %14 : vector<16x1xf32>
    %cst_6 = arith.constant 9.99999974E-6 : f32
    %16 = vector.broadcast %cst_6 : f32 to vector<16x1xf32>
    %17 = arith.addf %15, %16 : vector<16x1xf32>
    %18 = math.rsqrt %17 : vector<16x1xf32>
    %19 = vector.broadcast %18 : vector<16x1xf32> to vector<16x32xf32>
    %20 = arith.mulf %10, %19 : vector<16x32xf32>
    %c0_7 = arith.constant 0 : index
    %c0_8 = arith.constant 0 : index
    %21 = vector.load %arg3[%c0_7, %c0_8] : memref<1x32xf32, #tpu.memory_space<vmem>>, vector<1x32xf32>
    %22 = vector.broadcast %21 : vector<1x32xf32> to vector<16x32xf32>
    %23 = arith.mulf %20, %22 : vector<16x32xf32>
    %c0_9 = arith.constant 0 : index
    %c0_10 = arith.constant 0 : index
    %24 = vector.load %arg4[%c0_9, %c0_10] : memref<1x32xf32, #tpu.memory_space<vmem>>, vector<1x32xf32>
    %25 = vector.broadcast %24 : vector<1x32xf32> to vector<16x32xf32>
    %26 = arith.addf %23, %25 : vector<16x32xf32>
    %27 = arith.truncf %26 : vector<16x32xf32> to vector<16x32xbf16>
    %c0_11 = arith.constant 0 : index
    %c0_12 = arith.constant 0 : index
    %28 = vector.load %arg5[%c0_11, %c0_12] : memref<16x32xbf16, #tpu.memory_space<vmem>>, vector<16x32xbf16>
    tpu.vector_store %arg5[%c0_11, %c0_12], %27 {strides = array<i32>} : memref<16x32xbf16, #tpu.memory_space<vmem>>, vector<16x32xbf16>,
    return
  }
  func.func @transform_0(%arg0: i32) -> (i32, i32) {
    %c0_i32 = arith.constant 0 : i32
    %c0_i32_0 = arith.constant 0 : i32
    return %arg0, %c0_i32 : i32, i32
  }
  func.func @transform_1(%arg0: i32) -> (i32, i32) {
    %c0_i32 = arith.constant 0 : i32
    %c0_i32_0 = arith.constant 0 : i32
    return %arg0, %c0_i32 : i32, i32
  }
  func.func @transform_2(%arg0: i32) -> (i32, i32) {
    %c0_i32 = arith.constant 0 : i32
    %c0_i32_0 = arith.constant 0 : i32
    %c0_i32_1 = arith.constant 0 : i32
    return %c0_i32, %c0_i32_0 : i32, i32
  }
  func.func @transform_3(%arg0: i32) -> (i32, i32) {
    %c0_i32 = arith.constant 0 : i32
    %c0_i32_0 = arith.constant 0 : i32
    %c0_i32_1 = arith.constant 0 : i32
    return %c0_i32, %c0_i32_0 : i32, i32
  }
  func.func @transform_4(%arg0: i32) -> (i32, i32) {
    %c0_i32 = arith.constant 0 : i32
    %c0_i32_0 = arith.constant 0 : i32
    return %arg0, %c0_i32 : i32, i32
  }
}

module attributes {stable_mosaic.version = 11 : i64} {
  func.func @_mha_kernel(%arg0: i32, %arg1: i32, %arg2: memref<1x8x32xbf16, #tpu.memory_space<vmem>>, %arg3: memref<1x8x32xbf16, #tpu.memory_space<vmem>>, %arg4: memref<1x8x32xbf16, #tpu.memory_space<vmem>>, %arg5: memref<1x8x32xbf16, #tpu.memory_space<vmem>>) attributes {dimension_semantics = [#tpu.dimension_semantics<parallel>, #tpu.dimension_semantics<parallel>], iteration_bounds = array<i64: 2, 1>, scalar_prefetch = 0 : i64, scratch_operands = 0 : i64, tpu.core_type = #tpu.core_type<tc>, window_params = [{transform_indices = @transform_0, window_bounds = array<i64: 1, 8, 32>}, {transform_indices = @transform_1, window_bounds = array<i64: 1, 8, 32>}, {transform_indices = @transform_2, window_bounds = array<i64: 1, 8, 32>}, {transform_indices = @transform_3, window_bounds = array<i64: 1, 8, 32>}]} {
    %c0 = arith.constant 0 : index
    %c0_0 = arith.constant 0 : index
    %c0_1 = arith.constant 0 : index
    %0 = vector.load %arg2[%c0, %c0_0, %c0_1] : memref<1x8x32xbf16, #tpu.memory_space<vmem>>, vector<1x8x32xbf16>
    %1 = vector.shape_cast %0 : vector<1x8x32xbf16> to vector<8x32xbf16>
    %c0_2 = arith.constant 0 : index
    %c0_3 = arith.constant 0 : index
    %c0_4 = arith.constant 0 : index
    %2 = vector.load %arg3[%c0_2, %c0_3, %c0_4] : memref<1x8x32xbf16, #tpu.memory_space<vmem>>, vector<1x8x32xbf16>
    %3 = vector.shape_cast %2 : vector<1x8x32xbf16> to vector<8x32xbf16>
    %c0_5 = arith.constant 0 : index
    %c0_6 = arith.constant 0 : index
    %c0_7 = arith.constant 0 : index
    %4 = vector.load %arg4[%c0_5, %c0_6, %c0_7] : memref<1x8x32xbf16, #tpu.memory_space<vmem>>, vector<1x8x32xbf16>
    %5 = vector.shape_cast %4 : vector<1x8x32xbf16> to vector<8x32xbf16>
    %6 = vector.extract_strided_slice %1 {offsets = [0, 0], sizes = [8, 8], strides = [1, 1]} : vector<8x32xbf16> to vector<8x8xbf16>
    %7 = vector.extract_strided_slice %3 {offsets = [0, 0], sizes = [8, 8], strides = [1, 1]} : vector<8x32xbf16> to vector<8x8xbf16>
    %8 = vector.extract_strided_slice %5 {offsets = [0, 0], sizes = [8, 8], strides = [1, 1]} : vector<8x32xbf16> to vector<8x8xbf16>
    %cst = arith.constant dense<0.000000e+00> : vector<8x8xf32>
    %9 = tpu.matmul %6, %7, %cst {dimension_numbers = #tpu.dot_dimension_numbers<[1], [1], [0], [0], [0, 0, 1, 0], [], []>} : vector<8x8xbf16>, vector<8x8xbf16>, vector<8x8xf32> -> vector<8x8xf32>
    %cst_8 = arith.constant 0.353553385 : f32
    %10 = vector.broadcast %cst_8 : f32 to vector<8x8xf32>
    %11 = arith.mulf %9, %10 : vector<8x8xf32>
    %cst_9 = arith.constant dense<0xFF800000> : vector<8xf32>
    %12 = vector.multi_reduction <maximumf>, %11, %cst_9 [1] : vector<8x8xf32> to vector<8xf32>
    %13 = vector.shape_cast %12 : vector<8xf32> to vector<8x1xf32>
    %14 = vector.broadcast %13 : vector<8x1xf32> to vector<8x8xf32>
    %15 = arith.subf %11, %14 : vector<8x8xf32>
    %16 = math.exp %15 : vector<8x8xf32>
    %cst_10 = arith.constant dense<0.000000e+00> : vector<8xf32>
    %17 = vector.multi_reduction <add>, %16, %cst_10 [1] : vector<8x8xf32> to vector<8xf32>
    %18 = vector.shape_cast %17 : vector<8xf32> to vector<8x1xf32>
    %19 = tpu.reciprocal %18 {approx = true} : vector<8x1xf32> -> vector<8x1xf32>
    %20 = vector.broadcast %19 : vector<8x1xf32> to vector<8x8xf32>
    %21 = arith.mulf %16, %20 : vector<8x8xf32>
    %22 = arith.truncf %21 : vector<8x8xf32> to vector<8x8xbf16>
    %cst_11 = arith.constant dense<0.000000e+00> : vector<8x8xf32>
    %23 = tpu.matmul %22, %8, %cst_11 {dimension_numbers = #tpu.dot_dimension_numbers<[1], [0], [0], [1], [0, 0, 1, 1], [], []>} : vector<8x8xbf16>, vector<8x8xbf16>, vector<8x8xf32> -> vector<8x8xf32>
    %24 = arith.truncf %23 : vector<8x8xf32> to vector<8x8xbf16>
    %c0_12 = arith.constant 0 : index
    %c0_13 = arith.constant 0 : index
    %c0_14 = arith.constant 0 : index
    %25 = vector.load %arg5[%c0_12, %c0_13, %c0_14] : memref<1x8x32xbf16, #tpu.memory_space<vmem>>, vector<1x8x8xbf16>
    %26 = vector.shape_cast %25 : vector<1x8x8xbf16> to vector<8x8xbf16>
    %27 = vector.shape_cast %24 : vector<8x8xbf16> to vector<1x8x8xbf16>
    tpu.vector_store %arg5[%c0_12, %c0_13, %c0_14], %27 {strides = array<i32>} : memref<1x8x32xbf16, #tpu.memory_space<vmem>>, vector<1x8x8xbf16>,
    %28 = vector.extract_strided_slice %1 {offsets = [0, 8], sizes = [8, 8], strides = [1, 1]} : vector<8x32xbf16> to vector<8x8xbf16>
    %29 = vector.extract_strided_slice %3 {offsets = [0, 8], sizes = [8, 8], strides = [1, 1]} : vector<8x32xbf16> to vector<8x8xbf16>
    %30 = vector.extract_strided_slice %5 {offsets = [0, 8], sizes = [8, 8], strides = [1, 1]} : vector<8x32xbf16> to vector<8x8xbf16>
    %cst_15 = arith.constant dense<0.000000e+00> : vector<8x8xf32>
    %31 = tpu.matmul %28, %29, %cst_15 {dimension_numbers = #tpu.dot_dimension_numbers<[1], [1], [0], [0], [0, 0, 1, 0], [], []>} : vector<8x8xbf16>, vector<8x8xbf16>, vector<8x8xf32> -> vector<8x8xf32>
    %cst_16 = arith.constant 0.353553385 : f32
    %32 = vector.broadcast %cst_16 : f32 to vector<8x8xf32>
    %33 = arith.mulf %31, %32 : vector<8x8xf32>
    %cst_17 = arith.constant dense<0xFF800000> : vector<8xf32>
    %34 = vector.multi_reduction <maximumf>, %33, %cst_17 [1] : vector<8x8xf32> to vector<8xf32>
    %35 = vector.shape_cast %34 : vector<8xf32> to vector<8x1xf32>
    %36 = vector.broadcast %35 : vector<8x1xf32> to vector<8x8xf32>
    %37 = arith.subf %33, %36 : vector<8x8xf32>
    %38 = math.exp %37 : vector<8x8xf32>
    %cst_18 = arith.constant dense<0.000000e+00> : vector<8xf32>
    %39 = vector.multi_reduction <add>, %38, %cst_18 [1] : vector<8x8xf32> to vector<8xf32>
    %40 = vector.shape_cast %39 : vector<8xf32> to vector<8x1xf32>
    %41 = tpu.reciprocal %40 {approx = true} : vector<8x1xf32> -> vector<8x1xf32>
    %42 = vector.broadcast %41 : vector<8x1xf32> to vector<8x8xf32>
    %43 = arith.mulf %38, %42 : vector<8x8xf32>
    %44 = arith.truncf %43 : vector<8x8xf32> to vector<8x8xbf16>
    %cst_19 = arith.constant dense<0.000000e+00> : vector<8x8xf32>
    %45 = tpu.matmul %44, %30, %cst_19 {dimension_numbers = #tpu.dot_dimension_numbers<[1], [0], [0], [1], [0, 0, 1, 1], [], []>} : vector<8x8xbf16>, vector<8x8xbf16>, vector<8x8xf32> -> vector<8x8xf32>
    %46 = arith.truncf %45 : vector<8x8xf32> to vector<8x8xbf16>
    %c0_20 = arith.constant 0 : index
    %c0_21 = arith.constant 0 : index
    %c8 = arith.constant 8 : index
    %47 = vector.load %arg5[%c0_20, %c0_21, %c8] : memref<1x8x32xbf16, #tpu.memory_space<vmem>>, vector<1x8x8xbf16>
    %48 = vector.shape_cast %47 : vector<1x8x8xbf16> to vector<8x8xbf16>
    %49 = vector.shape_cast %46 : vector<8x8xbf16> to vector<1x8x8xbf16>
    tpu.vector_store %arg5[%c0_20, %c0_21, %c8], %49 {strides = array<i32>} : memref<1x8x32xbf16, #tpu.memory_space<vmem>>, vector<1x8x8xbf16>,
    %50 = vector.extract_strided_slice %1 {offsets = [0, 16], sizes = [8, 8], strides = [1, 1]} : vector<8x32xbf16> to vector<8x8xbf16>
    %51 = vector.extract_strided_slice %3 {offsets = [0, 16], sizes = [8, 8], strides = [1, 1]} : vector<8x32xbf16> to vector<8x8xbf16>
    %52 = vector.extract_strided_slice %5 {offsets = [0, 16], sizes = [8, 8], strides = [1, 1]} : vector<8x32xbf16> to vector<8x8xbf16>
    %cst_22 = arith.constant dense<0.000000e+00> : vector<8x8xf32>
    %53 = tpu.matmul %50, %51, %cst_22 {dimension_numbers = #tpu.dot_dimension_numbers<[1], [1], [0], [0], [0, 0, 1, 0], [], []>} : vector<8x8xbf16>, vector<8x8xbf16>, vector<8x8xf32> -> vector<8x8xf32>
    %cst_23 = arith.constant 0.353553385 : f32
    %54 = vector.broadcast %cst_23 : f32 to vector<8x8xf32>
    %55 = arith.mulf %53, %54 : vector<8x8xf32>
    %cst_24 = arith.constant dense<0xFF800000> : vector<8xf32>
    %56 = vector.multi_reduction <maximumf>, %55, %cst_24 [1] : vector<8x8xf32> to vector<8xf32>
    %57 = vector.shape_cast %56 : vector<8xf32> to vector<8x1xf32>
    %58 = vector.broadcast %57 : vector<8x1xf32> to vector<8x8xf32>
    %59 = arith.subf %55, %58 : vector<8x8xf32>
    %60 = math.exp %59 : vector<8x8xf32>
    %cst_25 = arith.constant dense<0.000000e+00> : vector<8xf32>
    %61 = vector.multi_reduction <add>, %60, %cst_25 [1] : vector<8x8xf32> to vector<8xf32>
    %62 = vector.shape_cast %61 : vector<8xf32> to vector<8x1xf32>
    %63 = tpu.reciprocal %62 {approx = true} : vector<8x1xf32> -> vector<8x1xf32>
    %64 = vector.broadcast %63 : vector<8x1xf32> to vector<8x8xf32>
    %65 = arith.mulf %60, %64 : vector<8x8xf32>
    %66 = arith.truncf %65 : vector<8x8xf32> to vector<8x8xbf16>
    %cst_26 = arith.constant dense<0.000000e+00> : vector<8x8xf32>
    %67 = tpu.matmul %66, %52, %cst_26 {dimension_numbers = #tpu.dot_dimension_numbers<[1], [0], [0], [1], [0, 0, 1, 1], [], []>} : vector<8x8xbf16>, vector<8x8xbf16>, vector<8x8xf32> -> vector<8x8xf32>
    %68 = arith.truncf %67 : vector<8x8xf32> to vector<8x8xbf16>
    %c0_27 = arith.constant 0 : index
    %c0_28 = arith.constant 0 : index
    %c16 = arith.constant 16 : index
    %69 = vector.load %arg5[%c0_27, %c0_28, %c16] : memref<1x8x32xbf16, #tpu.memory_space<vmem>>, vector<1x8x8xbf16>
    %70 = vector.shape_cast %69 : vector<1x8x8xbf16> to vector<8x8xbf16>
    %71 = vector.shape_cast %68 : vector<8x8xbf16> to vector<1x8x8xbf16>
    tpu.vector_store %arg5[%c0_27, %c0_28, %c16], %71 {strides = array<i32>} : memref<1x8x32xbf16, #tpu.memory_space<vmem>>, vector<1x8x8xbf16>,
    %72 = vector.extract_strided_slice %1 {offsets = [0, 24], sizes = [8, 8], strides = [1, 1]} : vector<8x32xbf16> to vector<8x8xbf16>
    %73 = vector.extract_strided_slice %3 {offsets = [0, 24], sizes = [8, 8], strides = [1, 1]} : vector<8x32xbf16> to vector<8x8xbf16>
    %74 = vector.extract_strided_slice %5 {offsets = [0, 24], sizes = [8, 8], strides = [1, 1]} : vector<8x32xbf16> to vector<8x8xbf16>
    %cst_29 = arith.constant dense<0.000000e+00> : vector<8x8xf32>
    %75 = tpu.matmul %72, %73, %cst_29 {dimension_numbers = #tpu.dot_dimension_numbers<[1], [1], [0], [0], [0, 0, 1, 0], [], []>} : vector<8x8xbf16>, vector<8x8xbf16>, vector<8x8xf32> -> vector<8x8xf32>
    %cst_30 = arith.constant 0.353553385 : f32
    %76 = vector.broadcast %cst_30 : f32 to vector<8x8xf32>
    %77 = arith.mulf %75, %76 : vector<8x8xf32>
    %cst_31 = arith.constant dense<0xFF800000> : vector<8xf32>
    %78 = vector.multi_reduction <maximumf>, %77, %cst_31 [1] : vector<8x8xf32> to vector<8xf32>
    %79 = vector.shape_cast %78 : vector<8xf32> to vector<8x1xf32>
    %80 = vector.broadcast %79 : vector<8x1xf32> to vector<8x8xf32>
    %81 = arith.subf %77, %80 : vector<8x8xf32>
    %82 = math.exp %81 : vector<8x8xf32>
    %cst_32 = arith.constant dense<0.000000e+00> : vector<8xf32>
    %83 = vector.multi_reduction <add>, %82, %cst_32 [1] : vector<8x8xf32> to vector<8xf32>
    %84 = vector.shape_cast %83 : vector<8xf32> to vector<8x1xf32>
    %85 = tpu.reciprocal %84 {approx = true} : vector<8x1xf32> -> vector<8x1xf32>
    %86 = vector.broadcast %85 : vector<8x1xf32> to vector<8x8xf32>
    %87 = arith.mulf %82, %86 : vector<8x8xf32>
    %88 = arith.truncf %87 : vector<8x8xf32> to vector<8x8xbf16>
    %cst_33 = arith.constant dense<0.000000e+00> : vector<8x8xf32>
    %89 = tpu.matmul %88, %74, %cst_33 {dimension_numbers = #tpu.dot_dimension_numbers<[1], [0], [0], [1], [0, 0, 1, 1], [], []>} : vector<8x8xbf16>, vector<8x8xbf16>, vector<8x8xf32> -> vector<8x8xf32>
    %90 = arith.truncf %89 : vector<8x8xf32> to vector<8x8xbf16>
    %c0_34 = arith.constant 0 : index
    %c0_35 = arith.constant 0 : index
    %c24 = arith.constant 24 : index
    %91 = vector.load %arg5[%c0_34, %c0_35, %c24] : memref<1x8x32xbf16, #tpu.memory_space<vmem>>, vector<1x8x8xbf16>
    %92 = vector.shape_cast %91 : vector<1x8x8xbf16> to vector<8x8xbf16>
    %93 = vector.shape_cast %90 : vector<8x8xbf16> to vector<1x8x8xbf16>
    tpu.vector_store %arg5[%c0_34, %c0_35, %c24], %93 {strides = array<i32>} : memref<1x8x32xbf16, #tpu.memory_space<vmem>>, vector<1x8x8xbf16>,
    return
  }
  func.func @transform_0(%arg0: i32, %arg1: i32) -> (i32, i32, i32) {
    %c0_i32 = arith.constant 0 : i32
    %c0_i32_0 = arith.constant 0 : i32
    return %arg0, %arg1, %c0_i32 : i32, i32, i32
  }
  func.func @transform_1(%arg0: i32, %arg1: i32) -> (i32, i32, i32) {
    %c0_i32 = arith.constant 0 : i32
    %c0_i32_0 = arith.constant 0 : i32
    %c0_i32_1 = arith.constant 0 : i32
    return %arg0, %c0_i32, %c0_i32_0 : i32, i32, i32
  }
  func.func @transform_2(%arg0: i32, %arg1: i32) -> (i32, i32, i32) {
    %c0_i32 = arith.constant 0 : i32
    %c0_i32_0 = arith.constant 0 : i32
    %c0_i32_1 = arith.constant 0 : i32
    return %arg0, %c0_i32, %c0_i32_0 : i32, i32, i32
  }
  func.func @transform_3(%arg0: i32, %arg1: i32) -> (i32, i32, i32) {
    %c0_i32 = arith.constant 0 : i32
    %c0_i32_0 = arith.constant 0 : i32
    return %arg0, %arg1, %c0_i32 : i32, i32, i32
  }
}

module attributes {stable_mosaic.version = 11 : i64} {
  func.func @_linear_add_kernel(%arg0: i32, %arg1: memref<16x32xbf16, #tpu.memory_space<vmem>>, %arg2: memref<16x32xbf16, #tpu.memory_space<vmem>>, %arg3: memref<32x32xbf16, #tpu.memory_space<vmem>>, %arg4: memref<1x32xf32, #tpu.memory_space<vmem>>, %arg5: memref<16x32xbf16, #tpu.memory_space<vmem>>) attributes {dimension_semantics = [#tpu.dimension_semantics<parallel>], iteration_bounds = array<i64: 1>, scalar_prefetch = 0 : i64, scratch_operands = 0 : i64, tpu.core_type = #tpu.core_type<tc>, window_params = [{transform_indices = @transform_0, window_bounds = array<i64: 16, 32>}, {transform_indices = @transform_1, window_bounds = array<i64: 16, 32>}, {pipeline_mode = #tpu.pipeline_mode<synchronous>, transform_indices = @transform_2, window_bounds = array<i64: 32, 32>}, {pipeline_mode = #tpu.pipeline_mode<synchronous>, transform_indices = @transform_3, window_bounds = array<i64: 1, 32>}, {transform_indices = @transform_4, window_bounds = array<i64: 16, 32>}]} {
    %c0 = arith.constant 0 : index
    %c0_0 = arith.constant 0 : index
    %0 = vector.load %arg1[%c0, %c0_0] : memref<16x32xbf16, #tpu.memory_space<vmem>>, vector<16x32xbf16>
    %c0_1 = arith.constant 0 : index
    %c0_2 = arith.constant 0 : index
    %1 = vector.load %arg2[%c0_1, %c0_2] : memref<16x32xbf16, #tpu.memory_space<vmem>>, vector<16x32xbf16>
    %2 = arith.addf %0, %1 : vector<16x32xbf16>
    %c0_3 = arith.constant 0 : index
    %c0_4 = arith.constant 0 : index
    %3 = vector.load %arg3[%c0_3, %c0_4] : memref<32x32xbf16, #tpu.memory_space<vmem>>, vector<32x32xbf16>
    %cst = arith.constant dense<0.000000e+00> : vector<16x32xf32>
    %4 = tpu.matmul %2, %3, %cst {dimension_numbers = #tpu.dot_dimension_numbers<[1], [0], [0], [1], [0, 0, 1, 1], [], []>} : vector<16x32xbf16>, vector<32x32xbf16>, vector<16x32xf32> -> vector<16x32xf32>
    %c0_5 = arith.constant 0 : index
    %c0_6 = arith.constant 0 : index
    %5 = vector.load %arg4[%c0_5, %c0_6] : memref<1x32xf32, #tpu.memory_space<vmem>>, vector<1x32xf32>
    %6 = vector.broadcast %5 : vector<1x32xf32> to vector<16x32xf32>
    %7 = arith.addf %4, %6 : vector<16x32xf32>
    %8 = arith.truncf %7 : vector<16x32xf32> to vector<16x32xbf16>
    %c0_7 = arith.constant 0 : index
    %c0_8 = arith.constant 0 : index
    %9 = vector.load %arg5[%c0_7, %c0_8] : memref<16x32xbf16, #tpu.memory_space<vmem>>, vector<16x32xbf16>
    tpu.vector_store %arg5[%c0_7, %c0_8], %8 {strides = array<i32>} : memref<16x32xbf16, #tpu.memory_space<vmem>>, vector<16x32xbf16>,
    return
  }
  func.func @transform_0(%arg0: i32) -> (i32, i32) {
    %c0_i32 = arith.constant 0 : i32
    %c0_i32_0 = arith.constant 0 : i32
    return %arg0, %c0_i32 : i32, i32
  }
  func.func @transform_1(%arg0: i32) -> (i32, i32) {
    %c0_i32 = arith.constant 0 : i32
    %c0_i32_0 = arith.constant 0 : i32
    return %arg0, %c0_i32 : i32, i32
  }
  func.func @transform_2(%arg0: i32) -> (i32, i32) {
    %c0_i32 = arith.constant 0 : i32
    %c0_i32_0 = arith.constant 0 : i32
    %c0_i32_1 = arith.constant 0 : i32
    return %c0_i32, %c0_i32_0 : i32, i32
  }
  func.func @transform_3(%arg0: i32) -> (i32, i32) {
    %c0_i32 = arith.constant 0 : i32
    %c0_i32_0 = arith.constant 0 : i32
    %c0_i32_1 = arith.constant 0 : i32
    return %c0_i32, %c0_i32_0 : i32, i32
  }
  func.func @transform_4(%arg0: i32) -> (i32, i32) {
    %c0_i32 = arith.constant 0 : i32
    %c0_i32_0 = arith.constant 0 : i32
    return %arg0, %c0_i32 : i32, i32
  }
}

module attributes {stable_mosaic.version = 11 : i64} {
  func.func @_linear_kernel(%arg0: i32, %arg1: memref<128x16xbf16, #tpu.memory_space<vmem>>, %arg2: memref<16x32xbf16, #tpu.memory_space<vmem>>, %arg3: memref<1x32xf32, #tpu.memory_space<vmem>>, %arg4: memref<128x32xbf16, #tpu.memory_space<vmem>>) attributes {dimension_semantics = [#tpu.dimension_semantics<parallel>], iteration_bounds = array<i64: 1>, scalar_prefetch = 0 : i64, scratch_operands = 0 : i64, tpu.core_type = #tpu.core_type<tc>, window_params = [{transform_indices = @transform_0, window_bounds = array<i64: 128, 16>}, {pipeline_mode = #tpu.pipeline_mode<synchronous>, transform_indices = @transform_1, window_bounds = array<i64: 16, 32>}, {pipeline_mode = #tpu.pipeline_mode<synchronous>, transform_indices = @transform_2, window_bounds = array<i64: 1, 32>}, {transform_indices = @transform_3, window_bounds = array<i64: 128, 32>}]} {
    %c0 = arith.constant 0 : index
    %c0_0 = arith.constant 0 : index
    %0 = vector.load %arg1[%c0, %c0_0] : memref<128x16xbf16, #tpu.memory_space<vmem>>, vector<128x16xbf16>
    %c0_1 = arith.constant 0 : index
    %c0_2 = arith.constant 0 : index
    %1 = vector.load %arg2[%c0_1, %c0_2] : memref<16x32xbf16, #tpu.memory_space<vmem>>, vector<16x32xbf16>
    %cst = arith.constant dense<0.000000e+00> : vector<128x32xf32>
    %2 = tpu.matmul %0, %1, %cst {dimension_numbers = #tpu.dot_dimension_numbers<[1], [0], [0], [1], [0, 0, 1, 1], [], []>} : vector<128x16xbf16>, vector<16x32xbf16>, vector<128x32xf32> -> vector<128x32xf32>
    %c0_3 = arith.constant 0 : index
    %c0_4 = arith.constant 0 : index
    %3 = vector.load %arg3[%c0_3, %c0_4] : memref<1x32xf32, #tpu.memory_space<vmem>>, vector<1x32xf32>
    %4 = vector.broadcast %3 : vector<1x32xf32> to vector<128x32xf32>
    %5 = arith.addf %2, %4 : vector<128x32xf32>
    %6 = arith.truncf %5 : vector<128x32xf32> to vector<128x32xbf16>
    %c0_5 = arith.constant 0 : index
    %c0_6 = arith.constant 0 : index
    %7 = vector.load %arg4[%c0_5, %c0_6] : memref<128x32xbf16, #tpu.memory_space<vmem>>, vector<128x32xbf16>
    tpu.vector_store %arg4[%c0_5, %c0_6], %6 {strides = array<i32>} : memref<128x32xbf16, #tpu.memory_space<vmem>>, vector<128x32xbf16>,
    return
  }
  func.func @transform_0(%arg0: i32) -> (i32, i32) {
    %c0_i32 = arith.constant 0 : i32
    %c0_i32_0 = arith.constant 0 : i32
    return %arg0, %c0_i32 : i32, i32
  }
  func.func @transform_1(%arg0: i32) -> (i32, i32) {
    %c0_i32 = arith.constant 0 : i32
    %c0_i32_0 = arith.constant 0 : i32
    %c0_i32_1 = arith.constant 0 : i32
    return %c0_i32, %c0_i32_0 : i32, i32
  }
  func.func @transform_2(%arg0: i32) -> (i32, i32) {
    %c0_i32 = arith.constant 0 : i32
    %c0_i32_0 = arith.constant 0 : i32
    %c0_i32_1 = arith.constant 0 : i32
    return %c0_i32, %c0_i32_0 : i32, i32
  }
  func.func @transform_3(%arg0: i32) -> (i32, i32) {
    %c0_i32 = arith.constant 0 : i32
    %c0_i32_0 = arith.constant 0 : i32
    return %arg0, %c0_i32 : i32, i32
  }
}

module attributes {stable_mosaic.version = 11 : i64} {
  func.func @_linear_kernel(%arg0: i32, %arg1: memref<128x48xf32, #tpu.memory_space<vmem>>, %arg2: memref<48x16xbf16, #tpu.memory_space<vmem>>, %arg3: memref<1x16xf32, #tpu.memory_space<vmem>>, %arg4: memref<128x16xbf16, #tpu.memory_space<vmem>>) attributes {dimension_semantics = [#tpu.dimension_semantics<parallel>], iteration_bounds = array<i64: 1>, scalar_prefetch = 0 : i64, scratch_operands = 0 : i64, tpu.core_type = #tpu.core_type<tc>, window_params = [{transform_indices = @transform_0, window_bounds = array<i64: 128, 48>}, {pipeline_mode = #tpu.pipeline_mode<synchronous>, transform_indices = @transform_1, window_bounds = array<i64: 48, 16>}, {pipeline_mode = #tpu.pipeline_mode<synchronous>, transform_indices = @transform_2, window_bounds = array<i64: 1, 16>}, {transform_indices = @transform_3, window_bounds = array<i64: 128, 16>}]} {
    %c0 = arith.constant 0 : index
    %c0_0 = arith.constant 0 : index
    %0 = vector.load %arg1[%c0, %c0_0] : memref<128x48xf32, #tpu.memory_space<vmem>>, vector<128x48xf32>
    %1 = arith.truncf %0 : vector<128x48xf32> to vector<128x48xbf16>
    %c0_1 = arith.constant 0 : index
    %c0_2 = arith.constant 0 : index
    %2 = vector.load %arg2[%c0_1, %c0_2] : memref<48x16xbf16, #tpu.memory_space<vmem>>, vector<48x16xbf16>
    %cst = arith.constant dense<0.000000e+00> : vector<128x16xf32>
    %3 = tpu.matmul %1, %2, %cst {dimension_numbers = #tpu.dot_dimension_numbers<[1], [0], [0], [1], [0, 0, 1, 1], [], []>} : vector<128x48xbf16>, vector<48x16xbf16>, vector<128x16xf32> -> vector<128x16xf32>
    %c0_3 = arith.constant 0 : index
    %c0_4 = arith.constant 0 : index
    %4 = vector.load %arg3[%c0_3, %c0_4] : memref<1x16xf32, #tpu.memory_space<vmem>>, vector<1x16xf32>
    %5 = vector.broadcast %4 : vector<1x16xf32> to vector<128x16xf32>
    %6 = arith.addf %3, %5 : vector<128x16xf32>
    %cst_5 = arith.constant 0.000000e+00 : f32
    %7 = vector.broadcast %cst_5 : f32 to vector<128x16xf32>
    %8 = arith.maximumf %6, %7 : vector<128x16xf32>
    %9 = arith.truncf %8 : vector<128x16xf32> to vector<128x16xbf16>
    %c0_6 = arith.constant 0 : index
    %c0_7 = arith.constant 0 : index
    %10 = vector.load %arg4[%c0_6, %c0_7] : memref<128x16xbf16, #tpu.memory_space<vmem>>, vector<128x16xbf16>
    tpu.vector_store %arg4[%c0_6, %c0_7], %9 {strides = array<i32>} : memref<128x16xbf16, #tpu.memory_space<vmem>>, vector<128x16xbf16>,
    return
  }
  func.func @transform_0(%arg0: i32) -> (i32, i32) {
    %c0_i32 = arith.constant 0 : i32
    %c0_i32_0 = arith.constant 0 : i32
    return %arg0, %c0_i32 : i32, i32
  }
  func.func @transform_1(%arg0: i32) -> (i32, i32) {
    %c0_i32 = arith.constant 0 : i32
    %c0_i32_0 = arith.constant 0 : i32
    %c0_i32_1 = arith.constant 0 : i32
    return %c0_i32, %c0_i32_0 : i32, i32
  }
  func.func @transform_2(%arg0: i32) -> (i32, i32) {
    %c0_i32 = arith.constant 0 : i32
    %c0_i32_0 = arith.constant 0 : i32
    %c0_i32_1 = arith.constant 0 : i32
    return %c0_i32, %c0_i32_0 : i32, i32
  }
  func.func @transform_3(%arg0: i32) -> (i32, i32) {
    %c0_i32 = arith.constant 0 : i32
    %c0_i32_0 = arith.constant 0 : i32
    return %arg0, %c0_i32 : i32, i32
  }
}

module attributes {stable_mosaic.version = 11 : i64} {
  func.func @_mha_kernel(%arg0: i32, %arg1: i32, %arg2: memref<1x64x32xbf16, #tpu.memory_space<vmem>>, %arg3: memref<1x64x32xbf16, #tpu.memory_space<vmem>>, %arg4: memref<1x64x32xbf16, #tpu.memory_space<vmem>>, %arg5: memref<1x64x32xbf16, #tpu.memory_space<vmem>>) attributes {dimension_semantics = [#tpu.dimension_semantics<parallel>, #tpu.dimension_semantics<parallel>], iteration_bounds = array<i64: 2, 1>, scalar_prefetch = 0 : i64, scratch_operands = 0 : i64, tpu.core_type = #tpu.core_type<tc>, window_params = [{transform_indices = @transform_0, window_bounds = array<i64: 1, 64, 32>}, {transform_indices = @transform_1, window_bounds = array<i64: 1, 64, 32>}, {transform_indices = @transform_2, window_bounds = array<i64: 1, 64, 32>}, {transform_indices = @transform_3, window_bounds = array<i64: 1, 64, 32>}]} {
    %c0 = arith.constant 0 : index
    %c0_0 = arith.constant 0 : index
    %c0_1 = arith.constant 0 : index
    %0 = vector.load %arg2[%c0, %c0_0, %c0_1] : memref<1x64x32xbf16, #tpu.memory_space<vmem>>, vector<1x64x32xbf16>
    %1 = vector.shape_cast %0 : vector<1x64x32xbf16> to vector<64x32xbf16>
    %c0_2 = arith.constant 0 : index
    %c0_3 = arith.constant 0 : index
    %c0_4 = arith.constant 0 : index
    %2 = vector.load %arg3[%c0_2, %c0_3, %c0_4] : memref<1x64x32xbf16, #tpu.memory_space<vmem>>, vector<1x64x32xbf16>
    %3 = vector.shape_cast %2 : vector<1x64x32xbf16> to vector<64x32xbf16>
    %c0_5 = arith.constant 0 : index
    %c0_6 = arith.constant 0 : index
    %c0_7 = arith.constant 0 : index
    %4 = vector.load %arg4[%c0_5, %c0_6, %c0_7] : memref<1x64x32xbf16, #tpu.memory_space<vmem>>, vector<1x64x32xbf16>
    %5 = vector.shape_cast %4 : vector<1x64x32xbf16> to vector<64x32xbf16>
    %6 = vector.extract_strided_slice %1 {offsets = [0, 0], sizes = [64, 8], strides = [1, 1]} : vector<64x32xbf16> to vector<64x8xbf16>
    %7 = vector.extract_strided_slice %3 {offsets = [0, 0], sizes = [64, 8], strides = [1, 1]} : vector<64x32xbf16> to vector<64x8xbf16>
    %8 = vector.extract_strided_slice %5 {offsets = [0, 0], sizes = [64, 8], strides = [1, 1]} : vector<64x32xbf16> to vector<64x8xbf16>
    %cst = arith.constant dense<0.000000e+00> : vector<64x64xf32>
    %9 = tpu.matmul %6, %7, %cst {dimension_numbers = #tpu.dot_dimension_numbers<[1], [1], [0], [0], [0, 0, 1, 0], [], []>} : vector<64x8xbf16>, vector<64x8xbf16>, vector<64x64xf32> -> vector<64x64xf32>
    %cst_8 = arith.constant 0.353553385 : f32
    %10 = vector.broadcast %cst_8 : f32 to vector<64x64xf32>
    %11 = arith.mulf %9, %10 : vector<64x64xf32>
    %cst_9 = arith.constant dense<0xFF800000> : vector<64xf32>
    %12 = vector.multi_reduction <maximumf>, %11, %cst_9 [1] : vector<64x64xf32> to vector<64xf32>
    %13 = vector.shape_cast %12 : vector<64xf32> to vector<64x1xf32>
    %14 = vector.broadcast %13 : vector<64x1xf32> to vector<64x64xf32>
    %15 = arith.subf %11, %14 : vector<64x64xf32>
    %16 = math.exp %15 : vector<64x64xf32>
    %cst_10 = arith.constant dense<0.000000e+00> : vector<64xf32>
    %17 = vector.multi_reduction <add>, %16, %cst_10 [1] : vector<64x64xf32> to vector<64xf32>
    %18 = vector.shape_cast %17 : vector<64xf32> to vector<64x1xf32>
    %19 = tpu.reciprocal %18 {approx = true} : vector<64x1xf32> -> vector<64x1xf32>
    %20 = vector.broadcast %19 : vector<64x1xf32> to vector<64x64xf32>
    %21 = arith.mulf %16, %20 : vector<64x64xf32>
    %22 = arith.truncf %21 : vector<64x64xf32> to vector<64x64xbf16>
    %cst_11 = arith.constant dense<0.000000e+00> : vector<64x8xf32>
    %23 = tpu.matmul %22, %8, %cst_11 {dimension_numbers = #tpu.dot_dimension_numbers<[1], [0], [0], [1], [0, 0, 1, 1], [], []>} : vector<64x64xbf16>, vector<64x8xbf16>, vector<64x8xf32> -> vector<64x8xf32>
    %24 = arith.truncf %23 : vector<64x8xf32> to vector<64x8xbf16>
    %c0_12 = arith.constant 0 : index
    %c0_13 = arith.constant 0 : index
    %c0_14 = arith.constant 0 : index
    %25 = vector.load %arg5[%c0_12, %c0_13, %c0_14] : memref<1x64x32xbf16, #tpu.memory_space<vmem>>, vector<1x64x8xbf16>
    %26 = vector.shape_cast %25 : vector<1x64x8xbf16> to vector<64x8xbf16>
    %27 = vector.shape_cast %24 : vector<64x8xbf16> to vector<1x64x8xbf16>
    tpu.vector_store %arg5[%c0_12, %c0_13, %c0_14], %27 {strides = array<i32>} : memref<1x64x32xbf16, #tpu.memory_space<vmem>>, vector<1x64x8xbf16>,
    %28 = vector.extract_strided_slice %1 {offsets = [0, 8], sizes = [64, 8], strides = [1, 1]} : vector<64x32xbf16> to vector<64x8xbf16>
    %29 = vector.extract_strided_slice %3 {offsets = [0, 8], sizes = [64, 8], strides = [1, 1]} : vector<64x32xbf16> to vector<64x8xbf16>
    %30 = vector.extract_strided_slice %5 {offsets = [0, 8], sizes = [64, 8], strides = [1, 1]} : vector<64x32xbf16> to vector<64x8xbf16>
    %cst_15 = arith.constant dense<0.000000e+00> : vector<64x64xf32>
    %31 = tpu.matmul %28, %29, %cst_15 {dimension_numbers = #tpu.dot_dimension_numbers<[1], [1], [0], [0], [0, 0, 1, 0], [], []>} : vector<64x8xbf16>, vector<64x8xbf16>, vector<64x64xf32> -> vector<64x64xf32>
    %cst_16 = arith.constant 0.353553385 : f32
    %32 = vector.broadcast %cst_16 : f32 to vector<64x64xf32>
    %33 = arith.mulf %31, %32 : vector<64x64xf32>
    %cst_17 = arith.constant dense<0xFF800000> : vector<64xf32>
    %34 = vector.multi_reduction <maximumf>, %33, %cst_17 [1] : vector<64x64xf32> to vector<64xf32>
    %35 = vector.shape_cast %34 : vector<64xf32> to vector<64x1xf32>
    %36 = vector.broadcast %35 : vector<64x1xf32> to vector<64x64xf32>
    %37 = arith.subf %33, %36 : vector<64x64xf32>
    %38 = math.exp %37 : vector<64x64xf32>
    %cst_18 = arith.constant dense<0.000000e+00> : vector<64xf32>
    %39 = vector.multi_reduction <add>, %38, %cst_18 [1] : vector<64x64xf32> to vector<64xf32>
    %40 = vector.shape_cast %39 : vector<64xf32> to vector<64x1xf32>
    %41 = tpu.reciprocal %40 {approx = true} : vector<64x1xf32> -> vector<64x1xf32>
    %42 = vector.broadcast %41 : vector<64x1xf32> to vector<64x64xf32>
    %43 = arith.mulf %38, %42 : vector<64x64xf32>
    %44 = arith.truncf %43 : vector<64x64xf32> to vector<64x64xbf16>
    %cst_19 = arith.constant dense<0.000000e+00> : vector<64x8xf32>
    %45 = tpu.matmul %44, %30, %cst_19 {dimension_numbers = #tpu.dot_dimension_numbers<[1], [0], [0], [1], [0, 0, 1, 1], [], []>} : vector<64x64xbf16>, vector<64x8xbf16>, vector<64x8xf32> -> vector<64x8xf32>
    %46 = arith.truncf %45 : vector<64x8xf32> to vector<64x8xbf16>
    %c0_20 = arith.constant 0 : index
    %c0_21 = arith.constant 0 : index
    %c8 = arith.constant 8 : index
    %47 = vector.load %arg5[%c0_20, %c0_21, %c8] : memref<1x64x32xbf16, #tpu.memory_space<vmem>>, vector<1x64x8xbf16>
    %48 = vector.shape_cast %47 : vector<1x64x8xbf16> to vector<64x8xbf16>
    %49 = vector.shape_cast %46 : vector<64x8xbf16> to vector<1x64x8xbf16>
    tpu.vector_store %arg5[%c0_20, %c0_21, %c8], %49 {strides = array<i32>} : memref<1x64x32xbf16, #tpu.memory_space<vmem>>, vector<1x64x8xbf16>,
    %50 = vector.extract_strided_slice %1 {offsets = [0, 16], sizes = [64, 8], strides = [1, 1]} : vector<64x32xbf16> to vector<64x8xbf16>
    %51 = vector.extract_strided_slice %3 {offsets = [0, 16], sizes = [64, 8], strides = [1, 1]} : vector<64x32xbf16> to vector<64x8xbf16>
    %52 = vector.extract_strided_slice %5 {offsets = [0, 16], sizes = [64, 8], strides = [1, 1]} : vector<64x32xbf16> to vector<64x8xbf16>
    %cst_22 = arith.constant dense<0.000000e+00> : vector<64x64xf32>
    %53 = tpu.matmul %50, %51, %cst_22 {dimension_numbers = #tpu.dot_dimension_numbers<[1], [1], [0], [0], [0, 0, 1, 0], [], []>} : vector<64x8xbf16>, vector<64x8xbf16>, vector<64x64xf32> -> vector<64x64xf32>
    %cst_23 = arith.constant 0.353553385 : f32
    %54 = vector.broadcast %cst_23 : f32 to vector<64x64xf32>
    %55 = arith.mulf %53, %54 : vector<64x64xf32>
    %cst_24 = arith.constant dense<0xFF800000> : vector<64xf32>
    %56 = vector.multi_reduction <maximumf>, %55, %cst_24 [1] : vector<64x64xf32> to vector<64xf32>
    %57 = vector.shape_cast %56 : vector<64xf32> to vector<64x1xf32>
    %58 = vector.broadcast %57 : vector<64x1xf32> to vector<64x64xf32>
    %59 = arith.subf %55, %58 : vector<64x64xf32>
    %60 = math.exp %59 : vector<64x64xf32>
    %cst_25 = arith.constant dense<0.000000e+00> : vector<64xf32>
    %61 = vector.multi_reduction <add>, %60, %cst_25 [1] : vector<64x64xf32> to vector<64xf32>
    %62 = vector.shape_cast %61 : vector<64xf32> to vector<64x1xf32>
    %63 = tpu.reciprocal %62 {approx = true} : vector<64x1xf32> -> vector<64x1xf32>
    %64 = vector.broadcast %63 : vector<64x1xf32> to vector<64x64xf32>
    %65 = arith.mulf %60, %64 : vector<64x64xf32>
    %66 = arith.truncf %65 : vector<64x64xf32> to vector<64x64xbf16>
    %cst_26 = arith.constant dense<0.000000e+00> : vector<64x8xf32>
    %67 = tpu.matmul %66, %52, %cst_26 {dimension_numbers = #tpu.dot_dimension_numbers<[1], [0], [0], [1], [0, 0, 1, 1], [], []>} : vector<64x64xbf16>, vector<64x8xbf16>, vector<64x8xf32> -> vector<64x8xf32>
    %68 = arith.truncf %67 : vector<64x8xf32> to vector<64x8xbf16>
    %c0_27 = arith.constant 0 : index
    %c0_28 = arith.constant 0 : index
    %c16 = arith.constant 16 : index
    %69 = vector.load %arg5[%c0_27, %c0_28, %c16] : memref<1x64x32xbf16, #tpu.memory_space<vmem>>, vector<1x64x8xbf16>
    %70 = vector.shape_cast %69 : vector<1x64x8xbf16> to vector<64x8xbf16>
    %71 = vector.shape_cast %68 : vector<64x8xbf16> to vector<1x64x8xbf16>
    tpu.vector_store %arg5[%c0_27, %c0_28, %c16], %71 {strides = array<i32>} : memref<1x64x32xbf16, #tpu.memory_space<vmem>>, vector<1x64x8xbf16>,
    %72 = vector.extract_strided_slice %1 {offsets = [0, 24], sizes = [64, 8], strides = [1, 1]} : vector<64x32xbf16> to vector<64x8xbf16>
    %73 = vector.extract_strided_slice %3 {offsets = [0, 24], sizes = [64, 8], strides = [1, 1]} : vector<64x32xbf16> to vector<64x8xbf16>
    %74 = vector.extract_strided_slice %5 {offsets = [0, 24], sizes = [64, 8], strides = [1, 1]} : vector<64x32xbf16> to vector<64x8xbf16>
    %cst_29 = arith.constant dense<0.000000e+00> : vector<64x64xf32>
    %75 = tpu.matmul %72, %73, %cst_29 {dimension_numbers = #tpu.dot_dimension_numbers<[1], [1], [0], [0], [0, 0, 1, 0], [], []>} : vector<64x8xbf16>, vector<64x8xbf16>, vector<64x64xf32> -> vector<64x64xf32>
    %cst_30 = arith.constant 0.353553385 : f32
    %76 = vector.broadcast %cst_30 : f32 to vector<64x64xf32>
    %77 = arith.mulf %75, %76 : vector<64x64xf32>
    %cst_31 = arith.constant dense<0xFF800000> : vector<64xf32>
    %78 = vector.multi_reduction <maximumf>, %77, %cst_31 [1] : vector<64x64xf32> to vector<64xf32>
    %79 = vector.shape_cast %78 : vector<64xf32> to vector<64x1xf32>
    %80 = vector.broadcast %79 : vector<64x1xf32> to vector<64x64xf32>
    %81 = arith.subf %77, %80 : vector<64x64xf32>
    %82 = math.exp %81 : vector<64x64xf32>
    %cst_32 = arith.constant dense<0.000000e+00> : vector<64xf32>
    %83 = vector.multi_reduction <add>, %82, %cst_32 [1] : vector<64x64xf32> to vector<64xf32>
    %84 = vector.shape_cast %83 : vector<64xf32> to vector<64x1xf32>
    %85 = tpu.reciprocal %84 {approx = true} : vector<64x1xf32> -> vector<64x1xf32>
    %86 = vector.broadcast %85 : vector<64x1xf32> to vector<64x64xf32>
    %87 = arith.mulf %82, %86 : vector<64x64xf32>
    %88 = arith.truncf %87 : vector<64x64xf32> to vector<64x64xbf16>
    %cst_33 = arith.constant dense<0.000000e+00> : vector<64x8xf32>
    %89 = tpu.matmul %88, %74, %cst_33 {dimension_numbers = #tpu.dot_dimension_numbers<[1], [0], [0], [1], [0, 0, 1, 1], [], []>} : vector<64x64xbf16>, vector<64x8xbf16>, vector<64x8xf32> -> vector<64x8xf32>
    %90 = arith.truncf %89 : vector<64x8xf32> to vector<64x8xbf16>
    %c0_34 = arith.constant 0 : index
    %c0_35 = arith.constant 0 : index
    %c24 = arith.constant 24 : index
    %91 = vector.load %arg5[%c0_34, %c0_35, %c24] : memref<1x64x32xbf16, #tpu.memory_space<vmem>>, vector<1x64x8xbf16>
    %92 = vector.shape_cast %91 : vector<1x64x8xbf16> to vector<64x8xbf16>
    %93 = vector.shape_cast %90 : vector<64x8xbf16> to vector<1x64x8xbf16>
    tpu.vector_store %arg5[%c0_34, %c0_35, %c24], %93 {strides = array<i32>} : memref<1x64x32xbf16, #tpu.memory_space<vmem>>, vector<1x64x8xbf16>,
    return
  }
  func.func @transform_0(%arg0: i32, %arg1: i32) -> (i32, i32, i32) {
    %c0_i32 = arith.constant 0 : i32
    %c0_i32_0 = arith.constant 0 : i32
    return %arg0, %arg1, %c0_i32 : i32, i32, i32
  }
  func.func @transform_1(%arg0: i32, %arg1: i32) -> (i32, i32, i32) {
    %c0_i32 = arith.constant 0 : i32
    %c0_i32_0 = arith.constant 0 : i32
    %c0_i32_1 = arith.constant 0 : i32
    return %arg0, %c0_i32, %c0_i32_0 : i32, i32, i32
  }
  func.func @transform_2(%arg0: i32, %arg1: i32) -> (i32, i32, i32) {
    %c0_i32 = arith.constant 0 : i32
    %c0_i32_0 = arith.constant 0 : i32
    %c0_i32_1 = arith.constant 0 : i32
    return %arg0, %c0_i32, %c0_i32_0 : i32, i32, i32
  }
  func.func @transform_3(%arg0: i32, %arg1: i32) -> (i32, i32, i32) {
    %c0_i32 = arith.constant 0 : i32
    %c0_i32_0 = arith.constant 0 : i32
    return %arg0, %arg1, %c0_i32 : i32, i32, i32
  }
}

module attributes {stable_mosaic.version = 11 : i64} {
  func.func @_qkv_proj_kernel(%arg0: i32, %arg1: memref<128x32xbf16, #tpu.memory_space<vmem>>, %arg2: memref<128x32xbf16, #tpu.memory_space<vmem>>, %arg3: memref<32x64xbf16, #tpu.memory_space<vmem>>, %arg4: memref<1x64xf32, #tpu.memory_space<vmem>>, %arg5: memref<32x32xbf16, #tpu.memory_space<vmem>>, %arg6: memref<1x32xf32, #tpu.memory_space<vmem>>, %arg7: memref<128x32xbf16, #tpu.memory_space<vmem>>, %arg8: memref<128x32xbf16, #tpu.memory_space<vmem>>, %arg9: memref<128x32xbf16, #tpu.memory_space<vmem>>) attributes {dimension_semantics = [#tpu.dimension_semantics<parallel>], iteration_bounds = array<i64: 1>, scalar_prefetch = 0 : i64, scratch_operands = 0 : i64, tpu.core_type = #tpu.core_type<tc>, window_params = [{transform_indices = @transform_0, window_bounds = array<i64: 128, 32>}, {transform_indices = @transform_1, window_bounds = array<i64: 128, 32>}, {pipeline_mode = #tpu.pipeline_mode<synchronous>, transform_indices = @transform_2, window_bounds = array<i64: 32, 64>}, {pipeline_mode = #tpu.pipeline_mode<synchronous>, transform_indices = @transform_3, window_bounds = array<i64: 1, 64>}, {pipeline_mode = #tpu.pipeline_mode<synchronous>, transform_indices = @transform_4, window_bounds = array<i64: 32, 32>}, {pipeline_mode = #tpu.pipeline_mode<synchronous>, transform_indices = @transform_5, window_bounds = array<i64: 1, 32>}, {transform_indices = @transform_6, window_bounds = array<i64: 128, 32>}, {transform_indices = @transform_7, window_bounds = array<i64: 128, 32>}, {transform_indices = @transform_8, window_bounds = array<i64: 128, 32>}]} {
    %c0 = arith.constant 0 : index
    %c0_0 = arith.constant 0 : index
    %0 = vector.load %arg1[%c0, %c0_0] : memref<128x32xbf16, #tpu.memory_space<vmem>>, vector<128x32xbf16>
    %c0_1 = arith.constant 0 : index
    %c0_2 = arith.constant 0 : index
    %1 = vector.load %arg1[%c0_1, %c0_2] : memref<128x32xbf16, #tpu.memory_space<vmem>>, vector<128x32xbf16>
    %c0_3 = arith.constant 0 : index
    %c0_4 = arith.constant 0 : index
    %2 = vector.load %arg2[%c0_3, %c0_4] : memref<128x32xbf16, #tpu.memory_space<vmem>>, vector<128x32xbf16>
    %3 = arith.addf %1, %2 : vector<128x32xbf16>
    %c0_5 = arith.constant 0 : index
    %c0_6 = arith.constant 0 : index
    %4 = vector.load %arg3[%c0_5, %c0_6] : memref<32x64xbf16, #tpu.memory_space<vmem>>, vector<32x64xbf16>
    %cst = arith.constant dense<0.000000e+00> : vector<128x64xf32>
    %5 = tpu.matmul %3, %4, %cst {dimension_numbers = #tpu.dot_dimension_numbers<[1], [0], [0], [1], [0, 0, 1, 1], [], []>} : vector<128x32xbf16>, vector<32x64xbf16>, vector<128x64xf32> -> vector<128x64xf32>
    %c0_7 = arith.constant 0 : index
    %c0_8 = arith.constant 0 : index
    %6 = vector.load %arg4[%c0_7, %c0_8] : memref<1x64xf32, #tpu.memory_space<vmem>>, vector<1x64xf32>
    %7 = vector.broadcast %6 : vector<1x64xf32> to vector<128x64xf32>
    %8 = arith.addf %5, %7 : vector<128x64xf32>
    %c0_9 = arith.constant 0 : index
    %c0_10 = arith.constant 0 : index
    %9 = vector.load %arg5[%c0_9, %c0_10] : memref<32x32xbf16, #tpu.memory_space<vmem>>, vector<32x32xbf16>
    %cst_11 = arith.constant dense<0.000000e+00> : vector<128x32xf32>
    %10 = tpu.matmul %0, %9, %cst_11 {dimension_numbers = #tpu.dot_dimension_numbers<[1], [0], [0], [1], [0, 0, 1, 1], [], []>} : vector<128x32xbf16>, vector<32x32xbf16>, vector<128x32xf32> -> vector<128x32xf32>
    %c0_12 = arith.constant 0 : index
    %c0_13 = arith.constant 0 : index
    %11 = vector.load %arg6[%c0_12, %c0_13] : memref<1x32xf32, #tpu.memory_space<vmem>>, vector<1x32xf32>
    %12 = vector.broadcast %11 : vector<1x32xf32> to vector<128x32xf32>
    %13 = arith.addf %10, %12 : vector<128x32xf32>
    %14 = vector.extract_strided_slice %8 {offsets = [0, 0], sizes = [128, 32], strides = [1, 1]} : vector<128x64xf32> to vector<128x32xf32>
    %15 = arith.truncf %14 : vector<128x32xf32> to vector<128x32xbf16>
    %c0_14 = arith.constant 0 : index
    %c0_15 = arith.constant 0 : index
    %16 = vector.load %arg7[%c0_14, %c0_15] : memref<128x32xbf16, #tpu.memory_space<vmem>>, vector<128x32xbf16>
    tpu.vector_store %arg7[%c0_14, %c0_15], %15 {strides = array<i32>} : memref<128x32xbf16, #tpu.memory_space<vmem>>, vector<128x32xbf16>,
    %17 = vector.extract_strided_slice %8 {offsets = [0, 32], sizes = [128, 32], strides = [1, 1]} : vector<128x64xf32> to vector<128x32xf32>
    %18 = arith.truncf %17 : vector<128x32xf32> to vector<128x32xbf16>
    %c0_16 = arith.constant 0 : index
    %c0_17 = arith.constant 0 : index
    %19 = vector.load %arg8[%c0_16, %c0_17] : memref<128x32xbf16, #tpu.memory_space<vmem>>, vector<128x32xbf16>
    tpu.vector_store %arg8[%c0_16, %c0_17], %18 {strides = array<i32>} : memref<128x32xbf16, #tpu.memory_space<vmem>>, vector<128x32xbf16>,
    %20 = arith.truncf %13 : vector<128x32xf32> to vector<128x32xbf16>
    %c0_18 = arith.constant 0 : index
    %c0_19 = arith.constant 0 : index
    %21 = vector.load %arg9[%c0_18, %c0_19] : memref<128x32xbf16, #tpu.memory_space<vmem>>, vector<128x32xbf16>
    tpu.vector_store %arg9[%c0_18, %c0_19], %20 {strides = array<i32>} : memref<128x32xbf16, #tpu.memory_space<vmem>>, vector<128x32xbf16>,
    return
  }
  func.func @transform_0(%arg0: i32) -> (i32, i32) {
    %c0_i32 = arith.constant 0 : i32
    %c0_i32_0 = arith.constant 0 : i32
    return %arg0, %c0_i32 : i32, i32
  }
  func.func @transform_1(%arg0: i32) -> (i32, i32) {
    %c0_i32 = arith.constant 0 : i32
    %c0_i32_0 = arith.constant 0 : i32
    return %arg0, %c0_i32 : i32, i32
  }
  func.func @transform_2(%arg0: i32) -> (i32, i32) {
    %c0_i32 = arith.constant 0 : i32
    %c0_i32_0 = arith.constant 0 : i32
    %c0_i32_1 = arith.constant 0 : i32
    return %c0_i32, %c0_i32_0 : i32, i32
  }
  func.func @transform_3(%arg0: i32) -> (i32, i32) {
    %c0_i32 = arith.constant 0 : i32
    %c0_i32_0 = arith.constant 0 : i32
    %c0_i32_1 = arith.constant 0 : i32
    return %c0_i32, %c0_i32_0 : i32, i32
  }
  func.func @transform_4(%arg0: i32) -> (i32, i32) {
    %c0_i32 = arith.constant 0 : i32
    %c0_i32_0 = arith.constant 0 : i32
    %c0_i32_1 = arith.constant 0 : i32
    return %c0_i32, %c0_i32_0 : i32, i32
  }
  func.func @transform_5(%arg0: i32) -> (i32, i32) {
    %c0_i32 = arith.constant 0 : i32
    %c0_i32_0 = arith.constant 0 : i32
    %c0_i32_1 = arith.constant 0 : i32
    return %c0_i32, %c0_i32_0 : i32, i32
  }
  func.func @transform_6(%arg0: i32) -> (i32, i32) {
    %c0_i32 = arith.constant 0 : i32
    %c0_i32_0 = arith.constant 0 : i32
    return %arg0, %c0_i32 : i32, i32
  }
  func.func @transform_7(%arg0: i32) -> (i32, i32) {
    %c0_i32 = arith.constant 0 : i32
    %c0_i32_0 = arith.constant 0 : i32
    return %arg0, %c0_i32 : i32, i32
  }
  func.func @transform_8(%arg0: i32) -> (i32, i32) {
    %c0_i32 = arith.constant 0 : i32
    %c0_i32_0 = arith.constant 0 : i32
    return %arg0, %c0_i32 : i32, i32
  }
}

module attributes {stable_mosaic.version = 11 : i64} {
  func.func @_linear_kernel(%arg0: i32, %arg1: memref<128x32xbf16, #tpu.memory_space<vmem>>, %arg2: memref<32x32xbf16, #tpu.memory_space<vmem>>, %arg3: memref<1x32xf32, #tpu.memory_space<vmem>>, %arg4: memref<128x32xbf16, #tpu.memory_space<vmem>>) attributes {dimension_semantics = [#tpu.dimension_semantics<parallel>], iteration_bounds = array<i64: 1>, scalar_prefetch = 0 : i64, scratch_operands = 0 : i64, tpu.core_type = #tpu.core_type<tc>, window_params = [{transform_indices = @transform_0, window_bounds = array<i64: 128, 32>}, {pipeline_mode = #tpu.pipeline_mode<synchronous>, transform_indices = @transform_1, window_bounds = array<i64: 32, 32>}, {pipeline_mode = #tpu.pipeline_mode<synchronous>, transform_indices = @transform_2, window_bounds = array<i64: 1, 32>}, {transform_indices = @transform_3, window_bounds = array<i64: 128, 32>}]} {
    %c0 = arith.constant 0 : index
    %c0_0 = arith.constant 0 : index
    %0 = vector.load %arg1[%c0, %c0_0] : memref<128x32xbf16, #tpu.memory_space<vmem>>, vector<128x32xbf16>
    %c0_1 = arith.constant 0 : index
    %c0_2 = arith.constant 0 : index
    %1 = vector.load %arg2[%c0_1, %c0_2] : memref<32x32xbf16, #tpu.memory_space<vmem>>, vector<32x32xbf16>
    %cst = arith.constant dense<0.000000e+00> : vector<128x32xf32>
    %2 = tpu.matmul %0, %1, %cst {dimension_numbers = #tpu.dot_dimension_numbers<[1], [0], [0], [1], [0, 0, 1, 1], [], []>} : vector<128x32xbf16>, vector<32x32xbf16>, vector<128x32xf32> -> vector<128x32xf32>
    %c0_3 = arith.constant 0 : index
    %c0_4 = arith.constant 0 : index
    %3 = vector.load %arg3[%c0_3, %c0_4] : memref<1x32xf32, #tpu.memory_space<vmem>>, vector<1x32xf32>
    %4 = vector.broadcast %3 : vector<1x32xf32> to vector<128x32xf32>
    %5 = arith.addf %2, %4 : vector<128x32xf32>
    %6 = arith.truncf %5 : vector<128x32xf32> to vector<128x32xbf16>
    %c0_5 = arith.constant 0 : index
    %c0_6 = arith.constant 0 : index
    %7 = vector.load %arg4[%c0_5, %c0_6] : memref<128x32xbf16, #tpu.memory_space<vmem>>, vector<128x32xbf16>
    tpu.vector_store %arg4[%c0_5, %c0_6], %6 {strides = array<i32>} : memref<128x32xbf16, #tpu.memory_space<vmem>>, vector<128x32xbf16>,
    return
  }
  func.func @transform_0(%arg0: i32) -> (i32, i32) {
    %c0_i32 = arith.constant 0 : i32
    %c0_i32_0 = arith.constant 0 : i32
    return %arg0, %c0_i32 : i32, i32
  }
  func.func @transform_1(%arg0: i32) -> (i32, i32) {
    %c0_i32 = arith.constant 0 : i32
    %c0_i32_0 = arith.constant 0 : i32
    %c0_i32_1 = arith.constant 0 : i32
    return %c0_i32, %c0_i32_0 : i32, i32
  }
  func.func @transform_2(%arg0: i32) -> (i32, i32) {
    %c0_i32 = arith.constant 0 : i32
    %c0_i32_0 = arith.constant 0 : i32
    %c0_i32_1 = arith.constant 0 : i32
    return %c0_i32, %c0_i32_0 : i32, i32
  }
  func.func @transform_3(%arg0: i32) -> (i32, i32) {
    %c0_i32 = arith.constant 0 : i32
    %c0_i32_0 = arith.constant 0 : i32
    return %arg0, %c0_i32 : i32, i32
  }
}

module attributes {stable_mosaic.version = 11 : i64} {
  func.func @_add_layernorm_kernel(%arg0: i32, %arg1: memref<128x32xbf16, #tpu.memory_space<vmem>>, %arg2: memref<128x32xbf16, #tpu.memory_space<vmem>>, %arg3: memref<1x32xf32, #tpu.memory_space<vmem>>, %arg4: memref<1x32xf32, #tpu.memory_space<vmem>>, %arg5: memref<128x32xbf16, #tpu.memory_space<vmem>>) attributes {dimension_semantics = [#tpu.dimension_semantics<parallel>], iteration_bounds = array<i64: 1>, scalar_prefetch = 0 : i64, scratch_operands = 0 : i64, tpu.core_type = #tpu.core_type<tc>, window_params = [{transform_indices = @transform_0, window_bounds = array<i64: 128, 32>}, {transform_indices = @transform_1, window_bounds = array<i64: 128, 32>}, {pipeline_mode = #tpu.pipeline_mode<synchronous>, transform_indices = @transform_2, window_bounds = array<i64: 1, 32>}, {pipeline_mode = #tpu.pipeline_mode<synchronous>, transform_indices = @transform_3, window_bounds = array<i64: 1, 32>}, {transform_indices = @transform_4, window_bounds = array<i64: 128, 32>}]} {
    %c0 = arith.constant 0 : index
    %c0_0 = arith.constant 0 : index
    %0 = vector.load %arg1[%c0, %c0_0] : memref<128x32xbf16, #tpu.memory_space<vmem>>, vector<128x32xbf16>
    %1 = arith.extf %0 : vector<128x32xbf16> to vector<128x32xf32>
    %c0_1 = arith.constant 0 : index
    %c0_2 = arith.constant 0 : index
    %2 = vector.load %arg2[%c0_1, %c0_2] : memref<128x32xbf16, #tpu.memory_space<vmem>>, vector<128x32xbf16>
    %3 = arith.extf %2 : vector<128x32xbf16> to vector<128x32xf32>
    %4 = arith.addf %1, %3 : vector<128x32xf32>
    %cst = arith.constant dense<0.000000e+00> : vector<128xf32>
    %5 = vector.multi_reduction <add>, %4, %cst [1] : vector<128x32xf32> to vector<128xf32>
    %6 = vector.shape_cast %5 : vector<128xf32> to vector<128x1xf32>
    %cst_3 = arith.constant 3.200000e+01 : f32
    %7 = vector.broadcast %cst_3 : f32 to vector<128x1xf32>
    %8 = arith.divf %6, %7 : vector<128x1xf32>
    %9 = vector.broadcast %8 : vector<128x1xf32> to vector<128x32xf32>
    %10 = arith.subf %4, %9 : vector<128x32xf32>
    %11 = arith.mulf %10, %10 : vector<128x32xf32>
    %cst_4 = arith.constant dense<0.000000e+00> : vector<128xf32>
    %12 = vector.multi_reduction <add>, %11, %cst_4 [1] : vector<128x32xf32> to vector<128xf32>
    %13 = vector.shape_cast %12 : vector<128xf32> to vector<128x1xf32>
    %cst_5 = arith.constant 3.200000e+01 : f32
    %14 = vector.broadcast %cst_5 : f32 to vector<128x1xf32>
    %15 = arith.divf %13, %14 : vector<128x1xf32>
    %cst_6 = arith.constant 9.99999974E-6 : f32
    %16 = vector.broadcast %cst_6 : f32 to vector<128x1xf32>
    %17 = arith.addf %15, %16 : vector<128x1xf32>
    %18 = math.rsqrt %17 : vector<128x1xf32>
    %19 = vector.broadcast %18 : vector<128x1xf32> to vector<128x32xf32>
    %20 = arith.mulf %10, %19 : vector<128x32xf32>
    %c0_7 = arith.constant 0 : index
    %c0_8 = arith.constant 0 : index
    %21 = vector.load %arg3[%c0_7, %c0_8] : memref<1x32xf32, #tpu.memory_space<vmem>>, vector<1x32xf32>
    %22 = vector.broadcast %21 : vector<1x32xf32> to vector<128x32xf32>
    %23 = arith.mulf %20, %22 : vector<128x32xf32>
    %c0_9 = arith.constant 0 : index
    %c0_10 = arith.constant 0 : index
    %24 = vector.load %arg4[%c0_9, %c0_10] : memref<1x32xf32, #tpu.memory_space<vmem>>, vector<1x32xf32>
    %25 = vector.broadcast %24 : vector<1x32xf32> to vector<128x32xf32>
    %26 = arith.addf %23, %25 : vector<128x32xf32>
    %27 = arith.truncf %26 : vector<128x32xf32> to vector<128x32xbf16>
    %c0_11 = arith.constant 0 : index
    %c0_12 = arith.constant 0 : index
    %28 = vector.load %arg5[%c0_11, %c0_12] : memref<128x32xbf16, #tpu.memory_space<vmem>>, vector<128x32xbf16>
    tpu.vector_store %arg5[%c0_11, %c0_12], %27 {strides = array<i32>} : memref<128x32xbf16, #tpu.memory_space<vmem>>, vector<128x32xbf16>,
    return
  }
  func.func @transform_0(%arg0: i32) -> (i32, i32) {
    %c0_i32 = arith.constant 0 : i32
    %c0_i32_0 = arith.constant 0 : i32
    return %arg0, %c0_i32 : i32, i32
  }
  func.func @transform_1(%arg0: i32) -> (i32, i32) {
    %c0_i32 = arith.constant 0 : i32
    %c0_i32_0 = arith.constant 0 : i32
    return %arg0, %c0_i32 : i32, i32
  }
  func.func @transform_2(%arg0: i32) -> (i32, i32) {
    %c0_i32 = arith.constant 0 : i32
    %c0_i32_0 = arith.constant 0 : i32
    %c0_i32_1 = arith.constant 0 : i32
    return %c0_i32, %c0_i32_0 : i32, i32
  }
  func.func @transform_3(%arg0: i32) -> (i32, i32) {
    %c0_i32 = arith.constant 0 : i32
    %c0_i32_0 = arith.constant 0 : i32
    %c0_i32_1 = arith.constant 0 : i32
    return %c0_i32, %c0_i32_0 : i32, i32
  }
  func.func @transform_4(%arg0: i32) -> (i32, i32) {
    %c0_i32 = arith.constant 0 : i32
    %c0_i32_0 = arith.constant 0 : i32
    return %arg0, %c0_i32 : i32, i32
  }
}

module attributes {stable_mosaic.version = 11 : i64} {
  func.func @_mlp_kernel(%arg0: i32, %arg1: memref<128x32xbf16, #tpu.memory_space<vmem>>, %arg2: memref<32x64xbf16, #tpu.memory_space<vmem>>, %arg3: memref<1x64xf32, #tpu.memory_space<vmem>>, %arg4: memref<64x32xbf16, #tpu.memory_space<vmem>>, %arg5: memref<1x32xf32, #tpu.memory_space<vmem>>, %arg6: memref<128x32xbf16, #tpu.memory_space<vmem>>) attributes {dimension_semantics = [#tpu.dimension_semantics<parallel>], iteration_bounds = array<i64: 1>, scalar_prefetch = 0 : i64, scratch_operands = 0 : i64, tpu.core_type = #tpu.core_type<tc>, window_params = [{transform_indices = @transform_0, window_bounds = array<i64: 128, 32>}, {pipeline_mode = #tpu.pipeline_mode<synchronous>, transform_indices = @transform_1, window_bounds = array<i64: 32, 64>}, {pipeline_mode = #tpu.pipeline_mode<synchronous>, transform_indices = @transform_2, window_bounds = array<i64: 1, 64>}, {pipeline_mode = #tpu.pipeline_mode<synchronous>, transform_indices = @transform_3, window_bounds = array<i64: 64, 32>}, {pipeline_mode = #tpu.pipeline_mode<synchronous>, transform_indices = @transform_4, window_bounds = array<i64: 1, 32>}, {transform_indices = @transform_5, window_bounds = array<i64: 128, 32>}]} {
    %c0 = arith.constant 0 : index
    %c0_0 = arith.constant 0 : index
    %0 = vector.load %arg1[%c0, %c0_0] : memref<128x32xbf16, #tpu.memory_space<vmem>>, vector<128x32xbf16>
    %c0_1 = arith.constant 0 : index
    %c0_2 = arith.constant 0 : index
    %1 = vector.load %arg2[%c0_1, %c0_2] : memref<32x64xbf16, #tpu.memory_space<vmem>>, vector<32x64xbf16>
    %cst = arith.constant dense<0.000000e+00> : vector<128x64xf32>
    %2 = tpu.matmul %0, %1, %cst {dimension_numbers = #tpu.dot_dimension_numbers<[1], [0], [0], [1], [0, 0, 1, 1], [], []>} : vector<128x32xbf16>, vector<32x64xbf16>, vector<128x64xf32> -> vector<128x64xf32>
    %c0_3 = arith.constant 0 : index
    %c0_4 = arith.constant 0 : index
    %3 = vector.load %arg3[%c0_3, %c0_4] : memref<1x64xf32, #tpu.memory_space<vmem>>, vector<1x64xf32>
    %4 = vector.broadcast %3 : vector<1x64xf32> to vector<128x64xf32>
    %5 = arith.addf %2, %4 : vector<128x64xf32>
    %cst_5 = arith.constant 0.000000e+00 : f32
    %6 = vector.broadcast %cst_5 : f32 to vector<128x64xf32>
    %7 = arith.maximumf %5, %6 : vector<128x64xf32>
    %8 = arith.truncf %7 : vector<128x64xf32> to vector<128x64xbf16>
    %c0_6 = arith.constant 0 : index
    %c0_7 = arith.constant 0 : index
    %9 = vector.load %arg4[%c0_6, %c0_7] : memref<64x32xbf16, #tpu.memory_space<vmem>>, vector<64x32xbf16>
    %cst_8 = arith.constant dense<0.000000e+00> : vector<128x32xf32>
    %10 = tpu.matmul %8, %9, %cst_8 {dimension_numbers = #tpu.dot_dimension_numbers<[1], [0], [0], [1], [0, 0, 1, 1], [], []>} : vector<128x64xbf16>, vector<64x32xbf16>, vector<128x32xf32> -> vector<128x32xf32>
    %c0_9 = arith.constant 0 : index
    %c0_10 = arith.constant 0 : index
    %11 = vector.load %arg5[%c0_9, %c0_10] : memref<1x32xf32, #tpu.memory_space<vmem>>, vector<1x32xf32>
    %12 = vector.broadcast %11 : vector<1x32xf32> to vector<128x32xf32>
    %13 = arith.addf %10, %12 : vector<128x32xf32>
    %14 = arith.truncf %13 : vector<128x32xf32> to vector<128x32xbf16>
    %c0_11 = arith.constant 0 : index
    %c0_12 = arith.constant 0 : index
    %15 = vector.load %arg6[%c0_11, %c0_12] : memref<128x32xbf16, #tpu.memory_space<vmem>>, vector<128x32xbf16>
    tpu.vector_store %arg6[%c0_11, %c0_12], %14 {strides = array<i32>} : memref<128x32xbf16, #tpu.memory_space<vmem>>, vector<128x32xbf16>,
    return
  }
  func.func @transform_0(%arg0: i32) -> (i32, i32) {
    %c0_i32 = arith.constant 0 : i32
    %c0_i32_0 = arith.constant 0 : i32
    return %arg0, %c0_i32 : i32, i32
  }
  func.func @transform_1(%arg0: i32) -> (i32, i32) {
    %c0_i32 = arith.constant 0 : i32
    %c0_i32_0 = arith.constant 0 : i32
    %c0_i32_1 = arith.constant 0 : i32
    return %c0_i32, %c0_i32_0 : i32, i32
  }
  func.func @transform_2(%arg0: i32) -> (i32, i32) {
    %c0_i32 = arith.constant 0 : i32
    %c0_i32_0 = arith.constant 0 : i32
    %c0_i32_1 = arith.constant 0 : i32
    return %c0_i32, %c0_i32_0 : i32, i32
  }
  func.func @transform_3(%arg0: i32) -> (i32, i32) {
    %c0_i32 = arith.constant 0 : i32
    %c0_i32_0 = arith.constant 0 : i32
    %c0_i32_1 = arith.constant 0 : i32
    return %c0_i32, %c0_i32_0 : i32, i32
  }
  func.func @transform_4(%arg0: i32) -> (i32, i32) {
    %c0_i32 = arith.constant 0 : i32
    %c0_i32_0 = arith.constant 0 : i32
    %c0_i32_1 = arith.constant 0 : i32
    return %c0_i32, %c0_i32_0 : i32, i32
  }
  func.func @transform_5(%arg0: i32) -> (i32, i32) {
    %c0_i32 = arith.constant 0 : i32
    %c0_i32_0 = arith.constant 0 : i32
    return %arg0, %c0_i32 : i32, i32
  }
}

module attributes {stable_mosaic.version = 11 : i64} {
  func.func @_mha_kernel(%arg0: i32, %arg1: i32, %arg2: memref<1x8x32xbf16, #tpu.memory_space<vmem>>, %arg3: memref<1x64x32xbf16, #tpu.memory_space<vmem>>, %arg4: memref<1x64x32xbf16, #tpu.memory_space<vmem>>, %arg5: memref<1x8x32xbf16, #tpu.memory_space<vmem>>) attributes {dimension_semantics = [#tpu.dimension_semantics<parallel>, #tpu.dimension_semantics<parallel>], iteration_bounds = array<i64: 2, 1>, scalar_prefetch = 0 : i64, scratch_operands = 0 : i64, tpu.core_type = #tpu.core_type<tc>, window_params = [{transform_indices = @transform_0, window_bounds = array<i64: 1, 8, 32>}, {transform_indices = @transform_1, window_bounds = array<i64: 1, 64, 32>}, {transform_indices = @transform_2, window_bounds = array<i64: 1, 64, 32>}, {transform_indices = @transform_3, window_bounds = array<i64: 1, 8, 32>}]} {
    %c0 = arith.constant 0 : index
    %c0_0 = arith.constant 0 : index
    %c0_1 = arith.constant 0 : index
    %0 = vector.load %arg2[%c0, %c0_0, %c0_1] : memref<1x8x32xbf16, #tpu.memory_space<vmem>>, vector<1x8x32xbf16>
    %1 = vector.shape_cast %0 : vector<1x8x32xbf16> to vector<8x32xbf16>
    %c0_2 = arith.constant 0 : index
    %c0_3 = arith.constant 0 : index
    %c0_4 = arith.constant 0 : index
    %2 = vector.load %arg3[%c0_2, %c0_3, %c0_4] : memref<1x64x32xbf16, #tpu.memory_space<vmem>>, vector<1x64x32xbf16>
    %3 = vector.shape_cast %2 : vector<1x64x32xbf16> to vector<64x32xbf16>
    %c0_5 = arith.constant 0 : index
    %c0_6 = arith.constant 0 : index
    %c0_7 = arith.constant 0 : index
    %4 = vector.load %arg4[%c0_5, %c0_6, %c0_7] : memref<1x64x32xbf16, #tpu.memory_space<vmem>>, vector<1x64x32xbf16>
    %5 = vector.shape_cast %4 : vector<1x64x32xbf16> to vector<64x32xbf16>
    %6 = vector.extract_strided_slice %1 {offsets = [0, 0], sizes = [8, 8], strides = [1, 1]} : vector<8x32xbf16> to vector<8x8xbf16>
    %7 = vector.extract_strided_slice %3 {offsets = [0, 0], sizes = [64, 8], strides = [1, 1]} : vector<64x32xbf16> to vector<64x8xbf16>
    %8 = vector.extract_strided_slice %5 {offsets = [0, 0], sizes = [64, 8], strides = [1, 1]} : vector<64x32xbf16> to vector<64x8xbf16>
    %cst = arith.constant dense<0.000000e+00> : vector<8x64xf32>
    %9 = tpu.matmul %6, %7, %cst {dimension_numbers = #tpu.dot_dimension_numbers<[1], [1], [0], [0], [0, 0, 1, 0], [], []>} : vector<8x8xbf16>, vector<64x8xbf16>, vector<8x64xf32> -> vector<8x64xf32>
    %cst_8 = arith.constant 0.353553385 : f32
    %10 = vector.broadcast %cst_8 : f32 to vector<8x64xf32>
    %11 = arith.mulf %9, %10 : vector<8x64xf32>
    %cst_9 = arith.constant dense<0xFF800000> : vector<8xf32>
    %12 = vector.multi_reduction <maximumf>, %11, %cst_9 [1] : vector<8x64xf32> to vector<8xf32>
    %13 = vector.shape_cast %12 : vector<8xf32> to vector<8x1xf32>
    %14 = vector.broadcast %13 : vector<8x1xf32> to vector<8x64xf32>
    %15 = arith.subf %11, %14 : vector<8x64xf32>
    %16 = math.exp %15 : vector<8x64xf32>
    %cst_10 = arith.constant dense<0.000000e+00> : vector<8xf32>
    %17 = vector.multi_reduction <add>, %16, %cst_10 [1] : vector<8x64xf32> to vector<8xf32>
    %18 = vector.shape_cast %17 : vector<8xf32> to vector<8x1xf32>
    %19 = tpu.reciprocal %18 {approx = true} : vector<8x1xf32> -> vector<8x1xf32>
    %20 = vector.broadcast %19 : vector<8x1xf32> to vector<8x64xf32>
    %21 = arith.mulf %16, %20 : vector<8x64xf32>
    %22 = arith.truncf %21 : vector<8x64xf32> to vector<8x64xbf16>
    %cst_11 = arith.constant dense<0.000000e+00> : vector<8x8xf32>
    %23 = tpu.matmul %22, %8, %cst_11 {dimension_numbers = #tpu.dot_dimension_numbers<[1], [0], [0], [1], [0, 0, 1, 1], [], []>} : vector<8x64xbf16>, vector<64x8xbf16>, vector<8x8xf32> -> vector<8x8xf32>
    %24 = arith.truncf %23 : vector<8x8xf32> to vector<8x8xbf16>
    %c0_12 = arith.constant 0 : index
    %c0_13 = arith.constant 0 : index
    %c0_14 = arith.constant 0 : index
    %25 = vector.load %arg5[%c0_12, %c0_13, %c0_14] : memref<1x8x32xbf16, #tpu.memory_space<vmem>>, vector<1x8x8xbf16>
    %26 = vector.shape_cast %25 : vector<1x8x8xbf16> to vector<8x8xbf16>
    %27 = vector.shape_cast %24 : vector<8x8xbf16> to vector<1x8x8xbf16>
    tpu.vector_store %arg5[%c0_12, %c0_13, %c0_14], %27 {strides = array<i32>} : memref<1x8x32xbf16, #tpu.memory_space<vmem>>, vector<1x8x8xbf16>,
    %28 = vector.extract_strided_slice %1 {offsets = [0, 8], sizes = [8, 8], strides = [1, 1]} : vector<8x32xbf16> to vector<8x8xbf16>
    %29 = vector.extract_strided_slice %3 {offsets = [0, 8], sizes = [64, 8], strides = [1, 1]} : vector<64x32xbf16> to vector<64x8xbf16>
    %30 = vector.extract_strided_slice %5 {offsets = [0, 8], sizes = [64, 8], strides = [1, 1]} : vector<64x32xbf16> to vector<64x8xbf16>
    %cst_15 = arith.constant dense<0.000000e+00> : vector<8x64xf32>
    %31 = tpu.matmul %28, %29, %cst_15 {dimension_numbers = #tpu.dot_dimension_numbers<[1], [1], [0], [0], [0, 0, 1, 0], [], []>} : vector<8x8xbf16>, vector<64x8xbf16>, vector<8x64xf32> -> vector<8x64xf32>
    %cst_16 = arith.constant 0.353553385 : f32
    %32 = vector.broadcast %cst_16 : f32 to vector<8x64xf32>
    %33 = arith.mulf %31, %32 : vector<8x64xf32>
    %cst_17 = arith.constant dense<0xFF800000> : vector<8xf32>
    %34 = vector.multi_reduction <maximumf>, %33, %cst_17 [1] : vector<8x64xf32> to vector<8xf32>
    %35 = vector.shape_cast %34 : vector<8xf32> to vector<8x1xf32>
    %36 = vector.broadcast %35 : vector<8x1xf32> to vector<8x64xf32>
    %37 = arith.subf %33, %36 : vector<8x64xf32>
    %38 = math.exp %37 : vector<8x64xf32>
    %cst_18 = arith.constant dense<0.000000e+00> : vector<8xf32>
    %39 = vector.multi_reduction <add>, %38, %cst_18 [1] : vector<8x64xf32> to vector<8xf32>
    %40 = vector.shape_cast %39 : vector<8xf32> to vector<8x1xf32>
    %41 = tpu.reciprocal %40 {approx = true} : vector<8x1xf32> -> vector<8x1xf32>
    %42 = vector.broadcast %41 : vector<8x1xf32> to vector<8x64xf32>
    %43 = arith.mulf %38, %42 : vector<8x64xf32>
    %44 = arith.truncf %43 : vector<8x64xf32> to vector<8x64xbf16>
    %cst_19 = arith.constant dense<0.000000e+00> : vector<8x8xf32>
    %45 = tpu.matmul %44, %30, %cst_19 {dimension_numbers = #tpu.dot_dimension_numbers<[1], [0], [0], [1], [0, 0, 1, 1], [], []>} : vector<8x64xbf16>, vector<64x8xbf16>, vector<8x8xf32> -> vector<8x8xf32>
    %46 = arith.truncf %45 : vector<8x8xf32> to vector<8x8xbf16>
    %c0_20 = arith.constant 0 : index
    %c0_21 = arith.constant 0 : index
    %c8 = arith.constant 8 : index
    %47 = vector.load %arg5[%c0_20, %c0_21, %c8] : memref<1x8x32xbf16, #tpu.memory_space<vmem>>, vector<1x8x8xbf16>
    %48 = vector.shape_cast %47 : vector<1x8x8xbf16> to vector<8x8xbf16>
    %49 = vector.shape_cast %46 : vector<8x8xbf16> to vector<1x8x8xbf16>
    tpu.vector_store %arg5[%c0_20, %c0_21, %c8], %49 {strides = array<i32>} : memref<1x8x32xbf16, #tpu.memory_space<vmem>>, vector<1x8x8xbf16>,
    %50 = vector.extract_strided_slice %1 {offsets = [0, 16], sizes = [8, 8], strides = [1, 1]} : vector<8x32xbf16> to vector<8x8xbf16>
    %51 = vector.extract_strided_slice %3 {offsets = [0, 16], sizes = [64, 8], strides = [1, 1]} : vector<64x32xbf16> to vector<64x8xbf16>
    %52 = vector.extract_strided_slice %5 {offsets = [0, 16], sizes = [64, 8], strides = [1, 1]} : vector<64x32xbf16> to vector<64x8xbf16>
    %cst_22 = arith.constant dense<0.000000e+00> : vector<8x64xf32>
    %53 = tpu.matmul %50, %51, %cst_22 {dimension_numbers = #tpu.dot_dimension_numbers<[1], [1], [0], [0], [0, 0, 1, 0], [], []>} : vector<8x8xbf16>, vector<64x8xbf16>, vector<8x64xf32> -> vector<8x64xf32>
    %cst_23 = arith.constant 0.353553385 : f32
    %54 = vector.broadcast %cst_23 : f32 to vector<8x64xf32>
    %55 = arith.mulf %53, %54 : vector<8x64xf32>
    %cst_24 = arith.constant dense<0xFF800000> : vector<8xf32>
    %56 = vector.multi_reduction <maximumf>, %55, %cst_24 [1] : vector<8x64xf32> to vector<8xf32>
    %57 = vector.shape_cast %56 : vector<8xf32> to vector<8x1xf32>
    %58 = vector.broadcast %57 : vector<8x1xf32> to vector<8x64xf32>
    %59 = arith.subf %55, %58 : vector<8x64xf32>
    %60 = math.exp %59 : vector<8x64xf32>
    %cst_25 = arith.constant dense<0.000000e+00> : vector<8xf32>
    %61 = vector.multi_reduction <add>, %60, %cst_25 [1] : vector<8x64xf32> to vector<8xf32>
    %62 = vector.shape_cast %61 : vector<8xf32> to vector<8x1xf32>
    %63 = tpu.reciprocal %62 {approx = true} : vector<8x1xf32> -> vector<8x1xf32>
    %64 = vector.broadcast %63 : vector<8x1xf32> to vector<8x64xf32>
    %65 = arith.mulf %60, %64 : vector<8x64xf32>
    %66 = arith.truncf %65 : vector<8x64xf32> to vector<8x64xbf16>
    %cst_26 = arith.constant dense<0.000000e+00> : vector<8x8xf32>
    %67 = tpu.matmul %66, %52, %cst_26 {dimension_numbers = #tpu.dot_dimension_numbers<[1], [0], [0], [1], [0, 0, 1, 1], [], []>} : vector<8x64xbf16>, vector<64x8xbf16>, vector<8x8xf32> -> vector<8x8xf32>
    %68 = arith.truncf %67 : vector<8x8xf32> to vector<8x8xbf16>
    %c0_27 = arith.constant 0 : index
    %c0_28 = arith.constant 0 : index
    %c16 = arith.constant 16 : index
    %69 = vector.load %arg5[%c0_27, %c0_28, %c16] : memref<1x8x32xbf16, #tpu.memory_space<vmem>>, vector<1x8x8xbf16>
    %70 = vector.shape_cast %69 : vector<1x8x8xbf16> to vector<8x8xbf16>
    %71 = vector.shape_cast %68 : vector<8x8xbf16> to vector<1x8x8xbf16>
    tpu.vector_store %arg5[%c0_27, %c0_28, %c16], %71 {strides = array<i32>} : memref<1x8x32xbf16, #tpu.memory_space<vmem>>, vector<1x8x8xbf16>,
    %72 = vector.extract_strided_slice %1 {offsets = [0, 24], sizes = [8, 8], strides = [1, 1]} : vector<8x32xbf16> to vector<8x8xbf16>
    %73 = vector.extract_strided_slice %3 {offsets = [0, 24], sizes = [64, 8], strides = [1, 1]} : vector<64x32xbf16> to vector<64x8xbf16>
    %74 = vector.extract_strided_slice %5 {offsets = [0, 24], sizes = [64, 8], strides = [1, 1]} : vector<64x32xbf16> to vector<64x8xbf16>
    %cst_29 = arith.constant dense<0.000000e+00> : vector<8x64xf32>
    %75 = tpu.matmul %72, %73, %cst_29 {dimension_numbers = #tpu.dot_dimension_numbers<[1], [1], [0], [0], [0, 0, 1, 0], [], []>} : vector<8x8xbf16>, vector<64x8xbf16>, vector<8x64xf32> -> vector<8x64xf32>
    %cst_30 = arith.constant 0.353553385 : f32
    %76 = vector.broadcast %cst_30 : f32 to vector<8x64xf32>
    %77 = arith.mulf %75, %76 : vector<8x64xf32>
    %cst_31 = arith.constant dense<0xFF800000> : vector<8xf32>
    %78 = vector.multi_reduction <maximumf>, %77, %cst_31 [1] : vector<8x64xf32> to vector<8xf32>
    %79 = vector.shape_cast %78 : vector<8xf32> to vector<8x1xf32>
    %80 = vector.broadcast %79 : vector<8x1xf32> to vector<8x64xf32>
    %81 = arith.subf %77, %80 : vector<8x64xf32>
    %82 = math.exp %81 : vector<8x64xf32>
    %cst_32 = arith.constant dense<0.000000e+00> : vector<8xf32>
    %83 = vector.multi_reduction <add>, %82, %cst_32 [1] : vector<8x64xf32> to vector<8xf32>
    %84 = vector.shape_cast %83 : vector<8xf32> to vector<8x1xf32>
    %85 = tpu.reciprocal %84 {approx = true} : vector<8x1xf32> -> vector<8x1xf32>
    %86 = vector.broadcast %85 : vector<8x1xf32> to vector<8x64xf32>
    %87 = arith.mulf %82, %86 : vector<8x64xf32>
    %88 = arith.truncf %87 : vector<8x64xf32> to vector<8x64xbf16>
    %cst_33 = arith.constant dense<0.000000e+00> : vector<8x8xf32>
    %89 = tpu.matmul %88, %74, %cst_33 {dimension_numbers = #tpu.dot_dimension_numbers<[1], [0], [0], [1], [0, 0, 1, 1], [], []>} : vector<8x64xbf16>, vector<64x8xbf16>, vector<8x8xf32> -> vector<8x8xf32>
    %90 = arith.truncf %89 : vector<8x8xf32> to vector<8x8xbf16>
    %c0_34 = arith.constant 0 : index
    %c0_35 = arith.constant 0 : index
    %c24 = arith.constant 24 : index
    %91 = vector.load %arg5[%c0_34, %c0_35, %c24] : memref<1x8x32xbf16, #tpu.memory_space<vmem>>, vector<1x8x8xbf16>
    %92 = vector.shape_cast %91 : vector<1x8x8xbf16> to vector<8x8xbf16>
    %93 = vector.shape_cast %90 : vector<8x8xbf16> to vector<1x8x8xbf16>
    tpu.vector_store %arg5[%c0_34, %c0_35, %c24], %93 {strides = array<i32>} : memref<1x8x32xbf16, #tpu.memory_space<vmem>>, vector<1x8x8xbf16>,
    return
  }
  func.func @transform_0(%arg0: i32, %arg1: i32) -> (i32, i32, i32) {
    %c0_i32 = arith.constant 0 : i32
    %c0_i32_0 = arith.constant 0 : i32
    return %arg0, %arg1, %c0_i32 : i32, i32, i32
  }
  func.func @transform_1(%arg0: i32, %arg1: i32) -> (i32, i32, i32) {
    %c0_i32 = arith.constant 0 : i32
    %c0_i32_0 = arith.constant 0 : i32
    %c0_i32_1 = arith.constant 0 : i32
    return %arg0, %c0_i32, %c0_i32_0 : i32, i32, i32
  }
  func.func @transform_2(%arg0: i32, %arg1: i32) -> (i32, i32, i32) {
    %c0_i32 = arith.constant 0 : i32
    %c0_i32_0 = arith.constant 0 : i32
    %c0_i32_1 = arith.constant 0 : i32
    return %arg0, %c0_i32, %c0_i32_0 : i32, i32, i32
  }
  func.func @transform_3(%arg0: i32, %arg1: i32) -> (i32, i32, i32) {
    %c0_i32 = arith.constant 0 : i32
    %c0_i32_0 = arith.constant 0 : i32
    return %arg0, %arg1, %c0_i32 : i32, i32, i32
  }
}

module attributes {stable_mosaic.version = 11 : i64} {
  func.func @_kv_proj_kernel(%arg0: i32, %arg1: memref<128x32xbf16, #tpu.memory_space<vmem>>, %arg2: memref<128x32xbf16, #tpu.memory_space<vmem>>, %arg3: memref<32x32xbf16, #tpu.memory_space<vmem>>, %arg4: memref<1x32xf32, #tpu.memory_space<vmem>>, %arg5: memref<32x32xbf16, #tpu.memory_space<vmem>>, %arg6: memref<1x32xf32, #tpu.memory_space<vmem>>, %arg7: memref<128x32xbf16, #tpu.memory_space<vmem>>, %arg8: memref<128x32xbf16, #tpu.memory_space<vmem>>) attributes {dimension_semantics = [#tpu.dimension_semantics<parallel>], iteration_bounds = array<i64: 1>, scalar_prefetch = 0 : i64, scratch_operands = 0 : i64, tpu.core_type = #tpu.core_type<tc>, window_params = [{transform_indices = @transform_0, window_bounds = array<i64: 128, 32>}, {transform_indices = @transform_1, window_bounds = array<i64: 128, 32>}, {pipeline_mode = #tpu.pipeline_mode<synchronous>, transform_indices = @transform_2, window_bounds = array<i64: 32, 32>}, {pipeline_mode = #tpu.pipeline_mode<synchronous>, transform_indices = @transform_3, window_bounds = array<i64: 1, 32>}, {pipeline_mode = #tpu.pipeline_mode<synchronous>, transform_indices = @transform_4, window_bounds = array<i64: 32, 32>}, {pipeline_mode = #tpu.pipeline_mode<synchronous>, transform_indices = @transform_5, window_bounds = array<i64: 1, 32>}, {transform_indices = @transform_6, window_bounds = array<i64: 128, 32>}, {transform_indices = @transform_7, window_bounds = array<i64: 128, 32>}]} {
    %c0 = arith.constant 0 : index
    %c0_0 = arith.constant 0 : index
    %0 = vector.load %arg1[%c0, %c0_0] : memref<128x32xbf16, #tpu.memory_space<vmem>>, vector<128x32xbf16>
    %c0_1 = arith.constant 0 : index
    %c0_2 = arith.constant 0 : index
    %1 = vector.load %arg1[%c0_1, %c0_2] : memref<128x32xbf16, #tpu.memory_space<vmem>>, vector<128x32xbf16>
    %c0_3 = arith.constant 0 : index
    %c0_4 = arith.constant 0 : index
    %2 = vector.load %arg2[%c0_3, %c0_4] : memref<128x32xbf16, #tpu.memory_space<vmem>>, vector<128x32xbf16>
    %3 = arith.addf %1, %2 : vector<128x32xbf16>
    %c0_5 = arith.constant 0 : index
    %c0_6 = arith.constant 0 : index
    %4 = vector.load %arg3[%c0_5, %c0_6] : memref<32x32xbf16, #tpu.memory_space<vmem>>, vector<32x32xbf16>
    %cst = arith.constant dense<0.000000e+00> : vector<128x32xf32>
    %5 = tpu.matmul %3, %4, %cst {dimension_numbers = #tpu.dot_dimension_numbers<[1], [0], [0], [1], [0, 0, 1, 1], [], []>} : vector<128x32xbf16>, vector<32x32xbf16>, vector<128x32xf32> -> vector<128x32xf32>
    %c0_7 = arith.constant 0 : index
    %c0_8 = arith.constant 0 : index
    %6 = vector.load %arg4[%c0_7, %c0_8] : memref<1x32xf32, #tpu.memory_space<vmem>>, vector<1x32xf32>
    %7 = vector.broadcast %6 : vector<1x32xf32> to vector<128x32xf32>
    %8 = arith.addf %5, %7 : vector<128x32xf32>
    %c0_9 = arith.constant 0 : index
    %c0_10 = arith.constant 0 : index
    %9 = vector.load %arg5[%c0_9, %c0_10] : memref<32x32xbf16, #tpu.memory_space<vmem>>, vector<32x32xbf16>
    %cst_11 = arith.constant dense<0.000000e+00> : vector<128x32xf32>
    %10 = tpu.matmul %0, %9, %cst_11 {dimension_numbers = #tpu.dot_dimension_numbers<[1], [0], [0], [1], [0, 0, 1, 1], [], []>} : vector<128x32xbf16>, vector<32x32xbf16>, vector<128x32xf32> -> vector<128x32xf32>
    %c0_12 = arith.constant 0 : index
    %c0_13 = arith.constant 0 : index
    %11 = vector.load %arg6[%c0_12, %c0_13] : memref<1x32xf32, #tpu.memory_space<vmem>>, vector<1x32xf32>
    %12 = vector.broadcast %11 : vector<1x32xf32> to vector<128x32xf32>
    %13 = arith.addf %10, %12 : vector<128x32xf32>
    %14 = arith.truncf %8 : vector<128x32xf32> to vector<128x32xbf16>
    %c0_14 = arith.constant 0 : index
    %c0_15 = arith.constant 0 : index
    %15 = vector.load %arg7[%c0_14, %c0_15] : memref<128x32xbf16, #tpu.memory_space<vmem>>, vector<128x32xbf16>
    tpu.vector_store %arg7[%c0_14, %c0_15], %14 {strides = array<i32>} : memref<128x32xbf16, #tpu.memory_space<vmem>>, vector<128x32xbf16>,
    %16 = arith.truncf %13 : vector<128x32xf32> to vector<128x32xbf16>
    %c0_16 = arith.constant 0 : index
    %c0_17 = arith.constant 0 : index
    %17 = vector.load %arg8[%c0_16, %c0_17] : memref<128x32xbf16, #tpu.memory_space<vmem>>, vector<128x32xbf16>
    tpu.vector_store %arg8[%c0_16, %c0_17], %16 {strides = array<i32>} : memref<128x32xbf16, #tpu.memory_space<vmem>>, vector<128x32xbf16>,
    return
  }
  func.func @transform_0(%arg0: i32) -> (i32, i32) {
    %c0_i32 = arith.constant 0 : i32
    %c0_i32_0 = arith.constant 0 : i32
    return %arg0, %c0_i32 : i32, i32
  }
  func.func @transform_1(%arg0: i32) -> (i32, i32) {
    %c0_i32 = arith.constant 0 : i32
    %c0_i32_0 = arith.constant 0 : i32
    return %arg0, %c0_i32 : i32, i32
  }
  func.func @transform_2(%arg0: i32) -> (i32, i32) {
    %c0_i32 = arith.constant 0 : i32
    %c0_i32_0 = arith.constant 0 : i32
    %c0_i32_1 = arith.constant 0 : i32
    return %c0_i32, %c0_i32_0 : i32, i32
  }
  func.func @transform_3(%arg0: i32) -> (i32, i32) {
    %c0_i32 = arith.constant 0 : i32
    %c0_i32_0 = arith.constant 0 : i32
    %c0_i32_1 = arith.constant 0 : i32
    return %c0_i32, %c0_i32_0 : i32, i32
  }
  func.func @transform_4(%arg0: i32) -> (i32, i32) {
    %c0_i32 = arith.constant 0 : i32
    %c0_i32_0 = arith.constant 0 : i32
    %c0_i32_1 = arith.constant 0 : i32
    return %c0_i32, %c0_i32_0 : i32, i32
  }
  func.func @transform_5(%arg0: i32) -> (i32, i32) {
    %c0_i32 = arith.constant 0 : i32
    %c0_i32_0 = arith.constant 0 : i32
    %c0_i32_1 = arith.constant 0 : i32
    return %c0_i32, %c0_i32_0 : i32, i32
  }
  func.func @transform_6(%arg0: i32) -> (i32, i32) {
    %c0_i32 = arith.constant 0 : i32
    %c0_i32_0 = arith.constant 0 : i32
    return %arg0, %c0_i32 : i32, i32
  }
  func.func @transform_7(%arg0: i32) -> (i32, i32) {
    %c0_i32 = arith.constant 0 : i32
    %c0_i32_0 = arith.constant 0 : i32
    return %arg0, %c0_i32 : i32, i32
  }
}

module attributes {stable_mosaic.version = 11 : i64} {
  func.func @_mlp_kernel(%arg0: i32, %arg1: memref<16x32xbf16, #tpu.memory_space<vmem>>, %arg2: memref<32x64xbf16, #tpu.memory_space<vmem>>, %arg3: memref<1x64xf32, #tpu.memory_space<vmem>>, %arg4: memref<64x32xbf16, #tpu.memory_space<vmem>>, %arg5: memref<1x32xf32, #tpu.memory_space<vmem>>, %arg6: memref<16x32xbf16, #tpu.memory_space<vmem>>) attributes {dimension_semantics = [#tpu.dimension_semantics<parallel>], iteration_bounds = array<i64: 1>, scalar_prefetch = 0 : i64, scratch_operands = 0 : i64, tpu.core_type = #tpu.core_type<tc>, window_params = [{transform_indices = @transform_0, window_bounds = array<i64: 16, 32>}, {pipeline_mode = #tpu.pipeline_mode<synchronous>, transform_indices = @transform_1, window_bounds = array<i64: 32, 64>}, {pipeline_mode = #tpu.pipeline_mode<synchronous>, transform_indices = @transform_2, window_bounds = array<i64: 1, 64>}, {pipeline_mode = #tpu.pipeline_mode<synchronous>, transform_indices = @transform_3, window_bounds = array<i64: 64, 32>}, {pipeline_mode = #tpu.pipeline_mode<synchronous>, transform_indices = @transform_4, window_bounds = array<i64: 1, 32>}, {transform_indices = @transform_5, window_bounds = array<i64: 16, 32>}]} {
    %c0 = arith.constant 0 : index
    %c0_0 = arith.constant 0 : index
    %0 = vector.load %arg1[%c0, %c0_0] : memref<16x32xbf16, #tpu.memory_space<vmem>>, vector<16x32xbf16>
    %c0_1 = arith.constant 0 : index
    %c0_2 = arith.constant 0 : index
    %1 = vector.load %arg2[%c0_1, %c0_2] : memref<32x64xbf16, #tpu.memory_space<vmem>>, vector<32x64xbf16>
    %cst = arith.constant dense<0.000000e+00> : vector<16x64xf32>
    %2 = tpu.matmul %0, %1, %cst {dimension_numbers = #tpu.dot_dimension_numbers<[1], [0], [0], [1], [0, 0, 1, 1], [], []>} : vector<16x32xbf16>, vector<32x64xbf16>, vector<16x64xf32> -> vector<16x64xf32>
    %c0_3 = arith.constant 0 : index
    %c0_4 = arith.constant 0 : index
    %3 = vector.load %arg3[%c0_3, %c0_4] : memref<1x64xf32, #tpu.memory_space<vmem>>, vector<1x64xf32>
    %4 = vector.broadcast %3 : vector<1x64xf32> to vector<16x64xf32>
    %5 = arith.addf %2, %4 : vector<16x64xf32>
    %cst_5 = arith.constant 0.000000e+00 : f32
    %6 = vector.broadcast %cst_5 : f32 to vector<16x64xf32>
    %7 = arith.maximumf %5, %6 : vector<16x64xf32>
    %8 = arith.truncf %7 : vector<16x64xf32> to vector<16x64xbf16>
    %c0_6 = arith.constant 0 : index
    %c0_7 = arith.constant 0 : index
    %9 = vector.load %arg4[%c0_6, %c0_7] : memref<64x32xbf16, #tpu.memory_space<vmem>>, vector<64x32xbf16>
    %cst_8 = arith.constant dense<0.000000e+00> : vector<16x32xf32>
    %10 = tpu.matmul %8, %9, %cst_8 {dimension_numbers = #tpu.dot_dimension_numbers<[1], [0], [0], [1], [0, 0, 1, 1], [], []>} : vector<16x64xbf16>, vector<64x32xbf16>, vector<16x32xf32> -> vector<16x32xf32>
    %c0_9 = arith.constant 0 : index
    %c0_10 = arith.constant 0 : index
    %11 = vector.load %arg5[%c0_9, %c0_10] : memref<1x32xf32, #tpu.memory_space<vmem>>, vector<1x32xf32>
    %12 = vector.broadcast %11 : vector<1x32xf32> to vector<16x32xf32>
    %13 = arith.addf %10, %12 : vector<16x32xf32>
    %14 = arith.truncf %13 : vector<16x32xf32> to vector<16x32xbf16>
    %c0_11 = arith.constant 0 : index
    %c0_12 = arith.constant 0 : index
    %15 = vector.load %arg6[%c0_11, %c0_12] : memref<16x32xbf16, #tpu.memory_space<vmem>>, vector<16x32xbf16>
    tpu.vector_store %arg6[%c0_11, %c0_12], %14 {strides = array<i32>} : memref<16x32xbf16, #tpu.memory_space<vmem>>, vector<16x32xbf16>,
    return
  }
  func.func @transform_0(%arg0: i32) -> (i32, i32) {
    %c0_i32 = arith.constant 0 : i32
    %c0_i32_0 = arith.constant 0 : i32
    return %arg0, %c0_i32 : i32, i32
  }
  func.func @transform_1(%arg0: i32) -> (i32, i32) {
    %c0_i32 = arith.constant 0 : i32
    %c0_i32_0 = arith.constant 0 : i32
    %c0_i32_1 = arith.constant 0 : i32
    return %c0_i32, %c0_i32_0 : i32, i32
  }
  func.func @transform_2(%arg0: i32) -> (i32, i32) {
    %c0_i32 = arith.constant 0 : i32
    %c0_i32_0 = arith.constant 0 : i32
    %c0_i32_1 = arith.constant 0 : i32
    return %c0_i32, %c0_i32_0 : i32, i32
  }
  func.func @transform_3(%arg0: i32) -> (i32, i32) {
    %c0_i32 = arith.constant 0 : i32
    %c0_i32_0 = arith.constant 0 : i32
    %c0_i32_1 = arith.constant 0 : i32
    return %c0_i32, %c0_i32_0 : i32, i32
  }
  func.func @transform_4(%arg0: i32) -> (i32, i32) {
    %c0_i32 = arith.constant 0 : i32
    %c0_i32_0 = arith.constant 0 : i32
    %c0_i32_1 = arith.constant 0 : i32
    return %c0_i32, %c0_i32_0 : i32, i32
  }
  func.func @transform_5(%arg0: i32) -> (i32, i32) {
    %c0_i32 = arith.constant 0 : i32
    %c0_i32_0 = arith.constant 0 : i32
    return %arg0, %c0_i32 : i32, i32
  }
}

module attributes {stable_mosaic.version = 11 : i64} {
  func.func @_layernorm_kernel(%arg0: i32, %arg1: memref<16x32xbf16, #tpu.memory_space<vmem>>, %arg2: memref<1x32xf32, #tpu.memory_space<vmem>>, %arg3: memref<1x32xf32, #tpu.memory_space<vmem>>, %arg4: memref<16x32xbf16, #tpu.memory_space<vmem>>) attributes {dimension_semantics = [#tpu.dimension_semantics<parallel>], iteration_bounds = array<i64: 1>, scalar_prefetch = 0 : i64, scratch_operands = 0 : i64, tpu.core_type = #tpu.core_type<tc>, window_params = [{transform_indices = @transform_0, window_bounds = array<i64: 16, 32>}, {pipeline_mode = #tpu.pipeline_mode<synchronous>, transform_indices = @transform_1, window_bounds = array<i64: 1, 32>}, {pipeline_mode = #tpu.pipeline_mode<synchronous>, transform_indices = @transform_2, window_bounds = array<i64: 1, 32>}, {transform_indices = @transform_3, window_bounds = array<i64: 16, 32>}]} {
    %c0 = arith.constant 0 : index
    %c0_0 = arith.constant 0 : index
    %0 = vector.load %arg1[%c0, %c0_0] : memref<16x32xbf16, #tpu.memory_space<vmem>>, vector<16x32xbf16>
    %1 = arith.extf %0 : vector<16x32xbf16> to vector<16x32xf32>
    %cst = arith.constant dense<0.000000e+00> : vector<16xf32>
    %2 = vector.multi_reduction <add>, %1, %cst [1] : vector<16x32xf32> to vector<16xf32>
    %3 = vector.shape_cast %2 : vector<16xf32> to vector<16x1xf32>
    %cst_1 = arith.constant 3.200000e+01 : f32
    %4 = vector.broadcast %cst_1 : f32 to vector<16x1xf32>
    %5 = arith.divf %3, %4 : vector<16x1xf32>
    %6 = vector.broadcast %5 : vector<16x1xf32> to vector<16x32xf32>
    %7 = arith.subf %1, %6 : vector<16x32xf32>
    %8 = arith.mulf %7, %7 : vector<16x32xf32>
    %cst_2 = arith.constant dense<0.000000e+00> : vector<16xf32>
    %9 = vector.multi_reduction <add>, %8, %cst_2 [1] : vector<16x32xf32> to vector<16xf32>
    %10 = vector.shape_cast %9 : vector<16xf32> to vector<16x1xf32>
    %cst_3 = arith.constant 3.200000e+01 : f32
    %11 = vector.broadcast %cst_3 : f32 to vector<16x1xf32>
    %12 = arith.divf %10, %11 : vector<16x1xf32>
    %cst_4 = arith.constant 9.99999974E-6 : f32
    %13 = vector.broadcast %cst_4 : f32 to vector<16x1xf32>
    %14 = arith.addf %12, %13 : vector<16x1xf32>
    %15 = math.rsqrt %14 : vector<16x1xf32>
    %16 = vector.broadcast %15 : vector<16x1xf32> to vector<16x32xf32>
    %17 = arith.mulf %7, %16 : vector<16x32xf32>
    %c0_5 = arith.constant 0 : index
    %c0_6 = arith.constant 0 : index
    %18 = vector.load %arg2[%c0_5, %c0_6] : memref<1x32xf32, #tpu.memory_space<vmem>>, vector<1x32xf32>
    %19 = vector.broadcast %18 : vector<1x32xf32> to vector<16x32xf32>
    %20 = arith.mulf %17, %19 : vector<16x32xf32>
    %c0_7 = arith.constant 0 : index
    %c0_8 = arith.constant 0 : index
    %21 = vector.load %arg3[%c0_7, %c0_8] : memref<1x32xf32, #tpu.memory_space<vmem>>, vector<1x32xf32>
    %22 = vector.broadcast %21 : vector<1x32xf32> to vector<16x32xf32>
    %23 = arith.addf %20, %22 : vector<16x32xf32>
    %24 = arith.truncf %23 : vector<16x32xf32> to vector<16x32xbf16>
    %c0_9 = arith.constant 0 : index
    %c0_10 = arith.constant 0 : index
    %25 = vector.load %arg4[%c0_9, %c0_10] : memref<16x32xbf16, #tpu.memory_space<vmem>>, vector<16x32xbf16>
    tpu.vector_store %arg4[%c0_9, %c0_10], %24 {strides = array<i32>} : memref<16x32xbf16, #tpu.memory_space<vmem>>, vector<16x32xbf16>,
    return
  }
  func.func @transform_0(%arg0: i32) -> (i32, i32) {
    %c0_i32 = arith.constant 0 : i32
    %c0_i32_0 = arith.constant 0 : i32
    return %arg0, %c0_i32 : i32, i32
  }
  func.func @transform_1(%arg0: i32) -> (i32, i32) {
    %c0_i32 = arith.constant 0 : i32
    %c0_i32_0 = arith.constant 0 : i32
    %c0_i32_1 = arith.constant 0 : i32
    return %c0_i32, %c0_i32_0 : i32, i32
  }
  func.func @transform_2(%arg0: i32) -> (i32, i32) {
    %c0_i32 = arith.constant 0 : i32
    %c0_i32_0 = arith.constant 0 : i32
    %c0_i32_1 = arith.constant 0 : i32
    return %c0_i32, %c0_i32_0 : i32, i32
  }
  func.func @transform_3(%arg0: i32) -> (i32, i32) {
    %c0_i32 = arith.constant 0 : i32
    %c0_i32_0 = arith.constant 0 : i32
    return %arg0, %c0_i32 : i32, i32
  }
}

module attributes {stable_mosaic.version = 11 : i64} {
  func.func @_mlp_kernel(%arg0: i32, %arg1: memref<16x32xbf16, #tpu.memory_space<vmem>>, %arg2: memref<32x32xbf16, #tpu.memory_space<vmem>>, %arg3: memref<1x32xf32, #tpu.memory_space<vmem>>, %arg4: memref<32x32xbf16, #tpu.memory_space<vmem>>, %arg5: memref<1x32xf32, #tpu.memory_space<vmem>>, %arg6: memref<32x4xbf16, #tpu.memory_space<vmem>>, %arg7: memref<1x4xf32, #tpu.memory_space<vmem>>, %arg8: memref<16x4xf32, #tpu.memory_space<vmem>>) attributes {dimension_semantics = [#tpu.dimension_semantics<parallel>], iteration_bounds = array<i64: 1>, scalar_prefetch = 0 : i64, scratch_operands = 0 : i64, tpu.core_type = #tpu.core_type<tc>, window_params = [{transform_indices = @transform_0, window_bounds = array<i64: 16, 32>}, {pipeline_mode = #tpu.pipeline_mode<synchronous>, transform_indices = @transform_1, window_bounds = array<i64: 32, 32>}, {pipeline_mode = #tpu.pipeline_mode<synchronous>, transform_indices = @transform_2, window_bounds = array<i64: 1, 32>}, {pipeline_mode = #tpu.pipeline_mode<synchronous>, transform_indices = @transform_3, window_bounds = array<i64: 32, 32>}, {pipeline_mode = #tpu.pipeline_mode<synchronous>, transform_indices = @transform_4, window_bounds = array<i64: 1, 32>}, {pipeline_mode = #tpu.pipeline_mode<synchronous>, transform_indices = @transform_5, window_bounds = array<i64: 32, 4>}, {pipeline_mode = #tpu.pipeline_mode<synchronous>, transform_indices = @transform_6, window_bounds = array<i64: 1, 4>}, {transform_indices = @transform_7, window_bounds = array<i64: 16, 4>}]} {
    %c0 = arith.constant 0 : index
    %c0_0 = arith.constant 0 : index
    %0 = vector.load %arg1[%c0, %c0_0] : memref<16x32xbf16, #tpu.memory_space<vmem>>, vector<16x32xbf16>
    %c0_1 = arith.constant 0 : index
    %c0_2 = arith.constant 0 : index
    %1 = vector.load %arg2[%c0_1, %c0_2] : memref<32x32xbf16, #tpu.memory_space<vmem>>, vector<32x32xbf16>
    %cst = arith.constant dense<0.000000e+00> : vector<16x32xf32>
    %2 = tpu.matmul %0, %1, %cst {dimension_numbers = #tpu.dot_dimension_numbers<[1], [0], [0], [1], [0, 0, 1, 1], [], []>} : vector<16x32xbf16>, vector<32x32xbf16>, vector<16x32xf32> -> vector<16x32xf32>
    %c0_3 = arith.constant 0 : index
    %c0_4 = arith.constant 0 : index
    %3 = vector.load %arg3[%c0_3, %c0_4] : memref<1x32xf32, #tpu.memory_space<vmem>>, vector<1x32xf32>
    %4 = vector.broadcast %3 : vector<1x32xf32> to vector<16x32xf32>
    %5 = arith.addf %2, %4 : vector<16x32xf32>
    %cst_5 = arith.constant 0.000000e+00 : f32
    %6 = vector.broadcast %cst_5 : f32 to vector<16x32xf32>
    %7 = arith.maximumf %5, %6 : vector<16x32xf32>
    %8 = arith.truncf %7 : vector<16x32xf32> to vector<16x32xbf16>
    %c0_6 = arith.constant 0 : index
    %c0_7 = arith.constant 0 : index
    %9 = vector.load %arg4[%c0_6, %c0_7] : memref<32x32xbf16, #tpu.memory_space<vmem>>, vector<32x32xbf16>
    %cst_8 = arith.constant dense<0.000000e+00> : vector<16x32xf32>
    %10 = tpu.matmul %8, %9, %cst_8 {dimension_numbers = #tpu.dot_dimension_numbers<[1], [0], [0], [1], [0, 0, 1, 1], [], []>} : vector<16x32xbf16>, vector<32x32xbf16>, vector<16x32xf32> -> vector<16x32xf32>
    %c0_9 = arith.constant 0 : index
    %c0_10 = arith.constant 0 : index
    %11 = vector.load %arg5[%c0_9, %c0_10] : memref<1x32xf32, #tpu.memory_space<vmem>>, vector<1x32xf32>
    %12 = vector.broadcast %11 : vector<1x32xf32> to vector<16x32xf32>
    %13 = arith.addf %10, %12 : vector<16x32xf32>
    %cst_11 = arith.constant 0.000000e+00 : f32
    %14 = vector.broadcast %cst_11 : f32 to vector<16x32xf32>
    %15 = arith.maximumf %13, %14 : vector<16x32xf32>
    %16 = arith.truncf %15 : vector<16x32xf32> to vector<16x32xbf16>
    %c0_12 = arith.constant 0 : index
    %c0_13 = arith.constant 0 : index
    %17 = vector.load %arg6[%c0_12, %c0_13] : memref<32x4xbf16, #tpu.memory_space<vmem>>, vector<32x4xbf16>
    %cst_14 = arith.constant dense<0.000000e+00> : vector<16x4xf32>
    %18 = tpu.matmul %16, %17, %cst_14 {dimension_numbers = #tpu.dot_dimension_numbers<[1], [0], [0], [1], [0, 0, 1, 1], [], []>} : vector<16x32xbf16>, vector<32x4xbf16>, vector<16x4xf32> -> vector<16x4xf32>
    %c0_15 = arith.constant 0 : index
    %c0_16 = arith.constant 0 : index
    %19 = vector.load %arg7[%c0_15, %c0_16] : memref<1x4xf32, #tpu.memory_space<vmem>>, vector<1x4xf32>
    %20 = vector.broadcast %19 : vector<1x4xf32> to vector<16x4xf32>
    %21 = arith.addf %18, %20 : vector<16x4xf32>
    %22 = arith.negf %21 : vector<16x4xf32>
    %23 = math.exp %22 : vector<16x4xf32>
    %cst_17 = arith.constant 1.000000e+00 : f32
    %24 = vector.broadcast %cst_17 : f32 to vector<16x4xf32>
    %25 = arith.addf %24, %23 : vector<16x4xf32>
    %26 = arith.divf %24, %25 : vector<16x4xf32>
    %c0_18 = arith.constant 0 : index
    %c0_19 = arith.constant 0 : index
    %27 = vector.load %arg8[%c0_18, %c0_19] : memref<16x4xf32, #tpu.memory_space<vmem>>, vector<16x4xf32>
    tpu.vector_store %arg8[%c0_18, %c0_19], %26 {strides = array<i32>} : memref<16x4xf32, #tpu.memory_space<vmem>>, vector<16x4xf32>,
    return
  }
  func.func @transform_0(%arg0: i32) -> (i32, i32) {
    %c0_i32 = arith.constant 0 : i32
    %c0_i32_0 = arith.constant 0 : i32
    return %arg0, %c0_i32 : i32, i32
  }
  func.func @transform_1(%arg0: i32) -> (i32, i32) {
    %c0_i32 = arith.constant 0 : i32
    %c0_i32_0 = arith.constant 0 : i32
    %c0_i32_1 = arith.constant 0 : i32
    return %c0_i32, %c0_i32_0 : i32, i32
  }
  func.func @transform_2(%arg0: i32) -> (i32, i32) {
    %c0_i32 = arith.constant 0 : i32
    %c0_i32_0 = arith.constant 0 : i32
    %c0_i32_1 = arith.constant 0 : i32
    return %c0_i32, %c0_i32_0 : i32, i32
  }
  func.func @transform_3(%arg0: i32) -> (i32, i32) {
    %c0_i32 = arith.constant 0 : i32
    %c0_i32_0 = arith.constant 0 : i32
    %c0_i32_1 = arith.constant 0 : i32
    return %c0_i32, %c0_i32_0 : i32, i32
  }
  func.func @transform_4(%arg0: i32) -> (i32, i32) {
    %c0_i32 = arith.constant 0 : i32
    %c0_i32_0 = arith.constant 0 : i32
    %c0_i32_1 = arith.constant 0 : i32
    return %c0_i32, %c0_i32_0 : i32, i32
  }
  func.func @transform_5(%arg0: i32) -> (i32, i32) {
    %c0_i32 = arith.constant 0 : i32
    %c0_i32_0 = arith.constant 0 : i32
    %c0_i32_1 = arith.constant 0 : i32
    return %c0_i32, %c0_i32_0 : i32, i32
  }
  func.func @transform_6(%arg0: i32) -> (i32, i32) {
    %c0_i32 = arith.constant 0 : i32
    %c0_i32_0 = arith.constant 0 : i32
    %c0_i32_1 = arith.constant 0 : i32
    return %c0_i32, %c0_i32_0 : i32, i32
  }
  func.func @transform_7(%arg0: i32) -> (i32, i32) {
    %c0_i32 = arith.constant 0 : i32
    %c0_i32_0 = arith.constant 0 : i32
    return %arg0, %c0_i32 : i32, i32
  }
}

module attributes {stable_mosaic.version = 11 : i64} {
  func.func @_linear_kernel(%arg0: i32, %arg1: memref<16x32xbf16, #tpu.memory_space<vmem>>, %arg2: memref<32x6xbf16, #tpu.memory_space<vmem>>, %arg3: memref<1x6xf32, #tpu.memory_space<vmem>>, %arg4: memref<16x6xf32, #tpu.memory_space<vmem>>) attributes {dimension_semantics = [#tpu.dimension_semantics<parallel>], iteration_bounds = array<i64: 1>, scalar_prefetch = 0 : i64, scratch_operands = 0 : i64, tpu.core_type = #tpu.core_type<tc>, window_params = [{transform_indices = @transform_0, window_bounds = array<i64: 16, 32>}, {pipeline_mode = #tpu.pipeline_mode<synchronous>, transform_indices = @transform_1, window_bounds = array<i64: 32, 6>}, {pipeline_mode = #tpu.pipeline_mode<synchronous>, transform_indices = @transform_2, window_bounds = array<i64: 1, 6>}, {transform_indices = @transform_3, window_bounds = array<i64: 16, 6>}]} {
    %c0 = arith.constant 0 : index
    %c0_0 = arith.constant 0 : index
    %0 = vector.load %arg1[%c0, %c0_0] : memref<16x32xbf16, #tpu.memory_space<vmem>>, vector<16x32xbf16>
    %c0_1 = arith.constant 0 : index
    %c0_2 = arith.constant 0 : index
    %1 = vector.load %arg2[%c0_1, %c0_2] : memref<32x6xbf16, #tpu.memory_space<vmem>>, vector<32x6xbf16>
    %cst = arith.constant dense<0.000000e+00> : vector<16x6xf32>
    %2 = tpu.matmul %0, %1, %cst {dimension_numbers = #tpu.dot_dimension_numbers<[1], [0], [0], [1], [0, 0, 1, 1], [], []>} : vector<16x32xbf16>, vector<32x6xbf16>, vector<16x6xf32> -> vector<16x6xf32>
    %c0_3 = arith.constant 0 : index
    %c0_4 = arith.constant 0 : index
    %3 = vector.load %arg3[%c0_3, %c0_4] : memref<1x6xf32, #tpu.memory_space<vmem>>, vector<1x6xf32>
    %4 = vector.broadcast %3 : vector<1x6xf32> to vector<16x6xf32>
    %5 = arith.addf %2, %4 : vector<16x6xf32>
    %c0_5 = arith.constant 0 : index
    %c0_6 = arith.constant 0 : index
    %6 = vector.load %arg4[%c0_5, %c0_6] : memref<16x6xf32, #tpu.memory_space<vmem>>, vector<16x6xf32>
    tpu.vector_store %arg4[%c0_5, %c0_6], %5 {strides = array<i32>} : memref<16x6xf32, #tpu.memory_space<vmem>>, vector<16x6xf32>,
    return
  }
  func.func @transform_0(%arg0: i32) -> (i32, i32) {
    %c0_i32 = arith.constant 0 : i32
    %c0_i32_0 = arith.constant 0 : i32
    return %arg0, %c0_i32 : i32, i32
  }
  func.func @transform_1(%arg0: i32) -> (i32, i32) {
    %c0_i32 = arith.constant 0 : i32
    %c0_i32_0 = arith.constant 0 : i32
    %c0_i32_1 = arith.constant 0 : i32
    return %c0_i32, %c0_i32_0 : i32, i32
  }
  func.func @transform_2(%arg0: i32) -> (i32, i32) {
    %c0_i32 = arith.constant 0 : i32
    %c0_i32_0 = arith.constant 0 : i32
    %c0_i32_1 = arith.constant 0 : i32
    return %c0_i32, %c0_i32_0 : i32, i32
  }
  func.func @transform_3(%arg0: i32) -> (i32, i32) {
    %c0_i32 = arith.constant 0 : i32
    %c0_i32_0 = arith.constant 0 : i32
    return %arg0, %c0_i32 : i32, i32
  }
}

</mosaic_0001>

<bundles_post_ra>
// kernel: detr_forward.55
= control target key start
LH: loop header
LB: loop body
LE: loop exit
PB: predicated region body
PF: predicated region fallthrough
CT: control target
= control target key end

     0   :  { %v130_v0 = vmov 0.0   ;;  %vm131_vm0 = vmmov 0   ;;  %vm45_vm1 = vcmask 261120   ;;  %vm98_vm2 = vcmask 257024   ;;  %s170_s1 = inlined_call_operand.vmem [shape: bf16[32,32], index: 1, kind: input, shape index: {}]   ;;  %s171_s0 = inlined_call_operand.vmem [shape: bf16[16,32], index: 0, kind: input, shape index: {}]   ;;  %s172_s2 = inlined_call_operand.vmem [shape: f32[1,32], index: 2, kind: input, shape index: {}]   ;;  %s173_s3 = inlined_call_operand.vmem [shape: bf16[16,32], index: 3, kind: output, shape index: {}]  }
   0x1   :  { %117 = vmatprep.subr.bf16.mxu0 %v130_v0  ;;  %v127_v1 = vld [vmem:[%s170_s1 + $0x8] sm:$0xff]   ;;  %121 = vmatprep.mubr.msk.bf16.mxu0 %vm131_vm0, %v130_v0  ;;  %v128_v2 = vld [vmem:[%s170_s1] sm:$0xff]  }
   0x2   :  { %118 = vmatpush3.bf16.msra.mxu0 %v127_v1  ;;  %v129_v3 = vld [vmem:[%s171_s0] sm:$0xff]  }
   0x3   :  { %119 = vmatprep.subr.bf16.mxu0 %v130_v0  ;;  %v105_v4 = vld [vmem:[%s172_s2] ss:$0 sm:$0xff] }
   0x6   :  { %120 = vmatpush3.bf16.msra.mxu0 %v128_v2 }
   0x9   :  { %122 = vmatmul.mubr.msk.bf16.vlgmr.msra.gmra.mxu0 %vm45_vm1, %v129_v3 }
  0xc9   :  { %v83_v5 = vpop.f32.mrf.mxu0 }
  0xca   :  { %v84_v6 = vadd.f32 %v105_v4, %v83_v5 }
  0xcb   :  { %v123_v7 = vpop.f32.mrf.mxu0 }
  0xcc   :  { %v112_v8 = vpack.c.bf16 %v84_v6, %v84_v6 }
  0xcd   :  { %v86_v9 = vpop.f32.mrf.mxu0 }
  0xce   :  { %99 = vst.msk [vmem:[%s173_s3] sm:$0xf] %vm98_vm2, %v112_v8  ;;  %v87_v10 = vadd.f32 %v105_v4, %v86_v9 }
  0xcf   :  { %v124_v11 = vpop.f32.mrf.mxu0 }
  0xd0   :  { %v113_v12 = vpack.c.bf16 %v87_v10, %v87_v10 }
  0xd2   :  { %100 = vst.msk [vmem:[%s173_s3 + $0x4] sm:$0xf] %vm98_vm2, %v113_v12 }

// kernel: detr_forward.53
= control target key start
LH: loop header
LB: loop body
LE: loop exit
PB: predicated region body
PF: predicated region fallthrough
CT: control target
= control target key end

     0   :  { %v267_v0 = vmov 0.0   ;;  %vm268_vm0 = vmmov 0   ;;  %vm61_vm1 = vcmask 261120   ;;  %vm186_vm2 = vcmask 257024   ;;  %s269_s23 = smov 96   ;;  %s369_s2 = inlined_call_operand.vmem [shape: bf16[32,64], index: 2, kind: input, shape index: {}]   ;;  %s370_s0 = inlined_call_operand.vmem [shape: bf16[16,32], index: 0, kind: input, shape index: {}]   ;;  %s371_s1 = inlined_call_operand.vmem [shape: bf16[16,32], index: 1, kind: input, shape index: {}]   ;;  %s372_s4 = inlined_call_operand.vmem [shape: bf16[32,32], index: 4, kind: input, shape index: {}]   ;;  %s373_s3 = inlined_call_operand.vmem [shape: f32[1,64], index: 3, kind: input, shape index: {}]   ;;  %s374_s5 = inlined_call_operand.vmem [shape: f32[1,32], index: 5, kind: input, shape index: {}]   ;;  %s375_s6 = inlined_call_operand.vmem [shape: bf16[16,32], index: 6, kind: output, shape index: {0}]   ;;  %s376_s8 = inlined_call_operand.vmem [shape: bf16[16,32], index: 8, kind: output, shape index: {2}]   ;;  %s377_s7 = inlined_call_operand.vmem [shape: bf16[16,32], index: 7, kind: output, shape index: {1}]  }
   0x1   :  { %243 = vmatprep.subr.bf16.mxu0 %v267_v0  ;;  %v262_v1 = vld [vmem:[%s369_s2 + $0x8] sm:$0xff]   ;;  %247 = vmatprep.mubr.msk.bf16.mxu0 %vm268_vm0, %v267_v0  ;;  %v263_v2 = vld [vmem:[%s369_s2] sm:$0xff]  }
   0x2   :  { %251 = vmatprep.subr.bf16.mxu1 %v267_v0  ;;  %255 = vmatprep.mubr.msk.bf16.mxu1 %vm268_vm0, %v267_v0  ;;  %v27_v3 = vld [vmem:[%s370_s0] sm:$0xf]  ;;  %v28_v4 = vld [vmem:[%s370_s0 + $0x4] sm:$0xf]  ;;  %v264_v9 = vld [vmem:[%s372_s4 + $0x8] sm:$0xff]  }
   0x3   :  { %244 = vmatpush3.bf16.msra.mxu0 %v262_v1  ;;  %v29_v5 = vld [vmem:[%s371_s1] sm:$0xf]  ;;  %v30_v6 = vld [vmem:[%s371_s1 + $0x4] sm:$0xf]  ;;  %252 = vmatpush3.bf16.msra.mxu1 %v264_v9  ;;  %v225_v12 = vcombine.low %v27_v3, %v28_v4 }
   0x4   :  { %245 = vmatprep.subr.bf16.mxu0 %v267_v0  ;;  %v31_v7 = vadd.bf16 %v29_v5, %v27_v3  ;;  %v32_v8 = vadd.bf16 %v30_v6, %v28_v4  ;;  %v265_v11 = vld [vmem:[%s372_s4] sm:$0xff]   ;;  %253 = vmatprep.subr.bf16.mxu1 %v267_v0 }
   0x5   :  { %v219_v13 = vld [vmem:[%s373_s3] ss:$0 sm:$0xff] }
   0x6   :  { %v220_v10 = vcombine.low %v31_v7, %v32_v8  ;;  %v224_v17 = vld [vmem:[%s374_s5] ss:$0 sm:$0xff] }
   0x7   :  { %246 = vmatpush3.bf16.msra.mxu0 %v263_v2  ;;  %254 = vmatpush3.bf16.msra.mxu1 %v265_v11 }
   0xa   :  { %248 = vmatmul.mubr.msk.bf16.vlgmr.msra.gmra.mxu0 %vm61_vm1, %v220_v10  ;;  %256 = vmatmul.mubr.msk.bf16.vlgmr.msra.gmra.mxu1 %vm61_vm1, %v225_v12 }
  0xca   :  { %v99_v14 = vpop.f32.mrf.mxu0  ;;  %v171_v20 = vpop.f32.mrf.mxu1 }
  0xcb   :  { %v100_v15 = vadd.f32 %v219_v13, %v99_v14  ;;  %v172_v22 = vadd.f32 %v224_v17, %v171_v20 }
  0xcc   :  { %v249_v16 = vpop.f32.mrf.mxu0  ;;  %v257_v24 = vpop.f32.mrf.mxu1 }
  0xcd   :  { %v233_v18 = vpack.c.bf16 %v100_v15, %v100_v15  ;;  %v235_v26 = vpack.c.bf16 %v172_v22, %v172_v22 }
  0xce   :  { %v102_v19 = vpop.f32.mrf.mxu0  ;;  %v174_v27 = vpop.f32.mrf.mxu1 }
  0xcf   :  { %187 = vst.msk [vmem:[%s375_s6] sm:$0xf] %vm186_vm2, %v233_v18  ;;  %v103_v21 = vadd.f32 %v219_v13, %v102_v19  ;;  %189 = vrot.lane.b32.xlu0 %v233_v18, %s269_s23  ;;  %205 = vst.msk [vmem:[%s376_s8] sm:$0xf] %vm186_vm2, %v235_v26  ;;  %v175_v28 = vadd.f32 %v224_v17, %v174_v27 }
  0xd0   :  { %v250_v23 = vpop.f32.mrf.mxu0  ;;  %v258_v29 = vpop.f32.mrf.mxu1 }
  0xd1   :  { %v234_v25 = vpack.c.bf16 %v103_v21, %v103_v21  ;;  %v236_v30 = vpack.c.bf16 %v175_v28, %v175_v28 }
  0xd3   :  { %188 = vst.msk [vmem:[%s375_s6 + $0x4] sm:$0xf] %vm186_vm2, %v234_v25  ;;  %191 = vrot.lane.b32.xlu0 %v234_v25, %s269_s23  ;;  %206 = vst.msk [vmem:[%s376_s8 + $0x4] sm:$0xf] %vm186_vm2, %v236_v30 }
 0x141   :  { %v190_v31 = vpop.permute.xlu0 %189 }
 0x142   :  { %195 = vst.msk [vmem:[%s377_s7] sm:$0xf] %vm186_vm2, %v190_v31 }
 0x145   :  { %v192_v32 = vpop.permute.xlu0 %191 }
 0x146   :  { %196 = vst.msk [vmem:[%s377_s7 + $0x4] sm:$0xf] %vm186_vm2, %v192_v32 }

// kernel: detr_forward.56
= control target key start
LH: loop header
LB: loop body
LE: loop exit
PB: predicated region body
PF: predicated region fallthrough
CT: control target
= control target key end

     0   :  { %vm27_vm0 = vcmask 261120   ;;  %vm81_vm1 = vcmask 257024   ;;  %s153_s0 = inlined_call_operand.vmem [shape: bf16[16,32], index: 0, kind: input, shape index: {}]   ;;  %s154_s1 = inlined_call_operand.vmem [shape: bf16[16,32], index: 1, kind: input, shape index: {}]   ;;  %s155_s2 = inlined_call_operand.vmem [shape: f32[1,32], index: 2, kind: input, shape index: {}]   ;;  %s156_s3 = inlined_call_operand.vmem [shape: f32[1,32], index: 3, kind: input, shape index: {}]   ;;  %s157_s4 = inlined_call_operand.vmem [shape: bf16[16,32], index: 4, kind: output, shape index: {}]  }
   0x1   :  { %v95_v0 = vld [vmem:[%s153_s0] sm:$0xff]  }
   0x2   :  { %v99_v1 = vld [vmem:[%s154_s1] sm:$0xff]   ;;  %v96_v2 = vunpack.c.l.bf16 %v95_v0  ;;  %v97_v4 = vunpack.c.h.bf16 %v95_v0 }
   0x3   :  { %v100_v3 = vunpack.c.l.bf16 %v99_v1  ;;  %v101_v5 = vunpack.c.h.bf16 %v99_v1  ;;  %v88_v27 = vld [vmem:[%s155_s2] ss:$0 sm:$0xff] }
   0x4   :  { %v89_v29 = vld [vmem:[%s156_s3] ss:$0 sm:$0xff] }
   0x5   :  { %v25_v6 = vadd.f32 %v100_v3, %v96_v2  ;;  %v26_v7 = vadd.f32 %v101_v5, %v97_v4 }
   0x7   :  { %v28_v8 = vsel %vm27_vm0, %v25_v6, 0.0  ;;  %v31_v9 = vsel %vm27_vm0, %v26_v7, 0.0 }
   0x8   :  { %29 = vadd.xlane.f32.xlu0 %v28_v8 }
   0xc   :  { %32 = vadd.xlane.f32.xlu0 %v31_v9 }
  0x91   :  { %v30_v10 = vpop.xlane.xlu0 %29 }
  0x92   :  { %v35_v11 = vmul.f32 0.03125, %v30_v10 }
  0x94   :  { %v37_v12 = vsub.f32 %v25_v6, %v35_v11 }
  0x95   :  { %v33_v13 = vpop.xlane.xlu0 %32 }
  0x96   :  { %v36_v14 = vmul.f32 0.03125, %v33_v13  ;;  %v39_v15 = vmul.f32 %v37_v12, %v37_v12 }
  0x98   :  { %v38_v16 = vsub.f32 %v26_v7, %v36_v14  ;;  %v41_v17 = vsel %vm27_vm0, %v39_v15, 0.0 }
  0x99   :  { %42 = vadd.xlane.f32.xlu1 %v41_v17 }
  0x9a   :  { %v40_v18 = vmul.f32 %v38_v16, %v38_v16 }
  0x9c   :  { %v44_v19 = vsel %vm27_vm0, %v40_v18, 0.0 }
  0x9d   :  { %45 = vadd.xlane.f32.xlu1 %v44_v19 }
 0x122   :  { %v43_v20 = vpop.xlane.xlu1 %42 }
 0x123   :  { %v47_v21 = vmul.f32 0.03125, %v43_v20 }
 0x125   :  { %v49_v22 = vadd.f32 1e-05, %v47_v21 }
 0x126   :  { %v46_v23 = vpop.xlane.xlu1 %45 }
 0x127   :  { %102 = vrsqrt.f32 %v49_v22  ;;  %v48_v24 = vmul.f32 0.03125, %v46_v23 }
 0x129   :  { %v50_v25 = vadd.f32 1e-05, %v48_v24 }
 0x12b   :  { %104 = vrsqrt.f32 %v50_v25 }
 0x134   :  { %v103_v26 = vpop.eup %102 }
 0x135   :  { %v53_v28 = vmul.f32 %v103_v26, %v37_v12 }
 0x137   :  { %v62_v30 = vmul.f32 %v88_v27, %v53_v28 }
 0x138   :  { %v105_v31 = vpop.eup %104 }
 0x139   :  { %v71_v32 = vadd.f32 %v89_v29, %v62_v30  ;;  %v54_v33 = vmul.f32 %v105_v31, %v38_v16 }
 0x13b   :  { %v92_v34 = vpack.c.bf16 %v71_v32, %v71_v32  ;;  %v63_v35 = vmul.f32 %v88_v27, %v54_v33 }
 0x13d   :  { %82 = vst.msk [vmem:[%s157_s4] sm:$0xf] %vm81_vm1, %v92_v34  ;;  %v72_v36 = vadd.f32 %v89_v29, %v63_v35 }
 0x13f   :  { %v93_v37 = vpack.c.bf16 %v72_v36, %v72_v36 }
 0x141   :  { %83 = vst.msk [vmem:[%s157_s4 + $0x4] sm:$0xf] %vm81_vm1, %v93_v37 }

// kernel: detr_forward.54
= control target key start
LH: loop header
LB: loop body
LE: loop exit
PB: predicated region body
PF: predicated region fallthrough
CT: control target
= control target key end

     0   :  { %s1007_s12 = smov 0   ;;  %s1009_s13 = smov 0   ;;  %s1120_s0 = inlined_call_operand.vmem [shape: bf16[2,8,32], index: 0, kind: input, shape index: {}]   ;;  %s1121_s1 = inlined_call_operand.vmem [shape: bf16[2,8,32], index: 1, kind: input, shape index: {}]   ;;  %s1122_s2 = inlined_call_operand.vmem [shape: bf16[2,8,32], index: 2, kind: input, shape index: {}]   ;;  %s1123_s3 = inlined_call_operand.vmem [shape: bf16[2,8,32], index: 3, kind: output, shape index: {}]  }
   0x1   :  { %s1011_s14 = smov 0  }
   0x2 LB: > { %s25_s15 = sadd.s32 1, %s973_s13  ;;  %p816_p0 = scmp.ge.s32.totalorder %s977_s14, 1  ;;  %s977_s14 = sphi %s1011_s14, %s13_s14   ;;  %s973_s13 = sphi %s1009_s13, %s1125_s13   ;;  %s969_s12 = sphi %s1007_s12, %s1124_s12  }
   0x3   : > { %p27_p1 = scmp.ge.s32.totalorder %s25_s15, 2  ;;  %p173_p2 = scmp.lt.s32.totalorder %s977_s14, 3 }
   0x5   : > { %s1127_s15 = smov (%p27_p1, %s25_s15), 0  ;;  %p174_p3 = pnand %p816_p0, %p173_p2 }
   0x6   : > { %p209_p4 = scmp.lt.s32.totalorder (!%p174_p3), %s969_s12, 1  ;;  %s981_s23 = smov (!%p174_p3), 120  }
   0x7   : > { %177 = sbr.rel (%p174_p3) target bundleno = 1414 (0x586), region = 32  ;;  %s982_s24 = smov (!%p174_p3), 112  }
   0x8   : > { %s983_s25 = smov (!%p174_p3), 104   ;;  %s984_s5 = smov (!%p174_p3), 8  }
   0x9   : > { %s985_s6 = smov (!%p174_p3), 16   ;;  %s986_s7 = smov (!%p174_p3), 24  }
   0xc   : > { %v979_v0 = vmov 0.0   ;;  %vm980_vm0 = vmmov 0   ;;  %s1129_s12 = smov (!%p209_p4, %s969_s12), 1  ;;  %vm235_vm1 = vcmask 64512   ;;  %vm298_vm2 = vcmask 1043456  }
   0xd   : > { %856 = vmatprep.subr.bf16.mxu0 %v979_v0  ;;  %858 = vmatprep.mubr.msk.bf16.mxu0 %vm980_vm0, %v979_v0  ;;  %s1031_s16 = sshll.u32 %s1129_s12, 2  ;;  %vm343_vm3 = vcmask 60416   ;;  %vm472_vm4 = vcmask 126016   ;;  %vm592_vm5 = vcmask 191616   ;;  %vm712_vm6 = vcmask 257216  }
   0xe   : > { %862 = vmatprep.subr.bf16.mxu1 %v979_v0  ;;  %864 = vmatprep.mubr.msk.bf16.mxu1 %vm980_vm0, %v979_v0  ;;  %s219_s19 = scalar_lea.vmem %s1121_s1, %s1031_s16  ;;  %s215_s22 = scalar_lea.vmem %s1120_s0, %s1031_s16 }
   0xf   : > { %v233_v1 = vld [vmem:[%s219_s19] sm:$0xf]  ;;  %s223_s28 = scalar_lea.vmem %s1122_s2, %s1031_s16  ;;  %s1082_s4 = scalar_lea.vmem %s1123_s3, %s1031_s16 }
  0x10   : > { %v240_v2 = vsel %vm235_vm1, %v233_v1, 0  ;;  %v232_v3 = vld [vmem:[%s215_s22] sm:$0xf]  ;;  %v824_v10 = vcombine.low %v233_v1, %v233_v1 }
  0x11   : > { %857 = vmatpush3.bf16.xpose.msra.mxu0 %v240_v2  ;;  %v823_v11 = vcombine.low %v232_v3, %v232_v3  ;;  %v1057_v17 = vld [vmem:[%s223_s28] sm:$0xf] }
  0x12   : > { %874 = vmatprep.subr.bf16.mxu0 %v979_v0  ;;  %353 = vrot.lane.b32.xlu1 %v824_v10, %s981_s23  ;;  %v300_v18 = vsel %vm298_vm2, %v1057_v17, 0  ;;  %v826_v2 = vcombine.low %v1057_v17, %v1057_v17 }
  0x13   : > { %863 = vmatpush3.bf16.msra.mxu1 %v300_v18 }
  0x14   : > { %868 = vmatprep.subr.bf16.mxu1 %v979_v0 }
  0x16   : > { %348 = vrot.lane.b32.xlu1 %v823_v11, %s981_s23 }
  0x18   : > { %859 = vmatmul.mubr.msk.bf16.vlgmr.msra.gmra.mxu0 %vm235_vm1, %v232_v3 }
  0x19   : > { %876 = vmatprep.mubr.msk.bf16.mxu0 %vm980_vm0, %v979_v0 }
  0x1a   : > { %474 = vrot.lane.b32.xlu1 %v823_v11, %s982_s24 }
  0x1e   : > { %596 = vrot.lane.b32.xlu1 %v824_v10, %s983_s25 }
  0x22   : > { %594 = vrot.lane.b32.xlu1 %v823_v11, %s983_s25 }
  0x84   : > { %v354_v21 = vpop.permute.xlu1 %353 }
  0x85   : > { %v359_v23 = vsel %vm235_vm1, %v354_v21, 0 }
  0x88   : > { %v349_v25 = vpop.permute.xlu1 %348 }
  0x8c   : > { %v475_v27 = vpop.permute.xlu1 %474 }
  0x90   : > { %v597_v29 = vpop.permute.xlu1 %596 }
  0x91   : > { %v602_v30 = vsel %vm235_vm1, %v597_v29, 0 }
  0x94   : > { %v595_v31 = vpop.permute.xlu1 %594 }
  0xd8   : > { %v276_v4 = vpop.f32.mrf.mxu0 }
  0xd9   : > { %v282_v5 = vmul.f32 0.35355338, %v276_v4 }
  0xda   : > { %v860_v6 = vpop.f32.mrf.mxu0 }
  0xdb   : > { %v283_v7 = vsel %vm235_vm1, %v282_v5, -inf }
  0xdc   : > { %284 = vmax.xlane.f32.xlu0 %v283_v7  ;;  %v279_v8 = vpop.f32.mrf.mxu0 }
  0xde   : > { %v861_v9 = vpop.f32.mrf.mxu0 }
 0x165   : > { %v285_v12 = vpop.xlane.xlu0 %284 }
 0x166   : > { %v286_v13 = vsub.f32 %v282_v5, %v285_v12 }
 0x168   : > { %v287_v14 = vmul.f32 1.442695, %v286_v13 }
 0x16a   : > { %939 = vpow2.f32 %v287_v14 }
 0x177   : > { %v940_v15 = vpop.eup %939 }
 0x178   : > { %v289_v16 = vsel %vm235_vm1, %v940_v15, 0.0 }
 0x179   : > { %290 = vadd.xlane.f32.xlu0 %v289_v16 }
 0x18f   : > { %476 = vrot.lane.b32.xlu0 %v824_v10, %s982_s24 }
 0x202   : > { %v291_v19 = vpop.xlane.xlu0 %290 }
 0x203   : > { %941 = vrcp.f32 %v291_v19 }
 0x206   : > { %v477_v26 = vpop.permute.xlu0 %476 }
 0x207   : > { %v482_v28 = vsel %vm235_vm1, %v477_v26, 0 }
 0x210   : > { %v942_v20 = vpop.eup %941 }
 0x211   : > { %v293_v22 = vmul.f32 %v942_v20, %v940_v15 }
 0x213   : > { %v294_v24 = vpack.c.bf16 %v293_v22, %v293_v22 }
 0x215   : > { %865 = vmatmul.mubr.msk.bf16.vlgmr.msra.gmra.mxu1 %vm235_vm1, %v294_v24 }
 0x216   : > { %869 = vmatpush3.bf16.xpose.msra.mxu1 %v359_v23  ;;  %870 = vmatprep.mubr.msk.bf16.mxu1 %vm980_vm0, %v979_v0 }
 0x217   : > { %880 = vmatprep.subr.bf16.mxu1 %v979_v0 }
 0x21d   : > { %871 = vmatmul.mubr.msk.bf16.vlgmr.msra.gmra.mxu1 %vm235_vm1, %v349_v25 }
 0x21e   : > { %881 = vmatpush3.bf16.xpose.msra.mxu1 %v482_v28  ;;  %882 = vmatprep.mubr.msk.bf16.mxu1 %vm980_vm0, %v979_v0 }
 0x21f   : > { %892 = vmatprep.subr.bf16.mxu1 %v979_v0 }
 0x225   : > { %883 = vmatmul.mubr.msk.bf16.vlgmr.msra.gmra.mxu1 %vm235_vm1, %v475_v27 }
 0x226   : > { %893 = vmatpush3.bf16.xpose.msra.mxu1 %v602_v30  ;;  %894 = vmatprep.mubr.msk.bf16.mxu1 %vm980_vm0, %v979_v0 }
 0x22d   : > { %895 = vmatmul.mubr.msk.bf16.vlgmr.msra.gmra.mxu1 %vm235_vm1, %v595_v31 }
 0x2d5   : > { %v336_v32 = vpop.f32.mrf.mxu1 }
 0x2d6   : > { %v342_v33 = vpack.c.bf16 %v336_v32, %v336_v32 }
 0x2d7   : > { %v866_v34 = vpop.f32.mrf.mxu1 }
 0x2d8   : > { %344 = vst.msk [vmem:[%s1082_s4] sm:$0xf] %vm343_vm3, %v342_v33 }
 0x2d9   : > { %v339_v35 = vpop.f32.mrf.mxu1 }
 0x2db   : > { %v867_v36 = vpop.f32.mrf.mxu1 }
 0x2dd   : > { %v395_v37 = vpop.f32.mrf.mxu1 }
 0x2de   : > { %v401_v38 = vmul.f32 0.35355338, %v395_v37 }
 0x2df   : > { %v872_v39 = vpop.f32.mrf.mxu1 }
 0x2e0   : > { %v402_v40 = vsel %vm235_vm1, %v401_v38, -inf }
 0x2e1   : > { %403 = vmax.xlane.f32.xlu1 %v402_v40  ;;  %v398_v41 = vpop.f32.mrf.mxu1 }
 0x2e3   : > { %v873_v42 = vpop.f32.mrf.mxu1 }
 0x2e5   : > { %v518_v43 = vpop.f32.mrf.mxu1 }
 0x2e6   : > { %v524_v44 = vmul.f32 0.35355338, %v518_v43 }
 0x2e7   : > { %v884_v45 = vpop.f32.mrf.mxu1 }
 0x2e8   : > { %v525_v46 = vsel %vm235_vm1, %v524_v44, -inf }
 0x2e9   : > { %526 = vmax.xlane.f32.xlu0 %v525_v46  ;;  %v521_v47 = vpop.f32.mrf.mxu1 }
 0x2eb   : > { %v885_v48 = vpop.f32.mrf.mxu1 }
 0x2ed   : > { %v638_v49 = vpop.f32.mrf.mxu1 }
 0x2ee   : > { %v644_v50 = vmul.f32 0.35355338, %v638_v49 }
 0x2ef   : > { %v896_v51 = vpop.f32.mrf.mxu1 }
 0x2f0   : > { %v645_v52 = vsel %vm235_vm1, %v644_v50, -inf }
 0x2f1   : > { %646 = vmax.xlane.f32.xlu1 %v645_v52  ;;  %v641_v53 = vpop.f32.mrf.mxu1 }
 0x2f3   : > { %v897_v54 = vpop.f32.mrf.mxu1 }
 0x36a   : > { %v404_v55 = vpop.xlane.xlu1 %403 }
 0x36b   : > { %v405_v56 = vsub.f32 %v401_v38, %v404_v55 }
 0x36d   : > { %v406_v57 = vmul.f32 1.442695, %v405_v56 }
 0x36f   : > { %943 = vpow2.f32 %v406_v57 }
 0x372   : > { %v527_v58 = vpop.xlane.xlu0 %526 }
 0x373   : > { %v528_v59 = vsub.f32 %v524_v44, %v527_v58 }
 0x375   : > { %v529_v60 = vmul.f32 1.442695, %v528_v59 }
 0x377   : > { %945 = vpow2.f32 %v529_v60 }
 0x37a   : > { %v647_v3 = vpop.xlane.xlu1 %646 }
 0x37b   : > { %v648_v4 = vsub.f32 %v644_v50, %v647_v3 }
 0x37c   : > { %v944_v61 = vpop.eup %943 }
 0x37d   : > { %v408_v62 = vsel %vm235_vm1, %v944_v61, 0.0  ;;  %v649_v5 = vmul.f32 1.442695, %v648_v4 }
 0x37e   : > { %409 = vadd.xlane.f32.xlu1 %v408_v62 }
 0x37f   : > { %947 = vpow2.f32 %v649_v5 }
 0x384   : > { %v946_v63 = vpop.eup %945 }
 0x385   : > { %v531_v1 = vsel %vm235_vm1, %v946_v63, 0.0 }
 0x386   : > { %532 = vadd.xlane.f32.xlu0 %v531_v1 }
 0x38c   : > { %v948_v6 = vpop.eup %947 }
 0x38d   : > { %v651_v7 = vsel %vm235_vm1, %v948_v6, 0.0 }
 0x38f   : > { %537 = vrot.lane.b32.xlu1 %v826_v2, %s982_s24 }
 0x39c   : > { %417 = vrot.lane.b32.xlu0 %v826_v2, %s981_s23 }
 0x3b3   : > { %652 = vadd.xlane.f32.xlu1 %v651_v7 }
 0x3c4   : > { %657 = vrot.lane.b32.xlu1 %v826_v2, %s983_s25 }
 0x407   : > { %v410_v8 = vpop.xlane.xlu1 %409 }
 0x408   : > { %949 = vrcp.f32 %v410_v8 }
 0x40b   : > { %v538_v14 = vpop.permute.xlu1 %537 }
 0x40c   : > { %v543_v16 = vsel %vm298_vm2, %v538_v14, 0 }
 0x40f   : > { %v533_v9 = vpop.xlane.xlu0 %532 }
 0x410   : > { %951 = vrcp.f32 %v533_v9 }
 0x413   : > { %v418_v10 = vpop.permute.xlu0 %417 }
 0x414   : > { %v423_v11 = vsel %vm298_vm2, %v418_v10, 0 }
 0x415   : > { %v950_v12 = vpop.eup %949  ;;  %875 = vmatpush3.bf16.msra.mxu0 %v423_v11 }
 0x416   : > { %886 = vmatprep.subr.bf16.mxu0 %v979_v0  ;;  %v412_v13 = vmul.f32 %v950_v12, %v944_v61 }
 0x418   : > { %v413_v15 = vpack.c.bf16 %v412_v13, %v412_v13 }
 0x41a   : > { %877 = vmatmul.mubr.msk.bf16.vlgmr.msra.gmra.mxu0 %vm235_vm1, %v413_v15 }
 0x41b   : > { %887 = vmatpush3.bf16.msra.mxu0 %v543_v16  ;;  %888 = vmatprep.mubr.msk.bf16.mxu0 %vm980_vm0, %v979_v0 }
 0x41c   : > { %898 = vmatprep.subr.bf16.mxu0 %v979_v0 }
 0x41d   : > { %v952_v17 = vpop.eup %951 }
 0x41e   : > { %v535_v18 = vmul.f32 %v952_v17, %v946_v63 }
 0x420   : > { %v536_v19 = vpack.c.bf16 %v535_v18, %v535_v18 }
 0x422   : > { %889 = vmatmul.mubr.msk.bf16.vlgmr.msra.gmra.mxu0 %vm235_vm1, %v536_v19 }
 0x423   : > { %900 = vmatprep.mubr.msk.bf16.mxu0 %vm980_vm0, %v979_v0 }
 0x43c   : > { %v653_v20 = vpop.xlane.xlu1 %652 }
 0x43d   : > { %953 = vrcp.f32 %v653_v20 }
 0x440   : > { %v658_v21 = vpop.permute.xlu1 %657 }
 0x441   : > { %v663_v22 = vsel %vm298_vm2, %v658_v21, 0 }
 0x442   : > { %899 = vmatpush3.bf16.msra.mxu0 %v663_v22 }
 0x44a   : > { %v954_v23 = vpop.eup %953 }
 0x44b   : > { %v655_v24 = vmul.f32 %v954_v23, %v948_v6 }
 0x44d   : > { %v656_v25 = vpack.c.bf16 %v655_v24, %v655_v24 }
 0x44f   : > { %901 = vmatmul.mubr.msk.bf16.vlgmr.msra.gmra.mxu0 %vm235_vm1, %v656_v25 }
 0x4da   : > { %v459_v26 = vpop.f32.mrf.mxu0 }
 0x4db   : > { %v837_v27 = vpack.c.bf16 %v459_v26, %v459_v26 }
 0x4dc   : > { %v878_v28 = vpop.f32.mrf.mxu0 }
 0x4dd   : > { %469 = vrot.lane.b32.xlu0 %v837_v27, %s984_s5 }
 0x4de   : > { %v462_v29 = vpop.f32.mrf.mxu0 }
 0x4e0   : > { %v879_v30 = vpop.f32.mrf.mxu0 }
 0x4e2   : > { %v579_v31 = vpop.f32.mrf.mxu0 }
 0x4e3   : > { %v838_v0 = vpack.c.bf16 %v579_v31, %v579_v31 }
 0x4e4   : > { %v890_v32 = vpop.f32.mrf.mxu0 }
 0x4e5   : > { %589 = vrot.lane.b32.xlu1 %v838_v0, %s985_s6 }
 0x4e6   : > { %v582_v33 = vpop.f32.mrf.mxu0 }
 0x4e8   : > { %v891_v34 = vpop.f32.mrf.mxu0 }
 0x50f   : > { %v699_v35 = vpop.f32.mrf.mxu0 }
 0x510   : > { %v839_v36 = vpack.c.bf16 %v699_v35, %v699_v35 }
 0x511   : > { %v902_v37 = vpop.f32.mrf.mxu0 }
 0x512   : > { %709 = vrot.lane.b32.xlu0 %v839_v36, %s986_s7 }
 0x513   : > { %v702_v38 = vpop.f32.mrf.mxu0 }
 0x515   : > { %v903_v39 = vpop.f32.mrf.mxu0 }
 0x54f   : > { %v470_v40 = vpop.permute.xlu0 %469 }
 0x550   : > { %473 = vst.msk [vmem:[%s1082_s4] sm:$0xf] %vm472_vm4, %v470_v40 }
 0x557   : > { %v590_v41 = vpop.permute.xlu1 %589 }
 0x558   : > { %593 = vst.msk [vmem:[%s1082_s4] sm:$0xf] %vm592_vm5, %v590_v41 }
 0x584   : > { %v710_v42 = vpop.permute.xlu0 %709 }
 0x585   : > { %713 = vst.msk [vmem:[%s1082_s4] sm:$0xf] %vm712_vm6, %v710_v42 }
 0x586 PF: > { %s13_s14 = sadd.s32 1, %s977_s14   ;;  %s1124_s12 = smov %s973_s13 }
 0x587   : > { %p10_p5 = scmp.ge.s32.totalorder %s13_s14, 4   ;;  %s1125_s13 = smov %s1127_s15 }
 0x589   :  { %12 = sbr.rel (!%p10_p5) target bundleno = 2 (0x2), region = 68 }

// kernel: detr_forward.57
= control target key start
LH: loop header
LB: loop body
LE: loop exit
PB: predicated region body
PF: predicated region fallthrough
CT: control target
= control target key end

     0   :  { %v136_v0 = vmov 0.0   ;;  %vm137_vm0 = vmmov 0   ;;  %vm52_vm1 = vcmask 261120   ;;  %vm105_vm2 = vcmask 257024   ;;  %s190_s2 = inlined_call_operand.vmem [shape: bf16[32,32], index: 2, kind: input, shape index: {}]   ;;  %s191_s0 = inlined_call_operand.vmem [shape: bf16[16,32], index: 0, kind: input, shape index: {}]   ;;  %s192_s1 = inlined_call_operand.vmem [shape: bf16[16,32], index: 1, kind: input, shape index: {}]   ;;  %s193_s3 = inlined_call_operand.vmem [shape: f32[1,32], index: 3, kind: input, shape index: {}]   ;;  %s194_s4 = inlined_call_operand.vmem [shape: bf16[16,32], index: 4, kind: output, shape index: {}]  }
   0x1   :  { %124 = vmatprep.subr.bf16.mxu0 %v136_v0  ;;  %v134_v1 = vld [vmem:[%s190_s2 + $0x8] sm:$0xff]   ;;  %128 = vmatprep.mubr.msk.bf16.mxu0 %vm137_vm0, %v136_v0  ;;  %v135_v2 = vld [vmem:[%s190_s2] sm:$0xff]  }
   0x2   :  { %125 = vmatpush3.bf16.msra.mxu0 %v134_v1  ;;  %v18_v3 = vld [vmem:[%s191_s0] sm:$0xf]  ;;  %v19_v4 = vld [vmem:[%s191_s0 + $0x4] sm:$0xf] }
   0x3   :  { %v20_v5 = vld [vmem:[%s192_s1] sm:$0xf]  ;;  %126 = vmatprep.subr.bf16.mxu0 %v136_v0  ;;  %v21_v6 = vld [vmem:[%s192_s1 + $0x4] sm:$0xf] }
   0x4   :  { %v22_v7 = vadd.bf16 %v20_v5, %v18_v3  ;;  %v23_v8 = vadd.bf16 %v21_v6, %v19_v4  ;;  %v112_v10 = vld [vmem:[%s193_s3] ss:$0 sm:$0xff] }
   0x6   :  { %127 = vmatpush3.bf16.msra.mxu0 %v135_v2  ;;  %v113_v9 = vcombine.low %v22_v7, %v23_v8 }
   0x9   :  { %129 = vmatmul.mubr.msk.bf16.vlgmr.msra.gmra.mxu0 %vm52_vm1, %v113_v9 }
  0xc9   :  { %v90_v11 = vpop.f32.mrf.mxu0 }
  0xca   :  { %v91_v12 = vadd.f32 %v112_v10, %v90_v11 }
  0xcb   :  { %v130_v13 = vpop.f32.mrf.mxu0 }
  0xcc   :  { %v119_v14 = vpack.c.bf16 %v91_v12, %v91_v12 }
  0xcd   :  { %v93_v15 = vpop.f32.mrf.mxu0 }
  0xce   :  { %106 = vst.msk [vmem:[%s194_s4] sm:$0xf] %vm105_vm2, %v119_v14  ;;  %v94_v16 = vadd.f32 %v112_v10, %v93_v15 }
  0xcf   :  { %v131_v17 = vpop.f32.mrf.mxu0 }
  0xd0   :  { %v120_v18 = vpack.c.bf16 %v94_v16, %v94_v16 }
  0xd2   :  { %107 = vst.msk [vmem:[%s194_s4 + $0x4] sm:$0xf] %vm105_vm2, %v120_v18 }

// kernel: detr_forward.39
= control target key start
LH: loop header
LB: loop body
LE: loop exit
PB: predicated region body
PF: predicated region fallthrough
CT: control target
= control target key end

     0   :  { %vm70_vm0 = vcmask 392192   ;;  %vm272_vm1 = vcmask 125952   ;;  %s549_s1 = inlined_call_operand.vmem [shape: bf16[48,16], index: 1, kind: input, shape index: {}]   ;;  %s550_s0 = inlined_call_operand.vmem [shape: f32[128,48], index: 0, kind: input, shape index: {}]   ;;  %s551_s2 = inlined_call_operand.vmem [shape: f32[1,16], index: 2, kind: input, shape index: {}]   ;;  %s552_s3 = inlined_call_operand.vmem [shape: bf16[128,16], index: 3, kind: output, shape index: {}]  }
   0x1   :  { %v376_v0 = vld [vmem:[%s549_s1 + $0x10] sm:$0xff]   ;;  %v377_v1 = vld [vmem:[%s549_s1 + $0x8] sm:$0xff]   ;;  %v15_v2 = vld [vmem:[%s550_s0] sm:$0xff] }
   0x2   :  { %348 = vmatprep.subr.bf16.mxu0 %v376_v0  ;;  %370 = vmatprep.subr.bf16.mxu1 %v376_v0  ;;  %v16_v3 = vld [vmem:[%s550_s0 + $0x8] sm:$0xff]  ;;  %v23_v4 = vld [vmem:[%s550_s0 + $0x40] sm:$0xff]  ;;  %v17_v9 = vld [vmem:[%s550_s0 + $0x10] sm:$0xff] }
   0x3   :  { %349 = vmatpush3.bf16.msra.mxu0 %v376_v0  ;;  %373 = vmatpush3.bf16.msra.mxu1 %v376_v0  ;;  %v378_v5 = vld [vmem:[%s549_s1] sm:$0xff]   ;;  %v31_v6 = vpack.c.bf16 %v16_v3, %v15_v2  ;;  %v24_v7 = vld [vmem:[%s550_s0 + $0x48] sm:$0xff]  ;;  %v18_v10 = vld [vmem:[%s550_s0 + $0x18] sm:$0xff] }
   0x4   :  { %350 = vmatprep.subr.bf16.mxu0 %v377_v1  ;;  %371 = vmatprep.subr.bf16.mxu1 %v377_v1  ;;  %v35_v8 = vpack.c.bf16 %v24_v7, %v23_v4  ;;  %v25_v11 = vld [vmem:[%s550_s0 + $0x50] sm:$0xff]  ;;  %v26_v12 = vld [vmem:[%s550_s0 + $0x58] sm:$0xff]  ;;  %v19_v13 = vld [vmem:[%s550_s0 + $0x20] sm:$0xff]  ;;  %v32_v17 = vpack.c.bf16 %v18_v10, %v17_v9 }
   0x5   :  { %354 = vmatprep.mubr.msk.bf16.mxu0 %vm70_vm0, %v31_v6  ;;  %v20_v14 = vld [vmem:[%s550_s0 + $0x28] sm:$0xff]  ;;  %v27_v15 = vld [vmem:[%s550_s0 + $0x60] sm:$0xff]  ;;  %v36_v18 = vpack.c.bf16 %v26_v12, %v25_v11  ;;  %v21_v21 = vld [vmem:[%s550_s0 + $0x30] sm:$0xff] }
   0x6   :  { %v28_v16 = vld [vmem:[%s550_s0 + $0x68] sm:$0xff]  ;;  %362 = vmatprep.mubr.msk.bf16.mxu1 %vm70_vm0, %v35_v8  ;;  %v33_v19 = vpack.c.bf16 %v20_v14, %v19_v13  ;;  %v22_v22 = vld [vmem:[%s550_s0 + $0x38] sm:$0xff]  ;;  %v29_v23 = vld [vmem:[%s550_s0 + $0x70] sm:$0xff] }
   0x7   :  { %351 = vmatpush3.bf16.msra.mxu0 %v377_v1  ;;  %374 = vmatpush3.bf16.msra.mxu1 %v377_v1  ;;  %v37_v20 = vpack.c.bf16 %v28_v16, %v27_v15  ;;  %v30_v24 = vld [vmem:[%s550_s0 + $0x78] sm:$0xff]  ;;  %v34_v25 = vpack.c.bf16 %v22_v22, %v21_v21  ;;  %v467_v27 = vld [vmem:[%s551_s2] ss:$0 sm:$0xff] }
   0x8   :  { %352 = vmatprep.subr.bf16.mxu0 %v378_v5  ;;  %372 = vmatprep.subr.bf16.mxu1 %v378_v5  ;;  %v38_v26 = vpack.c.bf16 %v30_v24, %v29_v23 }
   0xb   :  { %353 = vmatpush3.bf16.msra.mxu0 %v378_v5  ;;  %375 = vmatpush3.bf16.msra.mxu1 %v378_v5 }
   0xe   :  { %355 = vmatmul.mubr.msk.bf16.vlgmr.msra.gmra.mxu0 %vm70_vm0, %v32_v17  ;;  %363 = vmatmul.mubr.msk.bf16.vlgmr.msra.gmra.mxu1 %vm70_vm0, %v36_v18 }
   0xf   :  { %358 = vmatprep.mubr.msk.bf16.mxu0 %vm70_vm0, %v33_v19  ;;  %366 = vmatprep.mubr.msk.bf16.mxu1 %vm70_vm0, %v37_v20 }
  0x16   :  { %359 = vmatmul.mubr.msk.bf16.gmra.mxu0 %vm70_vm0, %v34_v25  ;;  %367 = vmatmul.mubr.msk.bf16.gmra.mxu1 %vm70_vm0, %v38_v26 }
  0xce   :  { %v356_v28 = vpop.f32.mrf.mxu0  ;;  %v364_v29 = vpop.f32.mrf.mxu1 }
  0xcf   :  { %v138_v30 = vadd.f32 %v356_v28, %v467_v27  ;;  %v170_v31 = vadd.f32 %v364_v29, %v467_v27 }
  0xd0   :  { %v129_v32 = vpop.f32.mrf.mxu0  ;;  %v161_v33 = vpop.f32.mrf.mxu1 }
  0xd1   :  { %v194_v34 = vmax.f32 %v138_v30, 0.0  ;;  %v202_v35 = vmax.f32 %v170_v31, 0.0  ;;  %v130_v36 = vadd.f32 %v467_v27, %v129_v32  ;;  %v162_v37 = vadd.f32 %v467_v27, %v161_v33 }
  0xd2   :  { %v357_v38 = vpop.f32.mrf.mxu0  ;;  %v365_v39 = vpop.f32.mrf.mxu1 }
  0xd3   :  { %v323_v40 = vpack.c.bf16 %v194_v34, %v194_v34  ;;  %v331_v41 = vpack.c.bf16 %v202_v35, %v202_v35  ;;  %v192_v42 = vmax.f32 %v130_v36, 0.0  ;;  %v200_v43 = vmax.f32 %v162_v37, 0.0 }
  0xd4   :  { %v141_v44 = vadd.f32 %v357_v38, %v467_v27  ;;  %v173_v45 = vadd.f32 %v365_v39, %v467_v27  ;;  %v132_v46 = vpop.f32.mrf.mxu0  ;;  %v164_v47 = vpop.f32.mrf.mxu1 }
  0xd5   :  { %275 = vst.msk [vmem:[%s552_s3 + $0x8] sm:$0xf] %vm272_vm1, %v323_v40  ;;  %283 = vst.msk [vmem:[%s552_s3 + $0x28] sm:$0xf] %vm272_vm1, %v331_v41  ;;  %v321_v48 = vpack.c.bf16 %v192_v42, %v192_v42  ;;  %v329_v49 = vpack.c.bf16 %v200_v43, %v200_v43  ;;  %v133_v50 = vadd.f32 %v467_v27, %v132_v46 }
  0xd6   :  { %v165_v51 = vadd.f32 %v467_v27, %v164_v47  ;;  %v195_v52 = vmax.f32 %v141_v44, 0.0  ;;  %v203_v53 = vmax.f32 %v173_v45, 0.0  ;;  %v360_v54 = vpop.f32.mrf.mxu0  ;;  %v368_v55 = vpop.f32.mrf.mxu1 }
  0xd7   :  { %273 = vst.msk [vmem:[%s552_s3] sm:$0xf] %vm272_vm1, %v321_v48  ;;  %281 = vst.msk [vmem:[%s552_s3 + $0x20] sm:$0xf] %vm272_vm1, %v329_v49  ;;  %v193_v56 = vmax.f32 %v133_v50, 0.0  ;;  %v154_v58 = vadd.f32 %v360_v54, %v467_v27  ;;  %v186_v59 = vadd.f32 %v368_v55, %v467_v27 }
  0xd8   :  { %v201_v57 = vmax.f32 %v165_v51, 0.0  ;;  %v324_v60 = vpack.c.bf16 %v195_v52, %v195_v52  ;;  %v332_v61 = vpack.c.bf16 %v203_v53, %v203_v53  ;;  %v145_v62 = vpop.f32.mrf.mxu0  ;;  %v177_v63 = vpop.f32.mrf.mxu1 }
  0xd9   :  { %v322_v0 = vpack.c.bf16 %v193_v56, %v193_v56  ;;  %v198_v2 = vmax.f32 %v154_v58, 0.0  ;;  %v206_v3 = vmax.f32 %v186_v59, 0.0  ;;  %v146_v4 = vadd.f32 %v467_v27, %v145_v62 }
  0xda   :  { %v330_v1 = vpack.c.bf16 %v201_v57, %v201_v57  ;;  %276 = vst.msk [vmem:[%s552_s3 + $0xc] sm:$0xf] %vm272_vm1, %v324_v60  ;;  %284 = vst.msk [vmem:[%s552_s3 + $0x2c] sm:$0xf] %vm272_vm1, %v332_v61  ;;  %v178_v5 = vadd.f32 %v467_v27, %v177_v63  ;;  %v361_v6 = vpop.f32.mrf.mxu0  ;;  %v369_v7 = vpop.f32.mrf.mxu1 }
  0xdb   :  { %274 = vst.msk [vmem:[%s552_s3 + $0x4] sm:$0xf] %vm272_vm1, %v322_v0  ;;  %v327_v8 = vpack.c.bf16 %v198_v2, %v198_v2  ;;  %v335_v9 = vpack.c.bf16 %v206_v3, %v206_v3  ;;  %v157_v10 = vadd.f32 %v361_v6, %v467_v27  ;;  %v189_v11 = vadd.f32 %v369_v7, %v467_v27 }
  0xdc   :  { %282 = vst.msk [vmem:[%s552_s3 + $0x24] sm:$0xf] %vm272_vm1, %v330_v1  ;;  %v196_v12 = vmax.f32 %v146_v4, 0.0  ;;  %v204_v13 = vmax.f32 %v178_v5, 0.0  ;;  %v148_v14 = vpop.f32.mrf.mxu0  ;;  %v180_v15 = vpop.f32.mrf.mxu1 }
  0xdd   :  { %279 = vst.msk [vmem:[%s552_s3 + $0x18] sm:$0xf] %vm272_vm1, %v327_v8  ;;  %287 = vst.msk [vmem:[%s552_s3 + $0x38] sm:$0xf] %vm272_vm1, %v335_v9  ;;  %v199_v16 = vmax.f32 %v157_v10, 0.0  ;;  %v207_v17 = vmax.f32 %v189_v11, 0.0  ;;  %v149_v18 = vadd.f32 %v467_v27, %v148_v14  ;;  %v181_v19 = vadd.f32 %v467_v27, %v180_v15 }
  0xde   :  { %v325_v20 = vpack.c.bf16 %v196_v12, %v196_v12  ;;  %v333_v21 = vpack.c.bf16 %v204_v13, %v204_v13 }
  0xdf   :  { %v328_v22 = vpack.c.bf16 %v199_v16, %v199_v16  ;;  %v336_v23 = vpack.c.bf16 %v207_v17, %v207_v17  ;;  %v197_v24 = vmax.f32 %v149_v18, 0.0  ;;  %v205_v25 = vmax.f32 %v181_v19, 0.0 }
  0xe0   :  { %277 = vst.msk [vmem:[%s552_s3 + $0x10] sm:$0xf] %vm272_vm1, %v325_v20  ;;  %285 = vst.msk [vmem:[%s552_s3 + $0x30] sm:$0xf] %vm272_vm1, %v333_v21 }
  0xe1   :  { %280 = vst.msk [vmem:[%s552_s3 + $0x1c] sm:$0xf] %vm272_vm1, %v328_v22  ;;  %288 = vst.msk [vmem:[%s552_s3 + $0x3c] sm:$0xf] %vm272_vm1, %v336_v23  ;;  %v326_v26 = vpack.c.bf16 %v197_v24, %v197_v24  ;;  %v334_v27 = vpack.c.bf16 %v205_v25, %v205_v25 }
  0xe3   :  { %278 = vst.msk [vmem:[%s552_s3 + $0x14] sm:$0xf] %vm272_vm1, %v326_v26  ;;  %286 = vst.msk [vmem:[%s552_s3 + $0x34] sm:$0xf] %vm272_vm1, %v334_v27 }

// kernel: detr_forward.40
= control target key start
LH: loop header
LB: loop body
LE: loop exit
PB: predicated region body
PF: predicated region fallthrough
CT: control target
= control target key end

     0   :  { %vm86_vm0 = vcmask 130048   ;;  %vm272_vm1 = vcmask 257024   ;;  %s503_s1 = inlined_call_operand.vmem [shape: bf16[16,32], index: 1, kind: input, shape index: {}]   ;;  %s504_s0 = inlined_call_operand.vmem [shape: bf16[128,16], index: 0, kind: input, shape index: {}]   ;;  %s505_s2 = inlined_call_operand.vmem [shape: f32[1,32], index: 2, kind: input, shape index: {}]   ;;  %s506_s3 = inlined_call_operand.vmem [shape: bf16[128,32], index: 3, kind: output, shape index: {}]  }
   0x1   :  { %v372_v0 = vld [vmem:[%s503_s1] sm:$0xff]   ;;  %v375_v3 = vld [vmem:[%s504_s0 + $0x8] sm:$0xff]   ;;  %v377_v5 = vld [vmem:[%s504_s0 + $0x10] sm:$0xff]  }
   0x2   :  { %v373_v1 = vld [vmem:[%s504_s0] sm:$0xff]   ;;  %352 = vmatprep.subr.bf16.mxu0 %v372_v0  ;;  %370 = vmatprep.subr.bf16.mxu1 %v372_v0  ;;  %v376_v4 = vld [vmem:[%s504_s0 + $0x28] sm:$0xff]   ;;  %v378_v6 = vld [vmem:[%s504_s0 + $0x30] sm:$0xff]  }
   0x3   :  { %v374_v2 = vld [vmem:[%s504_s0 + $0x20] sm:$0xff]   ;;  %353 = vmatpush3.bf16.msra.mxu0 %v372_v0  ;;  %371 = vmatpush3.bf16.msra.mxu1 %v372_v0  ;;  %v379_v7 = vld [vmem:[%s504_s0 + $0x18] sm:$0xff]  }
   0x4   :  { %354 = vmatprep.mubr.msk.bf16.mxu0 %vm86_vm0, %v373_v1  ;;  %362 = vmatprep.mubr.msk.bf16.mxu1 %vm86_vm0, %v374_v2  ;;  %v380_v8 = vld [vmem:[%s504_s0 + $0x38] sm:$0xff]   ;;  %v293_v9 = vld [vmem:[%s505_s2] ss:$0 sm:$0xff] }
   0x6   :  { %355 = vmatmul.mubr.msk.bf16.vlgmr.msra.gmra.mxu0 %vm86_vm0, %v375_v3  ;;  %363 = vmatmul.mubr.msk.bf16.vlgmr.msra.gmra.mxu1 %vm86_vm0, %v376_v4 }
   0x7   :  { %358 = vmatprep.mubr.msk.bf16.mxu0 %vm86_vm0, %v377_v5  ;;  %366 = vmatprep.mubr.msk.bf16.mxu1 %vm86_vm0, %v378_v6 }
   0xe   :  { %359 = vmatmul.mubr.msk.bf16.gmra.mxu0 %vm86_vm0, %v379_v7  ;;  %367 = vmatmul.mubr.msk.bf16.gmra.mxu1 %vm86_vm0, %v380_v8 }
  0xc6   :  { %v356_v10 = vpop.f32.mrf.mxu0  ;;  %v364_v11 = vpop.f32.mrf.mxu1 }
  0xc7   :  { %v154_v12 = vadd.f32 %v356_v10, %v293_v9  ;;  %v186_v13 = vadd.f32 %v364_v11, %v293_v9 }
  0xc8   :  { %v145_v14 = vpop.f32.mrf.mxu0  ;;  %v177_v15 = vpop.f32.mrf.mxu1 }
  0xc9   :  { %v329_v16 = vpack.c.bf16 %v154_v12, %v154_v12  ;;  %v337_v17 = vpack.c.bf16 %v186_v13, %v186_v13  ;;  %v146_v18 = vadd.f32 %v293_v9, %v145_v14  ;;  %v178_v19 = vadd.f32 %v293_v9, %v177_v15 }
  0xca   :  { %v357_v20 = vpop.f32.mrf.mxu0  ;;  %v365_v21 = vpop.f32.mrf.mxu1 }
  0xcb   :  { %275 = vst.msk [vmem:[%s506_s3 + $0x8] sm:$0xf] %vm272_vm1, %v329_v16  ;;  %283 = vst.msk [vmem:[%s506_s3 + $0x28] sm:$0xf] %vm272_vm1, %v337_v17  ;;  %v327_v22 = vpack.c.bf16 %v146_v18, %v146_v18  ;;  %v335_v23 = vpack.c.bf16 %v178_v19, %v178_v19  ;;  %v157_v24 = vadd.f32 %v357_v20, %v293_v9 }
  0xcc   :  { %v189_v25 = vadd.f32 %v365_v21, %v293_v9  ;;  %v148_v26 = vpop.f32.mrf.mxu0  ;;  %v180_v27 = vpop.f32.mrf.mxu1 }
  0xcd   :  { %273 = vst.msk [vmem:[%s506_s3] sm:$0xf] %vm272_vm1, %v327_v22  ;;  %281 = vst.msk [vmem:[%s506_s3 + $0x20] sm:$0xf] %vm272_vm1, %v335_v23  ;;  %v330_v28 = vpack.c.bf16 %v157_v24, %v157_v24  ;;  %v149_v30 = vadd.f32 %v293_v9, %v148_v26  ;;  %v181_v31 = vadd.f32 %v293_v9, %v180_v27 }
  0xce   :  { %v338_v29 = vpack.c.bf16 %v189_v25, %v189_v25  ;;  %v360_v32 = vpop.f32.mrf.mxu0  ;;  %v368_v33 = vpop.f32.mrf.mxu1 }
  0xcf   :  { %276 = vst.msk [vmem:[%s506_s3 + $0xc] sm:$0xf] %vm272_vm1, %v330_v28  ;;  %v328_v34 = vpack.c.bf16 %v149_v30, %v149_v30  ;;  %v336_v35 = vpack.c.bf16 %v181_v31, %v181_v31  ;;  %v170_v36 = vadd.f32 %v360_v32, %v293_v9  ;;  %v202_v37 = vadd.f32 %v368_v33, %v293_v9 }
  0xd0   :  { %284 = vst.msk [vmem:[%s506_s3 + $0x2c] sm:$0xf] %vm272_vm1, %v338_v29  ;;  %v161_v38 = vpop.f32.mrf.mxu0  ;;  %v193_v39 = vpop.f32.mrf.mxu1 }
  0xd1   :  { %274 = vst.msk [vmem:[%s506_s3 + $0x4] sm:$0xf] %vm272_vm1, %v328_v34  ;;  %282 = vst.msk [vmem:[%s506_s3 + $0x24] sm:$0xf] %vm272_vm1, %v336_v35  ;;  %v333_v40 = vpack.c.bf16 %v170_v36, %v170_v36  ;;  %v341_v41 = vpack.c.bf16 %v202_v37, %v202_v37  ;;  %v162_v42 = vadd.f32 %v293_v9, %v161_v38 }
  0xd2   :  { %v194_v43 = vadd.f32 %v293_v9, %v193_v39  ;;  %v361_v44 = vpop.f32.mrf.mxu0  ;;  %v369_v45 = vpop.f32.mrf.mxu1 }
  0xd3   :  { %279 = vst.msk [vmem:[%s506_s3 + $0x18] sm:$0xf] %vm272_vm1, %v333_v40  ;;  %287 = vst.msk [vmem:[%s506_s3 + $0x38] sm:$0xf] %vm272_vm1, %v341_v41  ;;  %v331_v46 = vpack.c.bf16 %v162_v42, %v162_v42  ;;  %v173_v48 = vadd.f32 %v361_v44, %v293_v9  ;;  %v205_v49 = vadd.f32 %v369_v45, %v293_v9 }
  0xd4   :  { %v339_v47 = vpack.c.bf16 %v194_v43, %v194_v43  ;;  %v164_v50 = vpop.f32.mrf.mxu0  ;;  %v196_v51 = vpop.f32.mrf.mxu1 }
  0xd5   :  { %277 = vst.msk [vmem:[%s506_s3 + $0x10] sm:$0xf] %vm272_vm1, %v331_v46  ;;  %v334_v52 = vpack.c.bf16 %v173_v48, %v173_v48  ;;  %v342_v53 = vpack.c.bf16 %v205_v49, %v205_v49  ;;  %v165_v54 = vadd.f32 %v293_v9, %v164_v50  ;;  %v197_v55 = vadd.f32 %v293_v9, %v196_v51 }
  0xd6   :  { %285 = vst.msk [vmem:[%s506_s3 + $0x30] sm:$0xf] %vm272_vm1, %v339_v47 }
  0xd7   :  { %280 = vst.msk [vmem:[%s506_s3 + $0x1c] sm:$0xf] %vm272_vm1, %v334_v52  ;;  %288 = vst.msk [vmem:[%s506_s3 + $0x3c] sm:$0xf] %vm272_vm1, %v342_v53  ;;  %v332_v56 = vpack.c.bf16 %v165_v54, %v165_v54  ;;  %v340_v57 = vpack.c.bf16 %v197_v55, %v197_v55 }
  0xd9   :  { %278 = vst.msk [vmem:[%s506_s3 + $0x14] sm:$0xf] %vm272_vm1, %v332_v56  ;;  %286 = vst.msk [vmem:[%s506_s3 + $0x34] sm:$0xf] %vm272_vm1, %v340_v57 }

// kernel: detr_forward.43
= control target key start
LH: loop header
LB: loop body
LE: loop exit
PB: predicated region body
PF: predicated region fallthrough
CT: control target
= control target key end

     0   :  { %vm94_vm0 = vcmask 261120   ;;  %vm280_vm1 = vcmask 257024   ;;  %s521_s1 = inlined_call_operand.vmem [shape: bf16[32,32], index: 1, kind: input, shape index: {}]   ;;  %s522_s0 = inlined_call_operand.vmem [shape: bf16[128,32], index: 0, kind: input, shape index: {}]   ;;  %s523_s2 = inlined_call_operand.vmem [shape: f32[1,32], index: 2, kind: input, shape index: {}]   ;;  %s524_s3 = inlined_call_operand.vmem [shape: bf16[128,32], index: 3, kind: output, shape index: {}]  }
   0x1   :  { %v386_v0 = vld [vmem:[%s521_s1 + $0x8] sm:$0xff]   ;;  %v387_v1 = vld [vmem:[%s521_s1] sm:$0xff]   ;;  %v392_v6 = vld [vmem:[%s522_s0 + $0x10] sm:$0xff]  }
   0x2   :  { %362 = vmatprep.subr.bf16.mxu0 %v386_v0  ;;  %382 = vmatprep.subr.bf16.mxu1 %v386_v0  ;;  %v388_v2 = vld [vmem:[%s522_s0] sm:$0xff]   ;;  %v390_v4 = vld [vmem:[%s522_s0 + $0x8] sm:$0xff]   ;;  %v393_v7 = vld [vmem:[%s522_s0 + $0x30] sm:$0xff]  }
   0x3   :  { %363 = vmatpush3.bf16.msra.mxu0 %v386_v0  ;;  %384 = vmatpush3.bf16.msra.mxu1 %v386_v0  ;;  %v389_v3 = vld [vmem:[%s522_s0 + $0x20] sm:$0xff]   ;;  %v391_v5 = vld [vmem:[%s522_s0 + $0x28] sm:$0xff]   ;;  %v394_v8 = vld [vmem:[%s522_s0 + $0x18] sm:$0xff]  }
   0x4   :  { %364 = vmatprep.subr.bf16.mxu0 %v387_v1  ;;  %383 = vmatprep.subr.bf16.mxu1 %v387_v1  ;;  %v395_v9 = vld [vmem:[%s522_s0 + $0x38] sm:$0xff]   ;;  %v301_v10 = vld [vmem:[%s523_s2] ss:$0 sm:$0xff] }
   0x5   :  { %366 = vmatprep.mubr.msk.bf16.mxu0 %vm94_vm0, %v388_v2  ;;  %374 = vmatprep.mubr.msk.bf16.mxu1 %vm94_vm0, %v389_v3 }
   0x7   :  { %365 = vmatpush3.bf16.msra.mxu0 %v387_v1  ;;  %385 = vmatpush3.bf16.msra.mxu1 %v387_v1 }
   0xa   :  { %367 = vmatmul.mubr.msk.bf16.vlgmr.msra.gmra.mxu0 %vm94_vm0, %v390_v4  ;;  %375 = vmatmul.mubr.msk.bf16.vlgmr.msra.gmra.mxu1 %vm94_vm0, %v391_v5 }
   0xb   :  { %370 = vmatprep.mubr.msk.bf16.mxu0 %vm94_vm0, %v392_v6  ;;  %378 = vmatprep.mubr.msk.bf16.mxu1 %vm94_vm0, %v393_v7 }
  0x12   :  { %371 = vmatmul.mubr.msk.bf16.gmra.mxu0 %vm94_vm0, %v394_v8  ;;  %379 = vmatmul.mubr.msk.bf16.gmra.mxu1 %vm94_vm0, %v395_v9 }
  0xca   :  { %v368_v11 = vpop.f32.mrf.mxu0  ;;  %v376_v12 = vpop.f32.mrf.mxu1 }
  0xcb   :  { %v162_v13 = vadd.f32 %v368_v11, %v301_v10  ;;  %v194_v14 = vadd.f32 %v376_v12, %v301_v10 }
  0xcc   :  { %v153_v15 = vpop.f32.mrf.mxu0  ;;  %v185_v16 = vpop.f32.mrf.mxu1 }
  0xcd   :  { %v338_v17 = vpack.c.bf16 %v162_v13, %v162_v13  ;;  %v346_v18 = vpack.c.bf16 %v194_v14, %v194_v14  ;;  %v154_v19 = vadd.f32 %v301_v10, %v153_v15  ;;  %v186_v20 = vadd.f32 %v301_v10, %v185_v16 }
  0xce   :  { %v369_v21 = vpop.f32.mrf.mxu0  ;;  %v377_v22 = vpop.f32.mrf.mxu1 }
  0xcf   :  { %283 = vst.msk [vmem:[%s524_s3 + $0x8] sm:$0xf] %vm280_vm1, %v338_v17  ;;  %291 = vst.msk [vmem:[%s524_s3 + $0x28] sm:$0xf] %vm280_vm1, %v346_v18  ;;  %v336_v23 = vpack.c.bf16 %v154_v19, %v154_v19  ;;  %v344_v24 = vpack.c.bf16 %v186_v20, %v186_v20  ;;  %v165_v25 = vadd.f32 %v369_v21, %v301_v10 }
  0xd0   :  { %v197_v26 = vadd.f32 %v377_v22, %v301_v10  ;;  %v156_v27 = vpop.f32.mrf.mxu0  ;;  %v188_v28 = vpop.f32.mrf.mxu1 }
  0xd1   :  { %281 = vst.msk [vmem:[%s524_s3] sm:$0xf] %vm280_vm1, %v336_v23  ;;  %289 = vst.msk [vmem:[%s524_s3 + $0x20] sm:$0xf] %vm280_vm1, %v344_v24  ;;  %v339_v29 = vpack.c.bf16 %v165_v25, %v165_v25  ;;  %v157_v31 = vadd.f32 %v301_v10, %v156_v27  ;;  %v189_v32 = vadd.f32 %v301_v10, %v188_v28 }
  0xd2   :  { %v347_v30 = vpack.c.bf16 %v197_v26, %v197_v26  ;;  %v372_v33 = vpop.f32.mrf.mxu0  ;;  %v380_v34 = vpop.f32.mrf.mxu1 }
  0xd3   :  { %284 = vst.msk [vmem:[%s524_s3 + $0xc] sm:$0xf] %vm280_vm1, %v339_v29  ;;  %v337_v35 = vpack.c.bf16 %v157_v31, %v157_v31  ;;  %v345_v36 = vpack.c.bf16 %v189_v32, %v189_v32  ;;  %v178_v37 = vadd.f32 %v372_v33, %v301_v10  ;;  %v210_v38 = vadd.f32 %v380_v34, %v301_v10 }
  0xd4   :  { %292 = vst.msk [vmem:[%s524_s3 + $0x2c] sm:$0xf] %vm280_vm1, %v347_v30  ;;  %v169_v39 = vpop.f32.mrf.mxu0  ;;  %v201_v40 = vpop.f32.mrf.mxu1 }
  0xd5   :  { %282 = vst.msk [vmem:[%s524_s3 + $0x4] sm:$0xf] %vm280_vm1, %v337_v35  ;;  %290 = vst.msk [vmem:[%s524_s3 + $0x24] sm:$0xf] %vm280_vm1, %v345_v36  ;;  %v342_v41 = vpack.c.bf16 %v178_v37, %v178_v37  ;;  %v350_v42 = vpack.c.bf16 %v210_v38, %v210_v38  ;;  %v170_v43 = vadd.f32 %v301_v10, %v169_v39 }
  0xd6   :  { %v202_v44 = vadd.f32 %v301_v10, %v201_v40  ;;  %v373_v45 = vpop.f32.mrf.mxu0  ;;  %v381_v46 = vpop.f32.mrf.mxu1 }
  0xd7   :  { %287 = vst.msk [vmem:[%s524_s3 + $0x18] sm:$0xf] %vm280_vm1, %v342_v41  ;;  %295 = vst.msk [vmem:[%s524_s3 + $0x38] sm:$0xf] %vm280_vm1, %v350_v42  ;;  %v340_v47 = vpack.c.bf16 %v170_v43, %v170_v43  ;;  %v181_v49 = vadd.f32 %v373_v45, %v301_v10  ;;  %v213_v50 = vadd.f32 %v381_v46, %v301_v10 }
  0xd8   :  { %v348_v48 = vpack.c.bf16 %v202_v44, %v202_v44  ;;  %v172_v51 = vpop.f32.mrf.mxu0  ;;  %v204_v52 = vpop.f32.mrf.mxu1 }
  0xd9   :  { %285 = vst.msk [vmem:[%s524_s3 + $0x10] sm:$0xf] %vm280_vm1, %v340_v47  ;;  %v343_v53 = vpack.c.bf16 %v181_v49, %v181_v49  ;;  %v351_v54 = vpack.c.bf16 %v213_v50, %v213_v50  ;;  %v173_v55 = vadd.f32 %v301_v10, %v172_v51  ;;  %v205_v56 = vadd.f32 %v301_v10, %v204_v52 }
  0xda   :  { %293 = vst.msk [vmem:[%s524_s3 + $0x30] sm:$0xf] %vm280_vm1, %v348_v48 }
  0xdb   :  { %288 = vst.msk [vmem:[%s524_s3 + $0x1c] sm:$0xf] %vm280_vm1, %v343_v53  ;;  %296 = vst.msk [vmem:[%s524_s3 + $0x3c] sm:$0xf] %vm280_vm1, %v351_v54  ;;  %v341_v57 = vpack.c.bf16 %v173_v55, %v173_v55  ;;  %v349_v58 = vpack.c.bf16 %v205_v56, %v205_v56 }
  0xdd   :  { %286 = vst.msk [vmem:[%s524_s3 + $0x14] sm:$0xf] %vm280_vm1, %v341_v57  ;;  %294 = vst.msk [vmem:[%s524_s3 + $0x34] sm:$0xf] %vm280_vm1, %v349_v58 }

// kernel: detr_forward.41
= control target key start
LH: loop header
LB: loop body
LE: loop exit
PB: predicated region body
PF: predicated region fallthrough
CT: control target
= control target key end

     0   :  { %vm138_vm0 = vcmask 261120   ;;  %vm508_vm1 = vcmask 257024   ;;  %s856_s9 = smov 96   ;;  %s1284_s2 = inlined_call_operand.vmem [shape: bf16[32,64], index: 2, kind: input, shape index: {}]   ;;  %s1285_s0 = inlined_call_operand.vmem [shape: bf16[128,32], index: 0, kind: input, shape index: {}]   ;;  %s1286_s1 = inlined_call_operand.vmem [shape: bf16[128,32], index: 1, kind: input, shape index: {}]   ;;  %s1287_s4 = inlined_call_operand.vmem [shape: bf16[32,32], index: 4, kind: input, shape index: {}]   ;;  %s1288_s3 = inlined_call_operand.vmem [shape: f32[1,64], index: 3, kind: input, shape index: {}]   ;;  %s1289_s6 = inlined_call_operand.vmem [shape: bf16[128,32], index: 6, kind: output, shape index: {0}]   ;;  %s1290_s5 = inlined_call_operand.vmem [shape: f32[1,32], index: 5, kind: input, shape index: {}]   ;;  %s1291_s8 = inlined_call_operand.vmem [shape: bf16[128,32], index: 8, kind: output, shape index: {2}]   ;;  %s1292_s7 = inlined_call_operand.vmem [shape: bf16[128,32], index: 7, kind: output, shape index: {1}]  }
   0x1   :  { %v844_v0 = vld [vmem:[%s1284_s2 + $0x8] sm:$0xff]   ;;  %v845_v1 = vld [vmem:[%s1284_s2] sm:$0xff]   ;;  %v31_v13 = vld [vmem:[%s1285_s0 + $0x10] sm:$0xf] }
   0x2   :  { %803 = vmatprep.subr.bf16.mxu0 %v844_v0  ;;  %v27_v2 = vld [vmem:[%s1285_s0] sm:$0xf]  ;;  %v28_v3 = vld [vmem:[%s1285_s0 + $0x4] sm:$0xf]  ;;  %v923_v7 = vld [vmem:[%s1285_s0 + $0x8] sm:$0xf] }
   0x3   :  { %v43_v4 = vld [vmem:[%s1286_s1] sm:$0xf]  ;;  %804 = vmatpush3.bf16.msra.mxu0 %v844_v0  ;;  %v44_v5 = vld [vmem:[%s1286_s1 + $0x4] sm:$0xf]  ;;  %v928_v8 = vld [vmem:[%s1285_s0 + $0xc] sm:$0xf]  ;;  %v701_v9 = vcombine.low %v27_v2, %v28_v3 }
   0x4   :  { %v59_v6 = vadd.bf16 %v43_v4, %v27_v2  ;;  %805 = vmatprep.subr.bf16.mxu0 %v845_v1  ;;  %v60_v10 = vadd.bf16 %v44_v5, %v28_v3  ;;  %v45_v11 = vld [vmem:[%s1286_s1 + $0x8] sm:$0xf]  ;;  %v46_v12 = vld [vmem:[%s1286_s1 + $0xc] sm:$0xf]  ;;  %v32_v16 = vld [vmem:[%s1285_s0 + $0x14] sm:$0xf]  ;;  %v702_v52 = vcombine.low %v923_v7, %v928_v8 }
   0x5   :  { %v61_v14 = vadd.bf16 %v45_v11, %v923_v7  ;;  %v62_v15 = vadd.bf16 %v46_v12, %v928_v8  ;;  %v47_v17 = vld [vmem:[%s1286_s1 + $0x10] sm:$0xf]  ;;  %v48_v18 = vld [vmem:[%s1286_s1 + $0x14] sm:$0xf]  ;;  %827 = vmatprep.mubr.msk.bf16.mxu1 %vm138_vm0, %v701_v9  ;;  %v33_v22 = vld [vmem:[%s1285_s0 + $0x18] sm:$0xf]  ;;  %v703_v53 = vcombine.low %v31_v13, %v32_v16 }
   0x6   :  { %v682_v19 = vcombine.low %v59_v6, %v60_v10  ;;  %v63_v20 = vadd.bf16 %v47_v17, %v31_v13  ;;  %v64_v21 = vadd.bf16 %v48_v18, %v32_v16  ;;  %v34_v23 = vld [vmem:[%s1285_s0 + $0x1c] sm:$0xf]  ;;  %v49_v25 = vld [vmem:[%s1286_s1 + $0x18] sm:$0xf]  ;;  %v35_v27 = vld [vmem:[%s1285_s0 + $0x20] sm:$0xf] }
   0x7   :  { %806 = vmatpush3.bf16.msra.mxu0 %v845_v1  ;;  %v683_v24 = vcombine.low %v61_v14, %v62_v15  ;;  %v50_v26 = vld [vmem:[%s1286_s1 + $0x1c] sm:$0xf]  ;;  %v36_v29 = vld [vmem:[%s1285_s0 + $0x24] sm:$0xf]  ;;  %v51_v30 = vld [vmem:[%s1286_s1 + $0x20] sm:$0xf]  ;;  %v65_v32 = vadd.bf16 %v49_v25, %v33_v22  ;;  %v704_v62 = vcombine.low %v33_v22, %v34_v23 }
   0x8   :  { %807 = vmatprep.mubr.msk.bf16.mxu0 %vm138_vm0, %v682_v19  ;;  %v684_v28 = vcombine.low %v63_v20, %v64_v21  ;;  %v52_v31 = vld [vmem:[%s1286_s1 + $0x24] sm:$0xf]  ;;  %v66_v33 = vadd.bf16 %v50_v26, %v34_v23  ;;  %v67_v34 = vadd.bf16 %v51_v30, %v35_v27  ;;  %v37_v36 = vld [vmem:[%s1285_s0 + $0x28] sm:$0xf]  ;;  %v38_v39 = vld [vmem:[%s1285_s0 + $0x2c] sm:$0xf]  ;;  %v705_v63 = vcombine.low %v35_v27, %v36_v29 }
   0x9   :  { %v68_v35 = vadd.bf16 %v52_v31, %v36_v29  ;;  %v846_v37 = vld [vmem:[%s1287_s4 + $0x8] sm:$0xff]   ;;  %v847_v40 = vld [vmem:[%s1287_s4] sm:$0xff]   ;;  %v39_v44 = vld [vmem:[%s1285_s0 + $0x30] sm:$0xf]  ;;  %v706_v1 = vcombine.low %v37_v36, %v38_v39 }
   0xa   :  { %808 = vmatmul.mubr.msk.bf16.vlgmr.msra.gmra.mxu0 %vm138_vm0, %v683_v24  ;;  %v685_v38 = vcombine.low %v65_v32, %v66_v33  ;;  %v53_v42 = vld [vmem:[%s1286_s1 + $0x28] sm:$0xf]  ;;  %v54_v43 = vld [vmem:[%s1286_s1 + $0x2c] sm:$0xf]  ;;  %823 = vmatprep.subr.bf16.mxu1 %v846_v37  ;;  %v40_v45 = vld [vmem:[%s1285_s0 + $0x34] sm:$0xf] }
   0xb   :  { %811 = vmatprep.mubr.msk.bf16.mxu0 %vm138_vm0, %v684_v28  ;;  %v686_v41 = vcombine.low %v67_v34, %v68_v35  ;;  %v55_v46 = vld [vmem:[%s1286_s1 + $0x30] sm:$0xf]  ;;  %v56_v47 = vld [vmem:[%s1286_s1 + $0x34] sm:$0xf]  ;;  %824 = vmatpush3.bf16.msra.mxu1 %v846_v37  ;;  %v69_v48 = vadd.bf16 %v53_v42, %v37_v36  ;;  %v70_v49 = vadd.bf16 %v54_v43, %v38_v39  ;;  %v41_v55 = vld [vmem:[%s1285_s0 + $0x38] sm:$0xf] }
   0xc   :  { %825 = vmatprep.subr.bf16.mxu1 %v847_v40  ;;  %v71_v50 = vadd.bf16 %v55_v46, %v39_v44  ;;  %v72_v51 = vadd.bf16 %v56_v47, %v40_v45  ;;  %v42_v57 = vld [vmem:[%s1285_s0 + $0x3c] sm:$0xf]  ;;  %v57_v58 = vld [vmem:[%s1286_s1 + $0x38] sm:$0xf]  ;;  %v707_v2 = vcombine.low %v39_v44, %v40_v45  ;;  %v1037_v4 = vld [vmem:[%s1288_s3] ss:$0 sm:$0xff] }
   0xd   :  { %v687_v54 = vcombine.low %v69_v48, %v70_v49  ;;  %v58_v59 = vld [vmem:[%s1286_s1 + $0x3c] sm:$0xf]  ;;  %v73_v60 = vadd.bf16 %v57_v58, %v41_v55  ;;  %v708_v3 = vcombine.low %v41_v55, %v42_v57  ;;  %v1068_v22 = vld [vmem:[%s1290_s5] ss:$0 sm:$0xff] }
   0xe   :  { %v688_v56 = vcombine.low %v71_v50, %v72_v51  ;;  %v74_v61 = vadd.bf16 %v58_v59, %v42_v57 }
   0xf   :  { %826 = vmatpush3.bf16.msra.mxu1 %v847_v40 }
  0x10   :  { %v689_v0 = vcombine.low %v73_v60, %v74_v61 }
  0x12   :  { %812 = vmatmul.mubr.msk.bf16.gmra.mxu0 %vm138_vm0, %v685_v38  ;;  %828 = vmatmul.mubr.msk.bf16.vlgmr.msra.gmra.mxu1 %vm138_vm0, %v702_v52 }
  0x13   :  { %815 = vmatprep.mubr.msk.bf16.mxu0 %vm138_vm0, %v686_v41  ;;  %831 = vmatprep.mubr.msk.bf16.mxu1 %vm138_vm0, %v703_v53 }
  0x1a   :  { %816 = vmatmul.mubr.msk.bf16.gmra.mxu0 %vm138_vm0, %v687_v54  ;;  %832 = vmatmul.mubr.msk.bf16.gmra.mxu1 %vm138_vm0, %v704_v62 }
  0x1b   :  { %819 = vmatprep.mubr.msk.bf16.mxu0 %vm138_vm0, %v688_v56  ;;  %835 = vmatprep.mubr.msk.bf16.mxu1 %vm138_vm0, %v705_v63 }
  0x22   :  { %820 = vmatmul.mubr.msk.bf16.gmra.mxu0 %vm138_vm0, %v689_v0  ;;  %836 = vmatmul.mubr.msk.bf16.gmra.mxu1 %vm138_vm0, %v706_v1 }
  0x23   :  { %839 = vmatprep.mubr.msk.bf16.mxu1 %vm138_vm0, %v707_v2 }
  0x2a   :  { %840 = vmatmul.mubr.msk.bf16.gmra.mxu1 %vm138_vm0, %v708_v3 }
  0xca   :  { %v809_v5 = vpop.f32.mrf.mxu0 }
  0xcb   :  { %v206_v6 = vadd.f32 %v809_v5, %v1037_v4 }
  0xcc   :  { %v197_v7 = vpop.f32.mrf.mxu0 }
  0xcd   :  { %v753_v8 = vpack.c.bf16 %v206_v6, %v206_v6  ;;  %v198_v9 = vadd.f32 %v1037_v4, %v197_v7 }
  0xce   :  { %v810_v10 = vpop.f32.mrf.mxu0 }
  0xcf   :  { %511 = vst.msk [vmem:[%s1289_s6 + $0x8] sm:$0xf] %vm508_vm1, %v753_v8  ;;  %v751_v11 = vpack.c.bf16 %v198_v9, %v198_v9  ;;  %v209_v12 = vadd.f32 %v810_v10, %v1037_v4  ;;  %529 = vrot.lane.b32.xlu1 %v753_v8, %s856_s9 }
  0xd0   :  { %v200_v13 = vpop.f32.mrf.mxu0 }
  0xd1   :  { %509 = vst.msk [vmem:[%s1289_s6] sm:$0xf] %vm508_vm1, %v751_v11  ;;  %v754_v14 = vpack.c.bf16 %v209_v12, %v209_v12  ;;  %v201_v15 = vadd.f32 %v1037_v4, %v200_v13  ;;  %525 = vrot.lane.b32.xlu0 %v751_v11, %s856_s9 }
  0xd2   :  { %v813_v16 = vpop.f32.mrf.mxu0  ;;  %v829_v26 = vpop.f32.mrf.mxu1 }
  0xd3   :  { %512 = vst.msk [vmem:[%s1289_s6 + $0xc] sm:$0xf] %vm508_vm1, %v754_v14  ;;  %v752_v17 = vpack.c.bf16 %v201_v15, %v201_v15  ;;  %v222_v18 = vadd.f32 %v813_v16, %v1037_v4  ;;  %531 = vrot.lane.b32.xlu1 %v754_v14, %s856_s9  ;;  %v390_v28 = vadd.f32 %v829_v26, %v1068_v22 }
  0xd4   :  { %v213_v19 = vpop.f32.mrf.mxu0  ;;  %v381_v31 = vpop.f32.mrf.mxu1 }
  0xd5   :  { %510 = vst.msk [vmem:[%s1289_s6 + $0x4] sm:$0xf] %vm508_vm1, %v752_v17  ;;  %v757_v20 = vpack.c.bf16 %v222_v18, %v222_v18  ;;  %v214_v21 = vadd.f32 %v1037_v4, %v213_v19  ;;  %527 = vrot.lane.b32.xlu0 %v752_v17, %s856_s9  ;;  %v769_v33 = vpack.c.bf16 %v390_v28, %v390_v28 }
  0xd6   :  { %v814_v23 = vpop.f32.mrf.mxu0  ;;  %v382_v34 = vadd.f32 %v1068_v22, %v381_v31  ;;  %v830_v37 = vpop.f32.mrf.mxu1 }
  0xd7   :  { %515 = vst.msk [vmem:[%s1289_s6 + $0x18] sm:$0xf] %vm508_vm1, %v757_v20  ;;  %v755_v24 = vpack.c.bf16 %v214_v21, %v214_v21  ;;  %v225_v25 = vadd.f32 %v814_v23, %v1037_v4  ;;  %655 = vst.msk [vmem:[%s1291_s8 + $0x8] sm:$0xf] %vm508_vm1, %v769_v33  ;;  %v393_v40 = vadd.f32 %v830_v37, %v1068_v22 }
  0xd8   :  { %v216_v27 = vpop.f32.mrf.mxu0  ;;  %v767_v39 = vpack.c.bf16 %v382_v34, %v382_v34  ;;  %v384_v43 = vpop.f32.mrf.mxu1 }
  0xd9   :  { %513 = vst.msk [vmem:[%s1289_s6 + $0x10] sm:$0xf] %vm508_vm1, %v755_v24  ;;  %v758_v29 = vpack.c.bf16 %v225_v25, %v225_v25  ;;  %v217_v30 = vadd.f32 %v1037_v4, %v216_v27  ;;  %537 = vrot.lane.b32.xlu0 %v757_v20, %s856_s9  ;;  %v770_v45 = vpack.c.bf16 %v393_v40, %v393_v40 }
  0xda   :  { %v817_v32 = vpop.f32.mrf.mxu0  ;;  %653 = vst.msk [vmem:[%s1291_s8] sm:$0xf] %vm508_vm1, %v767_v39  ;;  %v385_v46 = vadd.f32 %v1068_v22, %v384_v43  ;;  %v833_v49 = vpop.f32.mrf.mxu1 }
  0xdb   :  { %516 = vst.msk [vmem:[%s1289_s6 + $0x1c] sm:$0xf] %vm508_vm1, %v758_v29  ;;  %v756_v35 = vpack.c.bf16 %v217_v30, %v217_v30  ;;  %v238_v36 = vadd.f32 %v817_v32, %v1037_v4  ;;  %539 = vrot.lane.b32.xlu1 %v758_v29, %s856_s9  ;;  %656 = vst.msk [vmem:[%s1291_s8 + $0xc] sm:$0xf] %vm508_vm1, %v770_v45  ;;  %v406_v52 = vadd.f32 %v833_v49, %v1068_v22 }
  0xdc   :  { %v229_v38 = vpop.f32.mrf.mxu0  ;;  %v768_v51 = vpack.c.bf16 %v385_v46, %v385_v46  ;;  %v397_v55 = vpop.f32.mrf.mxu1 }
  0xdd   :  { %514 = vst.msk [vmem:[%s1289_s6 + $0x14] sm:$0xf] %vm508_vm1, %v756_v35  ;;  %v761_v41 = vpack.c.bf16 %v238_v36, %v238_v36  ;;  %v230_v42 = vadd.f32 %v1037_v4, %v229_v38  ;;  %533 = vrot.lane.b32.xlu0 %v755_v24, %s856_s9  ;;  %v773_v57 = vpack.c.bf16 %v406_v52, %v406_v52 }
  0xde   :  { %v818_v44 = vpop.f32.mrf.mxu0  ;;  %654 = vst.msk [vmem:[%s1291_s8 + $0x4] sm:$0xf] %vm508_vm1, %v768_v51  ;;  %v398_v58 = vadd.f32 %v1068_v22, %v397_v55  ;;  %v834_v61 = vpop.f32.mrf.mxu1 }
  0xdf   :  { %519 = vst.msk [vmem:[%s1289_s6 + $0x28] sm:$0xf] %vm508_vm1, %v761_v41  ;;  %v759_v47 = vpack.c.bf16 %v230_v42, %v230_v42  ;;  %v241_v48 = vadd.f32 %v818_v44, %v1037_v4  ;;  %535 = vrot.lane.b32.xlu1 %v756_v35, %s856_s9  ;;  %659 = vst.msk [vmem:[%s1291_s8 + $0x18] sm:$0xf] %vm508_vm1, %v773_v57  ;;  %v409_v0 = vadd.f32 %v834_v61, %v1068_v22 }
  0xe0   :  { %v232_v50 = vpop.f32.mrf.mxu0  ;;  %v771_v63 = vpack.c.bf16 %v398_v58, %v398_v58  ;;  %v400_v3 = vpop.f32.mrf.mxu1 }
  0xe1   :  { %517 = vst.msk [vmem:[%s1289_s6 + $0x20] sm:$0xf] %vm508_vm1, %v759_v47  ;;  %v762_v53 = vpack.c.bf16 %v241_v48, %v241_v48  ;;  %v233_v54 = vadd.f32 %v1037_v4, %v232_v50  ;;  %545 = vrot.lane.b32.xlu0 %v761_v41, %s856_s9  ;;  %v774_v6 = vpack.c.bf16 %v409_v0, %v409_v0 }
  0xe2   :  { %v821_v56 = vpop.f32.mrf.mxu0  ;;  %657 = vst.msk [vmem:[%s1291_s8 + $0x10] sm:$0xf] %vm508_vm1, %v771_v63  ;;  %v401_v7 = vadd.f32 %v1068_v22, %v400_v3  ;;  %v837_v10 = vpop.f32.mrf.mxu1 }
  0xe3   :  { %520 = vst.msk [vmem:[%s1289_s6 + $0x2c] sm:$0xf] %vm508_vm1, %v762_v53  ;;  %v760_v59 = vpack.c.bf16 %v233_v54, %v233_v54  ;;  %v254_v60 = vadd.f32 %v821_v56, %v1037_v4  ;;  %547 = vrot.lane.b32.xlu1 %v762_v53, %s856_s9  ;;  %660 = vst.msk [vmem:[%s1291_s8 + $0x1c] sm:$0xf] %vm508_vm1, %v774_v6  ;;  %v422_v13 = vadd.f32 %v837_v10, %v1068_v22 }
  0xe4   :  { %v245_v62 = vpop.f32.mrf.mxu0  ;;  %v772_v12 = vpack.c.bf16 %v401_v7, %v401_v7  ;;  %v413_v16 = vpop.f32.mrf.mxu1 }
  0xe5   :  { %518 = vst.msk [vmem:[%s1289_s6 + $0x24] sm:$0xf] %vm508_vm1, %v760_v59  ;;  %v765_v1 = vpack.c.bf16 %v254_v60, %v254_v60  ;;  %v246_v2 = vadd.f32 %v1037_v4, %v245_v62  ;;  %541 = vrot.lane.b32.xlu0 %v759_v47, %s856_s9  ;;  %v777_v17 = vpack.c.bf16 %v422_v13, %v422_v13 }
  0xe6   :  { %v822_v5 = vpop.f32.mrf.mxu0  ;;  %658 = vst.msk [vmem:[%s1291_s8 + $0x14] sm:$0xf] %vm508_vm1, %v772_v12  ;;  %v414_v18 = vadd.f32 %v1068_v22, %v413_v16  ;;  %v838_v20 = vpop.f32.mrf.mxu1 }
  0xe7   :  { %523 = vst.msk [vmem:[%s1289_s6 + $0x38] sm:$0xf] %vm508_vm1, %v765_v1  ;;  %v763_v8 = vpack.c.bf16 %v246_v2, %v246_v2  ;;  %v257_v9 = vadd.f32 %v822_v5, %v1037_v4  ;;  %543 = vrot.lane.b32.xlu1 %v760_v59, %s856_s9  ;;  %663 = vst.msk [vmem:[%s1291_s8 + $0x28] sm:$0xf] %vm508_vm1, %v777_v17  ;;  %v425_v21 = vadd.f32 %v838_v20, %v1068_v22 }
  0xe8   :  { %v248_v11 = vpop.f32.mrf.mxu0  ;;  %v416_v23 = vpop.f32.mrf.mxu1 }
  0xe9   :  { %521 = vst.msk [vmem:[%s1289_s6 + $0x30] sm:$0xf] %vm508_vm1, %v763_v8  ;;  %v766_v14 = vpack.c.bf16 %v257_v9, %v257_v9  ;;  %v249_v15 = vadd.f32 %v1037_v4, %v248_v11  ;;  %549 = vrot.lane.b32.xlu0 %v763_v8, %s856_s9  ;;  %v775_v4 = vpack.c.bf16 %v414_v18, %v414_v18 }
  0xea   :  { %v778_v24 = vpack.c.bf16 %v425_v21, %v425_v21  ;;  %v417_v25 = vadd.f32 %v1068_v22, %v416_v23  ;;  %v841_v26 = vpop.f32.mrf.mxu1 }
  0xeb   :  { %524 = vst.msk [vmem:[%s1289_s6 + $0x3c] sm:$0xf] %vm508_vm1, %v766_v14  ;;  %v764_v19 = vpack.c.bf16 %v249_v15, %v249_v15  ;;  %661 = vst.msk [vmem:[%s1291_s8 + $0x20] sm:$0xf] %vm508_vm1, %v775_v4  ;;  %v438_v28 = vadd.f32 %v841_v26, %v1068_v22 }
  0xec   :  { %664 = vst.msk [vmem:[%s1291_s8 + $0x2c] sm:$0xf] %vm508_vm1, %v778_v24  ;;  %v776_v27 = vpack.c.bf16 %v417_v25, %v417_v25  ;;  %v429_v29 = vpop.f32.mrf.mxu1 }
  0xed   :  { %522 = vst.msk [vmem:[%s1289_s6 + $0x34] sm:$0xf] %vm508_vm1, %v764_v19  ;;  %551 = vrot.lane.b32.xlu1 %v764_v19, %s856_s9  ;;  %553 = vrot.lane.b32.xlu0 %v765_v1, %s856_s9  ;;  %v781_v30 = vpack.c.bf16 %v438_v28, %v438_v28  ;;  %v430_v31 = vadd.f32 %v1068_v22, %v429_v29 }
  0xee   :  { %662 = vst.msk [vmem:[%s1291_s8 + $0x24] sm:$0xf] %vm508_vm1, %v776_v27  ;;  %v842_v32 = vpop.f32.mrf.mxu1 }
  0xef   :  { %667 = vst.msk [vmem:[%s1291_s8 + $0x38] sm:$0xf] %vm508_vm1, %v781_v30  ;;  %v779_v33 = vpack.c.bf16 %v430_v31, %v430_v31  ;;  %v441_v34 = vadd.f32 %v842_v32, %v1068_v22 }
  0xf0   :  { %v432_v35 = vpop.f32.mrf.mxu1 }
  0xf1   :  { %555 = vrot.lane.b32.xlu1 %v766_v14, %s856_s9  ;;  %665 = vst.msk [vmem:[%s1291_s8 + $0x30] sm:$0xf] %vm508_vm1, %v779_v33  ;;  %v782_v36 = vpack.c.bf16 %v441_v34, %v441_v34  ;;  %v433_v37 = vadd.f32 %v1068_v22, %v432_v35 }
  0xf3   :  { %668 = vst.msk [vmem:[%s1291_s8 + $0x3c] sm:$0xf] %vm508_vm1, %v782_v36  ;;  %v780_v38 = vpack.c.bf16 %v433_v37, %v433_v37 }
  0xf5   :  { %666 = vst.msk [vmem:[%s1291_s8 + $0x34] sm:$0xf] %vm508_vm1, %v780_v38 }
 0x141   :  { %v530_v39 = vpop.permute.xlu1 %529 }
 0x142   :  { %575 = vst.msk [vmem:[%s1292_s7 + $0x8] sm:$0xf] %vm508_vm1, %v530_v39 }
 0x143   :  { %v526_v40 = vpop.permute.xlu0 %525 }
 0x144   :  { %573 = vst.msk [vmem:[%s1292_s7] sm:$0xf] %vm508_vm1, %v526_v40 }
 0x145   :  { %v532_v22 = vpop.permute.xlu1 %531 }
 0x146   :  { %576 = vst.msk [vmem:[%s1292_s7 + $0xc] sm:$0xf] %vm508_vm1, %v532_v22 }
 0x147   :  { %v528_v41 = vpop.permute.xlu0 %527 }
 0x148   :  { %574 = vst.msk [vmem:[%s1292_s7 + $0x4] sm:$0xf] %vm508_vm1, %v528_v41 }
 0x14b   :  { %v538_v42 = vpop.permute.xlu0 %537 }
 0x14c   :  { %579 = vst.msk [vmem:[%s1292_s7 + $0x18] sm:$0xf] %vm508_vm1, %v538_v42 }
 0x14d   :  { %v540_v43 = vpop.permute.xlu1 %539 }
 0x14e   :  { %580 = vst.msk [vmem:[%s1292_s7 + $0x1c] sm:$0xf] %vm508_vm1, %v540_v43 }
 0x14f   :  { %v534_v44 = vpop.permute.xlu0 %533 }
 0x150   :  { %577 = vst.msk [vmem:[%s1292_s7 + $0x10] sm:$0xf] %vm508_vm1, %v534_v44 }
 0x151   :  { %v536_v45 = vpop.permute.xlu1 %535 }
 0x152   :  { %578 = vst.msk [vmem:[%s1292_s7 + $0x14] sm:$0xf] %vm508_vm1, %v536_v45 }
 0x153   :  { %v546_v46 = vpop.permute.xlu0 %545 }
 0x154   :  { %583 = vst.msk [vmem:[%s1292_s7 + $0x28] sm:$0xf] %vm508_vm1, %v546_v46 }
 0x155   :  { %v548_v47 = vpop.permute.xlu1 %547 }
 0x156   :  { %584 = vst.msk [vmem:[%s1292_s7 + $0x2c] sm:$0xf] %vm508_vm1, %v548_v47 }
 0x157   :  { %v542_v48 = vpop.permute.xlu0 %541 }
 0x158   :  { %581 = vst.msk [vmem:[%s1292_s7 + $0x20] sm:$0xf] %vm508_vm1, %v542_v48 }
 0x159   :  { %v544_v49 = vpop.permute.xlu1 %543 }
 0x15a   :  { %582 = vst.msk [vmem:[%s1292_s7 + $0x24] sm:$0xf] %vm508_vm1, %v544_v49 }
 0x15b   :  { %v550_v50 = vpop.permute.xlu0 %549 }
 0x15c   :  { %585 = vst.msk [vmem:[%s1292_s7 + $0x30] sm:$0xf] %vm508_vm1, %v550_v50 }
 0x15f   :  { %v552_v51 = vpop.permute.xlu1 %551  ;;  %v554_v52 = vpop.permute.xlu0 %553 }
 0x160   :  { %586 = vst.msk [vmem:[%s1292_s7 + $0x34] sm:$0xf] %vm508_vm1, %v552_v51  ;;  %587 = vst.msk [vmem:[%s1292_s7 + $0x38] sm:$0xf] %vm508_vm1, %v554_v52 }
 0x163   :  { %v556_v53 = vpop.permute.xlu1 %555 }
 0x164   :  { %588 = vst.msk [vmem:[%s1292_s7 + $0x3c] sm:$0xf] %vm508_vm1, %v556_v53 }

// kernel: detr_forward.42
= control target key start
LH: loop header
LB: loop body
LE: loop exit
PB: predicated region body
PF: predicated region fallthrough
CT: control target
= control target key end

     0   :  { %s2376_s12 = smov 0   ;;  %s2378_s13 = smov 0   ;;  %s2925_s0 = inlined_call_operand.vmem [shape: bf16[2,64,32], index: 0, kind: input, shape index: {}]   ;;  %s2926_s1 = inlined_call_operand.vmem [shape: bf16[2,64,32], index: 1, kind: input, shape index: {}]   ;;  %s2927_s2 = inlined_call_operand.vmem [shape: bf16[2,64,32], index: 2, kind: input, shape index: {}]   ;;  %s2928_s3 = inlined_call_operand.vmem [shape: bf16[2,64,32], index: 3, kind: output, shape index: {}]  }
   0x1   :  { %s2380_s14 = smov 0  }
   0x2 LB: > { %s25_s15 = sadd.s32 1, %s2344_s13  ;;  %p1816_p0 = scmp.ge.s32.totalorder %s2348_s14, 1  ;;  %s2348_s14 = sphi %s2380_s14, %s13_s14   ;;  %s2344_s13 = sphi %s2378_s13, %s2930_s13   ;;  %s2340_s12 = sphi %s2376_s12, %s2929_s12  }
   0x3   : > { %p27_p1 = scmp.ge.s32.totalorder %s25_s15, 2  ;;  %p178_p2 = scmp.lt.s32.totalorder %s2348_s14, 3 }
   0x5   : > { %s2932_s15 = smov (%p27_p1, %s25_s15), 0  ;;  %p179_p3 = pnand %p1816_p0, %p178_p2 }
   0x6   : > { %p221_p4 = scmp.lt.s32.totalorder (!%p179_p3), %s2340_s12, 1  ;;  %s2350_s26 = smov (!%p179_p3), 120  }
   0x7   : > { %182 = sbr.rel (%p179_p3) target bundleno = 2653 (0xa5d), region = 32  ;;  %s2351_s30 = smov (!%p179_p3), 112  }
   0x8   : > { %s2352_s4 = smov (!%p179_p3), 104   ;;  %s2353_s5 = smov (!%p179_p3), 8  }
   0x9   : > { %s2354_s6 = smov (!%p179_p3), 16   ;;  %s2355_s7 = smov (!%p179_p3), 24  }
   0xc   : > { %s2934_s12 = smov (!%p221_p4, %s2340_s12), 1  ;;  %vm315_vm0 = vcmask 64512   ;;  %vm413_vm1 = vcmask 523264   ;;  %vm639_vm2 = vcmask 60416   ;;  %vm990_vm3 = vcmask 126016  }
   0xd   : > { %s2394_s16 = sshll.u32 %s2934_s12, 5  ;;  %vm1341_vm4 = vcmask 191616   ;;  %vm1692_vm5 = vcmask 257216  }
   0xe   : > { %s2400_s19 = scalar_lea.vmem %s2926_s1, %s2394_s16  ;;  %s2412_s22 = scalar_lea.vmem %s2925_s0, %s2394_s16 }
   0xf   : > { %v2403_v0 = vld [vmem:[%s2400_s19 + $0x18] sm:$0xff]   ;;  %v2406_v1 = vld [vmem:[%s2400_s19 + $0x10] sm:$0xff]   ;;  %v2421_v3 = vld [vmem:[%s2412_s22] sm:$0xff]   ;;  %s2498_s25 = scalar_lea.vmem %s2927_s2, %s2394_s16  ;;  %s2566_s29 = scalar_lea.vmem %s2928_s3, %s2394_s16 }
  0x10   : > { %2131 = vmatprep.subr.msk.bf16.mxu0 %vm315_vm0, %v2403_v0  ;;  %v338_v2 = vsel %vm315_vm0, %v2403_v0, 0  ;;  %2011 = vmatprep.mubr.msk.bf16.mxu0 %vm315_vm0, %v2421_v3  ;;  %v335_v4 = vsel %vm315_vm0, %v2406_v1, 0  ;;  %v2428_v5 = vld [vmem:[%s2400_s19 + $0x8] sm:$0xff]   ;;  %v2435_v7 = vld [vmem:[%s2400_s19] sm:$0xff]   ;;  %v2445_v10 = vld [vmem:[%s2412_s22 + $0x10] sm:$0xff]  }
  0x11   : > { %2004 = vmatpush3.bf16.xpose.msra.mxu0 %v338_v2  ;;  %v332_v6 = vsel %vm315_vm0, %v2428_v5, 0  ;;  %v329_v8 = vsel %vm315_vm0, %v2435_v7, 0  ;;  %v2442_v9 = vld [vmem:[%s2412_s22 + $0x8] sm:$0xff]   ;;  %v2452_v11 = vld [vmem:[%s2412_s22 + $0x18] sm:$0xff]  }
  0x12   : > { %2132 = vmatprep.subr.msk.bf16.mxu0 %vm315_vm0, %v2406_v1 }
  0x19   : > { %2006 = vmatpush3.bf16.xpose.msra.mxu0 %v335_v4 }
  0x1a   : > { %2133 = vmatprep.subr.msk.bf16.mxu0 %vm315_vm0, %v2428_v5 }
  0x21   : > { %2008 = vmatpush3.bf16.xpose.msra.mxu0 %v332_v6  ;;  %v2501_v6 = vld [vmem:[%s2498_s25 + $0x18] sm:$0xff]  }
  0x22   : > { %2134 = vmatprep.subr.msk.bf16.mxu0 %vm315_vm0, %v2435_v7  ;;  %2019 = vmatprep.subr.bf16.mxu1 %v2501_v6 }
  0x23   : > { %2020 = vmatpush3.bf16.msra.mxu1 %v2501_v6 }
  0x29   : > { %2010 = vmatpush3.bf16.xpose.msra.mxu0 %v329_v8  ;;  %v2506_v8 = vld [vmem:[%s2498_s25 + $0x10] sm:$0xff]  }
  0x2a   : > { %2021 = vmatprep.subr.bf16.mxu1 %v2506_v8 }
  0x2b   : > { %2022 = vmatpush3.bf16.msra.mxu1 %v2506_v8 }
  0x30   : > { %2012 = vmatmul.mubr.msk.bf16.vlgmr.msra.gmra.mxu0 %vm315_vm0, %v2442_v9 }
  0x31   : > { %2015 = vmatprep.mubr.msk.bf16.mxu0 %vm315_vm0, %v2445_v10 }
  0x38   : > { %2016 = vmatmul.mubr.msk.bf16.gmra.mxu0 %vm315_vm0, %v2452_v11 }
  0xf0   : > { %v2013_v12 = vpop.f32.mrf.mxu0 }
  0xf1   : > { %v407_v13 = vmul.f32 0.35355338, %v2013_v12  ;;  %v2513_v12 = vld [vmem:[%s2498_s25 + $0x8] sm:$0xff]  }
  0xf2   : > { %v374_v14 = vpop.f32.mrf.mxu0  ;;  %2023 = vmatprep.subr.bf16.mxu1 %v2513_v12 }
  0xf3   : > { %v405_v15 = vmul.f32 0.35355338, %v374_v14  ;;  %v420_v16 = vsel %vm413_vm1, %v407_v13, -inf  ;;  %2024 = vmatpush3.bf16.msra.mxu1 %v2513_v12 }
  0xf4   : > { %421 = vmax.xlane.f32.xlu1 %v420_v16  ;;  %v2014_v17 = vpop.f32.mrf.mxu0 }
  0xf5   : > { %v408_v18 = vmul.f32 0.35355338, %v2014_v17  ;;  %v414_v19 = vsel %vm413_vm1, %v405_v15, -inf }
  0xf6   : > { %415 = vmax.xlane.f32.xlu0 %v414_v19  ;;  %v377_v20 = vpop.f32.mrf.mxu0 }
  0xf7   : > { %v406_v21 = vmul.f32 0.35355338, %v377_v20  ;;  %v423_v22 = vsel %vm413_vm1, %v408_v18, -inf }
  0xf8   : > { %424 = vmax.xlane.f32.xlu1 %v423_v22  ;;  %v2017_v23 = vpop.f32.mrf.mxu0 }
  0xf9   : > { %v417_v24 = vsel %vm413_vm1, %v406_v21, -inf  ;;  %v411_v26 = vmul.f32 0.35355338, %v2017_v23 }
  0xfa   : > { %418 = vmax.xlane.f32.xlu0 %v417_v24  ;;  %v390_v25 = vpop.f32.mrf.mxu0 }
  0xfb   : > { %v409_v27 = vmul.f32 0.35355338, %v390_v25  ;;  %v432_v33 = vsel %vm413_vm1, %v411_v26, -inf }
  0xfc   : > { %v2018_v28 = vpop.f32.mrf.mxu0 }
  0xfd   : > { %v426_v29 = vsel %vm413_vm1, %v409_v27, -inf  ;;  %v2461_v31 = vmul.f32 0.35355338, %v2018_v28 }
  0xfe   : > { %427 = vmax.xlane.f32.xlu0 %v426_v29  ;;  %v393_v30 = vpop.f32.mrf.mxu0 }
  0xff   : > { %v2463_v32 = vmul.f32 0.35355338, %v393_v30  ;;  %v435_v35 = vsel %vm413_vm1, %v2461_v31, -inf }
 0x101   : > { %v429_v34 = vsel %vm413_vm1, %v2463_v32, -inf }
 0x102   : > { %433 = vmax.xlane.f32.xlu0 %v432_v33  ;;  %430 = vmax.xlane.f32.xlu1 %v429_v34 }
 0x106   : > { %436 = vmax.xlane.f32.xlu1 %v435_v35 }
 0x17d   : > { %v422_v36 = vpop.xlane.xlu1 %421 }
 0x17e   : > { %v440_v37 = vsub.f32 %v407_v13, %v422_v36  ;;  %v2516_v13 = vld [vmem:[%s2498_s25] sm:$0xff]  }
 0x17f   : > { %v416_v38 = vpop.xlane.xlu0 %415  ;;  %2025 = vmatprep.subr.bf16.mxu1 %v2516_v13 }
 0x180   : > { %v450_v39 = vmul.f32 1.442695, %v440_v37  ;;  %v438_v40 = vsub.f32 %v405_v15, %v416_v38  ;;  %2026 = vmatpush3.bf16.msra.mxu1 %v2516_v13 }
 0x181   : > { %v425_v41 = vpop.xlane.xlu1 %424 }
 0x182   : > { %2189 = vpow2.f32 %v450_v39  ;;  %v446_v42 = vmul.f32 1.442695, %v438_v40  ;;  %v441_v43 = vsub.f32 %v408_v18, %v425_v41 }
 0x183   : > { %v419_v44 = vpop.xlane.xlu0 %418 }
 0x184   : > { %2191 = vpow2.f32 %v446_v42  ;;  %v452_v45 = vmul.f32 1.442695, %v441_v43  ;;  %v439_v46 = vsub.f32 %v406_v21, %v419_v44 }
 0x186   : > { %2193 = vpow2.f32 %v452_v45  ;;  %v448_v47 = vmul.f32 1.442695, %v439_v46 }
 0x187   : > { %v428_v48 = vpop.xlane.xlu0 %427 }
 0x188   : > { %2195 = vpow2.f32 %v448_v47  ;;  %v442_v49 = vsub.f32 %v409_v27, %v428_v48 }
 0x18a   : > { %v454_v52 = vmul.f32 1.442695, %v442_v49 }
 0x18b   : > { %v434_v50 = vpop.xlane.xlu0 %433  ;;  %v431_v14 = vpop.xlane.xlu1 %430 }
 0x18c   : > { %v444_v51 = vsub.f32 %v411_v26, %v434_v50  ;;  %v443_v17 = vsub.f32 %v2463_v32, %v431_v14 }
 0x18e   : > { %v458_v53 = vmul.f32 1.442695, %v444_v51  ;;  %v456_v19 = vmul.f32 1.442695, %v443_v17 }
 0x18f   : > { %v2470_v54 = vpop.eup %2189  ;;  %v437_v15 = vpop.xlane.xlu1 %436 }
 0x190   : > { %2197 = vpow2.f32 %v458_v53  ;;  %v468_v55 = vsel %vm413_vm1, %v2470_v54, 0.0  ;;  %v445_v16 = vsub.f32 %v2461_v31, %v437_v15 }
 0x191   : > { %v2474_v56 = vpop.eup %2191  ;;  %469 = vadd.xlane.f32.xlu0 %v468_v55  ;;  %2199 = vpow2.f32 %v454_v52 }
 0x192   : > { %v462_v58 = vsel %vm413_vm1, %v2474_v56, 0.0  ;;  %v460_v18 = vmul.f32 1.442695, %v445_v16 }
 0x193   : > { %v2476_v57 = vpop.eup %2193 }
 0x194   : > { %v471_v59 = vsel %vm413_vm1, %v2476_v57, 0.0  ;;  %2201 = vpow2.f32 %v460_v18 }
 0x195   : > { %v2482_v60 = vpop.eup %2195  ;;  %463 = vadd.xlane.f32.xlu0 %v462_v58  ;;  %472 = vadd.xlane.f32.xlu1 %v471_v59  ;;  %2203 = vpow2.f32 %v456_v19 }
 0x196   : > { %v465_v61 = vsel %vm413_vm1, %v2482_v60, 0.0 }
 0x199   : > { %466 = vadd.xlane.f32.xlu1 %v465_v61 }
 0x19d   : > { %v2486_v62 = vpop.eup %2197 }
 0x19e   : > { %v480_v63 = vsel %vm413_vm1, %v2486_v62, 0.0  ;;  %v2490_v2 = vpop.eup %2199 }
 0x19f   : > { %481 = vadd.xlane.f32.xlu0 %v480_v63  ;;  %v474_v4 = vsel %vm413_vm1, %v2490_v2, 0.0 }
 0x1a1   : > { %v2202_v20 = vpop.eup %2201 }
 0x1a2   : > { %v483_v21 = vsel %vm413_vm1, %v2202_v20, 0.0  ;;  %v2204_v22 = vpop.eup %2203 }
 0x1a3   : > { %475 = vadd.xlane.f32.xlu0 %v474_v4  ;;  %v477_v23 = vsel %vm413_vm1, %v2204_v22, 0.0 }
 0x1aa   : > { %660 = vrot.lane.b32.xlu1 %v2406_v1, %s2350_s26 }
 0x1ae   : > { %658 = vrot.lane.b32.xlu1 %v2428_v5, %s2350_s26 }
 0x1b9   : > { %662 = vrot.lane.b32.xlu0 %v2403_v0, %s2350_s26 }
 0x1bd   : > { %648 = vrot.lane.b32.xlu0 %v2421_v3, %s2350_s26 }
 0x1c1   : > { %652 = vrot.lane.b32.xlu0 %v2445_v10, %s2350_s26 }
 0x1d2   : > { %484 = vadd.xlane.f32.xlu1 %v483_v21 }
 0x1d6   : > { %478 = vadd.xlane.f32.xlu1 %v477_v23 }
 0x1e7   : > { %656 = vrot.lane.b32.xlu1 %v2435_v7, %s2350_s26 }
 0x1eb   : > { %650 = vrot.lane.b32.xlu1 %v2442_v9, %s2350_s26 }
 0x1ef   : > { %654 = vrot.lane.b32.xlu1 %v2452_v11, %s2350_s26 }
 0x21a   : > { %v470_v24 = vpop.xlane.xlu0 %469 }
 0x21e   : > { %v464_v25 = vpop.xlane.xlu0 %463  ;;  %v473_v26 = vpop.xlane.xlu1 %472 }
 0x21f   : > { %2205 = vrcp.f32 %v473_v26 }
 0x220   : > { %2207 = vrcp.f32 %v464_v25 }
 0x221   : > { %2209 = vrcp.f32 %v470_v24 }
 0x222   : > { %v467_v27 = vpop.xlane.xlu1 %466 }
 0x223   : > { %2211 = vrcp.f32 %v467_v27 }
 0x226   : > { %v661_v42 = vpop.permute.xlu1 %660 }
 0x227   : > { %v683_v43 = vsel %vm315_vm0, %v661_v42, 0 }
 0x228   : > { %v482_v28 = vpop.xlane.xlu0 %481 }
 0x22a   : > { %v659_v44 = vpop.permute.xlu1 %658 }
 0x22b   : > { %v680_v45 = vsel %vm315_vm0, %v659_v44, 0 }
 0x22c   : > { %v476_v29 = vpop.xlane.xlu0 %475  ;;  %v2206_v30 = vpop.eup %2205 }
 0x22d   : > { %v2208_v31 = vpop.eup %2207  ;;  %v497_v35 = vmul.f32 %v2206_v30, %v2476_v57 }
 0x22e   : > { %v2210_v32 = vpop.eup %2209  ;;  %v494_v36 = vmul.f32 %v2208_v31, %v2474_v56 }
 0x22f   : > { %v496_v38 = vmul.f32 %v2210_v32, %v2470_v54 }
 0x230   : > { %v2212_v33 = vpop.eup %2211  ;;  %v663_v34 = vpop.permute.xlu0 %662 }
 0x231   : > { %v495_v37 = vmul.f32 %v2212_v33, %v2482_v60  ;;  %2135 = vmatprep.subr.msk.bf16.mxu1 %vm315_vm0, %v663_v34  ;;  %v503_v40 = vpack.c.bf16 %v497_v35, %v496_v38  ;;  %v686_v41 = vsel %vm315_vm0, %v663_v34, 0 }
 0x233   : > { %v502_v39 = vpack.c.bf16 %v495_v37, %v494_v36 }
 0x234   : > { %v649_v60 = vpop.permute.xlu0 %648 }
 0x235   : > { %2027 = vmatprep.mubr.msk.bf16.mxu1 %vm413_vm1, %v502_v39 }
 0x236   : > { %2028 = vmatmul.mubr.msk.bf16.vlgmr.msra.gmra.mxu1 %vm413_vm1, %v503_v40 }
 0x237   : > { %2036 = vmatpush3.bf16.xpose.msra.mxu1 %v686_v41 }
 0x238   : > { %2136 = vmatprep.subr.msk.bf16.mxu1 %vm315_vm0, %v661_v42  ;;  %v653_v63 = vpop.permute.xlu0 %652 }
 0x23f   : > { %2038 = vmatpush3.bf16.xpose.msra.mxu1 %v683_v43 }
 0x240   : > { %2137 = vmatprep.subr.msk.bf16.mxu1 %vm315_vm0, %v659_v44 }
 0x247   : > { %2040 = vmatpush3.bf16.xpose.msra.mxu1 %v680_v45 }
 0x25b   : > { %v485_v46 = vpop.xlane.xlu1 %484 }
 0x25c   : > { %2213 = vrcp.f32 %v485_v46 }
 0x25d   : > { %2215 = vrcp.f32 %v476_v29 }
 0x25e   : > { %2217 = vrcp.f32 %v482_v28 }
 0x25f   : > { %v479_v47 = vpop.xlane.xlu1 %478 }
 0x260   : > { %2219 = vrcp.f32 %v479_v47 }
 0x263   : > { %v657_v48 = vpop.permute.xlu1 %656 }
 0x264   : > { %2138 = vmatprep.subr.msk.bf16.mxu1 %vm315_vm0, %v657_v48  ;;  %v677_v49 = vsel %vm315_vm0, %v657_v48, 0 }
 0x265   : > { %2042 = vmatpush3.bf16.xpose.msra.mxu1 %v677_v49 }
 0x267   : > { %v651_v61 = vpop.permute.xlu1 %650 }
 0x269   : > { %v2214_v50 = vpop.eup %2213 }
 0x26a   : > { %v2216_v51 = vpop.eup %2215  ;;  %v501_v54 = vmul.f32 %v2214_v50, %v2202_v20 }
 0x26b   : > { %v2218_v52 = vpop.eup %2217  ;;  %v498_v55 = vmul.f32 %v2216_v51, %v2490_v2  ;;  %v655_v4 = vpop.permute.xlu1 %654 }
 0x26c   : > { %v500_v57 = vmul.f32 %v2218_v52, %v2486_v62 }
 0x26d   : > { %v2220_v53 = vpop.eup %2219 }
 0x26e   : > { %v499_v56 = vmul.f32 %v2220_v53, %v2204_v22  ;;  %v505_v59 = vpack.c.bf16 %v501_v54, %v500_v57 }
 0x270   : > { %v504_v58 = vpack.c.bf16 %v499_v56, %v498_v55 }
 0x272   : > { %2031 = vmatprep.mubr.msk.bf16.mxu1 %vm413_vm1, %v504_v58 }
 0x273   : > { %2032 = vmatmul.mubr.msk.bf16.gmra.mxu1 %vm413_vm1, %v505_v59 }
 0x274   : > { %2043 = vmatprep.mubr.msk.bf16.mxu1 %vm315_vm0, %v649_v60 }
 0x27b   : > { %2044 = vmatmul.mubr.msk.bf16.vlgmr.msra.gmra.mxu1 %vm315_vm0, %v651_v61 }
 0x27c   : > { %2047 = vmatprep.mubr.msk.bf16.mxu1 %vm315_vm0, %v653_v63 }
 0x283   : > { %2048 = vmatmul.mubr.msk.bf16.gmra.mxu1 %vm315_vm0, %v655_v4 }
 0x2f6   : > { %v2029_v62 = vpop.f32.mrf.mxu1 }
 0x2f7   : > { %v1909_v2 = vpack.c.bf16 %v2029_v62, %v2029_v62 }
 0x2f8   : > { %v576_v14 = vpop.f32.mrf.mxu1 }
 0x2f9   : > { %642 = vst.msk [vmem:[%s2566_s29 + $0x8] sm:$0xf] %vm639_vm2, %v1909_v2  ;;  %v1907_v15 = vpack.c.bf16 %v576_v14, %v576_v14 }
 0x2fa   : > { %v2030_v16 = vpop.f32.mrf.mxu1 }
 0x2fb   : > { %640 = vst.msk [vmem:[%s2566_s29] sm:$0xf] %vm639_vm2, %v1907_v15  ;;  %v1910_v17 = vpack.c.bf16 %v2030_v16, %v2030_v16 }
 0x2fc   : > { %v579_v18 = vpop.f32.mrf.mxu1 }
 0x2fd   : > { %643 = vst.msk [vmem:[%s2566_s29 + $0xc] sm:$0xf] %vm639_vm2, %v1910_v17  ;;  %v1908_v19 = vpack.c.bf16 %v579_v18, %v579_v18 }
 0x2ff   : > { %641 = vst.msk [vmem:[%s2566_s29 + $0x4] sm:$0xf] %vm639_vm2, %v1908_v19 }
 0x333   : > { %v2033_v20 = vpop.f32.mrf.mxu1 }
 0x334   : > { %v1913_v21 = vpack.c.bf16 %v2033_v20, %v2033_v20 }
 0x335   : > { %v592_v22 = vpop.f32.mrf.mxu1 }
 0x336   : > { %646 = vst.msk [vmem:[%s2566_s29 + $0x18] sm:$0xf] %vm639_vm2, %v1913_v21  ;;  %v1911_v23 = vpack.c.bf16 %v592_v22, %v592_v22 }
 0x337   : > { %v2034_v24 = vpop.f32.mrf.mxu1 }
 0x338   : > { %644 = vst.msk [vmem:[%s2566_s29 + $0x10] sm:$0xf] %vm639_vm2, %v1911_v23  ;;  %v1914_v25 = vpack.c.bf16 %v2034_v24, %v2034_v24 }
 0x339   : > { %v595_v26 = vpop.f32.mrf.mxu1 }
 0x33a   : > { %647 = vst.msk [vmem:[%s2566_s29 + $0x1c] sm:$0xf] %vm639_vm2, %v1914_v25  ;;  %v1912_v27 = vpack.c.bf16 %v595_v26, %v595_v26 }
 0x33b   : > { %v2045_v28 = vpop.f32.mrf.mxu1 }
 0x33c   : > { %645 = vst.msk [vmem:[%s2566_s29 + $0x14] sm:$0xf] %vm639_vm2, %v1912_v27  ;;  %v755_v32 = vmul.f32 0.35355338, %v2045_v28 }
 0x33d   : > { %v722_v29 = vpop.f32.mrf.mxu1 }
 0x33e   : > { %v753_v30 = vmul.f32 0.35355338, %v722_v29  ;;  %v767_v38 = vsel %vm413_vm1, %v755_v32, -inf }
 0x33f   : > { %v2046_v31 = vpop.f32.mrf.mxu1 }
 0x340   : > { %v761_v33 = vsel %vm413_vm1, %v753_v30, -inf  ;;  %v756_v37 = vmul.f32 0.35355338, %v2046_v31 }
 0x341   : > { %762 = vmax.xlane.f32.xlu0 %v761_v33  ;;  %v725_v34 = vpop.f32.mrf.mxu1 }
 0x342   : > { %v754_v35 = vmul.f32 0.35355338, %v725_v34  ;;  %v770_v44 = vsel %vm413_vm1, %v756_v37, -inf }
 0x343   : > { %v2049_v36 = vpop.f32.mrf.mxu1 }
 0x344   : > { %v764_v39 = vsel %vm413_vm1, %v754_v35, -inf  ;;  %v759_v41 = vmul.f32 0.35355338, %v2049_v36 }
 0x345   : > { %768 = vmax.xlane.f32.xlu0 %v767_v38  ;;  %765 = vmax.xlane.f32.xlu1 %v764_v39  ;;  %v738_v40 = vpop.f32.mrf.mxu1 }
 0x346   : > { %v757_v46 = vmul.f32 0.35355338, %v738_v40  ;;  %v779_v49 = vsel %vm413_vm1, %v759_v41, -inf }
 0x347   : > { %v2050_v42 = vpop.f32.mrf.mxu1 }
 0x348   : > { %v760_v43 = vmul.f32 0.35355338, %v2050_v42  ;;  %v773_v51 = vsel %vm413_vm1, %v757_v46, -inf }
 0x349   : > { %771 = vmax.xlane.f32.xlu0 %v770_v44  ;;  %v741_v45 = vpop.f32.mrf.mxu1 }
 0x34a   : > { %v782_v47 = vsel %vm413_vm1, %v760_v43, -inf  ;;  %v758_v48 = vmul.f32 0.35355338, %v741_v45 }
 0x34b   : > { %783 = vmax.xlane.f32.xlu1 %v782_v47 }
 0x34c   : > { %v776_v50 = vsel %vm413_vm1, %v758_v48, -inf }
 0x34d   : > { %780 = vmax.xlane.f32.xlu0 %v779_v49 }
 0x34f   : > { %777 = vmax.xlane.f32.xlu1 %v776_v50 }
 0x351   : > { %774 = vmax.xlane.f32.xlu0 %v773_v51 }
 0x360   : > { %857 = vrot.lane.b32.xlu1 %v2506_v8, %s2350_s26 }
 0x364   : > { %855 = vrot.lane.b32.xlu1 %v2513_v12, %s2350_s26 }
 0x367   : > { %859 = vrot.lane.b32.xlu0 %v2501_v6, %s2350_s26 }
 0x368   : > { %853 = vrot.lane.b32.xlu1 %v2516_v13, %s2350_s26 }
 0x3ca   : > { %v763_v52 = vpop.xlane.xlu0 %762 }
 0x3cb   : > { %v785_v53 = vsub.f32 %v753_v30, %v763_v52 }
 0x3cd   : > { %v793_v57 = vmul.f32 1.442695, %v785_v53 }
 0x3ce   : > { %v769_v54 = vpop.xlane.xlu0 %768  ;;  %v766_v55 = vpop.xlane.xlu1 %765 }
 0x3cf   : > { %v787_v56 = vsub.f32 %v755_v32, %v769_v54  ;;  %v786_v59 = vsub.f32 %v754_v35, %v766_v55 }
 0x3d1   : > { %v797_v58 = vmul.f32 1.442695, %v787_v56  ;;  %v795_v4 = vmul.f32 1.442695, %v786_v59 }
 0x3d2   : > { %v772_v60 = vpop.xlane.xlu0 %771 }
 0x3d3   : > { %2221 = vpow2.f32 %v797_v58  ;;  %v788_v61 = vsub.f32 %v756_v37, %v772_v60 }
 0x3d4   : > { %v784_v63 = vpop.xlane.xlu1 %783  ;;  %2223 = vpow2.f32 %v793_v57 }
 0x3d5   : > { %v799_v62 = vmul.f32 1.442695, %v788_v61  ;;  %v792_v2 = vsub.f32 %v760_v43, %v784_v63 }
 0x3d6   : > { %v781_v14 = vpop.xlane.xlu0 %780 }
 0x3d7   : > { %2225 = vpow2.f32 %v799_v62  ;;  %v791_v15 = vsub.f32 %v759_v41, %v781_v14  ;;  %v807_v17 = vmul.f32 1.442695, %v792_v2 }
 0x3d8   : > { %v778_v16 = vpop.xlane.xlu1 %777  ;;  %2227 = vpow2.f32 %v795_v4 }
 0x3d9   : > { %v805_v18 = vmul.f32 1.442695, %v791_v15  ;;  %v790_v19 = vsub.f32 %v758_v48, %v778_v16 }
 0x3da   : > { %v775_v20 = vpop.xlane.xlu0 %774 }
 0x3db   : > { %2229 = vpow2.f32 %v805_v18  ;;  %v789_v21 = vsub.f32 %v757_v46, %v775_v20  ;;  %v803_v23 = vmul.f32 1.442695, %v790_v19 }
 0x3dc   : > { %v858_v22 = vpop.permute.xlu1 %857  ;;  %2231 = vpow2.f32 %v807_v17 }
 0x3dd   : > { %v801_v24 = vmul.f32 1.442695, %v789_v21 }
 0x3de   : > { %v860_v25 = vpop.permute.xlu0 %859 }
 0x3df   : > { %2233 = vpow2.f32 %v801_v24  ;;  %2051 = vmatprep.subr.bf16.mxu0 %v860_v25 }
 0x3e0   : > { %v2600_v26 = vpop.eup %2221  ;;  %2052 = vmatpush3.bf16.msra.mxu0 %v860_v25  ;;  %v856_v27 = vpop.permute.xlu1 %855  ;;  %2235 = vpow2.f32 %v803_v23 }
 0x3e1   : > { %v815_v28 = vsel %vm413_vm1, %v2600_v26, 0.0  ;;  %2053 = vmatprep.subr.bf16.mxu0 %v858_v22  ;;  %v2224_v29 = vpop.eup %2223 }
 0x3e2   : > { %816 = vadd.xlane.f32.xlu0 %v815_v28  ;;  %v809_v31 = vsel %vm413_vm1, %v2224_v29, 0.0 }
 0x3e4   : > { %v2226_v30 = vpop.eup %2225  ;;  %2054 = vmatpush3.bf16.msra.mxu0 %v858_v22  ;;  %v854_v34 = vpop.permute.xlu1 %853 }
 0x3e5   : > { %v818_v32 = vsel %vm413_vm1, %v2226_v30, 0.0  ;;  %2055 = vmatprep.subr.bf16.mxu0 %v856_v27  ;;  %v2228_v33 = vpop.eup %2227 }
 0x3e6   : > { %810 = vadd.xlane.f32.xlu0 %v809_v31  ;;  %819 = vadd.xlane.f32.xlu1 %v818_v32  ;;  %v812_v37 = vsel %vm413_vm1, %v2228_v33, 0.0 }
 0x3e8   : > { %v2606_v35 = vpop.eup %2229  ;;  %2056 = vmatpush3.bf16.msra.mxu0 %v856_v27 }
 0x3e9   : > { %v827_v36 = vsel %vm413_vm1, %v2606_v35, 0.0  ;;  %2057 = vmatprep.subr.bf16.mxu0 %v854_v34  ;;  %v2232_v38 = vpop.eup %2231 }
 0x3ea   : > { %828 = vadd.xlane.f32.xlu0 %v827_v36  ;;  %813 = vadd.xlane.f32.xlu1 %v812_v37  ;;  %v830_v41 = vsel %vm413_vm1, %v2232_v38, 0.0 }
 0x3ec   : > { %v2234_v39 = vpop.eup %2233  ;;  %2058 = vmatpush3.bf16.msra.mxu0 %v854_v34 }
 0x3ed   : > { %v821_v40 = vsel %vm413_vm1, %v2234_v39, 0.0  ;;  %v2236_v42 = vpop.eup %2235 }
 0x3ee   : > { %822 = vadd.xlane.f32.xlu1 %v821_v40  ;;  %831 = vadd.xlane.f32.xlu0 %v830_v41  ;;  %v824_v43 = vsel %vm413_vm1, %v2236_v42, 0.0 }
 0x3f2   : > { %825 = vadd.xlane.f32.xlu0 %v824_v43 }
 0x3ff   : > { %1011 = vrot.lane.b32.xlu1 %v2406_v1, %s2351_s30 }
 0x403   : > { %1009 = vrot.lane.b32.xlu1 %v2428_v5, %s2351_s30 }
 0x407   : > { %1007 = vrot.lane.b32.xlu1 %v2435_v7, %s2351_s30 }
 0x408   : > { %1013 = vrot.lane.b32.xlu0 %v2403_v0, %s2351_s30 }
 0x40b   : > { %1001 = vrot.lane.b32.xlu1 %v2442_v9, %s2351_s30 }
 0x40c   : > { %999 = vrot.lane.b32.xlu0 %v2421_v3, %s2351_s30 }
 0x40f   : > { %1005 = vrot.lane.b32.xlu1 %v2452_v11, %s2351_s30 }
 0x410   : > { %1003 = vrot.lane.b32.xlu0 %v2445_v10, %s2351_s30 }
 0x46b   : > { %v817_v1 = vpop.xlane.xlu0 %816 }
 0x46f   : > { %v811_v5 = vpop.xlane.xlu0 %810  ;;  %v820_v44 = vpop.xlane.xlu1 %819 }
 0x470   : > { %2237 = vrcp.f32 %v820_v44 }
 0x471   : > { %2239 = vrcp.f32 %v811_v5 }
 0x472   : > { %2241 = vrcp.f32 %v817_v1 }
 0x473   : > { %v829_v7 = vpop.xlane.xlu0 %828  ;;  %v814_v45 = vpop.xlane.xlu1 %813 }
 0x474   : > { %2243 = vrcp.f32 %v814_v45 }
 0x477   : > { %v832_v0 = vpop.xlane.xlu0 %831  ;;  %v823_v46 = vpop.xlane.xlu1 %822 }
 0x478   : > { %2245 = vrcp.f32 %v832_v0 }
 0x479   : > { %2247 = vrcp.f32 %v823_v46 }
 0x47a   : > { %2249 = vrcp.f32 %v829_v7 }
 0x47b   : > { %v826_v3 = vpop.xlane.xlu0 %825  ;;  %v1012_v61 = vpop.permute.xlu1 %1011 }
 0x47c   : > { %2251 = vrcp.f32 %v826_v3  ;;  %v1034_v17 = vsel %vm315_vm0, %v1012_v61, 0 }
 0x47d   : > { %v2238_v47 = vpop.eup %2237 }
 0x47e   : > { %v2240_v49 = vpop.eup %2239  ;;  %v844_v52 = vmul.f32 %v2238_v47, %v2226_v30 }
 0x47f   : > { %v1014_v48 = vpop.permute.xlu0 %1013  ;;  %v2242_v50 = vpop.eup %2241  ;;  %v841_v53 = vmul.f32 %v2240_v49, %v2224_v29 }
 0x480   : > { %2139 = vmatprep.subr.msk.bf16.mxu0 %vm315_vm0, %v1014_v48  ;;  %v843_v55 = vmul.f32 %v2242_v50, %v2600_v26  ;;  %v1037_v59 = vsel %vm315_vm0, %v1014_v48, 0  ;;  %v1010_v20 = vpop.permute.xlu1 %1009 }
 0x481   : > { %v2244_v51 = vpop.eup %2243  ;;  %v1031_v21 = vsel %vm315_vm0, %v1010_v20, 0 }
 0x482   : > { %v842_v54 = vmul.f32 %v2244_v51, %v2228_v33  ;;  %v850_v58 = vpack.c.bf16 %v844_v52, %v843_v55 }
 0x483   : > { %v1000_v19 = vpop.permute.xlu0 %999 }
 0x484   : > { %v849_v56 = vpack.c.bf16 %v842_v54, %v841_v53  ;;  %v1008_v22 = vpop.permute.xlu1 %1007 }
 0x485   : > { %v2246_v57 = vpop.eup %2245  ;;  %v1028_v23 = vsel %vm315_vm0, %v1008_v22, 0 }
 0x486   : > { %v2248_v60 = vpop.eup %2247  ;;  %2059 = vmatprep.mubr.msk.bf16.mxu0 %vm413_vm1, %v849_v56  ;;  %v848_v14 = vmul.f32 %v2246_v57, %v2232_v38 }
 0x487   : > { %v2250_v63 = vpop.eup %2249  ;;  %2060 = vmatmul.mubr.msk.bf16.vlgmr.msra.gmra.mxu0 %vm413_vm1, %v850_v58  ;;  %v845_v62 = vmul.f32 %v2248_v60, %v2234_v39  ;;  %v1004_v25 = vpop.permute.xlu0 %1003 }
 0x488   : > { %2068 = vmatpush3.bf16.xpose.msra.mxu0 %v1037_v59  ;;  %v847_v16 = vmul.f32 %v2250_v63, %v2606_v35  ;;  %v1002_v24 = vpop.permute.xlu1 %1001 }
 0x489   : > { %v2252_v4 = vpop.eup %2251  ;;  %2140 = vmatprep.subr.msk.bf16.mxu0 %vm315_vm0, %v1012_v61 }
 0x48a   : > { %v846_v2 = vmul.f32 %v2252_v4, %v2236_v42  ;;  %v852_v18 = vpack.c.bf16 %v848_v14, %v847_v16 }
 0x48c   : > { %v851_v15 = vpack.c.bf16 %v846_v2, %v845_v62  ;;  %v1006_v26 = vpop.permute.xlu1 %1005 }
 0x48e   : > { %2063 = vmatprep.mubr.msk.bf16.mxu0 %vm413_vm1, %v851_v15 }
 0x48f   : > { %2064 = vmatmul.mubr.msk.bf16.gmra.mxu0 %vm413_vm1, %v852_v18 }
 0x490   : > { %2070 = vmatpush3.bf16.xpose.msra.mxu0 %v1034_v17  ;;  %2075 = vmatprep.mubr.msk.bf16.mxu0 %vm315_vm0, %v1000_v19 }
 0x491   : > { %2141 = vmatprep.subr.msk.bf16.mxu0 %vm315_vm0, %v1010_v20 }
 0x498   : > { %2072 = vmatpush3.bf16.xpose.msra.mxu0 %v1031_v21 }
 0x499   : > { %2142 = vmatprep.subr.msk.bf16.mxu0 %vm315_vm0, %v1008_v22 }
 0x4a0   : > { %2074 = vmatpush3.bf16.xpose.msra.mxu0 %v1028_v23 }
 0x4a7   : > { %2076 = vmatmul.mubr.msk.bf16.vlgmr.msra.gmra.mxu0 %vm315_vm0, %v1002_v24 }
 0x4a8   : > { %2079 = vmatprep.mubr.msk.bf16.mxu0 %vm315_vm0, %v1004_v25 }
 0x4af   : > { %2080 = vmatmul.mubr.msk.bf16.gmra.mxu0 %vm315_vm0, %v1006_v26 }
 0x547   : > { %v2648_v27 = vpop.f32.mrf.mxu0 }
 0x549   : > { %v2650_v28 = vpop.f32.mrf.mxu0 }
 0x54b   : > { %v2652_v29 = vpop.f32.mrf.mxu0 }
 0x54d   : > { %v2654_v30 = vpop.f32.mrf.mxu0 }
 0x54f   : > { %v2656_v31 = vpop.f32.mrf.mxu0 }
 0x551   : > { %v2658_v32 = vpop.f32.mrf.mxu0 }
 0x553   : > { %v2660_v33 = vpop.f32.mrf.mxu0 }
 0x555   : > { %v2662_v34 = vpop.f32.mrf.mxu0 }
 0x567   : > { %v2077_v35 = vpop.f32.mrf.mxu0 }
 0x568   : > { %v1106_v39 = vmul.f32 0.35355338, %v2077_v35 }
 0x569   : > { %v1073_v36 = vpop.f32.mrf.mxu0 }
 0x56a   : > { %v1104_v37 = vmul.f32 0.35355338, %v1073_v36  ;;  %v1118_v5 = vsel %vm413_vm1, %v1106_v39, -inf }
 0x56b   : > { %v2078_v38 = vpop.f32.mrf.mxu0 }
 0x56c   : > { %v1112_v40 = vsel %vm413_vm1, %v1104_v37, -inf  ;;  %v1107_v1 = vmul.f32 0.35355338, %v2078_v38 }
 0x56d   : > { %1113 = vmax.xlane.f32.xlu0 %v1112_v40  ;;  %v1076_v41 = vpop.f32.mrf.mxu0 }
 0x56e   : > { %v1105_v42 = vmul.f32 0.35355338, %v1076_v41  ;;  %v1121_v3 = vsel %vm413_vm1, %v1107_v1, -inf }
 0x56f   : > { %v2081_v43 = vpop.f32.mrf.mxu0 }
 0x570   : > { %v1115_v44 = vsel %vm413_vm1, %v1105_v42, -inf  ;;  %v1110_v45 = vmul.f32 0.35355338, %v2081_v43 }
 0x571   : > { %1119 = vmax.xlane.f32.xlu0 %v1118_v5  ;;  %1116 = vmax.xlane.f32.xlu1 %v1115_v44  ;;  %v1089_v7 = vpop.f32.mrf.mxu0 }
 0x572   : > { %v1108_v48 = vmul.f32 0.35355338, %v1089_v7  ;;  %v1130_v51 = vsel %vm413_vm1, %v1110_v45, -inf }
 0x573   : > { %v2082_v0 = vpop.f32.mrf.mxu0 }
 0x574   : > { %v1111_v46 = vmul.f32 0.35355338, %v2082_v0  ;;  %v1124_v53 = vsel %vm413_vm1, %v1108_v48, -inf }
 0x575   : > { %1122 = vmax.xlane.f32.xlu0 %v1121_v3  ;;  %v1092_v47 = vpop.f32.mrf.mxu0  ;;  %v2318_v3 = vld [vmem:[%s2400_s19 + $0x8] sm:$0xff]  }
 0x576   : > { %v1133_v49 = vsel %vm413_vm1, %v1111_v46, -inf  ;;  %v1109_v50 = vmul.f32 0.35355338, %v1092_v47  ;;  %v2319_v47 = vld [vmem:[%s2400_s19] sm:$0xff]  }
 0x577   : > { %1134 = vmax.xlane.f32.xlu1 %v1133_v49  ;;  %v2321_v49 = vld [vmem:[%s2412_s22] sm:$0xff]  }
 0x578   : > { %v1127_v52 = vsel %vm413_vm1, %v1109_v50, -inf }
 0x579   : > { %1131 = vmax.xlane.f32.xlu0 %v1130_v51 }
 0x57b   : > { %1128 = vmax.xlane.f32.xlu1 %v1127_v52 }
 0x57d   : > { %1125 = vmax.xlane.f32.xlu0 %v1124_v53 }
 0x58c   : > { %1208 = vrot.lane.b32.xlu1 %v2506_v8, %s2351_s30 }
 0x590   : > { %1206 = vrot.lane.b32.xlu1 %v2513_v12, %s2351_s30 }
 0x593   : > { %1210 = vrot.lane.b32.xlu0 %v2501_v6, %s2351_s30 }
 0x594   : > { %1204 = vrot.lane.b32.xlu1 %v2516_v13, %s2351_s30 }
 0x5f6   : > { %v1114_v54 = vpop.xlane.xlu0 %1113 }
 0x5f7   : > { %v1136_v55 = vsub.f32 %v1104_v37, %v1114_v54 }
 0x5f9   : > { %v1144_v59 = vmul.f32 1.442695, %v1136_v55 }
 0x5fa   : > { %v1120_v56 = vpop.xlane.xlu0 %1119  ;;  %v1117_v57 = vpop.xlane.xlu1 %1116 }
 0x5fb   : > { %v1138_v58 = vsub.f32 %v1106_v39, %v1120_v56  ;;  %v1137_v61 = vsub.f32 %v1105_v42, %v1117_v57 }
 0x5fd   : > { %v1148_v60 = vmul.f32 1.442695, %v1138_v58  ;;  %v1146_v12 = vmul.f32 1.442695, %v1137_v61 }
 0x5fe   : > { %v1123_v63 = vpop.xlane.xlu0 %1122 }
 0x5ff   : > { %2253 = vpow2.f32 %v1148_v60  ;;  %v1139_v8 = vsub.f32 %v1107_v1, %v1123_v63 }
 0x600   : > { %v1135_v4 = vpop.xlane.xlu1 %1134  ;;  %2255 = vpow2.f32 %v1144_v59 }
 0x601   : > { %v1150_v62 = vmul.f32 1.442695, %v1139_v8  ;;  %v1143_v2 = vsub.f32 %v1111_v46, %v1135_v4  ;;  %v2317_v46 = vld [vmem:[%s2400_s19 + $0x10] sm:$0xff]  }
 0x602   : > { %v1132_v6 = vpop.xlane.xlu0 %1131 }
 0x603   : > { %2257 = vpow2.f32 %v1150_v62  ;;  %v1142_v14 = vsub.f32 %v1110_v45, %v1132_v6  ;;  %v1158_v15 = vmul.f32 1.442695, %v1143_v2 }
 0x604   : > { %v1129_v13 = vpop.xlane.xlu1 %1128  ;;  %2259 = vpow2.f32 %v1146_v12 }
 0x605   : > { %v1156_v16 = vmul.f32 1.442695, %v1142_v14  ;;  %v1141_v17 = vsub.f32 %v1109_v50, %v1129_v13 }
 0x606   : > { %v1126_v18 = vpop.xlane.xlu0 %1125 }
 0x607   : > { %2261 = vpow2.f32 %v1156_v16  ;;  %v1140_v19 = vsub.f32 %v1108_v48, %v1126_v18  ;;  %v1154_v21 = vmul.f32 1.442695, %v1141_v17  ;;  %v2320_v48 = vld [vmem:[%s2400_s19 + $0x18] sm:$0xff]  }
 0x608   : > { %v1209_v20 = vpop.permute.xlu1 %1208  ;;  %2263 = vpow2.f32 %v1158_v15 }
 0x609   : > { %v1152_v22 = vmul.f32 1.442695, %v1140_v19 }
 0x60a   : > { %v1211_v23 = vpop.permute.xlu0 %1210 }
 0x60b   : > { %2265 = vpow2.f32 %v1152_v22  ;;  %2083 = vmatprep.subr.bf16.mxu1 %v1211_v23 }
 0x60c   : > { %v2680_v24 = vpop.eup %2253  ;;  %2084 = vmatpush3.bf16.msra.mxu1 %v1211_v23  ;;  %v1207_v25 = vpop.permute.xlu1 %1206  ;;  %2267 = vpow2.f32 %v1154_v21 }
 0x60d   : > { %v1166_v26 = vsel %vm413_vm1, %v2680_v24, 0.0  ;;  %2085 = vmatprep.subr.bf16.mxu1 %v1209_v20  ;;  %v2684_v35 = vpop.eup %2255 }
 0x60e   : > { %1167 = vadd.xlane.f32.xlu0 %v1166_v26  ;;  %v1160_v37 = vsel %vm413_vm1, %v2684_v35, 0.0 }
 0x610   : > { %v2258_v36 = vpop.eup %2257  ;;  %2086 = vmatpush3.bf16.msra.mxu1 %v1209_v20  ;;  %v1205_v40 = vpop.permute.xlu1 %1204 }
 0x611   : > { %v1169_v38 = vsel %vm413_vm1, %v2258_v36, 0.0  ;;  %2087 = vmatprep.subr.bf16.mxu1 %v1207_v25  ;;  %v2260_v39 = vpop.eup %2259 }
 0x612   : > { %1161 = vadd.xlane.f32.xlu0 %v1160_v37  ;;  %1170 = vadd.xlane.f32.xlu1 %v1169_v38  ;;  %v1163_v43 = vsel %vm413_vm1, %v2260_v39, 0.0 }
 0x614   : > { %v2689_v41 = vpop.eup %2261  ;;  %2088 = vmatpush3.bf16.msra.mxu1 %v1207_v25 }
 0x615   : > { %v1178_v42 = vsel %vm413_vm1, %v2689_v41, 0.0  ;;  %2089 = vmatprep.subr.bf16.mxu1 %v1205_v40  ;;  %v2694_v1 = vpop.eup %2263 }
 0x616   : > { %1179 = vadd.xlane.f32.xlu0 %v1178_v42  ;;  %1164 = vadd.xlane.f32.xlu1 %v1163_v43  ;;  %v1181_v7 = vsel %vm413_vm1, %v2694_v1, 0.0 }
 0x618   : > { %v2266_v5 = vpop.eup %2265  ;;  %2090 = vmatpush3.bf16.msra.mxu1 %v1205_v40 }
 0x619   : > { %v1172_v44 = vsel %vm413_vm1, %v2266_v5, 0.0  ;;  %v2268_v45 = vpop.eup %2267 }
 0x61a   : > { %1173 = vadd.xlane.f32.xlu1 %v1172_v44  ;;  %1182 = vadd.xlane.f32.xlu0 %v1181_v7  ;;  %v1175_v0 = vsel %vm413_vm1, %v2268_v45, 0.0 }
 0x61e   : > { %1176 = vadd.xlane.f32.xlu0 %v1175_v0 }
 0x62b   : > { %1362 = vrot.lane.b32.xlu1 %v2317_v46, %s2352_s4 }
 0x62f   : > { %1360 = vrot.lane.b32.xlu1 %v2318_v3, %s2352_s4 }
 0x633   : > { %1358 = vrot.lane.b32.xlu1 %v2319_v47, %s2352_s4 }
 0x634   : > { %1364 = vrot.lane.b32.xlu0 %v2320_v48, %s2352_s4 }
 0x637   : > { %1352 = vrot.lane.b32.xlu1 %v2442_v9, %s2352_s4 }
 0x638   : > { %1350 = vrot.lane.b32.xlu0 %v2321_v49, %s2352_s4 }
 0x63b   : > { %1356 = vrot.lane.b32.xlu1 %v2452_v11, %s2352_s4 }
 0x63c   : > { %1354 = vrot.lane.b32.xlu0 %v2445_v10, %s2352_s4 }
 0x697   : > { %v1168_v50 = vpop.xlane.xlu0 %1167 }
 0x69b   : > { %v1162_v51 = vpop.xlane.xlu0 %1161  ;;  %v1171_v52 = vpop.xlane.xlu1 %1170 }
 0x69c   : > { %2269 = vrcp.f32 %v1171_v52 }
 0x69d   : > { %2271 = vrcp.f32 %v1162_v51 }
 0x69e   : > { %2273 = vrcp.f32 %v1168_v50 }
 0x69f   : > { %v1180_v53 = vpop.xlane.xlu0 %1179  ;;  %v1165_v54 = vpop.xlane.xlu1 %1164 }
 0x6a0   : > { %2275 = vrcp.f32 %v1165_v54 }
 0x6a3   : > { %v1183_v55 = vpop.xlane.xlu0 %1182  ;;  %v1174_v9 = vpop.xlane.xlu1 %1173 }
 0x6a4   : > { %2277 = vrcp.f32 %v1183_v55 }
 0x6a5   : > { %2279 = vrcp.f32 %v1174_v9 }
 0x6a6   : > { %2281 = vrcp.f32 %v1180_v53 }
 0x6a7   : > { %v1177_v56 = vpop.xlane.xlu0 %1176  ;;  %v1363_v14 = vpop.permute.xlu1 %1362 }
 0x6a8   : > { %2283 = vrcp.f32 %v1177_v56  ;;  %v1385_v21 = vsel %vm315_vm0, %v1363_v14, 0 }
 0x6a9   : > { %v2270_v11 = vpop.eup %2269 }
 0x6aa   : > { %v2272_v58 = vpop.eup %2271  ;;  %v1195_v60 = vmul.f32 %v2270_v11, %v2258_v36 }
 0x6ab   : > { %v1365_v57 = vpop.permute.xlu0 %1364  ;;  %v2274_v10 = vpop.eup %2273  ;;  %v1192_v61 = vmul.f32 %v2272_v58, %v2684_v35 }
 0x6ac   : > { %2143 = vmatprep.subr.msk.bf16.mxu1 %vm315_vm0, %v1365_v57  ;;  %v1194_v8 = vmul.f32 %v2274_v10, %v2680_v24  ;;  %v1388_v2 = vsel %vm315_vm0, %v1365_v57, 0  ;;  %v1361_v24 = vpop.permute.xlu1 %1360 }
 0x6ad   : > { %v2276_v59 = vpop.eup %2275  ;;  %v1382_v25 = vsel %vm315_vm0, %v1361_v24, 0 }
 0x6ae   : > { %v1193_v63 = vmul.f32 %v2276_v59, %v2260_v39  ;;  %v1201_v62 = vpack.c.bf16 %v1195_v60, %v1194_v8 }
 0x6af   : > { %v1351_v23 = vpop.permute.xlu0 %1350 }
 0x6b0   : > { %v1200_v4 = vpack.c.bf16 %v1193_v63, %v1192_v61  ;;  %v1359_v26 = vpop.permute.xlu1 %1358 }
 0x6b1   : > { %v2278_v12 = vpop.eup %2277  ;;  %v1379_v35 = vsel %vm315_vm0, %v1359_v26, 0 }
 0x6b2   : > { %v2280_v6 = vpop.eup %2279  ;;  %2091 = vmatprep.mubr.msk.bf16.mxu1 %vm413_vm1, %v1200_v4  ;;  %v1199_v18 = vmul.f32 %v2278_v12, %v2694_v1 }
 0x6b3   : > { %v2282_v13 = vpop.eup %2281  ;;  %2092 = vmatmul.mubr.msk.bf16.vlgmr.msra.gmra.mxu1 %vm413_vm1, %v1201_v62  ;;  %v1196_v16 = vmul.f32 %v2280_v6, %v2266_v5  ;;  %v1355_v37 = vpop.permute.xlu0 %1354 }
 0x6b4   : > { %2100 = vmatpush3.bf16.xpose.msra.mxu1 %v1388_v2  ;;  %v1198_v20 = vmul.f32 %v2282_v13, %v2689_v41  ;;  %v1353_v36 = vpop.permute.xlu1 %1352 }
 0x6b5   : > { %v2284_v15 = vpop.eup %2283  ;;  %2144 = vmatprep.subr.msk.bf16.mxu1 %vm315_vm0, %v1363_v14 }
 0x6b6   : > { %v1197_v17 = vmul.f32 %v2284_v15, %v2268_v45  ;;  %v1203_v22 = vpack.c.bf16 %v1199_v18, %v1198_v20 }
 0x6b8   : > { %v1202_v19 = vpack.c.bf16 %v1197_v17, %v1196_v16  ;;  %v1357_v38 = vpop.permute.xlu1 %1356 }
 0x6ba   : > { %2095 = vmatprep.mubr.msk.bf16.mxu1 %vm413_vm1, %v1202_v19 }
 0x6bb   : > { %2096 = vmatmul.mubr.msk.bf16.gmra.mxu1 %vm413_vm1, %v1203_v22 }
 0x6bc   : > { %2102 = vmatpush3.bf16.xpose.msra.mxu1 %v1385_v21  ;;  %2107 = vmatprep.mubr.msk.bf16.mxu1 %vm315_vm0, %v1351_v23 }
 0x6bd   : > { %2145 = vmatprep.subr.msk.bf16.mxu1 %vm315_vm0, %v1361_v24 }
 0x6c4   : > { %2104 = vmatpush3.bf16.xpose.msra.mxu1 %v1382_v25 }
 0x6c5   : > { %2146 = vmatprep.subr.msk.bf16.mxu1 %vm315_vm0, %v1359_v26 }
 0x6cc   : > { %2106 = vmatpush3.bf16.xpose.msra.mxu1 %v1379_v35 }
 0x6d3   : > { %2108 = vmatmul.mubr.msk.bf16.vlgmr.msra.gmra.mxu1 %vm315_vm0, %v1353_v36 }
 0x6d4   : > { %2111 = vmatprep.mubr.msk.bf16.mxu1 %vm315_vm0, %v1355_v37 }
 0x6db   : > { %2112 = vmatmul.mubr.msk.bf16.gmra.mxu1 %vm315_vm0, %v1357_v38 }
 0x773   : > { %v2736_v39 = vpop.f32.mrf.mxu1 }
 0x775   : > { %v2738_v40 = vpop.f32.mrf.mxu1 }
 0x777   : > { %v2740_v41 = vpop.f32.mrf.mxu1 }
 0x779   : > { %v2742_v42 = vpop.f32.mrf.mxu1 }
 0x77b   : > { %v2744_v43 = vpop.f32.mrf.mxu1 }
 0x77d   : > { %v2746_v1 = vpop.f32.mrf.mxu1 }
 0x77f   : > { %v2748_v5 = vpop.f32.mrf.mxu1 }
 0x781   : > { %v2750_v44 = vpop.f32.mrf.mxu1 }
 0x793   : > { %v2109_v7 = vpop.f32.mrf.mxu1 }
 0x794   : > { %v1457_v3 = vmul.f32 0.35355338, %v2109_v7 }
 0x795   : > { %v1424_v45 = vpop.f32.mrf.mxu1 }
 0x796   : > { %v1455_v0 = vmul.f32 0.35355338, %v1424_v45  ;;  %v1469_v52 = vsel %vm413_vm1, %v1457_v3, -inf }
 0x797   : > { %v2110_v46 = vpop.f32.mrf.mxu1 }
 0x798   : > { %v1463_v47 = vsel %vm413_vm1, %v1455_v0, -inf  ;;  %v1458_v51 = vmul.f32 0.35355338, %v2110_v46 }
 0x799   : > { %1464 = vmax.xlane.f32.xlu0 %v1463_v47  ;;  %v1427_v48 = vpop.f32.mrf.mxu1 }
 0x79a   : > { %v1456_v49 = vmul.f32 0.35355338, %v1427_v48  ;;  %v1472_v56 = vsel %vm413_vm1, %v1458_v51, -inf  ;;  %v2322_v48 = vld [vmem:[%s2498_s25 + $0x10] sm:$0xff]  }
 0x79b   : > { %v2113_v50 = vpop.f32.mrf.mxu1 }
 0x79c   : > { %v1466_v53 = vsel %vm413_vm1, %v1456_v49, -inf  ;;  %v1461_v11 = vmul.f32 0.35355338, %v2113_v50 }
 0x79d   : > { %1470 = vmax.xlane.f32.xlu0 %v1469_v52  ;;  %1467 = vmax.xlane.f32.xlu1 %v1466_v53  ;;  %v1440_v54 = vpop.f32.mrf.mxu1  ;;  %v2324_v52 = vld [vmem:[%s2498_s25 + $0x18] sm:$0xff]   ;;  %v1915_v53 = vpack.c.bf16 %v2650_v28, %v2650_v28  ;;  %v1921_v28 = vpack.c.bf16 %v2656_v31, %v2656_v31  ;;  %v1927_v31 = vpack.c.bf16 %v2746_v1, %v2746_v1 }
 0x79e   : > { %v1459_v55 = vmul.f32 0.35355338, %v1440_v54  ;;  %v1481_v61 = vsel %vm413_vm1, %v1461_v11, -inf  ;;  %v1916_v1 = vpack.c.bf16 %v2654_v30, %v2654_v30  ;;  %v1924_v30 = vpack.c.bf16 %v2742_v42, %v2742_v42 }
 0x79f   : > { %v2114_v9 = vpop.f32.mrf.mxu1 }
 0x7a0   : > { %v2756_v58 = vmul.f32 0.35355338, %v2114_v9  ;;  %v1475_v59 = vsel %vm413_vm1, %v1459_v55, -inf }
 0x7a1   : > { %1473 = vmax.xlane.f32.xlu0 %v1472_v56  ;;  %v1443_v57 = vpop.f32.mrf.mxu1 }
 0x7a2   : > { %v2758_v10 = vmul.f32 0.35355338, %v1443_v57  ;;  %v1484_v63 = vsel %vm413_vm1, %v2756_v58, -inf }
 0x7a4   : > { %v1478_v60 = vsel %vm413_vm1, %v2758_v10, -inf }
 0x7a5   : > { %1476 = vmax.xlane.f32.xlu0 %v1475_v59  ;;  %1479 = vmax.xlane.f32.xlu1 %v1478_v60  ;;  %v2325_v60 = vld [vmem:[%s2498_s25] sm:$0xff]  }
 0x7a9   : > { %1482 = vmax.xlane.f32.xlu0 %v1481_v61  ;;  %1485 = vmax.xlane.f32.xlu1 %v1484_v63  ;;  %v1918_v61 = vpack.c.bf16 %v2652_v29, %v2652_v29  ;;  %v1922_v63 = vpack.c.bf16 %v2660_v33, %v2660_v33  ;;  %v1926_v29 = vpack.c.bf16 %v2740_v41, %v2740_v41 }
 0x7aa   : > { %v1930_v33 = vpack.c.bf16 %v2748_v5, %v2748_v5 }
 0x822   : > { %v1465_v8 = vpop.xlane.xlu0 %1464 }
 0x823   : > { %v1487_v4 = vsub.f32 %v1455_v0, %v1465_v8 }
 0x825   : > { %v1495_v6 = vmul.f32 1.442695, %v1487_v4 }
 0x826   : > { %v1471_v12 = vpop.xlane.xlu0 %1470  ;;  %v1468_v62 = vpop.xlane.xlu1 %1467 }
 0x827   : > { %v1489_v2 = vsub.f32 %v1457_v3, %v1471_v12  ;;  %v1488_v13 = vsub.f32 %v1456_v49, %v1468_v62  ;;  %v2323_v49 = vld [vmem:[%s2498_s25 + $0x8] sm:$0xff]  }
 0x829   : > { %v1499_v14 = vmul.f32 1.442695, %v1489_v2  ;;  %v1497_v17 = vmul.f32 1.442695, %v1488_v13 }
 0x82a   : > { %v1474_v15 = vpop.xlane.xlu0 %1473 }
 0x82b   : > { %2285 = vpow2.f32 %v1499_v14  ;;  %v1490_v16 = vsub.f32 %v1458_v51, %v1474_v15 }
 0x82c   : > { %2287 = vpow2.f32 %v1495_v6 }
 0x82d   : > { %v1501_v18 = vmul.f32 1.442695, %v1490_v16 }
 0x82e   : > { %v1477_v19 = vpop.xlane.xlu0 %1476  ;;  %v1480_v50 = vpop.xlane.xlu1 %1479 }
 0x82f   : > { %2289 = vpow2.f32 %v1501_v18  ;;  %v1491_v20 = vsub.f32 %v1459_v55, %v1477_v19  ;;  %v1917_v55 = vpack.c.bf16 %v2648_v27, %v2648_v27  ;;  %v1492_v9 = vsub.f32 %v2758_v10, %v1480_v50 }
 0x830   : > { %2291 = vpow2.f32 %v1497_v17  ;;  %v1923_v27 = vpack.c.bf16 %v2738_v40, %v2738_v40  ;;  %v1929_v40 = vpack.c.bf16 %v2744_v43, %v2744_v43  ;;  %v1920_v43 = vpack.c.bf16 %v2662_v34, %v2662_v34 }
 0x831   : > { %v1503_v23 = vmul.f32 1.442695, %v1491_v20  ;;  %v1505_v57 = vmul.f32 1.442695, %v1492_v9  ;;  %v1928_v34 = vpack.c.bf16 %v2750_v44, %v2750_v44 }
 0x832   : > { %v1483_v21 = vpop.xlane.xlu0 %1482  ;;  %v1486_v51 = vpop.xlane.xlu1 %1485 }
 0x833   : > { %v1493_v22 = vsub.f32 %v1461_v11, %v1483_v21  ;;  %v1494_v54 = vsub.f32 %v2756_v58, %v1486_v51  ;;  %v1919_v11 = vpack.c.bf16 %v2658_v32, %v2658_v32  ;;  %v1925_v32 = vpack.c.bf16 %v2736_v39, %v2736_v39 }
 0x835   : > { %v1507_v24 = vmul.f32 1.442695, %v1493_v22  ;;  %v1509_v56 = vmul.f32 1.442695, %v1494_v54 }
 0x837   : > { %2293 = vpow2.f32 %v1507_v24 }
 0x838   : > { %v2766_v25 = vpop.eup %2285  ;;  %2295 = vpow2.f32 %v1503_v23 }
 0x839   : > { %v1517_v26 = vsel %vm413_vm1, %v2766_v25, 0.0  ;;  %v2770_v35 = vpop.eup %2287  ;;  %2297 = vpow2.f32 %v1509_v56 }
 0x83a   : > { %1518 = vadd.xlane.f32.xlu0 %v1517_v26  ;;  %v1511_v37 = vsel %vm413_vm1, %v2770_v35, 0.0  ;;  %2299 = vpow2.f32 %v1505_v57 }
 0x83c   : > { %v2772_v36 = vpop.eup %2289 }
 0x83d   : > { %v1520_v38 = vsel %vm413_vm1, %v2772_v36, 0.0  ;;  %v2778_v7 = vpop.eup %2291 }
 0x83e   : > { %1512 = vadd.xlane.f32.xlu0 %v1511_v37  ;;  %1521 = vadd.xlane.f32.xlu1 %v1520_v38  ;;  %v1514_v45 = vsel %vm413_vm1, %v2778_v7, 0.0 }
 0x842   : > { %1515 = vadd.xlane.f32.xlu1 %v1514_v45 }
 0x844   : > { %v2782_v0 = vpop.eup %2293 }
 0x845   : > { %v1529_v46 = vsel %vm413_vm1, %v2782_v0, 0.0  ;;  %v2786_v3 = vpop.eup %2295 }
 0x846   : > { %1530 = vadd.xlane.f32.xlu0 %v1529_v46  ;;  %v1523_v47 = vsel %vm413_vm1, %v2786_v3, 0.0  ;;  %v2815_v58 = vpop.eup %2297 }
 0x847   : > { %v1532_v10 = vsel %vm413_vm1, %v2815_v58, 0.0  ;;  %v2822_v59 = vpop.eup %2299 }
 0x848   : > { %v1526_v39 = vsel %vm413_vm1, %v2822_v59, 0.0 }
 0x84a   : > { %1524 = vadd.xlane.f32.xlu0 %v1523_v47 }
 0x853   : > { %1559 = vrot.lane.b32.xlu1 %v2322_v48, %s2352_s4 }
 0x857   : > { %1557 = vrot.lane.b32.xlu1 %v2323_v49, %s2352_s4 }
 0x860   : > { %1561 = vrot.lane.b32.xlu0 %v2324_v52, %s2352_s4 }
 0x864   : > { %966 = vrot.lane.b32.xlu0 %v1915_v53, %s2353_s5 }
 0x868   : > { %970 = vrot.lane.b32.xlu0 %v1917_v55, %s2353_s5 }
 0x86c   : > { %974 = vrot.lane.b32.xlu0 %v1919_v11, %s2353_s5 }
 0x870   : > { %978 = vrot.lane.b32.xlu0 %v1921_v28, %s2353_s5 }
 0x874   : > { %1317 = vrot.lane.b32.xlu0 %v1923_v27, %s2354_s6 }
 0x878   : > { %1321 = vrot.lane.b32.xlu0 %v1925_v32, %s2354_s6 }
 0x87b   : > { %1533 = vadd.xlane.f32.xlu1 %v1532_v10 }
 0x87c   : > { %1325 = vrot.lane.b32.xlu0 %v1927_v31, %s2354_s6 }
 0x87f   : > { %1527 = vadd.xlane.f32.xlu1 %v1526_v39 }
 0x880   : > { %1329 = vrot.lane.b32.xlu0 %v1929_v40, %s2354_s6 }
 0x890   : > { %1555 = vrot.lane.b32.xlu1 %v2325_v60, %s2352_s4 }
 0x894   : > { %968 = vrot.lane.b32.xlu1 %v1916_v1, %s2353_s5 }
 0x898   : > { %972 = vrot.lane.b32.xlu1 %v1918_v61, %s2353_s5 }
 0x89c   : > { %976 = vrot.lane.b32.xlu1 %v1920_v43, %s2353_s5 }
 0x8a0   : > { %980 = vrot.lane.b32.xlu1 %v1922_v63, %s2353_s5 }
 0x8a4   : > { %1319 = vrot.lane.b32.xlu1 %v1924_v30, %s2354_s6 }
 0x8a8   : > { %1323 = vrot.lane.b32.xlu1 %v1926_v29, %s2354_s6 }
 0x8ac   : > { %1327 = vrot.lane.b32.xlu1 %v1928_v34, %s2354_s6 }
 0x8b0   : > { %1331 = vrot.lane.b32.xlu1 %v1930_v33, %s2354_s6 }
 0x8c3   : > { %v1519_v8 = vpop.xlane.xlu0 %1518 }
 0x8c7   : > { %v1513_v4 = vpop.xlane.xlu0 %1512  ;;  %v1522_v42 = vpop.xlane.xlu1 %1521 }
 0x8c8   : > { %2301 = vrcp.f32 %v1513_v4 }
 0x8cb   : > { %v1516_v12 = vpop.xlane.xlu1 %1515 }
 0x8cc   : > { %2303 = vrcp.f32 %v1516_v12 }
 0x8cd   : > { %2305 = vrcp.f32 %v1522_v42 }
 0x8ce   : > { %2307 = vrcp.f32 %v1519_v8 }
 0x8cf   : > { %v1531_v41 = vpop.xlane.xlu0 %1530  ;;  %v1560_v6 = vpop.permute.xlu1 %1559 }
 0x8d3   : > { %v1525_v62 = vpop.xlane.xlu0 %1524  ;;  %v1558_v17 = vpop.permute.xlu1 %1557 }
 0x8d5   : > { %v2302_v2 = vpop.eup %2301 }
 0x8d6   : > { %v1543_v5 = vmul.f32 %v2302_v2, %v2770_v35 }
 0x8d7   : > { %v1562_v14 = vpop.permute.xlu0 %1561 }
 0x8d8   : > { %2115 = vmatprep.subr.bf16.mxu0 %v1562_v14 }
 0x8d9   : > { %v2304_v44 = vpop.eup %2303  ;;  %2116 = vmatpush3.bf16.msra.mxu0 %v1562_v14 }
 0x8da   : > { %2117 = vmatprep.subr.bf16.mxu0 %v1560_v6  ;;  %v1544_v13 = vmul.f32 %v2304_v44, %v2778_v7  ;;  %v2306_v35 = vpop.eup %2305 }
 0x8db   : > { %v967_v15 = vpop.permute.xlu0 %966  ;;  %v2308_v38 = vpop.eup %2307  ;;  %v1546_v7 = vmul.f32 %v2306_v35, %v2772_v36 }
 0x8dc   : > { %991 = vst.msk [vmem:[%s2566_s29] sm:$0xf] %vm990_vm3, %v967_v15  ;;  %v1551_v16 = vpack.c.bf16 %v1544_v13, %v1543_v5  ;;  %v1545_v46 = vmul.f32 %v2308_v38, %v2766_v25 }
 0x8dd   : > { %2118 = vmatpush3.bf16.msra.mxu0 %v1560_v6 }
 0x8de   : > { %2119 = vmatprep.subr.bf16.mxu0 %v1558_v17  ;;  %2123 = vmatprep.mubr.msk.bf16.mxu0 %vm413_vm1, %v1551_v16  ;;  %v1552_v47 = vpack.c.bf16 %v1546_v7, %v1545_v46 }
 0x8df   : > { %v971_v18 = vpop.permute.xlu0 %970 }
 0x8e0   : > { %993 = vst.msk [vmem:[%s2566_s29 + $0x8] sm:$0xf] %vm990_vm3, %v971_v18 }
 0x8e1   : > { %2120 = vmatpush3.bf16.msra.mxu0 %v1558_v17 }
 0x8e3   : > { %v975_v19 = vpop.permute.xlu0 %974 }
 0x8e4   : > { %995 = vst.msk [vmem:[%s2566_s29 + $0x10] sm:$0xf] %vm990_vm3, %v975_v19 }
 0x8e7   : > { %v979_v20 = vpop.permute.xlu0 %978 }
 0x8e8   : > { %997 = vst.msk [vmem:[%s2566_s29 + $0x18] sm:$0xf] %vm990_vm3, %v979_v20 }
 0x8eb   : > { %v1318_v21 = vpop.permute.xlu0 %1317 }
 0x8ec   : > { %1342 = vst.msk [vmem:[%s2566_s29] sm:$0xf] %vm1341_vm4, %v1318_v21 }
 0x8ef   : > { %v1322_v22 = vpop.permute.xlu0 %1321 }
 0x8f0   : > { %1344 = vst.msk [vmem:[%s2566_s29 + $0x8] sm:$0xf] %vm1341_vm4, %v1322_v22 }
 0x8f3   : > { %v1326_v23 = vpop.permute.xlu0 %1325 }
 0x8f4   : > { %1346 = vst.msk [vmem:[%s2566_s29 + $0x10] sm:$0xf] %vm1341_vm4, %v1326_v23 }
 0x8f7   : > { %v1330_v24 = vpop.permute.xlu0 %1329 }
 0x8f8   : > { %1348 = vst.msk [vmem:[%s2566_s29 + $0x18] sm:$0xf] %vm1341_vm4, %v1330_v24 }
 0x904   : > { %v1534_v26 = vpop.xlane.xlu1 %1533 }
 0x905   : > { %2309 = vrcp.f32 %v1534_v26 }
 0x906   : > { %2311 = vrcp.f32 %v1525_v62 }
 0x907   : > { %2313 = vrcp.f32 %v1531_v41 }
 0x908   : > { %v1528_v37 = vpop.xlane.xlu1 %1527 }
 0x909   : > { %2315 = vrcp.f32 %v1528_v37 }
 0x90c   : > { %v1556_v45 = vpop.permute.xlu1 %1555 }
 0x90d   : > { %2121 = vmatprep.subr.bf16.mxu0 %v1556_v45 }
 0x90e   : > { %2122 = vmatpush3.bf16.msra.mxu0 %v1556_v45 }
 0x910   : > { %v969_v48 = vpop.permute.xlu1 %968 }
 0x911   : > { %992 = vst.msk [vmem:[%s2566_s29 + $0x4] sm:$0xf] %vm990_vm3, %v969_v48  ;;  %2124 = vmatmul.mubr.msk.bf16.vlgmr.msra.gmra.mxu0 %vm413_vm1, %v1552_v47 }
 0x912   : > { %v2310_v49 = vpop.eup %2309 }
 0x913   : > { %v2312_v50 = vpop.eup %2311  ;;  %v1550_v25 = vmul.f32 %v2310_v49, %v2815_v58 }
 0x914   : > { %v973_v51 = vpop.permute.xlu1 %972  ;;  %v2314_v52 = vpop.eup %2313  ;;  %v1547_v53 = vmul.f32 %v2312_v50, %v2786_v3 }
 0x915   : > { %994 = vst.msk [vmem:[%s2566_s29 + $0xc] sm:$0xf] %vm990_vm3, %v973_v51  ;;  %v1549_v9 = vmul.f32 %v2314_v52, %v2782_v0 }
 0x916   : > { %v2316_v36 = vpop.eup %2315 }
 0x917   : > { %v1548_v54 = vmul.f32 %v2316_v36, %v2822_v59  ;;  %v1554_v11 = vpack.c.bf16 %v1550_v25, %v1549_v9 }
 0x918   : > { %v977_v55 = vpop.permute.xlu1 %976 }
 0x919   : > { %996 = vst.msk [vmem:[%s2566_s29 + $0x14] sm:$0xf] %vm990_vm3, %v977_v55  ;;  %v1553_v56 = vpack.c.bf16 %v1548_v54, %v1547_v53 }
 0x91b   : > { %2127 = vmatprep.mubr.msk.bf16.mxu0 %vm413_vm1, %v1553_v56 }
 0x91c   : > { %2128 = vmatmul.mubr.msk.bf16.gmra.mxu0 %vm413_vm1, %v1554_v11  ;;  %v981_v57 = vpop.permute.xlu1 %980 }
 0x91d   : > { %998 = vst.msk [vmem:[%s2566_s29 + $0x1c] sm:$0xf] %vm990_vm3, %v981_v57 }
 0x920   : > { %v1320_v28 = vpop.permute.xlu1 %1319 }
 0x921   : > { %1343 = vst.msk [vmem:[%s2566_s29 + $0x4] sm:$0xf] %vm1341_vm4, %v1320_v28 }
 0x924   : > { %v1324_v3 = vpop.permute.xlu1 %1323 }
 0x925   : > { %1345 = vst.msk [vmem:[%s2566_s29 + $0xc] sm:$0xf] %vm1341_vm4, %v1324_v3 }
 0x928   : > { %v1328_v27 = vpop.permute.xlu1 %1327 }
 0x929   : > { %1347 = vst.msk [vmem:[%s2566_s29 + $0x14] sm:$0xf] %vm1341_vm4, %v1328_v27 }
 0x92c   : > { %v1332_v0 = vpop.permute.xlu1 %1331 }
 0x92d   : > { %1349 = vst.msk [vmem:[%s2566_s29 + $0x1c] sm:$0xf] %vm1341_vm4, %v1332_v0 }
 0x9d1   : > { %v2125_v32 = vpop.f32.mrf.mxu0 }
 0x9d2   : > { %v1933_v58 = vpack.c.bf16 %v2125_v32, %v2125_v32 }
 0x9d3   : > { %v1613_v31 = vpop.f32.mrf.mxu0 }
 0x9d4   : > { %1672 = vrot.lane.b32.xlu0 %v1933_v58, %s2355_s7  ;;  %v1931_v59 = vpack.c.bf16 %v1613_v31, %v1613_v31 }
 0x9d5   : > { %v2126_v10 = vpop.f32.mrf.mxu0 }
 0x9d6   : > { %v1934_v40 = vpack.c.bf16 %v2126_v10, %v2126_v10 }
 0x9d7   : > { %v1616_v39 = vpop.f32.mrf.mxu0 }
 0x9d8   : > { %1668 = vrot.lane.b32.xlu0 %v1931_v59, %s2355_s7  ;;  %1674 = vrot.lane.b32.xlu1 %v1934_v40, %s2355_s7  ;;  %v1932_v60 = vpack.c.bf16 %v1616_v39, %v1616_v39 }
 0x9dc   : > { %1670 = vrot.lane.b32.xlu1 %v1932_v60, %s2355_s7  ;;  %v2129_v1 = vpop.f32.mrf.mxu0 }
 0x9dd   : > { %v1937_v29 = vpack.c.bf16 %v2129_v1, %v2129_v1 }
 0x9de   : > { %v1629_v61 = vpop.f32.mrf.mxu0 }
 0x9df   : > { %v1935_v43 = vpack.c.bf16 %v1629_v61, %v1629_v61 }
 0x9e0   : > { %v2130_v63 = vpop.f32.mrf.mxu0 }
 0x9e1   : > { %1676 = vrot.lane.b32.xlu0 %v1935_v43, %s2355_s7  ;;  %v1938_v33 = vpack.c.bf16 %v2130_v63, %v2130_v63 }
 0x9e2   : > { %v1632_v30 = vpop.f32.mrf.mxu0 }
 0x9e3   : > { %v1936_v34 = vpack.c.bf16 %v1632_v30, %v1632_v30 }
 0x9e5   : > { %1680 = vrot.lane.b32.xlu0 %v1937_v29, %s2355_s7  ;;  %1678 = vrot.lane.b32.xlu1 %v1936_v34, %s2355_s7 }
 0x9e9   : > { %1682 = vrot.lane.b32.xlu1 %v1938_v33, %s2355_s7 }
 0xa46   : > { %v1673_v8 = vpop.permute.xlu0 %1672 }
 0xa47   : > { %1695 = vst.msk [vmem:[%s2566_s29 + $0x8] sm:$0xf] %vm1692_vm5, %v1673_v8 }
 0xa4a   : > { %v1669_v4 = vpop.permute.xlu0 %1668  ;;  %v1675_v42 = vpop.permute.xlu1 %1674 }
 0xa4b   : > { %1693 = vst.msk [vmem:[%s2566_s29] sm:$0xf] %vm1692_vm5, %v1669_v4  ;;  %1696 = vst.msk [vmem:[%s2566_s29 + $0xc] sm:$0xf] %vm1692_vm5, %v1675_v42 }
 0xa4e   : > { %v1671_v12 = vpop.permute.xlu1 %1670 }
 0xa4f   : > { %1694 = vst.msk [vmem:[%s2566_s29 + $0x4] sm:$0xf] %vm1692_vm5, %v1671_v12 }
 0xa53   : > { %v1677_v41 = vpop.permute.xlu0 %1676 }
 0xa54   : > { %1697 = vst.msk [vmem:[%s2566_s29 + $0x10] sm:$0xf] %vm1692_vm5, %v1677_v41 }
 0xa57   : > { %v1681_v62 = vpop.permute.xlu0 %1680  ;;  %v1679_v2 = vpop.permute.xlu1 %1678 }
 0xa58   : > { %1699 = vst.msk [vmem:[%s2566_s29 + $0x18] sm:$0xf] %vm1692_vm5, %v1681_v62  ;;  %1698 = vst.msk [vmem:[%s2566_s29 + $0x14] sm:$0xf] %vm1692_vm5, %v1679_v2 }
 0xa5b   : > { %v1683_v6 = vpop.permute.xlu1 %1682 }
 0xa5c   : > { %1700 = vst.msk [vmem:[%s2566_s29 + $0x1c] sm:$0xf] %vm1692_vm5, %v1683_v6 }
 0xa5d PF: > { %s13_s14 = sadd.s32 1, %s2348_s14   ;;  %s2929_s12 = smov %s2344_s13 }
 0xa5e   : > { %p10_p5 = scmp.ge.s32.totalorder %s13_s14, 4   ;;  %s2930_s13 = smov %s2932_s15 }
 0xa60   :  { %12 = sbr.rel (!%p10_p5) target bundleno = 2 (0x2), region = 68 }

// kernel: detr_forward.44
= control target key start
LH: loop header
LB: loop body
LE: loop exit
PB: predicated region body
PF: predicated region fallthrough
CT: control target
= control target key end

     0   :  { %vm97_vm0 = vcmask 261120   ;;  %vm417_vm1 = vcmask 257024   ;;  %s937_s0 = inlined_call_operand.vmem [shape: bf16[128,32], index: 0, kind: input, shape index: {}]   ;;  %s938_s1 = inlined_call_operand.vmem [shape: bf16[128,32], index: 1, kind: input, shape index: {}]   ;;  %s939_s2 = inlined_call_operand.vmem [shape: f32[1,32], index: 2, kind: input, shape index: {}]   ;;  %s940_s3 = inlined_call_operand.vmem [shape: f32[1,32], index: 3, kind: input, shape index: {}]   ;;  %s941_s4 = inlined_call_operand.vmem [shape: bf16[128,32], index: 4, kind: output, shape index: {}]  }
   0x1   :  { %v473_v0 = vld [vmem:[%s937_s0] sm:$0xff]   ;;  %v536_v2 = vld [vmem:[%s937_s0 + $0x8] sm:$0xff]   ;;  %v537_v8 = vld [vmem:[%s937_s0 + $0x10] sm:$0xff]  }
   0x2   :  { %v505_v1 = vld [vmem:[%s938_s1] sm:$0xff]   ;;  %v474_v3 = vunpack.c.l.bf16 %v473_v0  ;;  %v478_v5 = vunpack.c.l.bf16 %v536_v2  ;;  %v543_v6 = vld [vmem:[%s938_s1 + $0x8] sm:$0xff]   ;;  %v475_v7 = vunpack.c.h.bf16 %v473_v0  ;;  %v544_v9 = vld [vmem:[%s938_s1 + $0x10] sm:$0xff]   ;;  %v479_v12 = vunpack.c.h.bf16 %v536_v2 }
   0x3   :  { %v506_v4 = vunpack.c.l.bf16 %v505_v1  ;;  %v510_v10 = vunpack.c.l.bf16 %v543_v6  ;;  %v507_v11 = vunpack.c.h.bf16 %v505_v1  ;;  %v511_v13 = vunpack.c.h.bf16 %v543_v6  ;;  %v538_v22 = vld [vmem:[%s937_s0 + $0x18] sm:$0xff]   ;;  %v539_v34 = vld [vmem:[%s937_s0 + $0x20] sm:$0xff]   ;;  %v540_v44 = vld [vmem:[%s937_s0 + $0x28] sm:$0xff]  }
   0x4   :  { %v482_v15 = vunpack.c.l.bf16 %v537_v8  ;;  %v514_v16 = vunpack.c.l.bf16 %v544_v9  ;;  %v483_v17 = vunpack.c.h.bf16 %v537_v8  ;;  %v515_v21 = vunpack.c.h.bf16 %v544_v9  ;;  %v545_v23 = vld [vmem:[%s938_s1 + $0x18] sm:$0xff]   ;;  %v546_v35 = vld [vmem:[%s938_s1 + $0x20] sm:$0xff]   ;;  %v547_v45 = vld [vmem:[%s938_s1 + $0x28] sm:$0xff]  }
   0x5   :  { %v625_v14 = vadd.f32 %v506_v4, %v474_v3  ;;  %v627_v18 = vadd.f32 %v510_v10, %v478_v5  ;;  %v629_v19 = vadd.f32 %v507_v11, %v475_v7  ;;  %v631_v20 = vadd.f32 %v511_v13, %v479_v12  ;;  %v541_v54 = vld [vmem:[%s937_s0 + $0x30] sm:$0xff]   ;;  %v542_v0 = vld [vmem:[%s937_s0 + $0x38] sm:$0xff]  }
   0x6   :  { %v645_v27 = vadd.f32 %v514_v16, %v482_v15  ;;  %v486_v28 = vunpack.c.l.bf16 %v538_v22  ;;  %v518_v29 = vunpack.c.l.bf16 %v545_v23  ;;  %v649_v31 = vadd.f32 %v515_v21, %v483_v17  ;;  %v548_v55 = vld [vmem:[%s938_s1 + $0x30] sm:$0xff]   ;;  %v549_v1 = vld [vmem:[%s938_s1 + $0x38] sm:$0xff]  }
   0x7   :  { %v98_v24 = vsel %vm97_vm0, %v625_v14, 0.0  ;;  %v104_v25 = vsel %vm97_vm0, %v627_v18, 0.0  ;;  %v101_v26 = vsel %vm97_vm0, %v629_v19, 0.0  ;;  %v107_v30 = vsel %vm97_vm0, %v631_v20, 0.0 }
   0x8   :  { %99 = vadd.xlane.f32.xlu0 %v98_v24  ;;  %105 = vadd.xlane.f32.xlu1 %v104_v25  ;;  %v487_v32 = vunpack.c.h.bf16 %v538_v22  ;;  %v519_v33 = vunpack.c.h.bf16 %v545_v23  ;;  %v110_v36 = vsel %vm97_vm0, %v645_v27, 0.0  ;;  %v659_v37 = vadd.f32 %v518_v29, %v486_v28 }
   0x9   :  { %v490_v38 = vunpack.c.l.bf16 %v539_v34  ;;  %v522_v39 = vunpack.c.l.bf16 %v546_v35  ;;  %v113_v40 = vsel %vm97_vm0, %v649_v31, 0.0  ;;  %v491_v42 = vunpack.c.h.bf16 %v539_v34 }
   0xa   :  { %v663_v41 = vadd.f32 %v519_v33, %v487_v32  ;;  %v523_v43 = vunpack.c.h.bf16 %v546_v35  ;;  %v116_v46 = vsel %vm97_vm0, %v659_v37, 0.0  ;;  %v494_v48 = vunpack.c.l.bf16 %v540_v44 }
   0xb   :  { %v673_v47 = vadd.f32 %v522_v39, %v490_v38  ;;  %v526_v49 = vunpack.c.l.bf16 %v547_v45  ;;  %v495_v52 = vunpack.c.h.bf16 %v540_v44  ;;  %v527_v53 = vunpack.c.h.bf16 %v547_v45 }
   0xc   :  { %102 = vadd.xlane.f32.xlu0 %v101_v26  ;;  %108 = vadd.xlane.f32.xlu1 %v107_v30  ;;  %v119_v50 = vsel %vm97_vm0, %v663_v41, 0.0  ;;  %v677_v51 = vadd.f32 %v523_v43, %v491_v42  ;;  %v498_v58 = vunpack.c.l.bf16 %v541_v54  ;;  %v530_v59 = vunpack.c.l.bf16 %v548_v55 }
   0xd   :  { %v122_v56 = vsel %vm97_vm0, %v673_v47, 0.0  ;;  %v687_v57 = vadd.f32 %v526_v49, %v494_v48  ;;  %v691_v61 = vadd.f32 %v527_v53, %v495_v52  ;;  %v499_v62 = vunpack.c.h.bf16 %v541_v54 }
   0xe   :  { %v125_v60 = vsel %vm97_vm0, %v677_v51, 0.0  ;;  %v531_v63 = vunpack.c.h.bf16 %v548_v55  ;;  %v701_v3 = vadd.f32 %v530_v59, %v498_v58  ;;  %v502_v4 = vunpack.c.l.bf16 %v542_v0 }
   0xf   :  { %v128_v2 = vsel %vm97_vm0, %v687_v57, 0.0  ;;  %v534_v5 = vunpack.c.l.bf16 %v549_v1  ;;  %v131_v6 = vsel %vm97_vm0, %v691_v61, 0.0  ;;  %v503_v8 = vunpack.c.h.bf16 %v542_v0 }
  0x10   :  { %111 = vadd.xlane.f32.xlu0 %v110_v36  ;;  %114 = vadd.xlane.f32.xlu1 %v113_v40  ;;  %v705_v7 = vadd.f32 %v531_v63, %v499_v62  ;;  %v535_v9 = vunpack.c.h.bf16 %v549_v1  ;;  %v134_v10 = vsel %vm97_vm0, %v701_v3, 0.0 }
  0x11   :  { %v709_v11 = vadd.f32 %v534_v5, %v502_v4 }
  0x12   :  { %v137_v12 = vsel %vm97_vm0, %v705_v7, 0.0  ;;  %v713_v13 = vadd.f32 %v535_v9, %v503_v8 }
  0x13   :  { %v140_v15 = vsel %vm97_vm0, %v709_v11, 0.0 }
  0x14   :  { %117 = vadd.xlane.f32.xlu0 %v116_v46  ;;  %120 = vadd.xlane.f32.xlu1 %v119_v50  ;;  %v143_v16 = vsel %vm97_vm0, %v713_v13, 0.0 }
  0x18   :  { %123 = vadd.xlane.f32.xlu0 %v122_v56  ;;  %126 = vadd.xlane.f32.xlu1 %v125_v60 }
  0x1c   :  { %129 = vadd.xlane.f32.xlu0 %v128_v2  ;;  %132 = vadd.xlane.f32.xlu1 %v131_v6 }
  0x20   :  { %135 = vadd.xlane.f32.xlu0 %v134_v10  ;;  %138 = vadd.xlane.f32.xlu1 %v137_v12 }
  0x24   :  { %141 = vadd.xlane.f32.xlu0 %v140_v15  ;;  %144 = vadd.xlane.f32.xlu1 %v143_v16 }
  0x91   :  { %v100_v17 = vpop.xlane.xlu0 %99  ;;  %v106_v22 = vpop.xlane.xlu1 %105 }
  0x92   :  { %v147_v21 = vmul.f32 0.03125, %v100_v17  ;;  %v149_v23 = vmul.f32 0.03125, %v106_v22 }
  0x94   :  { %v720_v24 = vsub.f32 %v625_v14, %v147_v21  ;;  %v723_v25 = vsub.f32 %v627_v18, %v149_v23 }
  0x95   :  { %v103_v26 = vpop.xlane.xlu0 %102  ;;  %v109_v29 = vpop.xlane.xlu1 %108 }
  0x96   :  { %v148_v28 = vmul.f32 0.03125, %v103_v26  ;;  %v179_v30 = vmul.f32 %v720_v24, %v720_v24  ;;  %v150_v32 = vmul.f32 0.03125, %v109_v29  ;;  %v181_v33 = vmul.f32 %v723_v25, %v723_v25 }
  0x98   :  { %v730_v34 = vsub.f32 %v629_v19, %v148_v28  ;;  %v195_v35 = vsel %vm97_vm0, %v179_v30, 0.0  ;;  %v734_v14 = vsub.f32 %v631_v20, %v150_v32  ;;  %v201_v39 = vsel %vm97_vm0, %v181_v33, 0.0 }
  0x99   :  { %196 = vadd.xlane.f32.xlu0 %v195_v35  ;;  %v112_v18 = vpop.xlane.xlu0 %111  ;;  %v115_v38 = vpop.xlane.xlu1 %114 }
  0x9a   :  { %v151_v36 = vmul.f32 0.03125, %v112_v18  ;;  %v180_v40 = vmul.f32 %v730_v34, %v730_v34  ;;  %v152_v42 = vmul.f32 0.03125, %v115_v38  ;;  %v182_v43 = vmul.f32 %v734_v14, %v734_v14 }
  0x9c   :  { %v742_v19 = vsub.f32 %v645_v27, %v151_v36  ;;  %v198_v44 = vsel %vm97_vm0, %v180_v40, 0.0  ;;  %v746_v20 = vsub.f32 %v649_v31, %v152_v42  ;;  %v204_v49 = vsel %vm97_vm0, %v182_v43, 0.0 }
  0x9d   :  { %202 = vadd.xlane.f32.xlu0 %v201_v39  ;;  %199 = vadd.xlane.f32.xlu1 %v198_v44  ;;  %v118_v45 = vpop.xlane.xlu0 %117  ;;  %v121_v48 = vpop.xlane.xlu1 %120 }
  0x9e   :  { %v153_v46 = vmul.f32 0.03125, %v118_v45  ;;  %v183_v50 = vmul.f32 %v742_v19, %v742_v19  ;;  %v154_v52 = vmul.f32 0.03125, %v121_v48  ;;  %v184_v27 = vmul.f32 %v746_v20, %v746_v20 }
  0xa0   :  { %v754_v53 = vsub.f32 %v659_v37, %v153_v46  ;;  %v207_v31 = vsel %vm97_vm0, %v183_v50, 0.0  ;;  %v758_v54 = vsub.f32 %v663_v41, %v154_v52  ;;  %v210_v59 = vsel %vm97_vm0, %v184_v27, 0.0 }
  0xa1   :  { %205 = vadd.xlane.f32.xlu1 %v204_v49  ;;  %208 = vadd.xlane.f32.xlu0 %v207_v31  ;;  %v124_v55 = vpop.xlane.xlu0 %123  ;;  %v127_v58 = vpop.xlane.xlu1 %126 }
  0xa2   :  { %v155_v56 = vmul.f32 0.03125, %v124_v55  ;;  %v185_v60 = vmul.f32 %v754_v53, %v754_v53  ;;  %v156_v62 = vmul.f32 0.03125, %v127_v58  ;;  %v186_v37 = vmul.f32 %v758_v54, %v758_v54 }
  0xa4   :  { %v766_v63 = vsub.f32 %v673_v47, %v155_v56  ;;  %v213_v41 = vsel %vm97_vm0, %v185_v60, 0.0  ;;  %v770_v0 = vsub.f32 %v677_v51, %v156_v62  ;;  %v216_v5 = vsel %vm97_vm0, %v186_v37, 0.0 }
  0xa5   :  { %211 = vadd.xlane.f32.xlu1 %v210_v59  ;;  %214 = vadd.xlane.f32.xlu0 %v213_v41  ;;  %v130_v1 = vpop.xlane.xlu0 %129  ;;  %v133_v4 = vpop.xlane.xlu1 %132 }
  0xa6   :  { %v157_v2 = vmul.f32 0.03125, %v130_v1  ;;  %v187_v6 = vmul.f32 %v766_v63, %v766_v63  ;;  %v158_v8 = vmul.f32 0.03125, %v133_v4  ;;  %v188_v47 = vmul.f32 %v770_v0, %v770_v0 }
  0xa8   :  { %v778_v9 = vsub.f32 %v687_v57, %v157_v2  ;;  %v219_v51 = vsel %vm97_vm0, %v187_v6, 0.0  ;;  %v782_v10 = vsub.f32 %v691_v61, %v158_v8  ;;  %v222_v17 = vsel %vm97_vm0, %v188_v47, 0.0 }
  0xa9   :  { %217 = vadd.xlane.f32.xlu1 %v216_v5  ;;  %220 = vadd.xlane.f32.xlu0 %v219_v51  ;;  %v136_v12 = vpop.xlane.xlu0 %135  ;;  %v139_v16 = vpop.xlane.xlu1 %138  ;;  %v818_v51 = vld [vmem:[%s939_s2] ss:$0 sm:$0xff] }
  0xaa   :  { %v159_v15 = vmul.f32 0.03125, %v136_v12  ;;  %v189_v21 = vmul.f32 %v778_v9, %v778_v9  ;;  %v160_v22 = vmul.f32 0.03125, %v139_v16  ;;  %v190_v57 = vmul.f32 %v782_v10, %v782_v10 }
  0xac   :  { %v790_v23 = vsub.f32 %v701_v3, %v159_v15  ;;  %v225_v61 = vsel %vm97_vm0, %v189_v21, 0.0  ;;  %v794_v26 = vsub.f32 %v705_v7, %v160_v22  ;;  %v228_v32 = vsel %vm97_vm0, %v190_v57, 0.0 }
  0xad   :  { %223 = vadd.xlane.f32.xlu1 %v222_v17  ;;  %226 = vadd.xlane.f32.xlu0 %v225_v61  ;;  %v142_v28 = vpop.xlane.xlu0 %141  ;;  %v145_v30 = vpop.xlane.xlu1 %144  ;;  %v824_v17 = vld [vmem:[%s940_s3] ss:$0 sm:$0xff] }
  0xae   :  { %v161_v29 = vmul.f32 0.03125, %v142_v28  ;;  %v191_v33 = vmul.f32 %v790_v23, %v790_v23  ;;  %v162_v35 = vmul.f32 0.03125, %v145_v30  ;;  %v192_v3 = vmul.f32 %v794_v26, %v794_v26 }
  0xb0   :  { %v802_v18 = vsub.f32 %v709_v11, %v161_v29  ;;  %v231_v7 = vsel %vm97_vm0, %v191_v33, 0.0  ;;  %v806_v36 = vsub.f32 %v713_v13, %v162_v35  ;;  %v234_v38 = vsel %vm97_vm0, %v192_v3, 0.0 }
  0xb1   :  { %229 = vadd.xlane.f32.xlu1 %v228_v32  ;;  %232 = vadd.xlane.f32.xlu0 %v231_v7 }
  0xb2   :  { %v193_v39 = vmul.f32 %v802_v18, %v802_v18  ;;  %v194_v40 = vmul.f32 %v806_v36, %v806_v36 }
  0xb4   :  { %v237_v42 = vsel %vm97_vm0, %v193_v39, 0.0  ;;  %v240_v11 = vsel %vm97_vm0, %v194_v40, 0.0 }
  0xb5   :  { %235 = vadd.xlane.f32.xlu1 %v234_v38  ;;  %238 = vadd.xlane.f32.xlu0 %v237_v42 }
  0xb9   :  { %241 = vadd.xlane.f32.xlu1 %v240_v11 }
 0x122   :  { %v197_v43 = vpop.xlane.xlu0 %196 }
 0x123   :  { %v243_v13 = vmul.f32 0.03125, %v197_v43 }
 0x125   :  { %v259_v44 = vadd.f32 1e-05, %v243_v13 }
 0x126   :  { %v200_v45 = vpop.xlane.xlu1 %199  ;;  %v203_v46 = vpop.xlane.xlu0 %202 }
 0x127   :  { %550 = vrsqrt.f32 %v259_v44  ;;  %v244_v48 = vmul.f32 0.03125, %v200_v45  ;;  %v245_v49 = vmul.f32 0.03125, %v203_v46 }
 0x129   :  { %v260_v50 = vadd.f32 1e-05, %v244_v48  ;;  %v261_v52 = vadd.f32 1e-05, %v245_v49 }
 0x12a   :  { %v206_v27 = vpop.xlane.xlu1 %205  ;;  %v209_v31 = vpop.xlane.xlu0 %208 }
 0x12b   :  { %552 = vrsqrt.f32 %v260_v50  ;;  %v246_v55 = vmul.f32 0.03125, %v206_v27  ;;  %v247_v56 = vmul.f32 0.03125, %v209_v31 }
 0x12c   :  { %554 = vrsqrt.f32 %v261_v52 }
 0x12d   :  { %v262_v58 = vadd.f32 1e-05, %v246_v55  ;;  %v263_v59 = vadd.f32 1e-05, %v247_v56 }
 0x12e   :  { %v212_v60 = vpop.xlane.xlu1 %211  ;;  %v215_v62 = vpop.xlane.xlu0 %214 }
 0x12f   :  { %556 = vrsqrt.f32 %v262_v58  ;;  %v248_v37 = vmul.f32 0.03125, %v212_v60  ;;  %v249_v41 = vmul.f32 0.03125, %v215_v62 }
 0x130   :  { %558 = vrsqrt.f32 %v263_v59 }
 0x131   :  { %v264_v1 = vadd.f32 1e-05, %v248_v37  ;;  %v265_v2 = vadd.f32 1e-05, %v249_v41 }
 0x132   :  { %v218_v4 = vpop.xlane.xlu1 %217  ;;  %v221_v5 = vpop.xlane.xlu0 %220 }
 0x133   :  { %560 = vrsqrt.f32 %v264_v1  ;;  %v250_v6 = vmul.f32 0.03125, %v218_v4  ;;  %v251_v8 = vmul.f32 0.03125, %v221_v5 }
 0x134   :  { %v551_v47 = vpop.eup %550  ;;  %562 = vrsqrt.f32 %v265_v2 }
 0x135   :  { %v291_v12 = vmul.f32 %v551_v47, %v720_v24  ;;  %v266_v15 = vadd.f32 1e-05, %v250_v6  ;;  %v267_v16 = vadd.f32 1e-05, %v251_v8 }
 0x136   :  { %v224_v21 = vpop.xlane.xlu1 %223  ;;  %v227_v22 = vpop.xlane.xlu0 %226 }
 0x137   :  { %v314_v57 = vmul.f32 %v818_v51, %v291_v12  ;;  %564 = vrsqrt.f32 %v266_v15  ;;  %v252_v61 = vmul.f32 0.03125, %v224_v21  ;;  %v253_v28 = vmul.f32 0.03125, %v227_v22 }
 0x138   :  { %v553_v29 = vpop.eup %552  ;;  %566 = vrsqrt.f32 %v267_v16 }
 0x139   :  { %v555_v30 = vpop.eup %554  ;;  %v337_v32 = vadd.f32 %v824_v17, %v314_v57  ;;  %v292_v24 = vmul.f32 %v553_v29, %v730_v34  ;;  %v268_v33 = vadd.f32 1e-05, %v252_v61  ;;  %v269_v35 = vadd.f32 1e-05, %v253_v28 }
 0x13a   :  { %v293_v3 = vmul.f32 %v555_v30, %v723_v25  ;;  %v230_v7 = vpop.xlane.xlu1 %229  ;;  %v233_v38 = vpop.xlane.xlu0 %232 }
 0x13b   :  { %v456_v39 = vpack.c.bf16 %v337_v32, %v337_v32  ;;  %v315_v40 = vmul.f32 %v818_v51, %v292_v24  ;;  %568 = vrsqrt.f32 %v268_v33  ;;  %v254_v42 = vmul.f32 0.03125, %v230_v7 }
 0x13c   :  { %v557_v11 = vpop.eup %556  ;;  %v316_v43 = vmul.f32 %v818_v51, %v293_v3  ;;  %570 = vrsqrt.f32 %v269_v35  ;;  %v255_v13 = vmul.f32 0.03125, %v233_v38 }
 0x13d   :  { %v559_v44 = vpop.eup %558  ;;  %418 = vst.msk [vmem:[%s941_s4] sm:$0xf] %vm417_vm1, %v456_v39  ;;  %v338_v25 = vadd.f32 %v824_v17, %v315_v40  ;;  %v294_v34 = vmul.f32 %v557_v11, %v734_v14  ;;  %v270_v45 = vadd.f32 1e-05, %v254_v42 }
 0x13e   :  { %v339_v46 = vadd.f32 %v824_v17, %v316_v43  ;;  %v295_v48 = vmul.f32 %v559_v44, %v742_v19  ;;  %v271_v49 = vadd.f32 1e-05, %v255_v13  ;;  %v236_v50 = vpop.xlane.xlu1 %235  ;;  %v239_v52 = vpop.xlane.xlu0 %238 }
 0x13f   :  { %v457_v27 = vpack.c.bf16 %v338_v25, %v338_v25  ;;  %v317_v31 = vmul.f32 %v818_v51, %v294_v34  ;;  %572 = vrsqrt.f32 %v270_v45  ;;  %v256_v55 = vmul.f32 0.03125, %v236_v50 }
 0x140   :  { %v561_v56 = vpop.eup %560  ;;  %v458_v58 = vpack.c.bf16 %v339_v46, %v339_v46  ;;  %v318_v59 = vmul.f32 %v818_v51, %v295_v48  ;;  %574 = vrsqrt.f32 %v271_v49  ;;  %v257_v60 = vmul.f32 0.03125, %v239_v52 }
 0x141   :  { %v563_v14 = vpop.eup %562  ;;  %419 = vst.msk [vmem:[%s941_s4 + $0x4] sm:$0xf] %vm417_vm1, %v457_v27  ;;  %v340_v19 = vadd.f32 %v824_v17, %v317_v31  ;;  %v296_v62 = vmul.f32 %v561_v56, %v746_v20  ;;  %v272_v37 = vadd.f32 1e-05, %v256_v55 }
 0x142   :  { %420 = vst.msk [vmem:[%s941_s4 + $0x8] sm:$0xf] %vm417_vm1, %v458_v58  ;;  %v341_v41 = vadd.f32 %v824_v17, %v318_v59  ;;  %v297_v1 = vmul.f32 %v563_v14, %v754_v53  ;;  %v273_v2 = vadd.f32 1e-05, %v257_v60  ;;  %v242_v4 = vpop.xlane.xlu1 %241 }
 0x143   :  { %v459_v5 = vpack.c.bf16 %v340_v19, %v340_v19  ;;  %v319_v6 = vmul.f32 %v818_v51, %v296_v62  ;;  %576 = vrsqrt.f32 %v272_v37  ;;  %v258_v8 = vmul.f32 0.03125, %v242_v4 }
 0x144   :  { %v565_v47 = vpop.eup %564  ;;  %v460_v12 = vpack.c.bf16 %v341_v41, %v341_v41  ;;  %v320_v20 = vmul.f32 %v818_v51, %v297_v1  ;;  %578 = vrsqrt.f32 %v273_v2 }
 0x145   :  { %v567_v15 = vpop.eup %566  ;;  %421 = vst.msk [vmem:[%s941_s4 + $0xc] sm:$0xf] %vm417_vm1, %v459_v5  ;;  %v342_v53 = vadd.f32 %v824_v17, %v319_v6  ;;  %v298_v16 = vmul.f32 %v565_v47, %v758_v54  ;;  %v274_v21 = vadd.f32 1e-05, %v258_v8 }
 0x146   :  { %422 = vst.msk [vmem:[%s941_s4 + $0x10] sm:$0xf] %vm417_vm1, %v460_v12  ;;  %v343_v22 = vadd.f32 %v824_v17, %v320_v20  ;;  %v299_v57 = vmul.f32 %v567_v15, %v766_v63 }
 0x147   :  { %v461_v61 = vpack.c.bf16 %v342_v53, %v342_v53  ;;  %v321_v28 = vmul.f32 %v818_v51, %v298_v16  ;;  %580 = vrsqrt.f32 %v274_v21 }
 0x148   :  { %v569_v29 = vpop.eup %568  ;;  %v462_v30 = vpack.c.bf16 %v343_v22, %v343_v22  ;;  %v322_v32 = vmul.f32 %v818_v51, %v299_v57 }
 0x149   :  { %v571_v24 = vpop.eup %570  ;;  %423 = vst.msk [vmem:[%s941_s4 + $0x14] sm:$0xf] %vm417_vm1, %v461_v61  ;;  %v344_v54 = vadd.f32 %v824_v17, %v321_v28  ;;  %v300_v33 = vmul.f32 %v569_v29, %v770_v0 }
 0x14a   :  { %424 = vst.msk [vmem:[%s941_s4 + $0x18] sm:$0xf] %vm417_vm1, %v462_v30  ;;  %v345_v63 = vadd.f32 %v824_v17, %v322_v32  ;;  %v301_v35 = vmul.f32 %v571_v24, %v778_v9 }
 0x14b   :  { %v463_v3 = vpack.c.bf16 %v344_v54, %v344_v54  ;;  %v323_v7 = vmul.f32 %v818_v51, %v300_v33 }
 0x14c   :  { %v573_v38 = vpop.eup %572  ;;  %v464_v39 = vpack.c.bf16 %v345_v63, %v345_v63  ;;  %v324_v40 = vmul.f32 %v818_v51, %v301_v35 }
 0x14d   :  { %v575_v42 = vpop.eup %574  ;;  %425 = vst.msk [vmem:[%s941_s4 + $0x1c] sm:$0xf] %vm417_vm1, %v463_v3  ;;  %v346_v0 = vadd.f32 %v824_v17, %v323_v7  ;;  %v302_v11 = vmul.f32 %v573_v38, %v782_v10 }
 0x14e   :  { %426 = vst.msk [vmem:[%s941_s4 + $0x20] sm:$0xf] %vm417_vm1, %v464_v39  ;;  %v347_v9 = vadd.f32 %v824_v17, %v324_v40  ;;  %v303_v43 = vmul.f32 %v575_v42, %v790_v23 }
 0x14f   :  { %v465_v13 = vpack.c.bf16 %v346_v0, %v346_v0  ;;  %v325_v44 = vmul.f32 %v818_v51, %v302_v11 }
 0x150   :  { %v577_v25 = vpop.eup %576  ;;  %v466_v34 = vpack.c.bf16 %v347_v9, %v347_v9  ;;  %v326_v45 = vmul.f32 %v818_v51, %v303_v43 }
 0x151   :  { %v579_v46 = vpop.eup %578  ;;  %427 = vst.msk [vmem:[%s941_s4 + $0x24] sm:$0xf] %vm417_vm1, %v465_v13  ;;  %v348_v10 = vadd.f32 %v824_v17, %v325_v44  ;;  %v304_v48 = vmul.f32 %v577_v25, %v794_v26 }
 0x152   :  { %428 = vst.msk [vmem:[%s941_s4 + $0x28] sm:$0xf] %vm417_vm1, %v466_v34  ;;  %v349_v23 = vadd.f32 %v824_v17, %v326_v45  ;;  %v305_v49 = vmul.f32 %v579_v46, %v802_v18 }
 0x153   :  { %v467_v50 = vpack.c.bf16 %v348_v10, %v348_v10  ;;  %v327_v52 = vmul.f32 %v818_v51, %v304_v48 }
 0x154   :  { %v581_v27 = vpop.eup %580  ;;  %v468_v31 = vpack.c.bf16 %v349_v23, %v349_v23  ;;  %v328_v55 = vmul.f32 %v818_v51, %v305_v49 }
 0x155   :  { %429 = vst.msk [vmem:[%s941_s4 + $0x2c] sm:$0xf] %vm417_vm1, %v467_v50  ;;  %v350_v26 = vadd.f32 %v824_v17, %v327_v52  ;;  %v306_v56 = vmul.f32 %v581_v27, %v806_v36 }
 0x156   :  { %430 = vst.msk [vmem:[%s941_s4 + $0x30] sm:$0xf] %vm417_vm1, %v468_v31  ;;  %v351_v18 = vadd.f32 %v824_v17, %v328_v55 }
 0x157   :  { %v469_v58 = vpack.c.bf16 %v350_v26, %v350_v26  ;;  %v329_v59 = vmul.f32 %v818_v51, %v306_v56 }
 0x158   :  { %v470_v60 = vpack.c.bf16 %v351_v18, %v351_v18 }
 0x159   :  { %431 = vst.msk [vmem:[%s941_s4 + $0x34] sm:$0xf] %vm417_vm1, %v469_v58  ;;  %v352_v14 = vadd.f32 %v824_v17, %v329_v59 }
 0x15a   :  { %432 = vst.msk [vmem:[%s941_s4 + $0x38] sm:$0xf] %vm417_vm1, %v470_v60 }
 0x15b   :  { %v471_v36 = vpack.c.bf16 %v352_v14, %v352_v14 }
 0x15d   :  { %433 = vst.msk [vmem:[%s941_s4 + $0x3c] sm:$0xf] %vm417_vm1, %v471_v36 }

// kernel: detr_forward.45
= control target key start
LH: loop header
LB: loop body
LE: loop exit
PB: predicated region body
PF: predicated region fallthrough
CT: control target
= control target key end

     0   :  { %vm100_vm0 = vcmask 261120   ;;  %vm285_vm1 = vcmask 523264   ;;  %vm471_vm2 = vcmask 257024   ;;  %s812_s1 = inlined_call_operand.vmem [shape: bf16[32,64], index: 1, kind: input, shape index: {}]   ;;  %s813_s0 = inlined_call_operand.vmem [shape: bf16[128,32], index: 0, kind: input, shape index: {}]   ;;  %s814_s3 = inlined_call_operand.vmem [shape: bf16[64,32], index: 3, kind: input, shape index: {}]   ;;  %s815_s2 = inlined_call_operand.vmem [shape: f32[1,64], index: 2, kind: input, shape index: {}]   ;;  %s816_s4 = inlined_call_operand.vmem [shape: f32[1,32], index: 4, kind: input, shape index: {}]   ;;  %s817_s5 = inlined_call_operand.vmem [shape: bf16[128,32], index: 5, kind: output, shape index: {}]  }
   0x1   :  { %v622_v0 = vld [vmem:[%s812_s1 + $0x8] sm:$0xff]   ;;  %v623_v1 = vld [vmem:[%s812_s1] sm:$0xff]   ;;  %v626_v4 = vld [vmem:[%s813_s0 + $0x10] sm:$0xff]  }
   0x2   :  { %578 = vmatprep.subr.bf16.mxu0 %v622_v0  ;;  %v624_v2 = vld [vmem:[%s813_s0] sm:$0xff]   ;;  %v625_v3 = vld [vmem:[%s813_s0 + $0x8] sm:$0xff]   ;;  %v632_v5 = vld [vmem:[%s814_s3 + $0x18] sm:$0xff]  }
   0x3   :  { %579 = vmatpush3.bf16.msra.mxu0 %v622_v0  ;;  %582 = vmatprep.mubr.msk.bf16.mxu0 %vm100_vm0, %v624_v2  ;;  %v627_v6 = vld [vmem:[%s813_s0 + $0x18] sm:$0xff]   ;;  %v628_v7 = vld [vmem:[%s813_s0 + $0x20] sm:$0xff]   ;;  %v629_v8 = vld [vmem:[%s813_s0 + $0x28] sm:$0xff]  }
   0x4   :  { %580 = vmatprep.subr.bf16.mxu0 %v623_v1  ;;  %598 = vmatprep.subr.bf16.mxu1 %v632_v5  ;;  %v630_v9 = vld [vmem:[%s813_s0 + $0x30] sm:$0xff]   ;;  %v631_v10 = vld [vmem:[%s813_s0 + $0x38] sm:$0xff]   ;;  %v634_v12 = vld [vmem:[%s814_s3 + $0x8] sm:$0xff]  }
   0x5   :  { %599 = vmatpush3.bf16.msra.mxu1 %v632_v5  ;;  %v633_v11 = vld [vmem:[%s814_s3 + $0x10] sm:$0xff]   ;;  %v635_v13 = vld [vmem:[%s814_s3] sm:$0xff]  }
   0x6   :  { %600 = vmatprep.subr.bf16.mxu1 %v633_v11  ;;  %v492_v16 = vld [vmem:[%s815_s2] ss:$0 sm:$0xff] }
   0x7   :  { %581 = vmatpush3.bf16.msra.mxu0 %v623_v1 }
   0x9   :  { %601 = vmatpush3.bf16.msra.mxu1 %v633_v11 }
   0xa   :  { %583 = vmatmul.mubr.msk.bf16.vlgmr.msra.gmra.mxu0 %vm100_vm0, %v625_v3  ;;  %602 = vmatprep.subr.bf16.mxu1 %v634_v12 }
   0xb   :  { %586 = vmatprep.mubr.msk.bf16.mxu0 %vm100_vm0, %v626_v4 }
   0xd   :  { %603 = vmatpush3.bf16.msra.mxu1 %v634_v12 }
   0xe   :  { %604 = vmatprep.subr.bf16.mxu1 %v635_v13 }
  0x11   :  { %605 = vmatpush3.bf16.msra.mxu1 %v635_v13 }
  0x12   :  { %587 = vmatmul.mubr.msk.bf16.gmra.mxu0 %vm100_vm0, %v627_v6 }
  0x13   :  { %590 = vmatprep.mubr.msk.bf16.mxu0 %vm100_vm0, %v628_v7  ;;  %v730_v7 = vld [vmem:[%s816_s4] ss:$0 sm:$0xff] }
  0x1a   :  { %591 = vmatmul.mubr.msk.bf16.gmra.mxu0 %vm100_vm0, %v629_v8 }
  0x1b   :  { %594 = vmatprep.mubr.msk.bf16.mxu0 %vm100_vm0, %v630_v9 }
  0x22   :  { %595 = vmatmul.mubr.msk.bf16.gmra.mxu0 %vm100_vm0, %v631_v10 }
  0xca   :  { %v584_v14 = vpop.f32.mrf.mxu0 }
  0xcb   :  { %v168_v20 = vadd.f32 %v584_v14, %v492_v16 }
  0xcc   :  { %v159_v15 = vpop.f32.mrf.mxu0 }
  0xcd   :  { %v160_v18 = vadd.f32 %v492_v16, %v159_v15  ;;  %v224_v27 = vmax.f32 %v168_v20, 0.0 }
  0xce   :  { %v585_v17 = vpop.f32.mrf.mxu0 }
  0xcf   :  { %v171_v19 = vadd.f32 %v585_v17, %v492_v16  ;;  %v222_v25 = vmax.f32 %v160_v18, 0.0 }
  0xd0   :  { %v162_v21 = vpop.f32.mrf.mxu0 }
  0xd1   :  { %v163_v22 = vadd.f32 %v492_v16, %v162_v21  ;;  %v225_v23 = vmax.f32 %v171_v19, 0.0 }
  0xd2   :  { %v588_v24 = vpop.f32.mrf.mxu0 }
  0xd3   :  { %v223_v26 = vmax.f32 %v163_v22, 0.0  ;;  %v239_v30 = vpack.c.bf16 %v225_v23, %v224_v27  ;;  %v184_v34 = vadd.f32 %v588_v24, %v492_v16 }
  0xd4   :  { %v175_v28 = vpop.f32.mrf.mxu0 }
  0xd5   :  { %v238_v29 = vpack.c.bf16 %v223_v26, %v222_v25  ;;  %v176_v32 = vadd.f32 %v492_v16, %v175_v28  ;;  %v228_v41 = vmax.f32 %v184_v34, 0.0 }
  0xd6   :  { %v589_v31 = vpop.f32.mrf.mxu0 }
  0xd7   :  { %v187_v33 = vadd.f32 %v589_v31, %v492_v16  ;;  %606 = vmatprep.mubr.msk.bf16.mxu1 %vm285_vm1, %v238_v29  ;;  %v226_v39 = vmax.f32 %v176_v32, 0.0 }
  0xd8   :  { %v178_v35 = vpop.f32.mrf.mxu0  ;;  %607 = vmatmul.mubr.msk.bf16.vlgmr.msra.gmra.mxu1 %vm285_vm1, %v239_v30 }
  0xd9   :  { %v179_v36 = vadd.f32 %v492_v16, %v178_v35  ;;  %v229_v37 = vmax.f32 %v187_v33, 0.0 }
  0xda   :  { %v592_v38 = vpop.f32.mrf.mxu0 }
  0xdb   :  { %v227_v40 = vmax.f32 %v179_v36, 0.0  ;;  %v241_v44 = vpack.c.bf16 %v229_v37, %v228_v41  ;;  %v200_v48 = vadd.f32 %v592_v38, %v492_v16 }
  0xdc   :  { %v191_v42 = vpop.f32.mrf.mxu0 }
  0xdd   :  { %v240_v43 = vpack.c.bf16 %v227_v40, %v226_v39  ;;  %v192_v46 = vadd.f32 %v492_v16, %v191_v42  ;;  %v232_v55 = vmax.f32 %v200_v48, 0.0 }
  0xde   :  { %v593_v45 = vpop.f32.mrf.mxu0 }
  0xdf   :  { %v203_v47 = vadd.f32 %v593_v45, %v492_v16  ;;  %610 = vmatprep.mubr.msk.bf16.mxu1 %vm285_vm1, %v240_v43  ;;  %v230_v53 = vmax.f32 %v192_v46, 0.0 }
  0xe0   :  { %v194_v49 = vpop.f32.mrf.mxu0  ;;  %611 = vmatmul.mubr.msk.bf16.gmra.mxu1 %vm285_vm1, %v241_v44 }
  0xe1   :  { %v195_v50 = vadd.f32 %v492_v16, %v194_v49  ;;  %v233_v51 = vmax.f32 %v203_v47, 0.0 }
  0xe2   :  { %v596_v52 = vpop.f32.mrf.mxu0 }
  0xe3   :  { %v231_v54 = vmax.f32 %v195_v50, 0.0  ;;  %v243_v58 = vpack.c.bf16 %v233_v51, %v232_v55  ;;  %v216_v62 = vadd.f32 %v596_v52, %v492_v16 }
  0xe4   :  { %v207_v56 = vpop.f32.mrf.mxu0 }
  0xe5   :  { %v242_v57 = vpack.c.bf16 %v231_v54, %v230_v53  ;;  %v208_v60 = vadd.f32 %v492_v16, %v207_v56  ;;  %v236_v4 = vmax.f32 %v216_v62, 0.0 }
  0xe6   :  { %v597_v59 = vpop.f32.mrf.mxu0 }
  0xe7   :  { %v219_v61 = vadd.f32 %v597_v59, %v492_v16  ;;  %614 = vmatprep.mubr.msk.bf16.mxu1 %vm285_vm1, %v242_v57  ;;  %v234_v2 = vmax.f32 %v208_v60, 0.0 }
  0xe8   :  { %v210_v63 = vpop.f32.mrf.mxu0  ;;  %615 = vmatmul.mubr.msk.bf16.gmra.mxu1 %vm285_vm1, %v243_v58 }
  0xe9   :  { %v211_v0 = vadd.f32 %v492_v16, %v210_v63  ;;  %v237_v1 = vmax.f32 %v219_v61, 0.0 }
  0xeb   :  { %v235_v3 = vmax.f32 %v211_v0, 0.0  ;;  %v245_v6 = vpack.c.bf16 %v237_v1, %v236_v4 }
  0xed   :  { %v244_v5 = vpack.c.bf16 %v235_v3, %v234_v2 }
  0xef   :  { %618 = vmatprep.mubr.msk.bf16.mxu1 %vm285_vm1, %v244_v5 }
  0xf0   :  { %619 = vmatmul.mubr.msk.bf16.gmra.mxu1 %vm285_vm1, %v245_v6 }
 0x198   :  { %v608_v8 = vpop.f32.mrf.mxu1 }
 0x199   :  { %v353_v9 = vadd.f32 %v608_v8, %v730_v7 }
 0x19a   :  { %v344_v10 = vpop.f32.mrf.mxu1 }
 0x19b   :  { %v542_v11 = vpack.c.bf16 %v353_v9, %v353_v9  ;;  %v345_v12 = vadd.f32 %v730_v7, %v344_v10 }
 0x19c   :  { %v609_v13 = vpop.f32.mrf.mxu1 }
 0x19d   :  { %474 = vst.msk [vmem:[%s817_s5 + $0x8] sm:$0xf] %vm471_vm2, %v542_v11  ;;  %v540_v14 = vpack.c.bf16 %v345_v12, %v345_v12  ;;  %v356_v15 = vadd.f32 %v609_v13, %v730_v7 }
 0x19e   :  { %v347_v16 = vpop.f32.mrf.mxu1 }
 0x19f   :  { %472 = vst.msk [vmem:[%s817_s5] sm:$0xf] %vm471_vm2, %v540_v14  ;;  %v543_v17 = vpack.c.bf16 %v356_v15, %v356_v15  ;;  %v348_v18 = vadd.f32 %v730_v7, %v347_v16 }
 0x1a0   :  { %v612_v19 = vpop.f32.mrf.mxu1 }
 0x1a1   :  { %475 = vst.msk [vmem:[%s817_s5 + $0xc] sm:$0xf] %vm471_vm2, %v543_v17  ;;  %v541_v20 = vpack.c.bf16 %v348_v18, %v348_v18  ;;  %v369_v21 = vadd.f32 %v612_v19, %v730_v7 }
 0x1a2   :  { %v360_v22 = vpop.f32.mrf.mxu1 }
 0x1a3   :  { %473 = vst.msk [vmem:[%s817_s5 + $0x4] sm:$0xf] %vm471_vm2, %v541_v20  ;;  %v546_v23 = vpack.c.bf16 %v369_v21, %v369_v21  ;;  %v361_v24 = vadd.f32 %v730_v7, %v360_v22 }
 0x1a4   :  { %v613_v25 = vpop.f32.mrf.mxu1 }
 0x1a5   :  { %478 = vst.msk [vmem:[%s817_s5 + $0x18] sm:$0xf] %vm471_vm2, %v546_v23  ;;  %v544_v26 = vpack.c.bf16 %v361_v24, %v361_v24  ;;  %v372_v27 = vadd.f32 %v613_v25, %v730_v7 }
 0x1a6   :  { %v363_v28 = vpop.f32.mrf.mxu1 }
 0x1a7   :  { %476 = vst.msk [vmem:[%s817_s5 + $0x10] sm:$0xf] %vm471_vm2, %v544_v26  ;;  %v547_v29 = vpack.c.bf16 %v372_v27, %v372_v27  ;;  %v364_v30 = vadd.f32 %v730_v7, %v363_v28 }
 0x1a8   :  { %v616_v31 = vpop.f32.mrf.mxu1 }
 0x1a9   :  { %479 = vst.msk [vmem:[%s817_s5 + $0x1c] sm:$0xf] %vm471_vm2, %v547_v29  ;;  %v545_v32 = vpack.c.bf16 %v364_v30, %v364_v30  ;;  %v385_v33 = vadd.f32 %v616_v31, %v730_v7 }
 0x1aa   :  { %v376_v34 = vpop.f32.mrf.mxu1 }
 0x1ab   :  { %477 = vst.msk [vmem:[%s817_s5 + $0x14] sm:$0xf] %vm471_vm2, %v545_v32  ;;  %v550_v35 = vpack.c.bf16 %v385_v33, %v385_v33  ;;  %v377_v36 = vadd.f32 %v730_v7, %v376_v34 }
 0x1ac   :  { %v617_v37 = vpop.f32.mrf.mxu1 }
 0x1ad   :  { %482 = vst.msk [vmem:[%s817_s5 + $0x28] sm:$0xf] %vm471_vm2, %v550_v35  ;;  %v548_v38 = vpack.c.bf16 %v377_v36, %v377_v36  ;;  %v388_v39 = vadd.f32 %v617_v37, %v730_v7 }
 0x1ae   :  { %v379_v40 = vpop.f32.mrf.mxu1 }
 0x1af   :  { %480 = vst.msk [vmem:[%s817_s5 + $0x20] sm:$0xf] %vm471_vm2, %v548_v38  ;;  %v551_v41 = vpack.c.bf16 %v388_v39, %v388_v39  ;;  %v380_v42 = vadd.f32 %v730_v7, %v379_v40 }
 0x1b0   :  { %v620_v43 = vpop.f32.mrf.mxu1 }
 0x1b1   :  { %483 = vst.msk [vmem:[%s817_s5 + $0x2c] sm:$0xf] %vm471_vm2, %v551_v41  ;;  %v549_v44 = vpack.c.bf16 %v380_v42, %v380_v42  ;;  %v401_v45 = vadd.f32 %v620_v43, %v730_v7 }
 0x1b2   :  { %v392_v46 = vpop.f32.mrf.mxu1 }
 0x1b3   :  { %481 = vst.msk [vmem:[%s817_s5 + $0x24] sm:$0xf] %vm471_vm2, %v549_v44  ;;  %v554_v47 = vpack.c.bf16 %v401_v45, %v401_v45  ;;  %v393_v48 = vadd.f32 %v730_v7, %v392_v46 }
 0x1b4   :  { %v621_v49 = vpop.f32.mrf.mxu1 }
 0x1b5   :  { %486 = vst.msk [vmem:[%s817_s5 + $0x38] sm:$0xf] %vm471_vm2, %v554_v47  ;;  %v552_v50 = vpack.c.bf16 %v393_v48, %v393_v48  ;;  %v404_v51 = vadd.f32 %v621_v49, %v730_v7 }
 0x1b6   :  { %v395_v52 = vpop.f32.mrf.mxu1 }
 0x1b7   :  { %484 = vst.msk [vmem:[%s817_s5 + $0x30] sm:$0xf] %vm471_vm2, %v552_v50  ;;  %v555_v53 = vpack.c.bf16 %v404_v51, %v404_v51  ;;  %v396_v54 = vadd.f32 %v730_v7, %v395_v52 }
 0x1b9   :  { %487 = vst.msk [vmem:[%s817_s5 + $0x3c] sm:$0xf] %vm471_vm2, %v555_v53  ;;  %v553_v55 = vpack.c.bf16 %v396_v54, %v396_v54 }
 0x1bb   :  { %485 = vst.msk [vmem:[%s817_s5 + $0x34] sm:$0xf] %vm471_vm2, %v553_v55 }

// kernel: detr_forward.59
= control target key start
LH: loop header
LB: loop body
LE: loop exit
PB: predicated region body
PF: predicated region fallthrough
CT: control target
= control target key end

     0   :  { %s1225_s12 = smov 0   ;;  %s1227_s13 = smov 0   ;;  %s1446_s0 = inlined_call_operand.vmem [shape: bf16[2,8,32], index: 0, kind: input, shape index: {}]   ;;  %s1447_s1 = inlined_call_operand.vmem [shape: bf16[2,64,32], index: 1, kind: input, shape index: {}]   ;;  %s1448_s2 = inlined_call_operand.vmem [shape: bf16[2,64,32], index: 2, kind: input, shape index: {}]   ;;  %s1449_s3 = inlined_call_operand.vmem [shape: bf16[2,8,32], index: 3, kind: output, shape index: {}]  }
   0x1   :  { %s1229_s14 = smov 0  }
   0x2 LB: > { %s25_s15 = sadd.s32 1, %s1191_s13  ;;  %p946_p0 = scmp.ge.s32.totalorder %s1195_s14, 1  ;;  %s1195_s14 = sphi %s1229_s14, %s13_s14   ;;  %s1191_s13 = sphi %s1227_s13, %s1451_s13   ;;  %s1187_s12 = sphi %s1225_s12, %s1450_s12  }
   0x3   : > { %p27_p1 = scmp.ge.s32.totalorder %s25_s15, 2  ;;  %p175_p2 = scmp.lt.s32.totalorder %s1195_s14, 3 }
   0x5   : > { %s1453_s15 = smov (%p27_p1, %s25_s15), 0  ;;  %p176_p3 = pnand %p946_p0, %p175_p2 }
   0x6   : > { %p213_p4 = scmp.lt.s32.totalorder (!%p176_p3), %s1187_s12, 1  ;;  %s1199_s24 = smov (!%p176_p3), 120  }
   0x7   : > { %179 = sbr.rel (%p176_p3) target bundleno = 2491 (0x9bb), region = 32  ;;  %s1200_s4 = smov (!%p176_p3), 112  }
   0x8   : > { %s1201_s5 = smov (!%p176_p3), 104   ;;  %s1202_s6 = smov (!%p176_p3), 8  }
   0x9   : > { %s1203_s7 = smov (!%p176_p3), 16   ;;  %s1204_s8 = smov (!%p176_p3), 24  }
   0xc   : > { %v1197_v0 = vmov 0.0   ;;  %vm1198_vm0 = vmmov 0   ;;  %s1455_s12 = smov (!%p213_p4, %s1187_s12), 1  ;;  %vm275_vm1 = vcmask 64512   ;;  %vm332_vm2 = vcmask 523264  }
   0xd   : > { %1020 = vmatprep.subr.bf16.mxu0 %v1197_v0  ;;  %1028 = vmatprep.mubr.msk.bf16.mxu0 %vm1198_vm0, %v1197_v0  ;;  %s975_s16 = sshll.u32 %s1455_s12, 5  ;;  %s947_s20 = sshll.u32 %s1455_s12, 2  ;;  %vm413_vm3 = vcmask 60416   ;;  %vm558_vm4 = vcmask 126016   ;;  %vm700_vm5 = vcmask 191616   ;;  %vm842_vm6 = vcmask 257216  }
   0xe   : > { %1032 = vmatprep.subr.bf16.mxu1 %v1197_v0  ;;  %1040 = vmatprep.mubr.msk.bf16.mxu1 %vm1198_vm0, %v1197_v0  ;;  %s224_s19 = scalar_lea.vmem %s1447_s1, %s975_s16  ;;  %s219_s23 = scalar_lea.vmem %s1446_s0, %s947_s20 }
   0xf   : > { %v1257_v1 = vld [vmem:[%s224_s19 + $0x18] sm:$0xff]   ;;  %v1262_v3 = vld [vmem:[%s224_s19 + $0x10] sm:$0xff]   ;;  %v1267_v5 = vld [vmem:[%s224_s19 + $0x8] sm:$0xff]   ;;  %s229_s27 = scalar_lea.vmem %s1448_s2, %s975_s16  ;;  %s1340_s30 = scalar_lea.vmem %s1449_s3, %s947_s20 }
  0x10   : > { %v289_v2 = vsel %vm275_vm1, %v1257_v1, 0  ;;  %v286_v4 = vsel %vm275_vm1, %v1262_v3, 0  ;;  %v283_v6 = vsel %vm275_vm1, %v1267_v5, 0  ;;  %v1272_v7 = vld [vmem:[%s224_s19] sm:$0xff]   ;;  %426 = vrot.lane.b32.xlu1 %v1257_v1, %s1199_s24  ;;  %v1303_v22 = vld [vmem:[%s229_s27 + $0x18] sm:$0xff]   ;;  %v1306_v23 = vld [vmem:[%s229_s27 + $0x10] sm:$0xff]  }
  0x11   : > { %1021 = vmatpush3.bf16.xpose.msra.mxu0 %v289_v2  ;;  %v280_v8 = vsel %vm275_vm1, %v1272_v7, 0  ;;  %v238_v9 = vld [vmem:[%s219_s23] sm:$0xf]  ;;  %1033 = vmatpush3.bf16.msra.mxu1 %v1303_v22  ;;  %v1310_v24 = vld [vmem:[%s229_s27 + $0x8] sm:$0xff]  }
  0x12   : > { %1022 = vmatprep.subr.bf16.mxu0 %v1197_v0  ;;  %v1293_v16 = vcombine.low %v238_v9, %v238_v9  ;;  %1034 = vmatprep.subr.bf16.mxu1 %v1197_v0  ;;  %v1314_v25 = vld [vmem:[%s229_s27] sm:$0xff]  }
  0x14   : > { %424 = vrot.lane.b32.xlu1 %v1262_v3, %s1199_s24 }
  0x15   : > { %1035 = vmatpush3.bf16.msra.mxu1 %v1306_v23 }
  0x16   : > { %1036 = vmatprep.subr.bf16.mxu1 %v1197_v0 }
  0x18   : > { %420 = vrot.lane.b32.xlu1 %v1272_v7, %s1199_s24 }
  0x19   : > { %1023 = vmatpush3.bf16.xpose.msra.mxu0 %v286_v4  ;;  %1037 = vmatpush3.bf16.msra.mxu1 %v1310_v24 }
  0x1a   : > { %1024 = vmatprep.subr.bf16.mxu0 %v1197_v0  ;;  %1038 = vmatprep.subr.bf16.mxu1 %v1197_v0 }
  0x1c   : > { %418 = vrot.lane.b32.xlu1 %v1293_v16, %s1199_s24 }
  0x1d   : > { %1039 = vmatpush3.bf16.msra.mxu1 %v1314_v25 }
  0x1e   : > { %1044 = vmatprep.subr.bf16.mxu1 %v1197_v0 }
  0x21   : > { %1025 = vmatpush3.bf16.xpose.msra.mxu0 %v283_v6 }
  0x22   : > { %1026 = vmatprep.subr.bf16.mxu0 %v1197_v0 }
  0x29   : > { %1027 = vmatpush3.bf16.xpose.msra.mxu0 %v280_v8 }
  0x2a   : > { %1056 = vmatprep.subr.bf16.mxu0 %v1197_v0 }
  0x30   : > { %1029 = vmatmul.mubr.msk.bf16.vlgmr.msra.gmra.mxu0 %vm275_vm1, %v238_v9 }
  0x31   : > { %1064 = vmatprep.mubr.msk.bf16.mxu0 %vm1198_vm0, %v1197_v0 }
  0x82   : > { %v427_v28 = vpop.permute.xlu1 %426 }
  0x83   : > { %v441_v30 = vsel %vm275_vm1, %v427_v28, 0 }
  0x86   : > { %v425_v32 = vpop.permute.xlu1 %424 }
  0x87   : > { %v438_v33 = vsel %vm275_vm1, %v425_v32, 0 }
  0x8a   : > { %v421_v36 = vpop.permute.xlu1 %420 }
  0x8b   : > { %v432_v37 = vsel %vm275_vm1, %v421_v36, 0 }
  0x8e   : > { %v419_v38 = vpop.permute.xlu1 %418 }
  0xf0   : > { %v325_v10 = vpop.f32.mrf.mxu0 }
  0xf1   : > { %v331_v11 = vmul.f32 0.35355338, %v325_v10 }
  0xf2   : > { %v1030_v12 = vpop.f32.mrf.mxu0 }
  0xf3   : > { %v333_v13 = vsel %vm332_vm2, %v331_v11, -inf }
  0xf4   : > { %334 = vmax.xlane.f32.xlu0 %v333_v13  ;;  %v328_v14 = vpop.f32.mrf.mxu0 }
  0xf6   : > { %v1031_v15 = vpop.f32.mrf.mxu0 }
 0x17d   : > { %v335_v17 = vpop.xlane.xlu0 %334 }
 0x17e   : > { %v336_v18 = vsub.f32 %v331_v11, %v335_v17 }
 0x180   : > { %v337_v19 = vmul.f32 1.442695, %v336_v18 }
 0x182   : > { %1157 = vpow2.f32 %v337_v19 }
 0x18f   : > { %v1158_v20 = vpop.eup %1157 }
 0x190   : > { %v339_v21 = vsel %vm332_vm2, %v1158_v20, 0.0 }
 0x191   : > { %340 = vadd.xlane.f32.xlu0 %v339_v21 }
 0x1a7   : > { %422 = vrot.lane.b32.xlu0 %v1267_v5, %s1199_s24 }
 0x21a   : > { %v341_v26 = vpop.xlane.xlu0 %340 }
 0x21b   : > { %1159 = vrcp.f32 %v341_v26 }
 0x21e   : > { %v423_v34 = vpop.permute.xlu0 %422 }
 0x21f   : > { %v435_v35 = vsel %vm275_vm1, %v423_v34, 0 }
 0x228   : > { %v1160_v27 = vpop.eup %1159 }
 0x229   : > { %v343_v29 = vmul.f32 %v1160_v27, %v1158_v20 }
 0x22b   : > { %v344_v31 = vpack.c.bf16 %v343_v29, %v343_v29 }
 0x22d   : > { %1041 = vmatmul.mubr.msk.bf16.vlgmr.msra.gmra.mxu1 %vm332_vm2, %v344_v31 }
 0x22e   : > { %1045 = vmatpush3.bf16.xpose.msra.mxu1 %v441_v30  ;;  %1052 = vmatprep.mubr.msk.bf16.mxu1 %vm1198_vm0, %v1197_v0 }
 0x22f   : > { %1046 = vmatprep.subr.bf16.mxu1 %v1197_v0 }
 0x236   : > { %1047 = vmatpush3.bf16.xpose.msra.mxu1 %v438_v33 }
 0x237   : > { %1048 = vmatprep.subr.bf16.mxu1 %v1197_v0 }
 0x23e   : > { %1049 = vmatpush3.bf16.xpose.msra.mxu1 %v435_v35 }
 0x23f   : > { %1050 = vmatprep.subr.bf16.mxu1 %v1197_v0 }
 0x246   : > { %1051 = vmatpush3.bf16.xpose.msra.mxu1 %v432_v37 }
 0x247   : > { %1080 = vmatprep.subr.bf16.mxu1 %v1197_v0 }
 0x24d   : > { %1053 = vmatmul.mubr.msk.bf16.vlgmr.msra.gmra.mxu1 %vm275_vm1, %v419_v38 }
 0x24e   : > { %1088 = vmatprep.mubr.msk.bf16.mxu1 %vm1198_vm0, %v1197_v0 }
 0x2ed   : > { %v406_v39 = vpop.f32.mrf.mxu1 }
 0x2ee   : > { %v412_v40 = vpack.c.bf16 %v406_v39, %v406_v39 }
 0x2ef   : > { %v1042_v41 = vpop.f32.mrf.mxu1 }
 0x2f0   : > { %414 = vst.msk [vmem:[%s1340_s30] sm:$0xf] %vm413_vm3, %v412_v40 }
 0x2f1   : > { %v409_v42 = vpop.f32.mrf.mxu1 }
 0x2f3   : > { %v1043_v43 = vpop.f32.mrf.mxu1 }
 0x30d   : > { %v477_v44 = vpop.f32.mrf.mxu1 }
 0x30e   : > { %v483_v45 = vmul.f32 0.35355338, %v477_v44 }
 0x30f   : > { %v1054_v46 = vpop.f32.mrf.mxu1 }
 0x310   : > { %v484_v47 = vsel %vm332_vm2, %v483_v45, -inf }
 0x311   : > { %485 = vmax.xlane.f32.xlu1 %v484_v47  ;;  %v480_v48 = vpop.f32.mrf.mxu1 }
 0x313   : > { %v1055_v49 = vpop.f32.mrf.mxu1 }
 0x322   : > { %502 = vrot.lane.b32.xlu1 %v1303_v22, %s1199_s24 }
 0x326   : > { %498 = vrot.lane.b32.xlu1 %v1310_v24, %s1199_s24 }
 0x32a   : > { %496 = vrot.lane.b32.xlu1 %v1314_v25, %s1199_s24 }
 0x32e   : > { %568 = vrot.lane.b32.xlu1 %v1257_v1, %s1200_s4 }
 0x332   : > { %566 = vrot.lane.b32.xlu1 %v1262_v3, %s1200_s4 }
 0x336   : > { %562 = vrot.lane.b32.xlu1 %v1272_v7, %s1200_s4 }
 0x39a   : > { %v486_v50 = vpop.xlane.xlu1 %485 }
 0x39b   : > { %v487_v51 = vsub.f32 %v483_v45, %v486_v50 }
 0x39d   : > { %v488_v52 = vmul.f32 1.442695, %v487_v51 }
 0x39e   : > { %v503_v55 = vpop.permute.xlu1 %502 }
 0x39f   : > { %1161 = vpow2.f32 %v488_v52  ;;  %1057 = vmatpush3.bf16.msra.mxu0 %v503_v55 }
 0x3a0   : > { %1058 = vmatprep.subr.bf16.mxu0 %v1197_v0 }
 0x3a2   : > { %v499_v57 = vpop.permute.xlu1 %498 }
 0x3a6   : > { %v497_v59 = vpop.permute.xlu1 %496 }
 0x3aa   : > { %v569_v61 = vpop.permute.xlu1 %568 }
 0x3ab   : > { %v583_v63 = vsel %vm275_vm1, %v569_v61, 0 }
 0x3ac   : > { %v1162_v53 = vpop.eup %1161 }
 0x3ad   : > { %v490_v54 = vsel %vm332_vm2, %v1162_v53, 0.0 }
 0x3ae   : > { %491 = vadd.xlane.f32.xlu0 %v490_v54  ;;  %v567_v4 = vpop.permute.xlu1 %566 }
 0x3af   : > { %v580_v6 = vsel %vm275_vm1, %v567_v4, 0 }
 0x3b2   : > { %v563_v10 = vpop.permute.xlu1 %562 }
 0x3b3   : > { %v574_v11 = vsel %vm275_vm1, %v563_v10, 0 }
 0x3c4   : > { %500 = vrot.lane.b32.xlu0 %v1306_v23, %s1199_s24 }
 0x3c8   : > { %564 = vrot.lane.b32.xlu0 %v1267_v5, %s1200_s4 }
 0x3cc   : > { %560 = vrot.lane.b32.xlu0 %v1293_v16, %s1200_s4 }
 0x3d0   : > { %644 = vrot.lane.b32.xlu0 %v1303_v22, %s1200_s4 }
 0x437   : > { %v492_v56 = vpop.xlane.xlu0 %491 }
 0x438   : > { %1163 = vrcp.f32 %v492_v56 }
 0x43b   : > { %v501_v58 = vpop.permute.xlu0 %500 }
 0x43c   : > { %1059 = vmatpush3.bf16.msra.mxu0 %v501_v58 }
 0x43d   : > { %1060 = vmatprep.subr.bf16.mxu0 %v1197_v0 }
 0x43f   : > { %v565_v8 = vpop.permute.xlu0 %564 }
 0x440   : > { %1061 = vmatpush3.bf16.msra.mxu0 %v499_v57  ;;  %v577_v9 = vsel %vm275_vm1, %v565_v8, 0 }
 0x441   : > { %1062 = vmatprep.subr.bf16.mxu0 %v1197_v0 }
 0x443   : > { %v561_v12 = vpop.permute.xlu0 %560 }
 0x444   : > { %1063 = vmatpush3.bf16.msra.mxu0 %v497_v59 }
 0x445   : > { %v1164_v60 = vpop.eup %1163  ;;  %1068 = vmatprep.subr.bf16.mxu0 %v1197_v0 }
 0x446   : > { %v494_v62 = vmul.f32 %v1164_v60, %v1162_v53 }
 0x447   : > { %v645_v28 = vpop.permute.xlu0 %644 }
 0x448   : > { %v495_v2 = vpack.c.bf16 %v494_v62, %v494_v62  ;;  %1081 = vmatpush3.bf16.msra.mxu1 %v645_v28 }
 0x449   : > { %1082 = vmatprep.subr.bf16.mxu1 %v1197_v0 }
 0x44a   : > { %1065 = vmatmul.mubr.msk.bf16.vlgmr.msra.gmra.mxu0 %vm332_vm2, %v495_v2 }
 0x44b   : > { %1069 = vmatpush3.bf16.xpose.msra.mxu0 %v583_v63  ;;  %1076 = vmatprep.mubr.msk.bf16.mxu0 %vm1198_vm0, %v1197_v0 }
 0x44c   : > { %1070 = vmatprep.subr.bf16.mxu0 %v1197_v0 }
 0x453   : > { %1071 = vmatpush3.bf16.xpose.msra.mxu0 %v580_v6 }
 0x454   : > { %1072 = vmatprep.subr.bf16.mxu0 %v1197_v0 }
 0x45b   : > { %1073 = vmatpush3.bf16.xpose.msra.mxu0 %v577_v9 }
 0x45c   : > { %1074 = vmatprep.subr.bf16.mxu0 %v1197_v0 }
 0x463   : > { %1075 = vmatpush3.bf16.xpose.msra.mxu0 %v574_v11 }
 0x464   : > { %1104 = vmatprep.subr.bf16.mxu0 %v1197_v0 }
 0x46a   : > { %1077 = vmatmul.mubr.msk.bf16.vlgmr.msra.gmra.mxu0 %vm275_vm1, %v561_v12 }
 0x46b   : > { %1112 = vmatprep.mubr.msk.bf16.mxu0 %vm1198_vm0, %v1197_v0 }
 0x50a   : > { %v1383_v13 = vpop.f32.mrf.mxu0 }
 0x50b   : > { %v977_v54 = vpack.c.bf16 %v1383_v13, %v1383_v13 }
 0x50c   : > { %v1066_v14 = vpop.f32.mrf.mxu0 }
 0x50e   : > { %v548_v15 = vpop.f32.mrf.mxu0 }
 0x510   : > { %v1067_v17 = vpop.f32.mrf.mxu0 }
 0x52a   : > { %v619_v18 = vpop.f32.mrf.mxu0 }
 0x52b   : > { %v625_v19 = vmul.f32 0.35355338, %v619_v18 }
 0x52c   : > { %v1078_v20 = vpop.f32.mrf.mxu0 }
 0x52d   : > { %v626_v21 = vsel %vm332_vm2, %v625_v19, -inf }
 0x52e   : > { %627 = vmax.xlane.f32.xlu1 %v626_v21  ;;  %v622_v26 = vpop.f32.mrf.mxu0 }
 0x530   : > { %v1079_v27 = vpop.f32.mrf.mxu0 }
 0x53f   : > { %642 = vrot.lane.b32.xlu1 %v1306_v23, %s1200_s4 }
 0x543   : > { %640 = vrot.lane.b32.xlu1 %v1310_v24, %s1200_s4 }
 0x547   : > { %710 = vrot.lane.b32.xlu1 %v1257_v1, %s1201_s5 }
 0x54b   : > { %706 = vrot.lane.b32.xlu1 %v1267_v5, %s1201_s5 }
 0x54f   : > { %702 = vrot.lane.b32.xlu1 %v1293_v16, %s1201_s5 }
 0x553   : > { %784 = vrot.lane.b32.xlu1 %v1306_v23, %s1201_s5 }
 0x5b7   : > { %v628_v29 = vpop.xlane.xlu1 %627 }
 0x5b8   : > { %v629_v30 = vsub.f32 %v625_v19, %v628_v29 }
 0x5ba   : > { %v630_v31 = vmul.f32 1.442695, %v629_v30 }
 0x5bb   : > { %v643_v33 = vpop.permute.xlu1 %642 }
 0x5bc   : > { %1165 = vpow2.f32 %v630_v31  ;;  %1083 = vmatpush3.bf16.msra.mxu1 %v643_v33 }
 0x5bd   : > { %1084 = vmatprep.subr.bf16.mxu1 %v1197_v0 }
 0x5bf   : > { %v641_v5 = vpop.permute.xlu1 %640 }
 0x5c0   : > { %1085 = vmatpush3.bf16.msra.mxu1 %v641_v5 }
 0x5c1   : > { %1086 = vmatprep.subr.bf16.mxu1 %v1197_v0 }
 0x5c3   : > { %v711_v35 = vpop.permute.xlu1 %710 }
 0x5c4   : > { %v725_v37 = vsel %vm275_vm1, %v711_v35, 0 }
 0x5c7   : > { %v707_v39 = vpop.permute.xlu1 %706 }
 0x5c8   : > { %v719_v40 = vsel %vm275_vm1, %v707_v39, 0 }
 0x5c9   : > { %v1166_v32 = vpop.eup %1165 }
 0x5ca   : > { %v632_v1 = vsel %vm332_vm2, %v1166_v32, 0.0 }
 0x5cb   : > { %633 = vadd.xlane.f32.xlu0 %v632_v1  ;;  %v703_v43 = vpop.permute.xlu1 %702 }
 0x5cf   : > { %v785_v59 = vpop.permute.xlu1 %784 }
 0x5e1   : > { %638 = vrot.lane.b32.xlu0 %v1314_v25, %s1200_s4 }
 0x5e5   : > { %708 = vrot.lane.b32.xlu0 %v1262_v3, %s1201_s5 }
 0x5e9   : > { %704 = vrot.lane.b32.xlu0 %v1272_v7, %s1201_s5 }
 0x654   : > { %v634_v16 = vpop.xlane.xlu0 %633 }
 0x655   : > { %1167 = vrcp.f32 %v634_v16 }
 0x658   : > { %v639_v23 = vpop.permute.xlu0 %638 }
 0x659   : > { %1087 = vmatpush3.bf16.msra.mxu1 %v639_v23 }
 0x65a   : > { %1092 = vmatprep.subr.bf16.mxu1 %v1197_v0 }
 0x65c   : > { %v709_v3 = vpop.permute.xlu0 %708 }
 0x65d   : > { %v722_v7 = vsel %vm275_vm1, %v709_v3, 0 }
 0x660   : > { %v705_v41 = vpop.permute.xlu0 %704 }
 0x661   : > { %v716_v42 = vsel %vm275_vm1, %v705_v41, 0 }
 0x662   : > { %v1168_v34 = vpop.eup %1167 }
 0x663   : > { %v636_v36 = vmul.f32 %v1168_v34, %v1166_v32 }
 0x665   : > { %v637_v38 = vpack.c.bf16 %v636_v36, %v636_v36 }
 0x667   : > { %1089 = vmatmul.mubr.msk.bf16.vlgmr.msra.gmra.mxu1 %vm332_vm2, %v637_v38 }
 0x668   : > { %1093 = vmatpush3.bf16.xpose.msra.mxu1 %v725_v37  ;;  %1100 = vmatprep.mubr.msk.bf16.mxu1 %vm1198_vm0, %v1197_v0 }
 0x669   : > { %1094 = vmatprep.subr.bf16.mxu1 %v1197_v0 }
 0x670   : > { %1095 = vmatpush3.bf16.xpose.msra.mxu1 %v722_v7 }
 0x671   : > { %1096 = vmatprep.subr.bf16.mxu1 %v1197_v0 }
 0x678   : > { %1097 = vmatpush3.bf16.xpose.msra.mxu1 %v719_v40 }
 0x679   : > { %1098 = vmatprep.subr.bf16.mxu1 %v1197_v0 }
 0x680   : > { %1099 = vmatpush3.bf16.xpose.msra.mxu1 %v716_v42 }
 0x687   : > { %1101 = vmatmul.mubr.msk.bf16.vlgmr.msra.gmra.mxu1 %vm275_vm1, %v703_v43 }
 0x727   : > { %v687_v44 = vpop.f32.mrf.mxu1 }
 0x728   : > { %v978_v62 = vpack.c.bf16 %v687_v44, %v687_v44 }
 0x729   : > { %v1090_v45 = vpop.f32.mrf.mxu1 }
 0x72b   : > { %v690_v46 = vpop.f32.mrf.mxu1 }
 0x72d   : > { %v1091_v47 = vpop.f32.mrf.mxu1 }
 0x747   : > { %v761_v48 = vpop.f32.mrf.mxu1 }
 0x748   : > { %v767_v49 = vmul.f32 0.35355338, %v761_v48 }
 0x749   : > { %v1102_v50 = vpop.f32.mrf.mxu1 }
 0x74a   : > { %v768_v51 = vsel %vm332_vm2, %v767_v49, -inf }
 0x74b   : > { %769 = vmax.xlane.f32.xlu0 %v768_v51  ;;  %v764_v52 = vpop.f32.mrf.mxu1 }
 0x74d   : > { %v1103_v53 = vpop.f32.mrf.mxu1 }
 0x761   : > { %786 = vrot.lane.b32.xlu0 %v1303_v22, %s1201_s5 }
 0x765   : > { %782 = vrot.lane.b32.xlu0 %v1310_v24, %s1201_s5 }
 0x769   : > { %555 = vrot.lane.b32.xlu0 %v977_v54, %s1202_s6 }
 0x7d4   : > { %v770_v55 = vpop.xlane.xlu0 %769 }
 0x7d5   : > { %v771_v56 = vsub.f32 %v767_v49, %v770_v55 }
 0x7d7   : > { %v772_v57 = vmul.f32 1.442695, %v771_v56 }
 0x7d8   : > { %v787_v58 = vpop.permute.xlu0 %786 }
 0x7d9   : > { %1169 = vpow2.f32 %v772_v57  ;;  %1105 = vmatpush3.bf16.msra.mxu0 %v787_v58 }
 0x7da   : > { %1106 = vmatprep.subr.bf16.mxu0 %v1197_v0 }
 0x7dc   : > { %v783_v60 = vpop.permute.xlu0 %782 }
 0x7dd   : > { %1107 = vmatpush3.bf16.msra.mxu0 %v785_v59 }
 0x7de   : > { %1108 = vmatprep.subr.bf16.mxu0 %v1197_v0 }
 0x7e0   : > { %v556_v22 = vpop.permute.xlu0 %555 }
 0x7e1   : > { %559 = vst.msk [vmem:[%s1340_s30] sm:$0xf] %vm558_vm4, %v556_v22  ;;  %1109 = vmatpush3.bf16.msra.mxu0 %v783_v60 }
 0x7e2   : > { %1110 = vmatprep.subr.bf16.mxu0 %v1197_v0 }
 0x7e6   : > { %v1170_v24 = vpop.eup %1169 }
 0x7e7   : > { %v774_v61 = vsel %vm332_vm2, %v1170_v24, 0.0 }
 0x7e8   : > { %775 = vadd.xlane.f32.xlu1 %v774_v61 }
 0x7f9   : > { %780 = vrot.lane.b32.xlu1 %v1314_v25, %s1201_s5 }
 0x7fd   : > { %697 = vrot.lane.b32.xlu1 %v978_v62, %s1203_s7 }
 0x871   : > { %v776_v63 = vpop.xlane.xlu1 %775 }
 0x872   : > { %1171 = vrcp.f32 %v776_v63 }
 0x875   : > { %v781_v2 = vpop.permute.xlu1 %780 }
 0x876   : > { %1111 = vmatpush3.bf16.msra.mxu0 %v781_v2 }
 0x879   : > { %v698_v4 = vpop.permute.xlu1 %697 }
 0x87a   : > { %701 = vst.msk [vmem:[%s1340_s30] sm:$0xf] %vm700_vm5, %v698_v4 }
 0x87f   : > { %v1172_v6 = vpop.eup %1171 }
 0x880   : > { %v778_v0 = vmul.f32 %v1172_v6, %v1170_v24 }
 0x882   : > { %v779_v8 = vpack.c.bf16 %v778_v0, %v778_v0 }
 0x884   : > { %1113 = vmatmul.mubr.msk.bf16.vlgmr.msra.gmra.mxu0 %vm332_vm2, %v779_v8 }
 0x944   : > { %v829_v9 = vpop.f32.mrf.mxu0 }
 0x945   : > { %v979_v10 = vpack.c.bf16 %v829_v9, %v829_v9 }
 0x946   : > { %v1114_v11 = vpop.f32.mrf.mxu0 }
 0x947   : > { %839 = vrot.lane.b32.xlu0 %v979_v10, %s1204_s8 }
 0x948   : > { %v832_v25 = vpop.f32.mrf.mxu0 }
 0x94a   : > { %v1115_v12 = vpop.f32.mrf.mxu0 }
 0x9b9   : > { %v840_v13 = vpop.permute.xlu0 %839 }
 0x9ba   : > { %843 = vst.msk [vmem:[%s1340_s30] sm:$0xf] %vm842_vm6, %v840_v13 }
 0x9bb PF: > { %s13_s14 = sadd.s32 1, %s1195_s14   ;;  %s1450_s12 = smov %s1191_s13 }
 0x9bc   : > { %p10_p5 = scmp.ge.s32.totalorder %s13_s14, 4   ;;  %s1451_s13 = smov %s1453_s15 }
 0x9be   :  { %12 = sbr.rel (!%p10_p5) target bundleno = 2 (0x2), region = 68 }

// kernel: detr_forward.62
= control target key start
LH: loop header
LB: loop body
LE: loop exit
PB: predicated region body
PF: predicated region fallthrough
CT: control target
= control target key end

     0   :  { %v250_v0 = vmov 0.0   ;;  %vm251_vm0 = vmmov 0   ;;  %vm51_vm1 = vcmask 261120   ;;  %vm138_vm2 = vcmask 523264   ;;  %s315_s1 = inlined_call_operand.vmem [shape: bf16[32,64], index: 1, kind: input, shape index: {}]   ;;  %s316_s3 = inlined_call_operand.vmem [shape: bf16[64,32], index: 3, kind: input, shape index: {}]   ;;  %s317_s0 = inlined_call_operand.vmem [shape: bf16[16,32], index: 0, kind: input, shape index: {}]   ;;  %s318_s2 = inlined_call_operand.vmem [shape: f32[1,64], index: 2, kind: input, shape index: {}]   ;;  %s319_s4 = inlined_call_operand.vmem [shape: f32[1,32], index: 4, kind: input, shape index: {}]   ;;  %s320_s5 = inlined_call_operand.vmem [shape: bf16[16,32], index: 5, kind: output, shape index: {}]  }
   0x1   :  { %221 = vmatprep.subr.bf16.mxu0 %v250_v0  ;;  %v243_v1 = vld [vmem:[%s315_s1 + $0x8] sm:$0xff]   ;;  %225 = vmatprep.mubr.msk.bf16.mxu0 %vm251_vm0, %v250_v0  ;;  %v244_v2 = vld [vmem:[%s315_s1] sm:$0xff]   ;;  %v246_v3 = vld [vmem:[%s316_s3 + $0x18] sm:$0xff]   ;;  %vm191_vm3 = vcmask 257024  }
   0x2   :  { %229 = vmatprep.subr.bf16.mxu1 %v250_v0  ;;  %237 = vmatprep.mubr.msk.bf16.mxu1 %vm251_vm0, %v250_v0  ;;  %v245_v4 = vld [vmem:[%s317_s0] sm:$0xff]   ;;  %v247_v5 = vld [vmem:[%s316_s3 + $0x10] sm:$0xff]   ;;  %v248_v6 = vld [vmem:[%s316_s3 + $0x8] sm:$0xff]  }
   0x3   :  { %222 = vmatpush3.bf16.msra.mxu0 %v243_v1  ;;  %230 = vmatpush3.bf16.msra.mxu1 %v246_v3  ;;  %v249_v7 = vld [vmem:[%s316_s3] sm:$0xff]  }
   0x4   :  { %223 = vmatprep.subr.bf16.mxu0 %v250_v0  ;;  %231 = vmatprep.subr.bf16.mxu1 %v250_v0  ;;  %v198_v8 = vld [vmem:[%s318_s2] ss:$0 sm:$0xff] }
   0x5   :  { %v203_v18 = vld [vmem:[%s319_s4] ss:$0 sm:$0xff] }
   0x7   :  { %224 = vmatpush3.bf16.msra.mxu0 %v244_v2  ;;  %232 = vmatpush3.bf16.msra.mxu1 %v247_v5 }
   0x8   :  { %233 = vmatprep.subr.bf16.mxu1 %v250_v0 }
   0xa   :  { %226 = vmatmul.mubr.msk.bf16.vlgmr.msra.gmra.mxu0 %vm51_vm1, %v245_v4 }
   0xb   :  { %234 = vmatpush3.bf16.msra.mxu1 %v248_v6 }
   0xc   :  { %235 = vmatprep.subr.bf16.mxu1 %v250_v0 }
   0xf   :  { %236 = vmatpush3.bf16.msra.mxu1 %v249_v7 }
  0xca   :  { %v89_v9 = vpop.f32.mrf.mxu0 }
  0xcb   :  { %v90_v11 = vadd.f32 %v198_v8, %v89_v9 }
  0xcc   :  { %v227_v10 = vpop.f32.mrf.mxu0 }
  0xcd   :  { %v96_v15 = vmax.f32 %v90_v11, 0.0 }
  0xce   :  { %v92_v12 = vpop.f32.mrf.mxu0 }
  0xcf   :  { %v93_v13 = vadd.f32 %v198_v8, %v92_v12 }
  0xd0   :  { %v228_v14 = vpop.f32.mrf.mxu0 }
  0xd1   :  { %v97_v16 = vmax.f32 %v93_v13, 0.0 }
  0xd3   :  { %v98_v17 = vpack.c.bf16 %v97_v16, %v96_v15 }
  0xd5   :  { %238 = vmatmul.mubr.msk.bf16.vlgmr.msra.gmra.mxu1 %vm138_vm2, %v98_v17 }
 0x195   :  { %v176_v19 = vpop.f32.mrf.mxu1 }
 0x196   :  { %v177_v20 = vadd.f32 %v203_v18, %v176_v19 }
 0x197   :  { %v239_v21 = vpop.f32.mrf.mxu1 }
 0x198   :  { %v211_v22 = vpack.c.bf16 %v177_v20, %v177_v20 }
 0x199   :  { %v179_v23 = vpop.f32.mrf.mxu1 }
 0x19a   :  { %192 = vst.msk [vmem:[%s320_s5] sm:$0xf] %vm191_vm3, %v211_v22  ;;  %v180_v24 = vadd.f32 %v203_v18, %v179_v23 }
 0x19b   :  { %v240_v25 = vpop.f32.mrf.mxu1 }
 0x19c   :  { %v212_v26 = vpack.c.bf16 %v180_v24, %v180_v24 }
 0x19e   :  { %193 = vst.msk [vmem:[%s320_s5 + $0x4] sm:$0xf] %vm191_vm3, %v212_v26 }

// kernel: detr_forward.58
= control target key start
LH: loop header
LB: loop body
LE: loop exit
PB: predicated region body
PF: predicated region fallthrough
CT: control target
= control target key end

     0   :  { %vm137_vm0 = vcmask 261120   ;;  %vm507_vm1 = vcmask 257024   ;;  %s1120_s2 = inlined_call_operand.vmem [shape: bf16[32,32], index: 2, kind: input, shape index: {}]   ;;  %s1121_s4 = inlined_call_operand.vmem [shape: bf16[32,32], index: 4, kind: input, shape index: {}]   ;;  %s1122_s0 = inlined_call_operand.vmem [shape: bf16[128,32], index: 0, kind: input, shape index: {}]   ;;  %s1123_s1 = inlined_call_operand.vmem [shape: bf16[128,32], index: 1, kind: input, shape index: {}]   ;;  %s1124_s3 = inlined_call_operand.vmem [shape: f32[1,32], index: 3, kind: input, shape index: {}]   ;;  %s1125_s5 = inlined_call_operand.vmem [shape: f32[1,32], index: 5, kind: input, shape index: {}]   ;;  %s1126_s6 = inlined_call_operand.vmem [shape: bf16[128,32], index: 6, kind: output, shape index: {0}]   ;;  %s1127_s7 = inlined_call_operand.vmem [shape: bf16[128,32], index: 7, kind: output, shape index: {1}]  }
   0x1   :  { %v774_v0 = vld [vmem:[%s1120_s2 + $0x8] sm:$0xff]   ;;  %v776_v2 = vld [vmem:[%s1120_s2] sm:$0xff]   ;;  %v30_v15 = vld [vmem:[%s1122_s0 + $0x10] sm:$0xf] }
   0x2   :  { %v775_v1 = vld [vmem:[%s1121_s4 + $0x8] sm:$0xff]   ;;  %734 = vmatprep.subr.bf16.mxu0 %v774_v0  ;;  %v777_v3 = vld [vmem:[%s1121_s4] sm:$0xff]   ;;  %v31_v19 = vld [vmem:[%s1122_s0 + $0x14] sm:$0xf] }
   0x3   :  { %754 = vmatprep.subr.bf16.mxu1 %v775_v1  ;;  %735 = vmatpush3.bf16.msra.mxu0 %v774_v0  ;;  %v26_v4 = vld [vmem:[%s1122_s0] sm:$0xf]  ;;  %v27_v5 = vld [vmem:[%s1122_s0 + $0x4] sm:$0xf]  ;;  %v28_v10 = vld [vmem:[%s1122_s0 + $0x8] sm:$0xf]  ;;  %v634_v25 = vcombine.low %v30_v15, %v31_v19 }
   0x4   :  { %755 = vmatpush3.bf16.msra.mxu1 %v775_v1  ;;  %736 = vmatprep.subr.bf16.mxu0 %v776_v2  ;;  %v42_v6 = vld [vmem:[%s1123_s1] sm:$0xf]  ;;  %v43_v7 = vld [vmem:[%s1123_s1 + $0x4] sm:$0xf]  ;;  %v632_v9 = vcombine.low %v26_v4, %v27_v5  ;;  %v29_v11 = vld [vmem:[%s1122_s0 + $0xc] sm:$0xf] }
   0x5   :  { %756 = vmatprep.subr.bf16.mxu1 %v777_v3  ;;  %v58_v8 = vadd.bf16 %v42_v6, %v26_v4  ;;  %v59_v12 = vadd.bf16 %v43_v7, %v27_v5  ;;  %v44_v13 = vld [vmem:[%s1123_s1 + $0x8] sm:$0xf]  ;;  %v45_v14 = vld [vmem:[%s1123_s1 + $0xc] sm:$0xf]  ;;  %v633_v18 = vcombine.low %v28_v10, %v29_v11  ;;  %v46_v20 = vld [vmem:[%s1123_s1 + $0x10] sm:$0xf] }
   0x6   :  { %758 = vmatprep.mubr.msk.bf16.mxu1 %vm137_vm0, %v632_v9  ;;  %v60_v16 = vadd.bf16 %v44_v13, %v28_v10  ;;  %v61_v17 = vadd.bf16 %v45_v14, %v29_v11  ;;  %v47_v21 = vld [vmem:[%s1123_s1 + $0x14] sm:$0xf]  ;;  %v62_v23 = vadd.bf16 %v46_v20, %v30_v15  ;;  %v32_v26 = vld [vmem:[%s1122_s0 + $0x18] sm:$0xf]  ;;  %v33_v27 = vld [vmem:[%s1122_s0 + $0x1c] sm:$0xf] }
   0x7   :  { %737 = vmatpush3.bf16.msra.mxu0 %v776_v2  ;;  %v613_v22 = vcombine.low %v58_v8, %v59_v12  ;;  %v63_v24 = vadd.bf16 %v47_v21, %v31_v19  ;;  %v48_v28 = vld [vmem:[%s1123_s1 + $0x18] sm:$0xf]  ;;  %v49_v30 = vld [vmem:[%s1123_s1 + $0x1c] sm:$0xf]  ;;  %v34_v31 = vld [vmem:[%s1122_s0 + $0x20] sm:$0xf]  ;;  %v635_v41 = vcombine.low %v32_v26, %v33_v27 }
   0x8   :  { %757 = vmatpush3.bf16.msra.mxu1 %v777_v3  ;;  %v614_v29 = vcombine.low %v60_v16, %v61_v17  ;;  %v35_v32 = vld [vmem:[%s1122_s0 + $0x24] sm:$0xf]  ;;  %v50_v34 = vld [vmem:[%s1123_s1 + $0x20] sm:$0xf]  ;;  %v64_v36 = vadd.bf16 %v48_v28, %v32_v26  ;;  %v65_v37 = vadd.bf16 %v49_v30, %v33_v27  ;;  %v36_v42 = vld [vmem:[%s1122_s0 + $0x28] sm:$0xf] }
   0x9   :  { %738 = vmatprep.mubr.msk.bf16.mxu0 %vm137_vm0, %v613_v22  ;;  %v615_v33 = vcombine.low %v62_v23, %v63_v24  ;;  %v51_v35 = vld [vmem:[%s1123_s1 + $0x24] sm:$0xf]  ;;  %v66_v38 = vadd.bf16 %v50_v34, %v34_v31  ;;  %v37_v43 = vld [vmem:[%s1122_s0 + $0x2c] sm:$0xf]  ;;  %v636_v45 = vcombine.low %v34_v31, %v35_v32  ;;  %v52_v46 = vld [vmem:[%s1123_s1 + $0x28] sm:$0xf] }
   0xa   :  { %739 = vmatmul.mubr.msk.bf16.vlgmr.msra.gmra.mxu0 %vm137_vm0, %v614_v29  ;;  %v67_v39 = vadd.bf16 %v51_v35, %v35_v32  ;;  %v616_v40 = vcombine.low %v64_v36, %v65_v37  ;;  %v53_v47 = vld [vmem:[%s1123_s1 + $0x2c] sm:$0xf]  ;;  %v38_v48 = vld [vmem:[%s1122_s0 + $0x30] sm:$0xf]  ;;  %v39_v49 = vld [vmem:[%s1122_s0 + $0x34] sm:$0xf]  ;;  %v68_v52 = vadd.bf16 %v52_v46, %v36_v42  ;;  %v637_v57 = vcombine.low %v36_v42, %v37_v43 }
   0xb   :  { %759 = vmatmul.mubr.msk.bf16.vlgmr.msra.gmra.mxu1 %vm137_vm0, %v633_v18  ;;  %742 = vmatprep.mubr.msk.bf16.mxu0 %vm137_vm0, %v615_v33  ;;  %v54_v50 = vld [vmem:[%s1123_s1 + $0x30] sm:$0xf]  ;;  %v55_v51 = vld [vmem:[%s1123_s1 + $0x34] sm:$0xf]  ;;  %v69_v53 = vadd.bf16 %v53_v47, %v37_v43  ;;  %v40_v58 = vld [vmem:[%s1122_s0 + $0x38] sm:$0xf]  ;;  %v638_v60 = vcombine.low %v38_v48, %v39_v49 }
   0xc   :  { %762 = vmatprep.mubr.msk.bf16.mxu1 %vm137_vm0, %v634_v25  ;;  %v617_v44 = vcombine.low %v66_v38, %v67_v39  ;;  %v70_v54 = vadd.bf16 %v54_v50, %v38_v48  ;;  %v71_v55 = vadd.bf16 %v55_v51, %v39_v49  ;;  %v41_v61 = vld [vmem:[%s1122_s0 + $0x3c] sm:$0xf]  ;;  %v56_v62 = vld [vmem:[%s1123_s1 + $0x38] sm:$0xf]  ;;  %v953_v4 = vld [vmem:[%s1124_s3] ss:$0 sm:$0xff] }
   0xd   :  { %v618_v56 = vcombine.low %v68_v52, %v69_v53  ;;  %v57_v63 = vld [vmem:[%s1123_s1 + $0x3c] sm:$0xf]  ;;  %v72_v0 = vadd.bf16 %v56_v62, %v40_v58  ;;  %v639_v3 = vcombine.low %v40_v58, %v41_v61  ;;  %v958_v5 = vld [vmem:[%s1125_s5] ss:$0 sm:$0xff] }
   0xe   :  { %v619_v59 = vcombine.low %v70_v54, %v71_v55  ;;  %v73_v1 = vadd.bf16 %v57_v63, %v41_v61 }
  0x10   :  { %v620_v2 = vcombine.low %v72_v0, %v73_v1 }
  0x12   :  { %743 = vmatmul.mubr.msk.bf16.gmra.mxu0 %vm137_vm0, %v616_v40 }
  0x13   :  { %763 = vmatmul.mubr.msk.bf16.gmra.mxu1 %vm137_vm0, %v635_v41  ;;  %746 = vmatprep.mubr.msk.bf16.mxu0 %vm137_vm0, %v617_v44 }
  0x14   :  { %766 = vmatprep.mubr.msk.bf16.mxu1 %vm137_vm0, %v636_v45 }
  0x1a   :  { %747 = vmatmul.mubr.msk.bf16.gmra.mxu0 %vm137_vm0, %v618_v56 }
  0x1b   :  { %767 = vmatmul.mubr.msk.bf16.gmra.mxu1 %vm137_vm0, %v637_v57  ;;  %750 = vmatprep.mubr.msk.bf16.mxu0 %vm137_vm0, %v619_v59 }
  0x1c   :  { %770 = vmatprep.mubr.msk.bf16.mxu1 %vm137_vm0, %v638_v60 }
  0x22   :  { %751 = vmatmul.mubr.msk.bf16.gmra.mxu0 %vm137_vm0, %v620_v2 }
  0x23   :  { %771 = vmatmul.mubr.msk.bf16.gmra.mxu1 %vm137_vm0, %v639_v3 }
  0xca   :  { %v740_v6 = vpop.f32.mrf.mxu0 }
  0xcb   :  { %v760_v7 = vpop.f32.mrf.mxu1  ;;  %v205_v8 = vadd.f32 %v740_v6, %v953_v4 }
  0xcc   :  { %v389_v9 = vadd.f32 %v760_v7, %v958_v5  ;;  %v196_v10 = vpop.f32.mrf.mxu0 }
  0xcd   :  { %v380_v11 = vpop.f32.mrf.mxu1  ;;  %v684_v12 = vpack.c.bf16 %v205_v8, %v205_v8  ;;  %v197_v14 = vadd.f32 %v953_v4, %v196_v10 }
  0xce   :  { %v700_v13 = vpack.c.bf16 %v389_v9, %v389_v9  ;;  %v381_v15 = vadd.f32 %v958_v5, %v380_v11  ;;  %v741_v16 = vpop.f32.mrf.mxu0 }
  0xcf   :  { %v761_v17 = vpop.f32.mrf.mxu1  ;;  %510 = vst.msk [vmem:[%s1126_s6 + $0x8] sm:$0xf] %vm507_vm1, %v684_v12  ;;  %v682_v18 = vpack.c.bf16 %v197_v14, %v197_v14  ;;  %v208_v20 = vadd.f32 %v741_v16, %v953_v4 }
  0xd0   :  { %590 = vst.msk [vmem:[%s1127_s7 + $0x8] sm:$0xf] %vm507_vm1, %v700_v13  ;;  %v698_v19 = vpack.c.bf16 %v381_v15, %v381_v15  ;;  %v392_v21 = vadd.f32 %v761_v17, %v958_v5  ;;  %v199_v22 = vpop.f32.mrf.mxu0 }
  0xd1   :  { %v383_v23 = vpop.f32.mrf.mxu1  ;;  %508 = vst.msk [vmem:[%s1126_s6] sm:$0xf] %vm507_vm1, %v682_v18  ;;  %v685_v24 = vpack.c.bf16 %v208_v20, %v208_v20  ;;  %v200_v26 = vadd.f32 %v953_v4, %v199_v22 }
  0xd2   :  { %588 = vst.msk [vmem:[%s1127_s7] sm:$0xf] %vm507_vm1, %v698_v19  ;;  %v701_v25 = vpack.c.bf16 %v392_v21, %v392_v21  ;;  %v384_v27 = vadd.f32 %v958_v5, %v383_v23  ;;  %v744_v28 = vpop.f32.mrf.mxu0 }
  0xd3   :  { %v764_v29 = vpop.f32.mrf.mxu1  ;;  %511 = vst.msk [vmem:[%s1126_s6 + $0xc] sm:$0xf] %vm507_vm1, %v685_v24  ;;  %v683_v30 = vpack.c.bf16 %v200_v26, %v200_v26  ;;  %v221_v32 = vadd.f32 %v744_v28, %v953_v4 }
  0xd4   :  { %591 = vst.msk [vmem:[%s1127_s7 + $0xc] sm:$0xf] %vm507_vm1, %v701_v25  ;;  %v699_v31 = vpack.c.bf16 %v384_v27, %v384_v27  ;;  %v405_v33 = vadd.f32 %v764_v29, %v958_v5  ;;  %v212_v34 = vpop.f32.mrf.mxu0 }
  0xd5   :  { %v396_v35 = vpop.f32.mrf.mxu1  ;;  %509 = vst.msk [vmem:[%s1126_s6 + $0x4] sm:$0xf] %vm507_vm1, %v683_v30  ;;  %v688_v36 = vpack.c.bf16 %v221_v32, %v221_v32  ;;  %v213_v38 = vadd.f32 %v953_v4, %v212_v34 }
  0xd6   :  { %589 = vst.msk [vmem:[%s1127_s7 + $0x4] sm:$0xf] %vm507_vm1, %v699_v31  ;;  %v704_v37 = vpack.c.bf16 %v405_v33, %v405_v33  ;;  %v397_v39 = vadd.f32 %v958_v5, %v396_v35  ;;  %v745_v40 = vpop.f32.mrf.mxu0 }
  0xd7   :  { %v765_v41 = vpop.f32.mrf.mxu1  ;;  %514 = vst.msk [vmem:[%s1126_s6 + $0x18] sm:$0xf] %vm507_vm1, %v688_v36  ;;  %v686_v42 = vpack.c.bf16 %v213_v38, %v213_v38  ;;  %v224_v44 = vadd.f32 %v745_v40, %v953_v4 }
  0xd8   :  { %594 = vst.msk [vmem:[%s1127_s7 + $0x18] sm:$0xf] %vm507_vm1, %v704_v37  ;;  %v702_v43 = vpack.c.bf16 %v397_v39, %v397_v39  ;;  %v408_v45 = vadd.f32 %v765_v41, %v958_v5  ;;  %v215_v46 = vpop.f32.mrf.mxu0 }
  0xd9   :  { %v399_v47 = vpop.f32.mrf.mxu1  ;;  %512 = vst.msk [vmem:[%s1126_s6 + $0x10] sm:$0xf] %vm507_vm1, %v686_v42  ;;  %v689_v48 = vpack.c.bf16 %v224_v44, %v224_v44  ;;  %v216_v50 = vadd.f32 %v953_v4, %v215_v46 }
  0xda   :  { %592 = vst.msk [vmem:[%s1127_s7 + $0x10] sm:$0xf] %vm507_vm1, %v702_v43  ;;  %v705_v49 = vpack.c.bf16 %v408_v45, %v408_v45  ;;  %v400_v51 = vadd.f32 %v958_v5, %v399_v47  ;;  %v748_v52 = vpop.f32.mrf.mxu0 }
  0xdb   :  { %v768_v53 = vpop.f32.mrf.mxu1  ;;  %515 = vst.msk [vmem:[%s1126_s6 + $0x1c] sm:$0xf] %vm507_vm1, %v689_v48  ;;  %v687_v54 = vpack.c.bf16 %v216_v50, %v216_v50  ;;  %v237_v56 = vadd.f32 %v748_v52, %v953_v4 }
  0xdc   :  { %595 = vst.msk [vmem:[%s1127_s7 + $0x1c] sm:$0xf] %vm507_vm1, %v705_v49  ;;  %v703_v55 = vpack.c.bf16 %v400_v51, %v400_v51  ;;  %v421_v57 = vadd.f32 %v768_v53, %v958_v5  ;;  %v228_v58 = vpop.f32.mrf.mxu0 }
  0xdd   :  { %v412_v59 = vpop.f32.mrf.mxu1  ;;  %513 = vst.msk [vmem:[%s1126_s6 + $0x14] sm:$0xf] %vm507_vm1, %v687_v54  ;;  %v692_v60 = vpack.c.bf16 %v237_v56, %v237_v56  ;;  %v229_v62 = vadd.f32 %v953_v4, %v228_v58 }
  0xde   :  { %593 = vst.msk [vmem:[%s1127_s7 + $0x14] sm:$0xf] %vm507_vm1, %v703_v55  ;;  %v708_v61 = vpack.c.bf16 %v421_v57, %v421_v57  ;;  %v413_v63 = vadd.f32 %v958_v5, %v412_v59  ;;  %v749_v0 = vpop.f32.mrf.mxu0 }
  0xdf   :  { %v769_v1 = vpop.f32.mrf.mxu1  ;;  %518 = vst.msk [vmem:[%s1126_s6 + $0x28] sm:$0xf] %vm507_vm1, %v692_v60  ;;  %v690_v2 = vpack.c.bf16 %v229_v62, %v229_v62  ;;  %v240_v6 = vadd.f32 %v749_v0, %v953_v4 }
  0xe0   :  { %598 = vst.msk [vmem:[%s1127_s7 + $0x28] sm:$0xf] %vm507_vm1, %v708_v61  ;;  %v706_v3 = vpack.c.bf16 %v413_v63, %v413_v63  ;;  %v424_v7 = vadd.f32 %v769_v1, %v958_v5  ;;  %v231_v8 = vpop.f32.mrf.mxu0 }
  0xe1   :  { %v415_v9 = vpop.f32.mrf.mxu1  ;;  %516 = vst.msk [vmem:[%s1126_s6 + $0x20] sm:$0xf] %vm507_vm1, %v690_v2  ;;  %v693_v10 = vpack.c.bf16 %v240_v6, %v240_v6  ;;  %v232_v12 = vadd.f32 %v953_v4, %v231_v8 }
  0xe2   :  { %596 = vst.msk [vmem:[%s1127_s7 + $0x20] sm:$0xf] %vm507_vm1, %v706_v3  ;;  %v709_v11 = vpack.c.bf16 %v424_v7, %v424_v7  ;;  %v416_v13 = vadd.f32 %v958_v5, %v415_v9  ;;  %v752_v14 = vpop.f32.mrf.mxu0 }
  0xe3   :  { %v772_v15 = vpop.f32.mrf.mxu1  ;;  %519 = vst.msk [vmem:[%s1126_s6 + $0x2c] sm:$0xf] %vm507_vm1, %v693_v10  ;;  %v691_v16 = vpack.c.bf16 %v232_v12, %v232_v12  ;;  %v253_v18 = vadd.f32 %v752_v14, %v953_v4 }
  0xe4   :  { %599 = vst.msk [vmem:[%s1127_s7 + $0x2c] sm:$0xf] %vm507_vm1, %v709_v11  ;;  %v707_v17 = vpack.c.bf16 %v416_v13, %v416_v13  ;;  %v437_v19 = vadd.f32 %v772_v15, %v958_v5  ;;  %v244_v20 = vpop.f32.mrf.mxu0 }
  0xe5   :  { %v428_v21 = vpop.f32.mrf.mxu1  ;;  %517 = vst.msk [vmem:[%s1126_s6 + $0x24] sm:$0xf] %vm507_vm1, %v691_v16  ;;  %v696_v22 = vpack.c.bf16 %v253_v18, %v253_v18  ;;  %v245_v24 = vadd.f32 %v953_v4, %v244_v20 }
  0xe6   :  { %597 = vst.msk [vmem:[%s1127_s7 + $0x24] sm:$0xf] %vm507_vm1, %v707_v17  ;;  %v712_v23 = vpack.c.bf16 %v437_v19, %v437_v19  ;;  %v429_v25 = vadd.f32 %v958_v5, %v428_v21  ;;  %v753_v26 = vpop.f32.mrf.mxu0 }
  0xe7   :  { %v773_v27 = vpop.f32.mrf.mxu1  ;;  %522 = vst.msk [vmem:[%s1126_s6 + $0x38] sm:$0xf] %vm507_vm1, %v696_v22  ;;  %v694_v28 = vpack.c.bf16 %v245_v24, %v245_v24  ;;  %v256_v30 = vadd.f32 %v753_v26, %v953_v4 }
  0xe8   :  { %602 = vst.msk [vmem:[%s1127_s7 + $0x38] sm:$0xf] %vm507_vm1, %v712_v23  ;;  %v710_v29 = vpack.c.bf16 %v429_v25, %v429_v25  ;;  %v440_v31 = vadd.f32 %v773_v27, %v958_v5  ;;  %v247_v32 = vpop.f32.mrf.mxu0 }
  0xe9   :  { %v431_v33 = vpop.f32.mrf.mxu1  ;;  %520 = vst.msk [vmem:[%s1126_s6 + $0x30] sm:$0xf] %vm507_vm1, %v694_v28  ;;  %v697_v34 = vpack.c.bf16 %v256_v30, %v256_v30  ;;  %v248_v36 = vadd.f32 %v953_v4, %v247_v32 }
  0xea   :  { %600 = vst.msk [vmem:[%s1127_s7 + $0x30] sm:$0xf] %vm507_vm1, %v710_v29  ;;  %v713_v35 = vpack.c.bf16 %v440_v31, %v440_v31  ;;  %v432_v37 = vadd.f32 %v958_v5, %v431_v33 }
  0xeb   :  { %523 = vst.msk [vmem:[%s1126_s6 + $0x3c] sm:$0xf] %vm507_vm1, %v697_v34  ;;  %v695_v38 = vpack.c.bf16 %v248_v36, %v248_v36 }
  0xec   :  { %603 = vst.msk [vmem:[%s1127_s7 + $0x3c] sm:$0xf] %vm507_vm1, %v713_v35  ;;  %v711_v39 = vpack.c.bf16 %v432_v37, %v432_v37 }
  0xed   :  { %521 = vst.msk [vmem:[%s1126_s6 + $0x34] sm:$0xf] %vm507_vm1, %v695_v38 }
  0xee   :  { %601 = vst.msk [vmem:[%s1127_s7 + $0x34] sm:$0xf] %vm507_vm1, %v711_v39 }

// kernel: detr_forward.75
= control target key start
LH: loop header
LB: loop body
LE: loop exit
PB: predicated region body
PF: predicated region fallthrough
CT: control target
= control target key end

     0   :  { %vm18_vm0 = vcmask 261120   ;;  %vm72_vm1 = vcmask 257024   ;;  %s132_s0 = inlined_call_operand.vmem [shape: bf16[16,32], index: 0, kind: input, shape index: {}]   ;;  %s133_s1 = inlined_call_operand.vmem [shape: f32[1,32], index: 1, kind: input, shape index: {}]   ;;  %s134_s2 = inlined_call_operand.vmem [shape: f32[1,32], index: 2, kind: input, shape index: {}]   ;;  %s135_s3 = inlined_call_operand.vmem [shape: bf16[16,32], index: 3, kind: output, shape index: {}]  }
   0x1   :  { %v86_v0 = vld [vmem:[%s132_s0] sm:$0xff]  }
   0x2   :  { %v87_v1 = vunpack.c.l.bf16 %v86_v0  ;;  %v88_v2 = vunpack.c.h.bf16 %v86_v0  ;;  %v79_v22 = vld [vmem:[%s133_s1] ss:$0 sm:$0xff] }
   0x3   :  { %v80_v24 = vld [vmem:[%s134_s2] ss:$0 sm:$0xff] }
   0x4   :  { %v19_v3 = vsel %vm18_vm0, %v87_v1, 0.0  ;;  %v22_v4 = vsel %vm18_vm0, %v88_v2, 0.0 }
   0x5   :  { %20 = vadd.xlane.f32.xlu0 %v19_v3 }
   0x9   :  { %23 = vadd.xlane.f32.xlu0 %v22_v4 }
  0x8e   :  { %v21_v5 = vpop.xlane.xlu0 %20 }
  0x8f   :  { %v26_v6 = vmul.f32 0.03125, %v21_v5 }
  0x91   :  { %v28_v7 = vsub.f32 %v87_v1, %v26_v6 }
  0x92   :  { %v24_v8 = vpop.xlane.xlu0 %23 }
  0x93   :  { %v27_v9 = vmul.f32 0.03125, %v24_v8  ;;  %v30_v10 = vmul.f32 %v28_v7, %v28_v7 }
  0x95   :  { %v29_v11 = vsub.f32 %v88_v2, %v27_v9  ;;  %v32_v12 = vsel %vm18_vm0, %v30_v10, 0.0 }
  0x96   :  { %33 = vadd.xlane.f32.xlu1 %v32_v12 }
  0x97   :  { %v31_v13 = vmul.f32 %v29_v11, %v29_v11 }
  0x99   :  { %v35_v14 = vsel %vm18_vm0, %v31_v13, 0.0 }
  0x9a   :  { %36 = vadd.xlane.f32.xlu1 %v35_v14 }
 0x11f   :  { %v34_v15 = vpop.xlane.xlu1 %33 }
 0x120   :  { %v38_v16 = vmul.f32 0.03125, %v34_v15 }
 0x122   :  { %v40_v17 = vadd.f32 1e-05, %v38_v16 }
 0x123   :  { %v37_v18 = vpop.xlane.xlu1 %36 }
 0x124   :  { %89 = vrsqrt.f32 %v40_v17  ;;  %v39_v19 = vmul.f32 0.03125, %v37_v18 }
 0x126   :  { %v41_v20 = vadd.f32 1e-05, %v39_v19 }
 0x128   :  { %91 = vrsqrt.f32 %v41_v20 }
 0x131   :  { %v90_v21 = vpop.eup %89 }
 0x132   :  { %v44_v23 = vmul.f32 %v90_v21, %v28_v7 }
 0x134   :  { %v53_v25 = vmul.f32 %v79_v22, %v44_v23 }
 0x135   :  { %v92_v26 = vpop.eup %91 }
 0x136   :  { %v62_v27 = vadd.f32 %v80_v24, %v53_v25  ;;  %v45_v28 = vmul.f32 %v92_v26, %v29_v11 }
 0x138   :  { %v83_v29 = vpack.c.bf16 %v62_v27, %v62_v27  ;;  %v54_v30 = vmul.f32 %v79_v22, %v45_v28 }
 0x13a   :  { %73 = vst.msk [vmem:[%s135_s3] sm:$0xf] %vm72_vm1, %v83_v29  ;;  %v63_v31 = vadd.f32 %v80_v24, %v54_v30 }
 0x13c   :  { %v84_v32 = vpack.c.bf16 %v63_v31, %v63_v31 }
 0x13e   :  { %74 = vst.msk [vmem:[%s135_s3 + $0x4] sm:$0xf] %vm72_vm1, %v84_v32 }

// kernel: detr_forward.76
= control target key start
LH: loop header
LB: loop body
LE: loop exit
PB: predicated region body
PF: predicated region fallthrough
CT: control target
= control target key end

     0   :  { %v118_v0 = vmov 0.0   ;;  %vm119_vm0 = vmmov 0   ;;  %vm45_vm1 = vcmask 261120   ;;  %vm90_vm2 = vcmask 48128   ;;  %s158_s1 = inlined_call_operand.vmem [shape: bf16[32,6], index: 1, kind: input, shape index: {}]   ;;  %s159_s0 = inlined_call_operand.vmem [shape: bf16[16,32], index: 0, kind: input, shape index: {}]   ;;  %s160_s2 = inlined_call_operand.vmem [shape: f32[1,6], index: 2, kind: input, shape index: {}]   ;;  %s161_s3 = inlined_call_operand.vmem [shape: f32[16,6], index: 3, kind: output, shape index: {}]  }
   0x1   :  { %105 = vmatprep.subr.bf16.mxu0 %v118_v0  ;;  %v115_v1 = vld [vmem:[%s158_s1 + $0x8] sm:$0xff]   ;;  %109 = vmatprep.mubr.msk.bf16.mxu0 %vm119_vm0, %v118_v0  ;;  %v116_v2 = vld [vmem:[%s158_s1] sm:$0xff]  }
   0x2   :  { %106 = vmatpush3.bf16.msra.mxu0 %v115_v1  ;;  %v117_v3 = vld [vmem:[%s159_s0] sm:$0xff]  }
   0x3   :  { %107 = vmatprep.subr.bf16.mxu0 %v118_v0  ;;  %v97_v4 = vld [vmem:[%s160_s2] ss:$0 sm:$0xff] }
   0x6   :  { %108 = vmatpush3.bf16.msra.mxu0 %v116_v2 }
   0x9   :  { %110 = vmatmul.mubr.msk.bf16.vlgmr.msra.gmra.mxu0 %vm45_vm1, %v117_v3 }
  0xc9   :  { %v83_v5 = vpop.f32.mrf.mxu0 }
  0xca   :  { %v84_v6 = vadd.f32 %v97_v4, %v83_v5 }
  0xcb   :  { %v111_v7 = vpop.f32.mrf.mxu0 }
  0xcc   :  { %91 = vst.msk [vmem:[%s161_s3] sm:$0xff] %vm90_vm2, %v84_v6 }
  0xcd   :  { %v86_v8 = vpop.f32.mrf.mxu0 }
  0xce   :  { %v87_v9 = vadd.f32 %v97_v4, %v86_v8 }
  0xcf   :  { %v112_v10 = vpop.f32.mrf.mxu0 }
  0xd0   :  { %92 = vst.msk [vmem:[%s161_s3 + $0x8] sm:$0xff] %vm90_vm2, %v87_v9 }

// kernel: detr_forward.77
= control target key start
LH: loop header
LB: loop body
LE: loop exit
PB: predicated region body
PF: predicated region fallthrough
CT: control target
= control target key end

     0   :  { %v326_v0 = vmov 0.0   ;;  %vm327_vm0 = vmmov 0   ;;  %vm57_vm1 = vcmask 261120   ;;  %vm254_vm2 = vcmask 31744   ;;  %s407_s1 = inlined_call_operand.vmem [shape: bf16[32,32], index: 1, kind: input, shape index: {}]   ;;  %s408_s0 = inlined_call_operand.vmem [shape: bf16[16,32], index: 0, kind: input, shape index: {}]   ;;  %s409_s3 = inlined_call_operand.vmem [shape: bf16[32,32], index: 3, kind: input, shape index: {}]   ;;  %s410_s2 = inlined_call_operand.vmem [shape: f32[1,32], index: 2, kind: input, shape index: {}]   ;;  %s411_s5 = inlined_call_operand.vmem [shape: bf16[32,4], index: 5, kind: input, shape index: {}]   ;;  %s412_s4 = inlined_call_operand.vmem [shape: f32[1,32], index: 4, kind: input, shape index: {}]   ;;  %s413_s6 = inlined_call_operand.vmem [shape: f32[1,4], index: 6, kind: input, shape index: {}]   ;;  %s414_s7 = inlined_call_operand.vmem [shape: f32[16,4], index: 7, kind: output, shape index: {}]  }
   0x1   :  { %285 = vmatprep.subr.bf16.mxu0 %v326_v0  ;;  %v311_v1 = vld [vmem:[%s407_s1 + $0x8] sm:$0xff]   ;;  %289 = vmatprep.mubr.msk.bf16.mxu0 %vm327_vm0, %v326_v0  ;;  %v312_v2 = vld [vmem:[%s407_s1] sm:$0xff]  }
   0x2   :  { %293 = vmatprep.subr.bf16.mxu1 %v326_v0  ;;  %297 = vmatprep.mubr.msk.bf16.mxu1 %vm327_vm0, %v326_v0  ;;  %v313_v3 = vld [vmem:[%s408_s0] sm:$0xff]   ;;  %v314_v4 = vld [vmem:[%s409_s3 + $0x8] sm:$0xff]  }
   0x3   :  { %286 = vmatpush3.bf16.msra.mxu0 %v311_v1  ;;  %294 = vmatpush3.bf16.msra.mxu1 %v314_v4  ;;  %v315_v5 = vld [vmem:[%s409_s3] sm:$0xff]   ;;  %v316_v16 = vld [vmem:[%s411_s5 + $0x8] sm:$0xff]  }
   0x4   :  { %287 = vmatprep.subr.bf16.mxu0 %v326_v0  ;;  %295 = vmatprep.subr.bf16.mxu1 %v326_v0  ;;  %v261_v6 = vld [vmem:[%s410_s2] ss:$0 sm:$0xff] }
   0x5   :  { %v317_v17 = vld [vmem:[%s411_s5] sm:$0xff]  }
   0x6   :  { %v266_v18 = vld [vmem:[%s412_s4] ss:$0 sm:$0xff] }
   0x7   :  { %288 = vmatpush3.bf16.msra.mxu0 %v312_v2  ;;  %296 = vmatpush3.bf16.msra.mxu1 %v315_v5  ;;  %v270_v28 = vld [vmem:[%s413_s6] ss:$0 sm:$0xff] }
   0x8   :  { %301 = vmatprep.subr.bf16.mxu0 %v326_v0 }
   0xa   :  { %290 = vmatmul.mubr.msk.bf16.vlgmr.msra.gmra.mxu0 %vm57_vm1, %v313_v3 }
   0xb   :  { %305 = vmatprep.mubr.msk.bf16.mxu0 %vm327_vm0, %v326_v0  ;;  %302 = vmatpush3.bf16.msra.mxu0 %v316_v16 }
   0xc   :  { %303 = vmatprep.subr.bf16.mxu0 %v326_v0 }
   0xf   :  { %304 = vmatpush3.bf16.msra.mxu0 %v317_v17 }
  0xca   :  { %v95_v7 = vpop.f32.mrf.mxu0 }
  0xcb   :  { %v96_v9 = vadd.f32 %v261_v6, %v95_v7 }
  0xcc   :  { %v291_v8 = vpop.f32.mrf.mxu0 }
  0xcd   :  { %v102_v13 = vmax.f32 %v96_v9, 0.0 }
  0xce   :  { %v98_v10 = vpop.f32.mrf.mxu0 }
  0xcf   :  { %v99_v11 = vadd.f32 %v261_v6, %v98_v10 }
  0xd0   :  { %v292_v12 = vpop.f32.mrf.mxu0 }
  0xd1   :  { %v103_v14 = vmax.f32 %v99_v11, 0.0 }
  0xd3   :  { %v104_v15 = vpack.c.bf16 %v103_v14, %v102_v13 }
  0xd5   :  { %298 = vmatmul.mubr.msk.bf16.vlgmr.msra.gmra.mxu1 %vm57_vm1, %v104_v15 }
 0x195   :  { %v165_v19 = vpop.f32.mrf.mxu1 }
 0x196   :  { %v166_v21 = vadd.f32 %v266_v18, %v165_v19 }
 0x197   :  { %v299_v20 = vpop.f32.mrf.mxu1 }
 0x198   :  { %v172_v25 = vmax.f32 %v166_v21, 0.0 }
 0x199   :  { %v168_v22 = vpop.f32.mrf.mxu1 }
 0x19a   :  { %v169_v23 = vadd.f32 %v266_v18, %v168_v22 }
 0x19b   :  { %v300_v24 = vpop.f32.mrf.mxu1 }
 0x19c   :  { %v173_v26 = vmax.f32 %v169_v23, 0.0 }
 0x19e   :  { %v174_v27 = vpack.c.bf16 %v173_v26, %v172_v25 }
 0x1a0   :  { %306 = vmatmul.mubr.msk.bf16.vlgmr.msra.gmra.mxu0 %vm57_vm1, %v174_v27 }
 0x260   :  { %v235_v29 = vpop.f32.mrf.mxu0 }
 0x261   :  { %v236_v30 = vadd.f32 %v270_v28, %v235_v29 }
 0x262   :  { %v307_v31 = vpop.f32.mrf.mxu0 }
 0x263   :  { %v274_v32 = vmul.f32 -1.442695, %v236_v30 }
 0x264   :  { %v238_v33 = vpop.f32.mrf.mxu0 }
 0x265   :  { %318 = vpow2.f32 %v274_v32  ;;  %v239_v34 = vadd.f32 %v270_v28, %v238_v33 }
 0x266   :  { %v308_v35 = vpop.f32.mrf.mxu0 }
 0x267   :  { %v275_v36 = vmul.f32 -1.442695, %v239_v34 }
 0x269   :  { %320 = vpow2.f32 %v275_v36 }
 0x272   :  { %v319_v37 = vpop.eup %318 }
 0x273   :  { %v248_v38 = vadd.f32 1.0, %v319_v37 }
 0x275   :  { %322 = vrcp.f32 %v248_v38 }
 0x276   :  { %v321_v39 = vpop.eup %320 }
 0x277   :  { %v249_v40 = vadd.f32 1.0, %v321_v39 }
 0x279   :  { %324 = vrcp.f32 %v249_v40 }
 0x282   :  { %v323_v41 = vpop.eup %322 }
 0x283   :  { %255 = vst.msk [vmem:[%s414_s7] sm:$0xff] %vm254_vm2, %v323_v41 }
 0x286   :  { %v325_v42 = vpop.eup %324 }
 0x287   :  { %256 = vst.msk [vmem:[%s414_s7 + $0x8] sm:$0xff] %vm254_vm2, %v325_v42 }

</bundles_post_ra>
